<compile_context>
chip_gen: v5e
topology: v5e:2x2
jax: 0.10.0
libtpu: 0.0.40
codegen_flags: <defaults>
</compile_context>

<pallas_src>
import jax
import jax.numpy as jnp
from jax.experimental import pallas as pl
from jax.experimental.pallas import tpu as pltpu


def make_fused_kernel(ntype_order, cetypes, layer_cfgs, num_heads):
    """Builds the single fused kernel (statically unrolled over layers/etypes/heads)."""
    n_layers = len(layer_cfgs)
    H = num_heads

    def kernel(*refs):
        # ---- unpack the flat ref list ----------------------------------
        idx = 0
        feats = {}
        for nt in ntype_order:
            feats[nt] = refs[idx][...]
            idx += 1
        adjs = {}
        for (_, e, _) in cetypes:
            adjs[e] = refs[idx][...]
            idx += 1
        params = []
        for _ in range(n_layers):
            lp = []
            for _ in cetypes:
                lp.append(refs[idx:idx + 4])   # (w_src_aug, b_src_aug, w_dst_sc, b_dst_sc)
                idx += 4
            params.append(lp)
        out_refs = {nt: refs[idx + i] for i, nt in enumerate(ntype_order)}

        # ---- 3 stacked MultiHeteroGATLayer's ----------------------------
        cur = feats
        for (merge, fdims), lparams in zip(layer_cfgs, params):
            agg = {}
            for (s, e, d), (wsr, bsr, wdr, bdr) in zip(cetypes, lparams):
                F = fdims[d]
                HF = H * F
                x_s = cur[s]                                     # [Ns, Ds]
                x_d = cur[d]                                     # [Nd, Dd]
                # One MXU matmul gives all heads' z_src AND the per-head src
                # attention score (a_src was folded into extra columns).
                zs = jnp.dot(x_s, wsr[...],
                             preferred_element_type=jnp.float32) + bsr[...]   # [Ns, H*F+H]
                z_src = zs[:, :HF]                               # [Ns, H*F]  head-major
                s_srcT = jnp.transpose(zs[:, HF:], (1, 0))       # [H, Ns]
                s_dst = jnp.dot(x_d, wdr[...],
                                preferred_element_type=jnp.float32) + bdr[...]  # [Nd, H]
                adj = adjs[e]                                    # [Nd, Ns]

                heads = []
                for h in range(H):                               # static unroll
                    el = s_dst[:, h:h + 1] + s_srcT[h:h + 1, :]  # [Nd, Ns]
                    el = jnp.where(el > 0, el, 0.2 * el)         # LeakyReLU(0.2)
                    m = jnp.max(el, axis=-1, keepdims=True)
                    # single masking mechanism: multiply by adjacency
                    # (isolated dst rows -> denom 0 -> all-zero output row)
                    p = jnp.exp(el - m) * adj
                    denom = jnp.sum(p, axis=-1, keepdims=True)
                    alpha = p * pl.reciprocal(
                        jnp.maximum(denom, jnp.float32(1e-9)), approx=True)
                    heads.append(jnp.dot(alpha, z_src[:, h * F:(h + 1) * F],
                                         preferred_element_type=jnp.float32))
                h_e = jnp.concatenate(heads, axis=-1)            # [Nd, H*F] head-major (torch.cat order)
                agg[d] = h_e if d not in agg else agg[d] + h_e   # DGL 'sum' cross-etype reduce

            nxt = {}
            for d, v in agg.items():
                F = fdims[d]
                if merge == 'cat':
                    nxt[d] = jnp.maximum(v, 0.0)                 # ReLU, keep lane-dense [Nd, H*F]
                else:                                            # 'avg': mean over heads, no activation
                    acc = v[:, 0:F]
                    for h in range(1, H):
                        acc = acc + v[:, h * F:(h + 1) * F]
                    nxt[d] = acc * (1.0 / H)
            cur = nxt

        for nt in ntype_order:
            out_refs[nt][...] = cur[nt]

    return kernel


def hybrid_schedule_net(feat_dict, adjs, fused_params, cetypes, ntype_order,
                        hid_dim, out_dim, num_heads):
    """Whole forward = one pallas_call."""
    layer_cfgs = (('cat', hid_dim), ('cat', hid_dim), ('avg', out_dim))

    inputs = [feat_dict[nt] for nt in ntype_order]
    inputs += [adjs[e] for (_, e, _) in cetypes]
    for lp in fused_params:
        for (_, e, _) in cetypes:
            inputs.extend(lp[e])

    out_shape = tuple(
        jax.ShapeDtypeStruct((feat_dict[nt].shape[0], out_dim[nt]), jnp.float32)
        for nt in ntype_order)

    kernel = make_fused_kernel(ntype_order, cetypes, layer_cfgs, num_heads)

    outs = pl.pallas_call(
        kernel,
        out_shape=out_shape,
        in_specs=[pl.BlockSpec(memory_space=pltpu.MemorySpace.VMEM) for _ in inputs],
        out_specs=tuple(pl.BlockSpec(memory_space=pltpu.MemorySpace.VMEM)
                        for _ in out_shape),
    )(*inputs)
    return {nt: o for nt, o in zip(ntype_order, outs)}


def init_layer_params(key, in_dim, out_dim, cetypes, num_heads):
    params = {}
    for (s, e, d) in cetypes:
        key, k1, k2, k3, k4, k5, k6 = jax.random.split(key, 7)
        Ds, Dd, F = in_dim[s], in_dim[d], out_dim[d]
        params[e] = dict(
            w_src=jax.random.normal(k1, (num_heads, Ds, F), jnp.float32) / jnp.sqrt(Ds),
            b_src=0.01 * jax.random.normal(k2, (num_heads, 1, F), jnp.float32),
            w_dst=jax.random.normal(k3, (num_heads, Dd, F), jnp.float32) / jnp.sqrt(Dd),
            b_dst=0.01 * jax.random.normal(k4, (num_heads, 1, F), jnp.float32),
            a_src=jax.random.normal(k5, (num_heads, 1, F), jnp.float32),
            a_dst=jax.random.normal(k6, (num_heads, 1, F), jnp.float32),
        )
    return key, params


def fuse_layer_params(layer_params, cetypes):
    """One-time host-side parameter transform: fold heads into the matmul N dim
    and fold the attention vectors into extra weight columns."""
    fused = {}
    for (_, e, _) in cetypes:
        p = layer_params[e]
        H, Ds, F = p['w_src'].shape
        # z columns for all heads, head-major on the lane axis (== torch.cat order)
        w_z = jnp.transpose(p['w_src'], (1, 0, 2)).reshape(Ds, H * F)
        b_z = p['b_src'].reshape(1, H * F)
        # per-head src attention score column: s_src = x @ (W_src a_src) + b_src.a_src
        a_s = p['a_src'][:, 0, :]                                   # [H, F]
        w_a = jnp.einsum('hdf,hf->dh', p['w_src'], a_s)             # [Ds, H]
        b_a = jnp.sum(p['b_src'][:, 0, :] * a_s, axis=-1)[None, :]  # [1, H]
        w_src_aug = jnp.concatenate([w_z, w_a], axis=1)             # [Ds, H*F + H]
        b_src_aug = jnp.concatenate([b_z, b_a], axis=1)             # [1,  H*F + H]
        # dst side only needs its score (z_dst never used downstream)
        a_d = p['a_dst'][:, 0, :]
        w_dst_sc = jnp.einsum('hdf,hf->dh', p['w_dst'], a_d)        # [Dd, H]
        b_dst_sc = jnp.sum(p['b_dst'][:, 0, :] * a_d, axis=-1)[None, :]
        fused[e] = (w_src_aug, b_src_aug, w_dst_sc, b_dst_sc)
    return fused


if __name__ == "__main__":
    key = jax.random.PRNGKey(0)
    num_heads = 4

    # Small synthetic heterograph: two node types, four canonical edge types.
    ntype_order = ('task', 'robot')
    ntypes = {'task': 6, 'robot': 3}
    in_dim = {'task': 6, 'robot': 4}
    hid_dim = {'task': 8, 'robot': 8}
    out_dim = {'task': 8, 'robot': 4}
    cetypes = [('task', 'tt', 'task'),
               ('task', 'tr', 'robot'),
               ('robot', 'rt', 'task'),
               ('robot', 'rr', 'robot')]
    hid_in = {k: hid_dim[k] * num_heads for k in hid_dim}

    # Node features
    key, kf1, kf2 = jax.random.split(key, 3)
    feat_dict = {
        'task': jax.random.normal(kf1, (ntypes['task'], in_dim['task']), jnp.float32),
        'robot': jax.random.normal(kf2, (ntypes['robot'], in_dim['robot']), jnp.float32),
    }

    # Dense 0/1 adjacency masks per edge type, [N_dst, N_src]
    adjs = {}
    for (s, e, d) in cetypes:
        key, ka = jax.random.split(key)
        a = (jax.random.uniform(ka, (ntypes[d], ntypes[s])) > 0.4).astype(jnp.float32)
        if s == d:  # self-loops for same-type relations
            a = jnp.maximum(a, jnp.eye(ntypes[s], dtype=jnp.float32))
        adjs[e] = a

    # Deterministic parameter init (matches HybridScheduleNet.__init__ shapes),
    # then the one-time fusion transform (outside the kernel / forward pass).
    key, p1 = init_layer_params(key, in_dim, hid_dim, cetypes, num_heads)
    key, p2 = init_layer_params(key, hid_in, hid_dim, cetypes, num_heads)
    key, p3 = init_layer_params(key, hid_in, out_dim, cetypes, num_heads)
    fused_params = [fuse_layer_params(p, cetypes) for p in (p1, p2, p3)]

    out = hybrid_schedule_net(feat_dict, adjs, fused_params, cetypes, ntype_order,
                              hid_dim, out_dim, num_heads)
    out = jax.block_until_ready(out)

    assert out['task'].shape == (ntypes['task'], out_dim['task'])
    assert out['robot'].shape == (ntypes['robot'], out_dim['robot'])
    assert bool(jnp.all(jnp.isfinite(out['task'])))
    assert bool(jnp.all(jnp.isfinite(out['robot'])))
    print("KERNEL_OK")
</pallas_src>

<mosaic_0001>
module attributes {stable_mosaic.version = 11 : i64} {
  func.func @kernel(%arg0: memref<6x6xf32, #tpu.memory_space<vmem>>, %arg1: memref<3x4xf32, #tpu.memory_space<vmem>>, %arg2: memref<6x6xf32, #tpu.memory_space<vmem>>, %arg3: memref<3x6xf32, #tpu.memory_space<vmem>>, %arg4: memref<6x3xf32, #tpu.memory_space<vmem>>, %arg5: memref<3x3xf32, #tpu.memory_space<vmem>>, %arg6: memref<6x36xf32, #tpu.memory_space<vmem>>, %arg7: memref<1x36xf32, #tpu.memory_space<vmem>>, %arg8: memref<6x4xf32, #tpu.memory_space<vmem>>, %arg9: memref<1x4xf32, #tpu.memory_space<vmem>>, %arg10: memref<6x36xf32, #tpu.memory_space<vmem>>, %arg11: memref<1x36xf32, #tpu.memory_space<vmem>>, %arg12: memref<4x4xf32, #tpu.memory_space<vmem>>, %arg13: memref<1x4xf32, #tpu.memory_space<vmem>>, %arg14: memref<4x36xf32, #tpu.memory_space<vmem>>, %arg15: memref<1x36xf32, #tpu.memory_space<vmem>>, %arg16: memref<6x4xf32, #tpu.memory_space<vmem>>, %arg17: memref<1x4xf32, #tpu.memory_space<vmem>>, %arg18: memref<4x36xf32, #tpu.memory_space<vmem>>, %arg19: memref<1x36xf32, #tpu.memory_space<vmem>>, %arg20: memref<4x4xf32, #tpu.memory_space<vmem>>, %arg21: memref<1x4xf32, #tpu.memory_space<vmem>>, %arg22: memref<32x36xf32, #tpu.memory_space<vmem>>, %arg23: memref<1x36xf32, #tpu.memory_space<vmem>>, %arg24: memref<32x4xf32, #tpu.memory_space<vmem>>, %arg25: memref<1x4xf32, #tpu.memory_space<vmem>>, %arg26: memref<32x36xf32, #tpu.memory_space<vmem>>, %arg27: memref<1x36xf32, #tpu.memory_space<vmem>>, %arg28: memref<32x4xf32, #tpu.memory_space<vmem>>, %arg29: memref<1x4xf32, #tpu.memory_space<vmem>>, %arg30: memref<32x36xf32, #tpu.memory_space<vmem>>, %arg31: memref<1x36xf32, #tpu.memory_space<vmem>>, %arg32: memref<32x4xf32, #tpu.memory_space<vmem>>, %arg33: memref<1x4xf32, #tpu.memory_space<vmem>>, %arg34: memref<32x36xf32, #tpu.memory_space<vmem>>, %arg35: memref<1x36xf32, #tpu.memory_space<vmem>>, %arg36: memref<32x4xf32, #tpu.memory_space<vmem>>, %arg37: memref<1x4xf32, #tpu.memory_space<vmem>>, %arg38: memref<32x36xf32, #tpu.memory_space<vmem>>, %arg39: memref<1x36xf32, #tpu.memory_space<vmem>>, %arg40: memref<32x4xf32, #tpu.memory_space<vmem>>, %arg41: memref<1x4xf32, #tpu.memory_space<vmem>>, %arg42: memref<32x20xf32, #tpu.memory_space<vmem>>, %arg43: memref<1x20xf32, #tpu.memory_space<vmem>>, %arg44: memref<32x4xf32, #tpu.memory_space<vmem>>, %arg45: memref<1x4xf32, #tpu.memory_space<vmem>>, %arg46: memref<32x36xf32, #tpu.memory_space<vmem>>, %arg47: memref<1x36xf32, #tpu.memory_space<vmem>>, %arg48: memref<32x4xf32, #tpu.memory_space<vmem>>, %arg49: memref<1x4xf32, #tpu.memory_space<vmem>>, %arg50: memref<32x20xf32, #tpu.memory_space<vmem>>, %arg51: memref<1x20xf32, #tpu.memory_space<vmem>>, %arg52: memref<32x4xf32, #tpu.memory_space<vmem>>, %arg53: memref<1x4xf32, #tpu.memory_space<vmem>>, %arg54: memref<6x8xf32, #tpu.memory_space<vmem>>, %arg55: memref<3x4xf32, #tpu.memory_space<vmem>>) attributes {dimension_semantics = [], scalar_prefetch = 0 : i64, scratch_operands = 0 : i64, tpu.core_type = #tpu.core_type<tc>} {
    %c0 = arith.constant 0 : index
    %c0_0 = arith.constant 0 : index
    %0 = vector.load %arg0[%c0, %c0_0] : memref<6x6xf32, #tpu.memory_space<vmem>>, vector<6x6xf32>
    %c0_1 = arith.constant 0 : index
    %c0_2 = arith.constant 0 : index
    %1 = vector.load %arg1[%c0_1, %c0_2] : memref<3x4xf32, #tpu.memory_space<vmem>>, vector<3x4xf32>
    %c0_3 = arith.constant 0 : index
    %c0_4 = arith.constant 0 : index
    %2 = vector.load %arg2[%c0_3, %c0_4] : memref<6x6xf32, #tpu.memory_space<vmem>>, vector<6x6xf32>
    %c0_5 = arith.constant 0 : index
    %c0_6 = arith.constant 0 : index
    %3 = vector.load %arg3[%c0_5, %c0_6] : memref<3x6xf32, #tpu.memory_space<vmem>>, vector<3x6xf32>
    %c0_7 = arith.constant 0 : index
    %c0_8 = arith.constant 0 : index
    %4 = vector.load %arg4[%c0_7, %c0_8] : memref<6x3xf32, #tpu.memory_space<vmem>>, vector<6x3xf32>
    %c0_9 = arith.constant 0 : index
    %c0_10 = arith.constant 0 : index
    %5 = vector.load %arg5[%c0_9, %c0_10] : memref<3x3xf32, #tpu.memory_space<vmem>>, vector<3x3xf32>
    %c0_11 = arith.constant 0 : index
    %c0_12 = arith.constant 0 : index
    %6 = vector.load %arg6[%c0_11, %c0_12] : memref<6x36xf32, #tpu.memory_space<vmem>>, vector<6x36xf32>
    %cst = arith.constant dense<0.000000e+00> : vector<6x36xf32>
    %7 = tpu.matmul %0, %6, %cst {dimension_numbers = #tpu.dot_dimension_numbers<[1], [0], [0], [1], [0, 0, 1, 1], [], []>} : vector<6x6xf32>, vector<6x36xf32>, vector<6x36xf32> -> vector<6x36xf32>
    %c0_13 = arith.constant 0 : index
    %c0_14 = arith.constant 0 : index
    %8 = vector.load %arg7[%c0_13, %c0_14] : memref<1x36xf32, #tpu.memory_space<vmem>>, vector<1x36xf32>
    %9 = vector.broadcast %8 : vector<1x36xf32> to vector<6x36xf32>
    %10 = arith.addf %7, %9 : vector<6x36xf32>
    %11 = vector.extract_strided_slice %10 {offsets = [0, 0], sizes = [6, 32], strides = [1, 1]} : vector<6x36xf32> to vector<6x32xf32>
    %12 = vector.extract_strided_slice %10 {offsets = [0, 32], sizes = [6, 4], strides = [1, 1]} : vector<6x36xf32> to vector<6x4xf32>
    %13 = tpu.transpose %12, [1, 0] : vector<6x4xf32> -> vector<4x6xf32>
    %c0_15 = arith.constant 0 : index
    %c0_16 = arith.constant 0 : index
    %14 = vector.load %arg8[%c0_15, %c0_16] : memref<6x4xf32, #tpu.memory_space<vmem>>, vector<6x4xf32>
    %cst_17 = arith.constant dense<0.000000e+00> : vector<6x4xf32>
    %15 = tpu.matmul %0, %14, %cst_17 {dimension_numbers = #tpu.dot_dimension_numbers<[1], [0], [0], [1], [0, 0, 1, 1], [], []>} : vector<6x6xf32>, vector<6x4xf32>, vector<6x4xf32> -> vector<6x4xf32>
    %c0_18 = arith.constant 0 : index
    %c0_19 = arith.constant 0 : index
    %16 = vector.load %arg9[%c0_18, %c0_19] : memref<1x4xf32, #tpu.memory_space<vmem>>, vector<1x4xf32>
    %17 = vector.broadcast %16 : vector<1x4xf32> to vector<6x4xf32>
    %18 = arith.addf %15, %17 : vector<6x4xf32>
    %19 = vector.extract_strided_slice %18 {offsets = [0, 0], sizes = [6, 1], strides = [1, 1]} : vector<6x4xf32> to vector<6x1xf32>
    %20 = vector.extract_strided_slice %13 {offsets = [0, 0], sizes = [1, 6], strides = [1, 1]} : vector<4x6xf32> to vector<1x6xf32>
    %21 = vector.broadcast %19 : vector<6x1xf32> to vector<6x6xf32>
    %22 = vector.broadcast %20 : vector<1x6xf32> to vector<6x6xf32>
    %23 = arith.addf %21, %22 : vector<6x6xf32>
    %cst_20 = arith.constant 0.000000e+00 : f32
    %24 = vector.broadcast %cst_20 : f32 to vector<6x6xf32>
    %25 = arith.cmpf ogt, %23, %24 : vector<6x6xf32>
    %cst_21 = arith.constant 2.000000e-01 : f32
    %26 = vector.broadcast %cst_21 : f32 to vector<6x6xf32>
    %27 = arith.mulf %26, %23 : vector<6x6xf32>
    %28 = arith.select %25, %23, %27 : vector<6x6xi1>, vector<6x6xf32>
    %cst_22 = arith.constant dense<0xFF800000> : vector<6xf32>
    %29 = vector.multi_reduction <maximumf>, %28, %cst_22 [1] : vector<6x6xf32> to vector<6xf32>
    %30 = vector.shape_cast %29 : vector<6xf32> to vector<6x1xf32>
    %31 = vector.broadcast %30 : vector<6x1xf32> to vector<6x6xf32>
    %32 = arith.subf %28, %31 : vector<6x6xf32>
    %33 = math.exp %32 : vector<6x6xf32>
    %34 = arith.mulf %33, %2 : vector<6x6xf32>
    %cst_23 = arith.constant dense<0.000000e+00> : vector<6xf32>
    %35 = vector.multi_reduction <add>, %34, %cst_23 [1] : vector<6x6xf32> to vector<6xf32>
    %36 = vector.shape_cast %35 : vector<6xf32> to vector<6x1xf32>
    %cst_24 = arith.constant 9.99999971E-10 : f32
    %37 = vector.broadcast %cst_24 : f32 to vector<6x1xf32>
    %38 = arith.maximumf %36, %37 : vector<6x1xf32>
    %39 = tpu.reciprocal %38 {approx = true} : vector<6x1xf32> -> vector<6x1xf32>
    %40 = vector.broadcast %39 : vector<6x1xf32> to vector<6x6xf32>
    %41 = arith.mulf %34, %40 : vector<6x6xf32>
    %42 = vector.extract_strided_slice %11 {offsets = [0, 0], sizes = [6, 8], strides = [1, 1]} : vector<6x32xf32> to vector<6x8xf32>
    %cst_25 = arith.constant dense<0.000000e+00> : vector<6x8xf32>
    %43 = tpu.matmul %41, %42, %cst_25 {dimension_numbers = #tpu.dot_dimension_numbers<[1], [0], [0], [1], [0, 0, 1, 1], [], []>} : vector<6x6xf32>, vector<6x8xf32>, vector<6x8xf32> -> vector<6x8xf32>
    %44 = vector.extract_strided_slice %18 {offsets = [0, 1], sizes = [6, 1], strides = [1, 1]} : vector<6x4xf32> to vector<6x1xf32>
    %45 = vector.extract_strided_slice %13 {offsets = [1, 0], sizes = [1, 6], strides = [1, 1]} : vector<4x6xf32> to vector<1x6xf32>
    %46 = vector.broadcast %44 : vector<6x1xf32> to vector<6x6xf32>
    %47 = vector.broadcast %45 : vector<1x6xf32> to vector<6x6xf32>
    %48 = arith.addf %46, %47 : vector<6x6xf32>
    %cst_26 = arith.constant 0.000000e+00 : f32
    %49 = vector.broadcast %cst_26 : f32 to vector<6x6xf32>
    %50 = arith.cmpf ogt, %48, %49 : vector<6x6xf32>
    %cst_27 = arith.constant 2.000000e-01 : f32
    %51 = vector.broadcast %cst_27 : f32 to vector<6x6xf32>
    %52 = arith.mulf %51, %48 : vector<6x6xf32>
    %53 = arith.select %50, %48, %52 : vector<6x6xi1>, vector<6x6xf32>
    %cst_28 = arith.constant dense<0xFF800000> : vector<6xf32>
    %54 = vector.multi_reduction <maximumf>, %53, %cst_28 [1] : vector<6x6xf32> to vector<6xf32>
    %55 = vector.shape_cast %54 : vector<6xf32> to vector<6x1xf32>
    %56 = vector.broadcast %55 : vector<6x1xf32> to vector<6x6xf32>
    %57 = arith.subf %53, %56 : vector<6x6xf32>
    %58 = math.exp %57 : vector<6x6xf32>
    %59 = arith.mulf %58, %2 : vector<6x6xf32>
    %cst_29 = arith.constant dense<0.000000e+00> : vector<6xf32>
    %60 = vector.multi_reduction <add>, %59, %cst_29 [1] : vector<6x6xf32> to vector<6xf32>
    %61 = vector.shape_cast %60 : vector<6xf32> to vector<6x1xf32>
    %cst_30 = arith.constant 9.99999971E-10 : f32
    %62 = vector.broadcast %cst_30 : f32 to vector<6x1xf32>
    %63 = arith.maximumf %61, %62 : vector<6x1xf32>
    %64 = tpu.reciprocal %63 {approx = true} : vector<6x1xf32> -> vector<6x1xf32>
    %65 = vector.broadcast %64 : vector<6x1xf32> to vector<6x6xf32>
    %66 = arith.mulf %59, %65 : vector<6x6xf32>
    %67 = vector.extract_strided_slice %11 {offsets = [0, 8], sizes = [6, 8], strides = [1, 1]} : vector<6x32xf32> to vector<6x8xf32>
    %cst_31 = arith.constant dense<0.000000e+00> : vector<6x8xf32>
    %68 = tpu.matmul %66, %67, %cst_31 {dimension_numbers = #tpu.dot_dimension_numbers<[1], [0], [0], [1], [0, 0, 1, 1], [], []>} : vector<6x6xf32>, vector<6x8xf32>, vector<6x8xf32> -> vector<6x8xf32>
    %69 = vector.extract_strided_slice %18 {offsets = [0, 2], sizes = [6, 1], strides = [1, 1]} : vector<6x4xf32> to vector<6x1xf32>
    %70 = vector.extract_strided_slice %13 {offsets = [2, 0], sizes = [1, 6], strides = [1, 1]} : vector<4x6xf32> to vector<1x6xf32>
    %71 = vector.broadcast %69 : vector<6x1xf32> to vector<6x6xf32>
    %72 = vector.broadcast %70 : vector<1x6xf32> to vector<6x6xf32>
    %73 = arith.addf %71, %72 : vector<6x6xf32>
    %cst_32 = arith.constant 0.000000e+00 : f32
    %74 = vector.broadcast %cst_32 : f32 to vector<6x6xf32>
    %75 = arith.cmpf ogt, %73, %74 : vector<6x6xf32>
    %cst_33 = arith.constant 2.000000e-01 : f32
    %76 = vector.broadcast %cst_33 : f32 to vector<6x6xf32>
    %77 = arith.mulf %76, %73 : vector<6x6xf32>
    %78 = arith.select %75, %73, %77 : vector<6x6xi1>, vector<6x6xf32>
    %cst_34 = arith.constant dense<0xFF800000> : vector<6xf32>
    %79 = vector.multi_reduction <maximumf>, %78, %cst_34 [1] : vector<6x6xf32> to vector<6xf32>
    %80 = vector.shape_cast %79 : vector<6xf32> to vector<6x1xf32>
    %81 = vector.broadcast %80 : vector<6x1xf32> to vector<6x6xf32>
    %82 = arith.subf %78, %81 : vector<6x6xf32>
    %83 = math.exp %82 : vector<6x6xf32>
    %84 = arith.mulf %83, %2 : vector<6x6xf32>
    %cst_35 = arith.constant dense<0.000000e+00> : vector<6xf32>
    %85 = vector.multi_reduction <add>, %84, %cst_35 [1] : vector<6x6xf32> to vector<6xf32>
    %86 = vector.shape_cast %85 : vector<6xf32> to vector<6x1xf32>
    %cst_36 = arith.constant 9.99999971E-10 : f32
    %87 = vector.broadcast %cst_36 : f32 to vector<6x1xf32>
    %88 = arith.maximumf %86, %87 : vector<6x1xf32>
    %89 = tpu.reciprocal %88 {approx = true} : vector<6x1xf32> -> vector<6x1xf32>
    %90 = vector.broadcast %89 : vector<6x1xf32> to vector<6x6xf32>
    %91 = arith.mulf %84, %90 : vector<6x6xf32>
    %92 = vector.extract_strided_slice %11 {offsets = [0, 16], sizes = [6, 8], strides = [1, 1]} : vector<6x32xf32> to vector<6x8xf32>
    %cst_37 = arith.constant dense<0.000000e+00> : vector<6x8xf32>
    %93 = tpu.matmul %91, %92, %cst_37 {dimension_numbers = #tpu.dot_dimension_numbers<[1], [0], [0], [1], [0, 0, 1, 1], [], []>} : vector<6x6xf32>, vector<6x8xf32>, vector<6x8xf32> -> vector<6x8xf32>
    %94 = vector.extract_strided_slice %18 {offsets = [0, 3], sizes = [6, 1], strides = [1, 1]} : vector<6x4xf32> to vector<6x1xf32>
    %95 = vector.extract_strided_slice %13 {offsets = [3, 0], sizes = [1, 6], strides = [1, 1]} : vector<4x6xf32> to vector<1x6xf32>
    %96 = vector.broadcast %94 : vector<6x1xf32> to vector<6x6xf32>
    %97 = vector.broadcast %95 : vector<1x6xf32> to vector<6x6xf32>
    %98 = arith.addf %96, %97 : vector<6x6xf32>
    %cst_38 = arith.constant 0.000000e+00 : f32
    %99 = vector.broadcast %cst_38 : f32 to vector<6x6xf32>
    %100 = arith.cmpf ogt, %98, %99 : vector<6x6xf32>
    %cst_39 = arith.constant 2.000000e-01 : f32
    %101 = vector.broadcast %cst_39 : f32 to vector<6x6xf32>
    %102 = arith.mulf %101, %98 : vector<6x6xf32>
    %103 = arith.select %100, %98, %102 : vector<6x6xi1>, vector<6x6xf32>
    %cst_40 = arith.constant dense<0xFF800000> : vector<6xf32>
    %104 = vector.multi_reduction <maximumf>, %103, %cst_40 [1] : vector<6x6xf32> to vector<6xf32>
    %105 = vector.shape_cast %104 : vector<6xf32> to vector<6x1xf32>
    %106 = vector.broadcast %105 : vector<6x1xf32> to vector<6x6xf32>
    %107 = arith.subf %103, %106 : vector<6x6xf32>
    %108 = math.exp %107 : vector<6x6xf32>
    %109 = arith.mulf %108, %2 : vector<6x6xf32>
    %cst_41 = arith.constant dense<0.000000e+00> : vector<6xf32>
    %110 = vector.multi_reduction <add>, %109, %cst_41 [1] : vector<6x6xf32> to vector<6xf32>
    %111 = vector.shape_cast %110 : vector<6xf32> to vector<6x1xf32>
    %cst_42 = arith.constant 9.99999971E-10 : f32
    %112 = vector.broadcast %cst_42 : f32 to vector<6x1xf32>
    %113 = arith.maximumf %111, %112 : vector<6x1xf32>
    %114 = tpu.reciprocal %113 {approx = true} : vector<6x1xf32> -> vector<6x1xf32>
    %115 = vector.broadcast %114 : vector<6x1xf32> to vector<6x6xf32>
    %116 = arith.mulf %109, %115 : vector<6x6xf32>
    %117 = vector.extract_strided_slice %11 {offsets = [0, 24], sizes = [6, 8], strides = [1, 1]} : vector<6x32xf32> to vector<6x8xf32>
    %cst_43 = arith.constant dense<0.000000e+00> : vector<6x8xf32>
    %118 = tpu.matmul %116, %117, %cst_43 {dimension_numbers = #tpu.dot_dimension_numbers<[1], [0], [0], [1], [0, 0, 1, 1], [], []>} : vector<6x6xf32>, vector<6x8xf32>, vector<6x8xf32> -> vector<6x8xf32>
    %119 = tpu.concatenate %43, %68, %93, %118 in 1 : vector<6x8xf32>, vector<6x8xf32>, vector<6x8xf32>, vector<6x8xf32> -> vector<6x32xf32>
    %c0_44 = arith.constant 0 : index
    %c0_45 = arith.constant 0 : index
    %120 = vector.load %arg10[%c0_44, %c0_45] : memref<6x36xf32, #tpu.memory_space<vmem>>, vector<6x36xf32>
    %cst_46 = arith.constant dense<0.000000e+00> : vector<6x36xf32>
    %121 = tpu.matmul %0, %120, %cst_46 {dimension_numbers = #tpu.dot_dimension_numbers<[1], [0], [0], [1], [0, 0, 1, 1], [], []>} : vector<6x6xf32>, vector<6x36xf32>, vector<6x36xf32> -> vector<6x36xf32>
    %c0_47 = arith.constant 0 : index
    %c0_48 = arith.constant 0 : index
    %122 = vector.load %arg11[%c0_47, %c0_48] : memref<1x36xf32, #tpu.memory_space<vmem>>, vector<1x36xf32>
    %123 = vector.broadcast %122 : vector<1x36xf32> to vector<6x36xf32>
    %124 = arith.addf %121, %123 : vector<6x36xf32>
    %125 = vector.extract_strided_slice %124 {offsets = [0, 0], sizes = [6, 32], strides = [1, 1]} : vector<6x36xf32> to vector<6x32xf32>
    %126 = vector.extract_strided_slice %124 {offsets = [0, 32], sizes = [6, 4], strides = [1, 1]} : vector<6x36xf32> to vector<6x4xf32>
    %127 = tpu.transpose %126, [1, 0] : vector<6x4xf32> -> vector<4x6xf32>
    %c0_49 = arith.constant 0 : index
    %c0_50 = arith.constant 0 : index
    %128 = vector.load %arg12[%c0_49, %c0_50] : memref<4x4xf32, #tpu.memory_space<vmem>>, vector<4x4xf32>
    %cst_51 = arith.constant dense<0.000000e+00> : vector<3x4xf32>
    %129 = tpu.matmul %1, %128, %cst_51 {dimension_numbers = #tpu.dot_dimension_numbers<[1], [0], [0], [1], [0, 0, 1, 1], [], []>} : vector<3x4xf32>, vector<4x4xf32>, vector<3x4xf32> -> vector<3x4xf32>
    %c0_52 = arith.constant 0 : index
    %c0_53 = arith.constant 0 : index
    %130 = vector.load %arg13[%c0_52, %c0_53] : memref<1x4xf32, #tpu.memory_space<vmem>>, vector<1x4xf32>
    %131 = vector.broadcast %130 : vector<1x4xf32> to vector<3x4xf32>
    %132 = arith.addf %129, %131 : vector<3x4xf32>
    %133 = vector.extract_strided_slice %132 {offsets = [0, 0], sizes = [3, 1], strides = [1, 1]} : vector<3x4xf32> to vector<3x1xf32>
    %134 = vector.extract_strided_slice %127 {offsets = [0, 0], sizes = [1, 6], strides = [1, 1]} : vector<4x6xf32> to vector<1x6xf32>
    %135 = vector.broadcast %133 : vector<3x1xf32> to vector<3x6xf32>
    %136 = vector.broadcast %134 : vector<1x6xf32> to vector<3x6xf32>
    %137 = arith.addf %135, %136 : vector<3x6xf32>
    %cst_54 = arith.constant 0.000000e+00 : f32
    %138 = vector.broadcast %cst_54 : f32 to vector<3x6xf32>
    %139 = arith.cmpf ogt, %137, %138 : vector<3x6xf32>
    %cst_55 = arith.constant 2.000000e-01 : f32
    %140 = vector.broadcast %cst_55 : f32 to vector<3x6xf32>
    %141 = arith.mulf %140, %137 : vector<3x6xf32>
    %142 = arith.select %139, %137, %141 : vector<3x6xi1>, vector<3x6xf32>
    %cst_56 = arith.constant dense<0xFF800000> : vector<3xf32>
    %143 = vector.multi_reduction <maximumf>, %142, %cst_56 [1] : vector<3x6xf32> to vector<3xf32>
    %144 = vector.shape_cast %143 : vector<3xf32> to vector<3x1xf32>
    %145 = vector.broadcast %144 : vector<3x1xf32> to vector<3x6xf32>
    %146 = arith.subf %142, %145 : vector<3x6xf32>
    %147 = math.exp %146 : vector<3x6xf32>
    %148 = arith.mulf %147, %3 : vector<3x6xf32>
    %cst_57 = arith.constant dense<0.000000e+00> : vector<3xf32>
    %149 = vector.multi_reduction <add>, %148, %cst_57 [1] : vector<3x6xf32> to vector<3xf32>
    %150 = vector.shape_cast %149 : vector<3xf32> to vector<3x1xf32>
    %cst_58 = arith.constant 9.99999971E-10 : f32
    %151 = vector.broadcast %cst_58 : f32 to vector<3x1xf32>
    %152 = arith.maximumf %150, %151 : vector<3x1xf32>
    %153 = tpu.reciprocal %152 {approx = true} : vector<3x1xf32> -> vector<3x1xf32>
    %154 = vector.broadcast %153 : vector<3x1xf32> to vector<3x6xf32>
    %155 = arith.mulf %148, %154 : vector<3x6xf32>
    %156 = vector.extract_strided_slice %125 {offsets = [0, 0], sizes = [6, 8], strides = [1, 1]} : vector<6x32xf32> to vector<6x8xf32>
    %cst_59 = arith.constant dense<0.000000e+00> : vector<3x8xf32>
    %157 = tpu.matmul %155, %156, %cst_59 {dimension_numbers = #tpu.dot_dimension_numbers<[1], [0], [0], [1], [0, 0, 1, 1], [], []>} : vector<3x6xf32>, vector<6x8xf32>, vector<3x8xf32> -> vector<3x8xf32>
    %158 = vector.extract_strided_slice %132 {offsets = [0, 1], sizes = [3, 1], strides = [1, 1]} : vector<3x4xf32> to vector<3x1xf32>
    %159 = vector.extract_strided_slice %127 {offsets = [1, 0], sizes = [1, 6], strides = [1, 1]} : vector<4x6xf32> to vector<1x6xf32>
    %160 = vector.broadcast %158 : vector<3x1xf32> to vector<3x6xf32>
    %161 = vector.broadcast %159 : vector<1x6xf32> to vector<3x6xf32>
    %162 = arith.addf %160, %161 : vector<3x6xf32>
    %cst_60 = arith.constant 0.000000e+00 : f32
    %163 = vector.broadcast %cst_60 : f32 to vector<3x6xf32>
    %164 = arith.cmpf ogt, %162, %163 : vector<3x6xf32>
    %cst_61 = arith.constant 2.000000e-01 : f32
    %165 = vector.broadcast %cst_61 : f32 to vector<3x6xf32>
    %166 = arith.mulf %165, %162 : vector<3x6xf32>
    %167 = arith.select %164, %162, %166 : vector<3x6xi1>, vector<3x6xf32>
    %cst_62 = arith.constant dense<0xFF800000> : vector<3xf32>
    %168 = vector.multi_reduction <maximumf>, %167, %cst_62 [1] : vector<3x6xf32> to vector<3xf32>
    %169 = vector.shape_cast %168 : vector<3xf32> to vector<3x1xf32>
    %170 = vector.broadcast %169 : vector<3x1xf32> to vector<3x6xf32>
    %171 = arith.subf %167, %170 : vector<3x6xf32>
    %172 = math.exp %171 : vector<3x6xf32>
    %173 = arith.mulf %172, %3 : vector<3x6xf32>
    %cst_63 = arith.constant dense<0.000000e+00> : vector<3xf32>
    %174 = vector.multi_reduction <add>, %173, %cst_63 [1] : vector<3x6xf32> to vector<3xf32>
    %175 = vector.shape_cast %174 : vector<3xf32> to vector<3x1xf32>
    %cst_64 = arith.constant 9.99999971E-10 : f32
    %176 = vector.broadcast %cst_64 : f32 to vector<3x1xf32>
    %177 = arith.maximumf %175, %176 : vector<3x1xf32>
    %178 = tpu.reciprocal %177 {approx = true} : vector<3x1xf32> -> vector<3x1xf32>
    %179 = vector.broadcast %178 : vector<3x1xf32> to vector<3x6xf32>
    %180 = arith.mulf %173, %179 : vector<3x6xf32>
    %181 = vector.extract_strided_slice %125 {offsets = [0, 8], sizes = [6, 8], strides = [1, 1]} : vector<6x32xf32> to vector<6x8xf32>
    %cst_65 = arith.constant dense<0.000000e+00> : vector<3x8xf32>
    %182 = tpu.matmul %180, %181, %cst_65 {dimension_numbers = #tpu.dot_dimension_numbers<[1], [0], [0], [1], [0, 0, 1, 1], [], []>} : vector<3x6xf32>, vector<6x8xf32>, vector<3x8xf32> -> vector<3x8xf32>
    %183 = vector.extract_strided_slice %132 {offsets = [0, 2], sizes = [3, 1], strides = [1, 1]} : vector<3x4xf32> to vector<3x1xf32>
    %184 = vector.extract_strided_slice %127 {offsets = [2, 0], sizes = [1, 6], strides = [1, 1]} : vector<4x6xf32> to vector<1x6xf32>
    %185 = vector.broadcast %183 : vector<3x1xf32> to vector<3x6xf32>
    %186 = vector.broadcast %184 : vector<1x6xf32> to vector<3x6xf32>
    %187 = arith.addf %185, %186 : vector<3x6xf32>
    %cst_66 = arith.constant 0.000000e+00 : f32
    %188 = vector.broadcast %cst_66 : f32 to vector<3x6xf32>
    %189 = arith.cmpf ogt, %187, %188 : vector<3x6xf32>
    %cst_67 = arith.constant 2.000000e-01 : f32
    %190 = vector.broadcast %cst_67 : f32 to vector<3x6xf32>
    %191 = arith.mulf %190, %187 : vector<3x6xf32>
    %192 = arith.select %189, %187, %191 : vector<3x6xi1>, vector<3x6xf32>
    %cst_68 = arith.constant dense<0xFF800000> : vector<3xf32>
    %193 = vector.multi_reduction <maximumf>, %192, %cst_68 [1] : vector<3x6xf32> to vector<3xf32>
    %194 = vector.shape_cast %193 : vector<3xf32> to vector<3x1xf32>
    %195 = vector.broadcast %194 : vector<3x1xf32> to vector<3x6xf32>
    %196 = arith.subf %192, %195 : vector<3x6xf32>
    %197 = math.exp %196 : vector<3x6xf32>
    %198 = arith.mulf %197, %3 : vector<3x6xf32>
    %cst_69 = arith.constant dense<0.000000e+00> : vector<3xf32>
    %199 = vector.multi_reduction <add>, %198, %cst_69 [1] : vector<3x6xf32> to vector<3xf32>
    %200 = vector.shape_cast %199 : vector<3xf32> to vector<3x1xf32>
    %cst_70 = arith.constant 9.99999971E-10 : f32
    %201 = vector.broadcast %cst_70 : f32 to vector<3x1xf32>
    %202 = arith.maximumf %200, %201 : vector<3x1xf32>
    %203 = tpu.reciprocal %202 {approx = true} : vector<3x1xf32> -> vector<3x1xf32>
    %204 = vector.broadcast %203 : vector<3x1xf32> to vector<3x6xf32>
    %205 = arith.mulf %198, %204 : vector<3x6xf32>
    %206 = vector.extract_strided_slice %125 {offsets = [0, 16], sizes = [6, 8], strides = [1, 1]} : vector<6x32xf32> to vector<6x8xf32>
    %cst_71 = arith.constant dense<0.000000e+00> : vector<3x8xf32>
    %207 = tpu.matmul %205, %206, %cst_71 {dimension_numbers = #tpu.dot_dimension_numbers<[1], [0], [0], [1], [0, 0, 1, 1], [], []>} : vector<3x6xf32>, vector<6x8xf32>, vector<3x8xf32> -> vector<3x8xf32>
    %208 = vector.extract_strided_slice %132 {offsets = [0, 3], sizes = [3, 1], strides = [1, 1]} : vector<3x4xf32> to vector<3x1xf32>
    %209 = vector.extract_strided_slice %127 {offsets = [3, 0], sizes = [1, 6], strides = [1, 1]} : vector<4x6xf32> to vector<1x6xf32>
    %210 = vector.broadcast %208 : vector<3x1xf32> to vector<3x6xf32>
    %211 = vector.broadcast %209 : vector<1x6xf32> to vector<3x6xf32>
    %212 = arith.addf %210, %211 : vector<3x6xf32>
    %cst_72 = arith.constant 0.000000e+00 : f32
    %213 = vector.broadcast %cst_72 : f32 to vector<3x6xf32>
    %214 = arith.cmpf ogt, %212, %213 : vector<3x6xf32>
    %cst_73 = arith.constant 2.000000e-01 : f32
    %215 = vector.broadcast %cst_73 : f32 to vector<3x6xf32>
    %216 = arith.mulf %215, %212 : vector<3x6xf32>
    %217 = arith.select %214, %212, %216 : vector<3x6xi1>, vector<3x6xf32>
    %cst_74 = arith.constant dense<0xFF800000> : vector<3xf32>
    %218 = vector.multi_reduction <maximumf>, %217, %cst_74 [1] : vector<3x6xf32> to vector<3xf32>
    %219 = vector.shape_cast %218 : vector<3xf32> to vector<3x1xf32>
    %220 = vector.broadcast %219 : vector<3x1xf32> to vector<3x6xf32>
    %221 = arith.subf %217, %220 : vector<3x6xf32>
    %222 = math.exp %221 : vector<3x6xf32>
    %223 = arith.mulf %222, %3 : vector<3x6xf32>
    %cst_75 = arith.constant dense<0.000000e+00> : vector<3xf32>
    %224 = vector.multi_reduction <add>, %223, %cst_75 [1] : vector<3x6xf32> to vector<3xf32>
    %225 = vector.shape_cast %224 : vector<3xf32> to vector<3x1xf32>
    %cst_76 = arith.constant 9.99999971E-10 : f32
    %226 = vector.broadcast %cst_76 : f32 to vector<3x1xf32>
    %227 = arith.maximumf %225, %226 : vector<3x1xf32>
    %228 = tpu.reciprocal %227 {approx = true} : vector<3x1xf32> -> vector<3x1xf32>
    %229 = vector.broadcast %228 : vector<3x1xf32> to vector<3x6xf32>
    %230 = arith.mulf %223, %229 : vector<3x6xf32>
    %231 = vector.extract_strided_slice %125 {offsets = [0, 24], sizes = [6, 8], strides = [1, 1]} : vector<6x32xf32> to vector<6x8xf32>
    %cst_77 = arith.constant dense<0.000000e+00> : vector<3x8xf32>
    %232 = tpu.matmul %230, %231, %cst_77 {dimension_numbers = #tpu.dot_dimension_numbers<[1], [0], [0], [1], [0, 0, 1, 1], [], []>} : vector<3x6xf32>, vector<6x8xf32>, vector<3x8xf32> -> vector<3x8xf32>
    %233 = tpu.concatenate %157, %182, %207, %232 in 1 : vector<3x8xf32>, vector<3x8xf32>, vector<3x8xf32>, vector<3x8xf32> -> vector<3x32xf32>
    %c0_78 = arith.constant 0 : index
    %c0_79 = arith.constant 0 : index
    %234 = vector.load %arg14[%c0_78, %c0_79] : memref<4x36xf32, #tpu.memory_space<vmem>>, vector<4x36xf32>
    %cst_80 = arith.constant dense<0.000000e+00> : vector<3x36xf32>
    %235 = tpu.matmul %1, %234, %cst_80 {dimension_numbers = #tpu.dot_dimension_numbers<[1], [0], [0], [1], [0, 0, 1, 1], [], []>} : vector<3x4xf32>, vector<4x36xf32>, vector<3x36xf32> -> vector<3x36xf32>
    %c0_81 = arith.constant 0 : index
    %c0_82 = arith.constant 0 : index
    %236 = vector.load %arg15[%c0_81, %c0_82] : memref<1x36xf32, #tpu.memory_space<vmem>>, vector<1x36xf32>
    %237 = vector.broadcast %236 : vector<1x36xf32> to vector<3x36xf32>
    %238 = arith.addf %235, %237 : vector<3x36xf32>
    %239 = vector.extract_strided_slice %238 {offsets = [0, 0], sizes = [3, 32], strides = [1, 1]} : vector<3x36xf32> to vector<3x32xf32>
    %240 = vector.extract_strided_slice %238 {offsets = [0, 32], sizes = [3, 4], strides = [1, 1]} : vector<3x36xf32> to vector<3x4xf32>
    %241 = tpu.transpose %240, [1, 0] : vector<3x4xf32> -> vector<4x3xf32>
    %c0_83 = arith.constant 0 : index
    %c0_84 = arith.constant 0 : index
    %242 = vector.load %arg16[%c0_83, %c0_84] : memref<6x4xf32, #tpu.memory_space<vmem>>, vector<6x4xf32>
    %cst_85 = arith.constant dense<0.000000e+00> : vector<6x4xf32>
    %243 = tpu.matmul %0, %242, %cst_85 {dimension_numbers = #tpu.dot_dimension_numbers<[1], [0], [0], [1], [0, 0, 1, 1], [], []>} : vector<6x6xf32>, vector<6x4xf32>, vector<6x4xf32> -> vector<6x4xf32>
    %c0_86 = arith.constant 0 : index
    %c0_87 = arith.constant 0 : index
    %244 = vector.load %arg17[%c0_86, %c0_87] : memref<1x4xf32, #tpu.memory_space<vmem>>, vector<1x4xf32>
    %245 = vector.broadcast %244 : vector<1x4xf32> to vector<6x4xf32>
    %246 = arith.addf %243, %245 : vector<6x4xf32>
    %247 = vector.extract_strided_slice %246 {offsets = [0, 0], sizes = [6, 1], strides = [1, 1]} : vector<6x4xf32> to vector<6x1xf32>
    %248 = vector.extract_strided_slice %241 {offsets = [0, 0], sizes = [1, 3], strides = [1, 1]} : vector<4x3xf32> to vector<1x3xf32>
    %249 = vector.broadcast %247 : vector<6x1xf32> to vector<6x3xf32>
    %250 = vector.broadcast %248 : vector<1x3xf32> to vector<6x3xf32>
    %251 = arith.addf %249, %250 : vector<6x3xf32>
    %cst_88 = arith.constant 0.000000e+00 : f32
    %252 = vector.broadcast %cst_88 : f32 to vector<6x3xf32>
    %253 = arith.cmpf ogt, %251, %252 : vector<6x3xf32>
    %cst_89 = arith.constant 2.000000e-01 : f32
    %254 = vector.broadcast %cst_89 : f32 to vector<6x3xf32>
    %255 = arith.mulf %254, %251 : vector<6x3xf32>
    %256 = arith.select %253, %251, %255 : vector<6x3xi1>, vector<6x3xf32>
    %cst_90 = arith.constant dense<0xFF800000> : vector<6xf32>
    %257 = vector.multi_reduction <maximumf>, %256, %cst_90 [1] : vector<6x3xf32> to vector<6xf32>
    %258 = vector.shape_cast %257 : vector<6xf32> to vector<6x1xf32>
    %259 = vector.broadcast %258 : vector<6x1xf32> to vector<6x3xf32>
    %260 = arith.subf %256, %259 : vector<6x3xf32>
    %261 = math.exp %260 : vector<6x3xf32>
    %262 = arith.mulf %261, %4 : vector<6x3xf32>
    %cst_91 = arith.constant dense<0.000000e+00> : vector<6xf32>
    %263 = vector.multi_reduction <add>, %262, %cst_91 [1] : vector<6x3xf32> to vector<6xf32>
    %264 = vector.shape_cast %263 : vector<6xf32> to vector<6x1xf32>
    %cst_92 = arith.constant 9.99999971E-10 : f32
    %265 = vector.broadcast %cst_92 : f32 to vector<6x1xf32>
    %266 = arith.maximumf %264, %265 : vector<6x1xf32>
    %267 = tpu.reciprocal %266 {approx = true} : vector<6x1xf32> -> vector<6x1xf32>
    %268 = vector.broadcast %267 : vector<6x1xf32> to vector<6x3xf32>
    %269 = arith.mulf %262, %268 : vector<6x3xf32>
    %270 = vector.extract_strided_slice %239 {offsets = [0, 0], sizes = [3, 8], strides = [1, 1]} : vector<3x32xf32> to vector<3x8xf32>
    %cst_93 = arith.constant dense<0.000000e+00> : vector<6x8xf32>
    %271 = tpu.matmul %269, %270, %cst_93 {dimension_numbers = #tpu.dot_dimension_numbers<[1], [0], [0], [1], [0, 0, 1, 1], [], []>} : vector<6x3xf32>, vector<3x8xf32>, vector<6x8xf32> -> vector<6x8xf32>
    %272 = vector.extract_strided_slice %246 {offsets = [0, 1], sizes = [6, 1], strides = [1, 1]} : vector<6x4xf32> to vector<6x1xf32>
    %273 = vector.extract_strided_slice %241 {offsets = [1, 0], sizes = [1, 3], strides = [1, 1]} : vector<4x3xf32> to vector<1x3xf32>
    %274 = vector.broadcast %272 : vector<6x1xf32> to vector<6x3xf32>
    %275 = vector.broadcast %273 : vector<1x3xf32> to vector<6x3xf32>
    %276 = arith.addf %274, %275 : vector<6x3xf32>
    %cst_94 = arith.constant 0.000000e+00 : f32
    %277 = vector.broadcast %cst_94 : f32 to vector<6x3xf32>
    %278 = arith.cmpf ogt, %276, %277 : vector<6x3xf32>
    %cst_95 = arith.constant 2.000000e-01 : f32
    %279 = vector.broadcast %cst_95 : f32 to vector<6x3xf32>
    %280 = arith.mulf %279, %276 : vector<6x3xf32>
    %281 = arith.select %278, %276, %280 : vector<6x3xi1>, vector<6x3xf32>
    %cst_96 = arith.constant dense<0xFF800000> : vector<6xf32>
    %282 = vector.multi_reduction <maximumf>, %281, %cst_96 [1] : vector<6x3xf32> to vector<6xf32>
    %283 = vector.shape_cast %282 : vector<6xf32> to vector<6x1xf32>
    %284 = vector.broadcast %283 : vector<6x1xf32> to vector<6x3xf32>
    %285 = arith.subf %281, %284 : vector<6x3xf32>
    %286 = math.exp %285 : vector<6x3xf32>
    %287 = arith.mulf %286, %4 : vector<6x3xf32>
    %cst_97 = arith.constant dense<0.000000e+00> : vector<6xf32>
    %288 = vector.multi_reduction <add>, %287, %cst_97 [1] : vector<6x3xf32> to vector<6xf32>
    %289 = vector.shape_cast %288 : vector<6xf32> to vector<6x1xf32>
    %cst_98 = arith.constant 9.99999971E-10 : f32
    %290 = vector.broadcast %cst_98 : f32 to vector<6x1xf32>
    %291 = arith.maximumf %289, %290 : vector<6x1xf32>
    %292 = tpu.reciprocal %291 {approx = true} : vector<6x1xf32> -> vector<6x1xf32>
    %293 = vector.broadcast %292 : vector<6x1xf32> to vector<6x3xf32>
    %294 = arith.mulf %287, %293 : vector<6x3xf32>
    %295 = vector.extract_strided_slice %239 {offsets = [0, 8], sizes = [3, 8], strides = [1, 1]} : vector<3x32xf32> to vector<3x8xf32>
    %cst_99 = arith.constant dense<0.000000e+00> : vector<6x8xf32>
    %296 = tpu.matmul %294, %295, %cst_99 {dimension_numbers = #tpu.dot_dimension_numbers<[1], [0], [0], [1], [0, 0, 1, 1], [], []>} : vector<6x3xf32>, vector<3x8xf32>, vector<6x8xf32> -> vector<6x8xf32>
    %297 = vector.extract_strided_slice %246 {offsets = [0, 2], sizes = [6, 1], strides = [1, 1]} : vector<6x4xf32> to vector<6x1xf32>
    %298 = vector.extract_strided_slice %241 {offsets = [2, 0], sizes = [1, 3], strides = [1, 1]} : vector<4x3xf32> to vector<1x3xf32>
    %299 = vector.broadcast %297 : vector<6x1xf32> to vector<6x3xf32>
    %300 = vector.broadcast %298 : vector<1x3xf32> to vector<6x3xf32>
    %301 = arith.addf %299, %300 : vector<6x3xf32>
    %cst_100 = arith.constant 0.000000e+00 : f32
    %302 = vector.broadcast %cst_100 : f32 to vector<6x3xf32>
    %303 = arith.cmpf ogt, %301, %302 : vector<6x3xf32>
    %cst_101 = arith.constant 2.000000e-01 : f32
    %304 = vector.broadcast %cst_101 : f32 to vector<6x3xf32>
    %305 = arith.mulf %304, %301 : vector<6x3xf32>
    %306 = arith.select %303, %301, %305 : vector<6x3xi1>, vector<6x3xf32>
    %cst_102 = arith.constant dense<0xFF800000> : vector<6xf32>
    %307 = vector.multi_reduction <maximumf>, %306, %cst_102 [1] : vector<6x3xf32> to vector<6xf32>
    %308 = vector.shape_cast %307 : vector<6xf32> to vector<6x1xf32>
    %309 = vector.broadcast %308 : vector<6x1xf32> to vector<6x3xf32>
    %310 = arith.subf %306, %309 : vector<6x3xf32>
    %311 = math.exp %310 : vector<6x3xf32>
    %312 = arith.mulf %311, %4 : vector<6x3xf32>
    %cst_103 = arith.constant dense<0.000000e+00> : vector<6xf32>
    %313 = vector.multi_reduction <add>, %312, %cst_103 [1] : vector<6x3xf32> to vector<6xf32>
    %314 = vector.shape_cast %313 : vector<6xf32> to vector<6x1xf32>
    %cst_104 = arith.constant 9.99999971E-10 : f32
    %315 = vector.broadcast %cst_104 : f32 to vector<6x1xf32>
    %316 = arith.maximumf %314, %315 : vector<6x1xf32>
    %317 = tpu.reciprocal %316 {approx = true} : vector<6x1xf32> -> vector<6x1xf32>
    %318 = vector.broadcast %317 : vector<6x1xf32> to vector<6x3xf32>
    %319 = arith.mulf %312, %318 : vector<6x3xf32>
    %320 = vector.extract_strided_slice %239 {offsets = [0, 16], sizes = [3, 8], strides = [1, 1]} : vector<3x32xf32> to vector<3x8xf32>
    %cst_105 = arith.constant dense<0.000000e+00> : vector<6x8xf32>
    %321 = tpu.matmul %319, %320, %cst_105 {dimension_numbers = #tpu.dot_dimension_numbers<[1], [0], [0], [1], [0, 0, 1, 1], [], []>} : vector<6x3xf32>, vector<3x8xf32>, vector<6x8xf32> -> vector<6x8xf32>
    %322 = vector.extract_strided_slice %246 {offsets = [0, 3], sizes = [6, 1], strides = [1, 1]} : vector<6x4xf32> to vector<6x1xf32>
    %323 = vector.extract_strided_slice %241 {offsets = [3, 0], sizes = [1, 3], strides = [1, 1]} : vector<4x3xf32> to vector<1x3xf32>
    %324 = vector.broadcast %322 : vector<6x1xf32> to vector<6x3xf32>
    %325 = vector.broadcast %323 : vector<1x3xf32> to vector<6x3xf32>
    %326 = arith.addf %324, %325 : vector<6x3xf32>
    %cst_106 = arith.constant 0.000000e+00 : f32
    %327 = vector.broadcast %cst_106 : f32 to vector<6x3xf32>
    %328 = arith.cmpf ogt, %326, %327 : vector<6x3xf32>
    %cst_107 = arith.constant 2.000000e-01 : f32
    %329 = vector.broadcast %cst_107 : f32 to vector<6x3xf32>
    %330 = arith.mulf %329, %326 : vector<6x3xf32>
    %331 = arith.select %328, %326, %330 : vector<6x3xi1>, vector<6x3xf32>
    %cst_108 = arith.constant dense<0xFF800000> : vector<6xf32>
    %332 = vector.multi_reduction <maximumf>, %331, %cst_108 [1] : vector<6x3xf32> to vector<6xf32>
    %333 = vector.shape_cast %332 : vector<6xf32> to vector<6x1xf32>
    %334 = vector.broadcast %333 : vector<6x1xf32> to vector<6x3xf32>
    %335 = arith.subf %331, %334 : vector<6x3xf32>
    %336 = math.exp %335 : vector<6x3xf32>
    %337 = arith.mulf %336, %4 : vector<6x3xf32>
    %cst_109 = arith.constant dense<0.000000e+00> : vector<6xf32>
    %338 = vector.multi_reduction <add>, %337, %cst_109 [1] : vector<6x3xf32> to vector<6xf32>
    %339 = vector.shape_cast %338 : vector<6xf32> to vector<6x1xf32>
    %cst_110 = arith.constant 9.99999971E-10 : f32
    %340 = vector.broadcast %cst_110 : f32 to vector<6x1xf32>
    %341 = arith.maximumf %339, %340 : vector<6x1xf32>
    %342 = tpu.reciprocal %341 {approx = true} : vector<6x1xf32> -> vector<6x1xf32>
    %343 = vector.broadcast %342 : vector<6x1xf32> to vector<6x3xf32>
    %344 = arith.mulf %337, %343 : vector<6x3xf32>
    %345 = vector.extract_strided_slice %239 {offsets = [0, 24], sizes = [3, 8], strides = [1, 1]} : vector<3x32xf32> to vector<3x8xf32>
    %cst_111 = arith.constant dense<0.000000e+00> : vector<6x8xf32>
    %346 = tpu.matmul %344, %345, %cst_111 {dimension_numbers = #tpu.dot_dimension_numbers<[1], [0], [0], [1], [0, 0, 1, 1], [], []>} : vector<6x3xf32>, vector<3x8xf32>, vector<6x8xf32> -> vector<6x8xf32>
    %347 = tpu.concatenate %271, %296, %321, %346 in 1 : vector<6x8xf32>, vector<6x8xf32>, vector<6x8xf32>, vector<6x8xf32> -> vector<6x32xf32>
    %348 = arith.addf %119, %347 : vector<6x32xf32>
    %c0_112 = arith.constant 0 : index
    %c0_113 = arith.constant 0 : index
    %349 = vector.load %arg18[%c0_112, %c0_113] : memref<4x36xf32, #tpu.memory_space<vmem>>, vector<4x36xf32>
    %cst_114 = arith.constant dense<0.000000e+00> : vector<3x36xf32>
    %350 = tpu.matmul %1, %349, %cst_114 {dimension_numbers = #tpu.dot_dimension_numbers<[1], [0], [0], [1], [0, 0, 1, 1], [], []>} : vector<3x4xf32>, vector<4x36xf32>, vector<3x36xf32> -> vector<3x36xf32>
    %c0_115 = arith.constant 0 : index
    %c0_116 = arith.constant 0 : index
    %351 = vector.load %arg19[%c0_115, %c0_116] : memref<1x36xf32, #tpu.memory_space<vmem>>, vector<1x36xf32>
    %352 = vector.broadcast %351 : vector<1x36xf32> to vector<3x36xf32>
    %353 = arith.addf %350, %352 : vector<3x36xf32>
    %354 = vector.extract_strided_slice %353 {offsets = [0, 0], sizes = [3, 32], strides = [1, 1]} : vector<3x36xf32> to vector<3x32xf32>
    %355 = vector.extract_strided_slice %353 {offsets = [0, 32], sizes = [3, 4], strides = [1, 1]} : vector<3x36xf32> to vector<3x4xf32>
    %356 = tpu.transpose %355, [1, 0] : vector<3x4xf32> -> vector<4x3xf32>
    %c0_117 = arith.constant 0 : index
    %c0_118 = arith.constant 0 : index
    %357 = vector.load %arg20[%c0_117, %c0_118] : memref<4x4xf32, #tpu.memory_space<vmem>>, vector<4x4xf32>
    %cst_119 = arith.constant dense<0.000000e+00> : vector<3x4xf32>
    %358 = tpu.matmul %1, %357, %cst_119 {dimension_numbers = #tpu.dot_dimension_numbers<[1], [0], [0], [1], [0, 0, 1, 1], [], []>} : vector<3x4xf32>, vector<4x4xf32>, vector<3x4xf32> -> vector<3x4xf32>
    %c0_120 = arith.constant 0 : index
    %c0_121 = arith.constant 0 : index
    %359 = vector.load %arg21[%c0_120, %c0_121] : memref<1x4xf32, #tpu.memory_space<vmem>>, vector<1x4xf32>
    %360 = vector.broadcast %359 : vector<1x4xf32> to vector<3x4xf32>
    %361 = arith.addf %358, %360 : vector<3x4xf32>
    %362 = vector.extract_strided_slice %361 {offsets = [0, 0], sizes = [3, 1], strides = [1, 1]} : vector<3x4xf32> to vector<3x1xf32>
    %363 = vector.extract_strided_slice %356 {offsets = [0, 0], sizes = [1, 3], strides = [1, 1]} : vector<4x3xf32> to vector<1x3xf32>
    %364 = vector.broadcast %362 : vector<3x1xf32> to vector<3x3xf32>
    %365 = vector.broadcast %363 : vector<1x3xf32> to vector<3x3xf32>
    %366 = arith.addf %364, %365 : vector<3x3xf32>
    %cst_122 = arith.constant 0.000000e+00 : f32
    %367 = vector.broadcast %cst_122 : f32 to vector<3x3xf32>
    %368 = arith.cmpf ogt, %366, %367 : vector<3x3xf32>
    %cst_123 = arith.constant 2.000000e-01 : f32
    %369 = vector.broadcast %cst_123 : f32 to vector<3x3xf32>
    %370 = arith.mulf %369, %366 : vector<3x3xf32>
    %371 = arith.select %368, %366, %370 : vector<3x3xi1>, vector<3x3xf32>
    %cst_124 = arith.constant dense<0xFF800000> : vector<3xf32>
    %372 = vector.multi_reduction <maximumf>, %371, %cst_124 [1] : vector<3x3xf32> to vector<3xf32>
    %373 = vector.shape_cast %372 : vector<3xf32> to vector<3x1xf32>
    %374 = vector.broadcast %373 : vector<3x1xf32> to vector<3x3xf32>
    %375 = arith.subf %371, %374 : vector<3x3xf32>
    %376 = math.exp %375 : vector<3x3xf32>
    %377 = arith.mulf %376, %5 : vector<3x3xf32>
    %cst_125 = arith.constant dense<0.000000e+00> : vector<3xf32>
    %378 = vector.multi_reduction <add>, %377, %cst_125 [1] : vector<3x3xf32> to vector<3xf32>
    %379 = vector.shape_cast %378 : vector<3xf32> to vector<3x1xf32>
    %cst_126 = arith.constant 9.99999971E-10 : f32
    %380 = vector.broadcast %cst_126 : f32 to vector<3x1xf32>
    %381 = arith.maximumf %379, %380 : vector<3x1xf32>
    %382 = tpu.reciprocal %381 {approx = true} : vector<3x1xf32> -> vector<3x1xf32>
    %383 = vector.broadcast %382 : vector<3x1xf32> to vector<3x3xf32>
    %384 = arith.mulf %377, %383 : vector<3x3xf32>
    %385 = vector.extract_strided_slice %354 {offsets = [0, 0], sizes = [3, 8], strides = [1, 1]} : vector<3x32xf32> to vector<3x8xf32>
    %cst_127 = arith.constant dense<0.000000e+00> : vector<3x8xf32>
    %386 = tpu.matmul %384, %385, %cst_127 {dimension_numbers = #tpu.dot_dimension_numbers<[1], [0], [0], [1], [0, 0, 1, 1], [], []>} : vector<3x3xf32>, vector<3x8xf32>, vector<3x8xf32> -> vector<3x8xf32>
    %387 = vector.extract_strided_slice %361 {offsets = [0, 1], sizes = [3, 1], strides = [1, 1]} : vector<3x4xf32> to vector<3x1xf32>
    %388 = vector.extract_strided_slice %356 {offsets = [1, 0], sizes = [1, 3], strides = [1, 1]} : vector<4x3xf32> to vector<1x3xf32>
    %389 = vector.broadcast %387 : vector<3x1xf32> to vector<3x3xf32>
    %390 = vector.broadcast %388 : vector<1x3xf32> to vector<3x3xf32>
    %391 = arith.addf %389, %390 : vector<3x3xf32>
    %cst_128 = arith.constant 0.000000e+00 : f32
    %392 = vector.broadcast %cst_128 : f32 to vector<3x3xf32>
    %393 = arith.cmpf ogt, %391, %392 : vector<3x3xf32>
    %cst_129 = arith.constant 2.000000e-01 : f32
    %394 = vector.broadcast %cst_129 : f32 to vector<3x3xf32>
    %395 = arith.mulf %394, %391 : vector<3x3xf32>
    %396 = arith.select %393, %391, %395 : vector<3x3xi1>, vector<3x3xf32>
    %cst_130 = arith.constant dense<0xFF800000> : vector<3xf32>
    %397 = vector.multi_reduction <maximumf>, %396, %cst_130 [1] : vector<3x3xf32> to vector<3xf32>
    %398 = vector.shape_cast %397 : vector<3xf32> to vector<3x1xf32>
    %399 = vector.broadcast %398 : vector<3x1xf32> to vector<3x3xf32>
    %400 = arith.subf %396, %399 : vector<3x3xf32>
    %401 = math.exp %400 : vector<3x3xf32>
    %402 = arith.mulf %401, %5 : vector<3x3xf32>
    %cst_131 = arith.constant dense<0.000000e+00> : vector<3xf32>
    %403 = vector.multi_reduction <add>, %402, %cst_131 [1] : vector<3x3xf32> to vector<3xf32>
    %404 = vector.shape_cast %403 : vector<3xf32> to vector<3x1xf32>
    %cst_132 = arith.constant 9.99999971E-10 : f32
    %405 = vector.broadcast %cst_132 : f32 to vector<3x1xf32>
    %406 = arith.maximumf %404, %405 : vector<3x1xf32>
    %407 = tpu.reciprocal %406 {approx = true} : vector<3x1xf32> -> vector<3x1xf32>
    %408 = vector.broadcast %407 : vector<3x1xf32> to vector<3x3xf32>
    %409 = arith.mulf %402, %408 : vector<3x3xf32>
    %410 = vector.extract_strided_slice %354 {offsets = [0, 8], sizes = [3, 8], strides = [1, 1]} : vector<3x32xf32> to vector<3x8xf32>
    %cst_133 = arith.constant dense<0.000000e+00> : vector<3x8xf32>
    %411 = tpu.matmul %409, %410, %cst_133 {dimension_numbers = #tpu.dot_dimension_numbers<[1], [0], [0], [1], [0, 0, 1, 1], [], []>} : vector<3x3xf32>, vector<3x8xf32>, vector<3x8xf32> -> vector<3x8xf32>
    %412 = vector.extract_strided_slice %361 {offsets = [0, 2], sizes = [3, 1], strides = [1, 1]} : vector<3x4xf32> to vector<3x1xf32>
    %413 = vector.extract_strided_slice %356 {offsets = [2, 0], sizes = [1, 3], strides = [1, 1]} : vector<4x3xf32> to vector<1x3xf32>
    %414 = vector.broadcast %412 : vector<3x1xf32> to vector<3x3xf32>
    %415 = vector.broadcast %413 : vector<1x3xf32> to vector<3x3xf32>
    %416 = arith.addf %414, %415 : vector<3x3xf32>
    %cst_134 = arith.constant 0.000000e+00 : f32
    %417 = vector.broadcast %cst_134 : f32 to vector<3x3xf32>
    %418 = arith.cmpf ogt, %416, %417 : vector<3x3xf32>
    %cst_135 = arith.constant 2.000000e-01 : f32
    %419 = vector.broadcast %cst_135 : f32 to vector<3x3xf32>
    %420 = arith.mulf %419, %416 : vector<3x3xf32>
    %421 = arith.select %418, %416, %420 : vector<3x3xi1>, vector<3x3xf32>
    %cst_136 = arith.constant dense<0xFF800000> : vector<3xf32>
    %422 = vector.multi_reduction <maximumf>, %421, %cst_136 [1] : vector<3x3xf32> to vector<3xf32>
    %423 = vector.shape_cast %422 : vector<3xf32> to vector<3x1xf32>
    %424 = vector.broadcast %423 : vector<3x1xf32> to vector<3x3xf32>
    %425 = arith.subf %421, %424 : vector<3x3xf32>
    %426 = math.exp %425 : vector<3x3xf32>
    %427 = arith.mulf %426, %5 : vector<3x3xf32>
    %cst_137 = arith.constant dense<0.000000e+00> : vector<3xf32>
    %428 = vector.multi_reduction <add>, %427, %cst_137 [1] : vector<3x3xf32> to vector<3xf32>
    %429 = vector.shape_cast %428 : vector<3xf32> to vector<3x1xf32>
    %cst_138 = arith.constant 9.99999971E-10 : f32
    %430 = vector.broadcast %cst_138 : f32 to vector<3x1xf32>
    %431 = arith.maximumf %429, %430 : vector<3x1xf32>
    %432 = tpu.reciprocal %431 {approx = true} : vector<3x1xf32> -> vector<3x1xf32>
    %433 = vector.broadcast %432 : vector<3x1xf32> to vector<3x3xf32>
    %434 = arith.mulf %427, %433 : vector<3x3xf32>
    %435 = vector.extract_strided_slice %354 {offsets = [0, 16], sizes = [3, 8], strides = [1, 1]} : vector<3x32xf32> to vector<3x8xf32>
    %cst_139 = arith.constant dense<0.000000e+00> : vector<3x8xf32>
    %436 = tpu.matmul %434, %435, %cst_139 {dimension_numbers = #tpu.dot_dimension_numbers<[1], [0], [0], [1], [0, 0, 1, 1], [], []>} : vector<3x3xf32>, vector<3x8xf32>, vector<3x8xf32> -> vector<3x8xf32>
    %437 = vector.extract_strided_slice %361 {offsets = [0, 3], sizes = [3, 1], strides = [1, 1]} : vector<3x4xf32> to vector<3x1xf32>
    %438 = vector.extract_strided_slice %356 {offsets = [3, 0], sizes = [1, 3], strides = [1, 1]} : vector<4x3xf32> to vector<1x3xf32>
    %439 = vector.broadcast %437 : vector<3x1xf32> to vector<3x3xf32>
    %440 = vector.broadcast %438 : vector<1x3xf32> to vector<3x3xf32>
    %441 = arith.addf %439, %440 : vector<3x3xf32>
    %cst_140 = arith.constant 0.000000e+00 : f32
    %442 = vector.broadcast %cst_140 : f32 to vector<3x3xf32>
    %443 = arith.cmpf ogt, %441, %442 : vector<3x3xf32>
    %cst_141 = arith.constant 2.000000e-01 : f32
    %444 = vector.broadcast %cst_141 : f32 to vector<3x3xf32>
    %445 = arith.mulf %444, %441 : vector<3x3xf32>
    %446 = arith.select %443, %441, %445 : vector<3x3xi1>, vector<3x3xf32>
    %cst_142 = arith.constant dense<0xFF800000> : vector<3xf32>
    %447 = vector.multi_reduction <maximumf>, %446, %cst_142 [1] : vector<3x3xf32> to vector<3xf32>
    %448 = vector.shape_cast %447 : vector<3xf32> to vector<3x1xf32>
    %449 = vector.broadcast %448 : vector<3x1xf32> to vector<3x3xf32>
    %450 = arith.subf %446, %449 : vector<3x3xf32>
    %451 = math.exp %450 : vector<3x3xf32>
    %452 = arith.mulf %451, %5 : vector<3x3xf32>
    %cst_143 = arith.constant dense<0.000000e+00> : vector<3xf32>
    %453 = vector.multi_reduction <add>, %452, %cst_143 [1] : vector<3x3xf32> to vector<3xf32>
    %454 = vector.shape_cast %453 : vector<3xf32> to vector<3x1xf32>
    %cst_144 = arith.constant 9.99999971E-10 : f32
    %455 = vector.broadcast %cst_144 : f32 to vector<3x1xf32>
    %456 = arith.maximumf %454, %455 : vector<3x1xf32>
    %457 = tpu.reciprocal %456 {approx = true} : vector<3x1xf32> -> vector<3x1xf32>
    %458 = vector.broadcast %457 : vector<3x1xf32> to vector<3x3xf32>
    %459 = arith.mulf %452, %458 : vector<3x3xf32>
    %460 = vector.extract_strided_slice %354 {offsets = [0, 24], sizes = [3, 8], strides = [1, 1]} : vector<3x32xf32> to vector<3x8xf32>
    %cst_145 = arith.constant dense<0.000000e+00> : vector<3x8xf32>
    %461 = tpu.matmul %459, %460, %cst_145 {dimension_numbers = #tpu.dot_dimension_numbers<[1], [0], [0], [1], [0, 0, 1, 1], [], []>} : vector<3x3xf32>, vector<3x8xf32>, vector<3x8xf32> -> vector<3x8xf32>
    %462 = tpu.concatenate %386, %411, %436, %461 in 1 : vector<3x8xf32>, vector<3x8xf32>, vector<3x8xf32>, vector<3x8xf32> -> vector<3x32xf32>
    %463 = arith.addf %233, %462 : vector<3x32xf32>
    %cst_146 = arith.constant 0.000000e+00 : f32
    %464 = vector.broadcast %cst_146 : f32 to vector<6x32xf32>
    %465 = arith.maximumf %348, %464 : vector<6x32xf32>
    %cst_147 = arith.constant 0.000000e+00 : f32
    %466 = vector.broadcast %cst_147 : f32 to vector<3x32xf32>
    %467 = arith.maximumf %463, %466 : vector<3x32xf32>
    %c0_148 = arith.constant 0 : index
    %c0_149 = arith.constant 0 : index
    %468 = vector.load %arg22[%c0_148, %c0_149] : memref<32x36xf32, #tpu.memory_space<vmem>>, vector<32x36xf32>
    %cst_150 = arith.constant dense<0.000000e+00> : vector<6x36xf32>
    %469 = tpu.matmul %465, %468, %cst_150 {dimension_numbers = #tpu.dot_dimension_numbers<[1], [0], [0], [1], [0, 0, 1, 1], [], []>} : vector<6x32xf32>, vector<32x36xf32>, vector<6x36xf32> -> vector<6x36xf32>
    %c0_151 = arith.constant 0 : index
    %c0_152 = arith.constant 0 : index
    %470 = vector.load %arg23[%c0_151, %c0_152] : memref<1x36xf32, #tpu.memory_space<vmem>>, vector<1x36xf32>
    %471 = vector.broadcast %470 : vector<1x36xf32> to vector<6x36xf32>
    %472 = arith.addf %469, %471 : vector<6x36xf32>
    %473 = vector.extract_strided_slice %472 {offsets = [0, 0], sizes = [6, 32], strides = [1, 1]} : vector<6x36xf32> to vector<6x32xf32>
    %474 = vector.extract_strided_slice %472 {offsets = [0, 32], sizes = [6, 4], strides = [1, 1]} : vector<6x36xf32> to vector<6x4xf32>
    %475 = tpu.transpose %474, [1, 0] : vector<6x4xf32> -> vector<4x6xf32>
    %c0_153 = arith.constant 0 : index
    %c0_154 = arith.constant 0 : index
    %476 = vector.load %arg24[%c0_153, %c0_154] : memref<32x4xf32, #tpu.memory_space<vmem>>, vector<32x4xf32>
    %cst_155 = arith.constant dense<0.000000e+00> : vector<6x4xf32>
    %477 = tpu.matmul %465, %476, %cst_155 {dimension_numbers = #tpu.dot_dimension_numbers<[1], [0], [0], [1], [0, 0, 1, 1], [], []>} : vector<6x32xf32>, vector<32x4xf32>, vector<6x4xf32> -> vector<6x4xf32>
    %c0_156 = arith.constant 0 : index
    %c0_157 = arith.constant 0 : index
    %478 = vector.load %arg25[%c0_156, %c0_157] : memref<1x4xf32, #tpu.memory_space<vmem>>, vector<1x4xf32>
    %479 = vector.broadcast %478 : vector<1x4xf32> to vector<6x4xf32>
    %480 = arith.addf %477, %479 : vector<6x4xf32>
    %481 = vector.extract_strided_slice %480 {offsets = [0, 0], sizes = [6, 1], strides = [1, 1]} : vector<6x4xf32> to vector<6x1xf32>
    %482 = vector.extract_strided_slice %475 {offsets = [0, 0], sizes = [1, 6], strides = [1, 1]} : vector<4x6xf32> to vector<1x6xf32>
    %483 = vector.broadcast %481 : vector<6x1xf32> to vector<6x6xf32>
    %484 = vector.broadcast %482 : vector<1x6xf32> to vector<6x6xf32>
    %485 = arith.addf %483, %484 : vector<6x6xf32>
    %cst_158 = arith.constant 0.000000e+00 : f32
    %486 = vector.broadcast %cst_158 : f32 to vector<6x6xf32>
    %487 = arith.cmpf ogt, %485, %486 : vector<6x6xf32>
    %cst_159 = arith.constant 2.000000e-01 : f32
    %488 = vector.broadcast %cst_159 : f32 to vector<6x6xf32>
    %489 = arith.mulf %488, %485 : vector<6x6xf32>
    %490 = arith.select %487, %485, %489 : vector<6x6xi1>, vector<6x6xf32>
    %cst_160 = arith.constant dense<0xFF800000> : vector<6xf32>
    %491 = vector.multi_reduction <maximumf>, %490, %cst_160 [1] : vector<6x6xf32> to vector<6xf32>
    %492 = vector.shape_cast %491 : vector<6xf32> to vector<6x1xf32>
    %493 = vector.broadcast %492 : vector<6x1xf32> to vector<6x6xf32>
    %494 = arith.subf %490, %493 : vector<6x6xf32>
    %495 = math.exp %494 : vector<6x6xf32>
    %496 = arith.mulf %495, %2 : vector<6x6xf32>
    %cst_161 = arith.constant dense<0.000000e+00> : vector<6xf32>
    %497 = vector.multi_reduction <add>, %496, %cst_161 [1] : vector<6x6xf32> to vector<6xf32>
    %498 = vector.shape_cast %497 : vector<6xf32> to vector<6x1xf32>
    %cst_162 = arith.constant 9.99999971E-10 : f32
    %499 = vector.broadcast %cst_162 : f32 to vector<6x1xf32>
    %500 = arith.maximumf %498, %499 : vector<6x1xf32>
    %501 = tpu.reciprocal %500 {approx = true} : vector<6x1xf32> -> vector<6x1xf32>
    %502 = vector.broadcast %501 : vector<6x1xf32> to vector<6x6xf32>
    %503 = arith.mulf %496, %502 : vector<6x6xf32>
    %504 = vector.extract_strided_slice %473 {offsets = [0, 0], sizes = [6, 8], strides = [1, 1]} : vector<6x32xf32> to vector<6x8xf32>
    %cst_163 = arith.constant dense<0.000000e+00> : vector<6x8xf32>
    %505 = tpu.matmul %503, %504, %cst_163 {dimension_numbers = #tpu.dot_dimension_numbers<[1], [0], [0], [1], [0, 0, 1, 1], [], []>} : vector<6x6xf32>, vector<6x8xf32>, vector<6x8xf32> -> vector<6x8xf32>
    %506 = vector.extract_strided_slice %480 {offsets = [0, 1], sizes = [6, 1], strides = [1, 1]} : vector<6x4xf32> to vector<6x1xf32>
    %507 = vector.extract_strided_slice %475 {offsets = [1, 0], sizes = [1, 6], strides = [1, 1]} : vector<4x6xf32> to vector<1x6xf32>
    %508 = vector.broadcast %506 : vector<6x1xf32> to vector<6x6xf32>
    %509 = vector.broadcast %507 : vector<1x6xf32> to vector<6x6xf32>
    %510 = arith.addf %508, %509 : vector<6x6xf32>
    %cst_164 = arith.constant 0.000000e+00 : f32
    %511 = vector.broadcast %cst_164 : f32 to vector<6x6xf32>
    %512 = arith.cmpf ogt, %510, %511 : vector<6x6xf32>
    %cst_165 = arith.constant 2.000000e-01 : f32
    %513 = vector.broadcast %cst_165 : f32 to vector<6x6xf32>
    %514 = arith.mulf %513, %510 : vector<6x6xf32>
    %515 = arith.select %512, %510, %514 : vector<6x6xi1>, vector<6x6xf32>
    %cst_166 = arith.constant dense<0xFF800000> : vector<6xf32>
    %516 = vector.multi_reduction <maximumf>, %515, %cst_166 [1] : vector<6x6xf32> to vector<6xf32>
    %517 = vector.shape_cast %516 : vector<6xf32> to vector<6x1xf32>
    %518 = vector.broadcast %517 : vector<6x1xf32> to vector<6x6xf32>
    %519 = arith.subf %515, %518 : vector<6x6xf32>
    %520 = math.exp %519 : vector<6x6xf32>
    %521 = arith.mulf %520, %2 : vector<6x6xf32>
    %cst_167 = arith.constant dense<0.000000e+00> : vector<6xf32>
    %522 = vector.multi_reduction <add>, %521, %cst_167 [1] : vector<6x6xf32> to vector<6xf32>
    %523 = vector.shape_cast %522 : vector<6xf32> to vector<6x1xf32>
    %cst_168 = arith.constant 9.99999971E-10 : f32
    %524 = vector.broadcast %cst_168 : f32 to vector<6x1xf32>
    %525 = arith.maximumf %523, %524 : vector<6x1xf32>
    %526 = tpu.reciprocal %525 {approx = true} : vector<6x1xf32> -> vector<6x1xf32>
    %527 = vector.broadcast %526 : vector<6x1xf32> to vector<6x6xf32>
    %528 = arith.mulf %521, %527 : vector<6x6xf32>
    %529 = vector.extract_strided_slice %473 {offsets = [0, 8], sizes = [6, 8], strides = [1, 1]} : vector<6x32xf32> to vector<6x8xf32>
    %cst_169 = arith.constant dense<0.000000e+00> : vector<6x8xf32>
    %530 = tpu.matmul %528, %529, %cst_169 {dimension_numbers = #tpu.dot_dimension_numbers<[1], [0], [0], [1], [0, 0, 1, 1], [], []>} : vector<6x6xf32>, vector<6x8xf32>, vector<6x8xf32> -> vector<6x8xf32>
    %531 = vector.extract_strided_slice %480 {offsets = [0, 2], sizes = [6, 1], strides = [1, 1]} : vector<6x4xf32> to vector<6x1xf32>
    %532 = vector.extract_strided_slice %475 {offsets = [2, 0], sizes = [1, 6], strides = [1, 1]} : vector<4x6xf32> to vector<1x6xf32>
    %533 = vector.broadcast %531 : vector<6x1xf32> to vector<6x6xf32>
    %534 = vector.broadcast %532 : vector<1x6xf32> to vector<6x6xf32>
    %535 = arith.addf %533, %534 : vector<6x6xf32>
    %cst_170 = arith.constant 0.000000e+00 : f32
    %536 = vector.broadcast %cst_170 : f32 to vector<6x6xf32>
    %537 = arith.cmpf ogt, %535, %536 : vector<6x6xf32>
    %cst_171 = arith.constant 2.000000e-01 : f32
    %538 = vector.broadcast %cst_171 : f32 to vector<6x6xf32>
    %539 = arith.mulf %538, %535 : vector<6x6xf32>
    %540 = arith.select %537, %535, %539 : vector<6x6xi1>, vector<6x6xf32>
    %cst_172 = arith.constant dense<0xFF800000> : vector<6xf32>
    %541 = vector.multi_reduction <maximumf>, %540, %cst_172 [1] : vector<6x6xf32> to vector<6xf32>
    %542 = vector.shape_cast %541 : vector<6xf32> to vector<6x1xf32>
    %543 = vector.broadcast %542 : vector<6x1xf32> to vector<6x6xf32>
    %544 = arith.subf %540, %543 : vector<6x6xf32>
    %545 = math.exp %544 : vector<6x6xf32>
    %546 = arith.mulf %545, %2 : vector<6x6xf32>
    %cst_173 = arith.constant dense<0.000000e+00> : vector<6xf32>
    %547 = vector.multi_reduction <add>, %546, %cst_173 [1] : vector<6x6xf32> to vector<6xf32>
    %548 = vector.shape_cast %547 : vector<6xf32> to vector<6x1xf32>
    %cst_174 = arith.constant 9.99999971E-10 : f32
    %549 = vector.broadcast %cst_174 : f32 to vector<6x1xf32>
    %550 = arith.maximumf %548, %549 : vector<6x1xf32>
    %551 = tpu.reciprocal %550 {approx = true} : vector<6x1xf32> -> vector<6x1xf32>
    %552 = vector.broadcast %551 : vector<6x1xf32> to vector<6x6xf32>
    %553 = arith.mulf %546, %552 : vector<6x6xf32>
    %554 = vector.extract_strided_slice %473 {offsets = [0, 16], sizes = [6, 8], strides = [1, 1]} : vector<6x32xf32> to vector<6x8xf32>
    %cst_175 = arith.constant dense<0.000000e+00> : vector<6x8xf32>
    %555 = tpu.matmul %553, %554, %cst_175 {dimension_numbers = #tpu.dot_dimension_numbers<[1], [0], [0], [1], [0, 0, 1, 1], [], []>} : vector<6x6xf32>, vector<6x8xf32>, vector<6x8xf32> -> vector<6x8xf32>
    %556 = vector.extract_strided_slice %480 {offsets = [0, 3], sizes = [6, 1], strides = [1, 1]} : vector<6x4xf32> to vector<6x1xf32>
    %557 = vector.extract_strided_slice %475 {offsets = [3, 0], sizes = [1, 6], strides = [1, 1]} : vector<4x6xf32> to vector<1x6xf32>
    %558 = vector.broadcast %556 : vector<6x1xf32> to vector<6x6xf32>
    %559 = vector.broadcast %557 : vector<1x6xf32> to vector<6x6xf32>
    %560 = arith.addf %558, %559 : vector<6x6xf32>
    %cst_176 = arith.constant 0.000000e+00 : f32
    %561 = vector.broadcast %cst_176 : f32 to vector<6x6xf32>
    %562 = arith.cmpf ogt, %560, %561 : vector<6x6xf32>
    %cst_177 = arith.constant 2.000000e-01 : f32
    %563 = vector.broadcast %cst_177 : f32 to vector<6x6xf32>
    %564 = arith.mulf %563, %560 : vector<6x6xf32>
    %565 = arith.select %562, %560, %564 : vector<6x6xi1>, vector<6x6xf32>
    %cst_178 = arith.constant dense<0xFF800000> : vector<6xf32>
    %566 = vector.multi_reduction <maximumf>, %565, %cst_178 [1] : vector<6x6xf32> to vector<6xf32>
    %567 = vector.shape_cast %566 : vector<6xf32> to vector<6x1xf32>
    %568 = vector.broadcast %567 : vector<6x1xf32> to vector<6x6xf32>
    %569 = arith.subf %565, %568 : vector<6x6xf32>
    %570 = math.exp %569 : vector<6x6xf32>
    %571 = arith.mulf %570, %2 : vector<6x6xf32>
    %cst_179 = arith.constant dense<0.000000e+00> : vector<6xf32>
    %572 = vector.multi_reduction <add>, %571, %cst_179 [1] : vector<6x6xf32> to vector<6xf32>
    %573 = vector.shape_cast %572 : vector<6xf32> to vector<6x1xf32>
    %cst_180 = arith.constant 9.99999971E-10 : f32
    %574 = vector.broadcast %cst_180 : f32 to vector<6x1xf32>
    %575 = arith.maximumf %573, %574 : vector<6x1xf32>
    %576 = tpu.reciprocal %575 {approx = true} : vector<6x1xf32> -> vector<6x1xf32>
    %577 = vector.broadcast %576 : vector<6x1xf32> to vector<6x6xf32>
    %578 = arith.mulf %571, %577 : vector<6x6xf32>
    %579 = vector.extract_strided_slice %473 {offsets = [0, 24], sizes = [6, 8], strides = [1, 1]} : vector<6x32xf32> to vector<6x8xf32>
    %cst_181 = arith.constant dense<0.000000e+00> : vector<6x8xf32>
    %580 = tpu.matmul %578, %579, %cst_181 {dimension_numbers = #tpu.dot_dimension_numbers<[1], [0], [0], [1], [0, 0, 1, 1], [], []>} : vector<6x6xf32>, vector<6x8xf32>, vector<6x8xf32> -> vector<6x8xf32>
    %581 = tpu.concatenate %505, %530, %555, %580 in 1 : vector<6x8xf32>, vector<6x8xf32>, vector<6x8xf32>, vector<6x8xf32> -> vector<6x32xf32>
    %c0_182 = arith.constant 0 : index
    %c0_183 = arith.constant 0 : index
    %582 = vector.load %arg26[%c0_182, %c0_183] : memref<32x36xf32, #tpu.memory_space<vmem>>, vector<32x36xf32>
    %cst_184 = arith.constant dense<0.000000e+00> : vector<6x36xf32>
    %583 = tpu.matmul %465, %582, %cst_184 {dimension_numbers = #tpu.dot_dimension_numbers<[1], [0], [0], [1], [0, 0, 1, 1], [], []>} : vector<6x32xf32>, vector<32x36xf32>, vector<6x36xf32> -> vector<6x36xf32>
    %c0_185 = arith.constant 0 : index
    %c0_186 = arith.constant 0 : index
    %584 = vector.load %arg27[%c0_185, %c0_186] : memref<1x36xf32, #tpu.memory_space<vmem>>, vector<1x36xf32>
    %585 = vector.broadcast %584 : vector<1x36xf32> to vector<6x36xf32>
    %586 = arith.addf %583, %585 : vector<6x36xf32>
    %587 = vector.extract_strided_slice %586 {offsets = [0, 0], sizes = [6, 32], strides = [1, 1]} : vector<6x36xf32> to vector<6x32xf32>
    %588 = vector.extract_strided_slice %586 {offsets = [0, 32], sizes = [6, 4], strides = [1, 1]} : vector<6x36xf32> to vector<6x4xf32>
    %589 = tpu.transpose %588, [1, 0] : vector<6x4xf32> -> vector<4x6xf32>
    %c0_187 = arith.constant 0 : index
    %c0_188 = arith.constant 0 : index
    %590 = vector.load %arg28[%c0_187, %c0_188] : memref<32x4xf32, #tpu.memory_space<vmem>>, vector<32x4xf32>
    %cst_189 = arith.constant dense<0.000000e+00> : vector<3x4xf32>
    %591 = tpu.matmul %467, %590, %cst_189 {dimension_numbers = #tpu.dot_dimension_numbers<[1], [0], [0], [1], [0, 0, 1, 1], [], []>} : vector<3x32xf32>, vector<32x4xf32>, vector<3x4xf32> -> vector<3x4xf32>
    %c0_190 = arith.constant 0 : index
    %c0_191 = arith.constant 0 : index
    %592 = vector.load %arg29[%c0_190, %c0_191] : memref<1x4xf32, #tpu.memory_space<vmem>>, vector<1x4xf32>
    %593 = vector.broadcast %592 : vector<1x4xf32> to vector<3x4xf32>
    %594 = arith.addf %591, %593 : vector<3x4xf32>
    %595 = vector.extract_strided_slice %594 {offsets = [0, 0], sizes = [3, 1], strides = [1, 1]} : vector<3x4xf32> to vector<3x1xf32>
    %596 = vector.extract_strided_slice %589 {offsets = [0, 0], sizes = [1, 6], strides = [1, 1]} : vector<4x6xf32> to vector<1x6xf32>
    %597 = vector.broadcast %595 : vector<3x1xf32> to vector<3x6xf32>
    %598 = vector.broadcast %596 : vector<1x6xf32> to vector<3x6xf32>
    %599 = arith.addf %597, %598 : vector<3x6xf32>
    %cst_192 = arith.constant 0.000000e+00 : f32
    %600 = vector.broadcast %cst_192 : f32 to vector<3x6xf32>
    %601 = arith.cmpf ogt, %599, %600 : vector<3x6xf32>
    %cst_193 = arith.constant 2.000000e-01 : f32
    %602 = vector.broadcast %cst_193 : f32 to vector<3x6xf32>
    %603 = arith.mulf %602, %599 : vector<3x6xf32>
    %604 = arith.select %601, %599, %603 : vector<3x6xi1>, vector<3x6xf32>
    %cst_194 = arith.constant dense<0xFF800000> : vector<3xf32>
    %605 = vector.multi_reduction <maximumf>, %604, %cst_194 [1] : vector<3x6xf32> to vector<3xf32>
    %606 = vector.shape_cast %605 : vector<3xf32> to vector<3x1xf32>
    %607 = vector.broadcast %606 : vector<3x1xf32> to vector<3x6xf32>
    %608 = arith.subf %604, %607 : vector<3x6xf32>
    %609 = math.exp %608 : vector<3x6xf32>
    %610 = arith.mulf %609, %3 : vector<3x6xf32>
    %cst_195 = arith.constant dense<0.000000e+00> : vector<3xf32>
    %611 = vector.multi_reduction <add>, %610, %cst_195 [1] : vector<3x6xf32> to vector<3xf32>
    %612 = vector.shape_cast %611 : vector<3xf32> to vector<3x1xf32>
    %cst_196 = arith.constant 9.99999971E-10 : f32
    %613 = vector.broadcast %cst_196 : f32 to vector<3x1xf32>
    %614 = arith.maximumf %612, %613 : vector<3x1xf32>
    %615 = tpu.reciprocal %614 {approx = true} : vector<3x1xf32> -> vector<3x1xf32>
    %616 = vector.broadcast %615 : vector<3x1xf32> to vector<3x6xf32>
    %617 = arith.mulf %610, %616 : vector<3x6xf32>
    %618 = vector.extract_strided_slice %587 {offsets = [0, 0], sizes = [6, 8], strides = [1, 1]} : vector<6x32xf32> to vector<6x8xf32>
    %cst_197 = arith.constant dense<0.000000e+00> : vector<3x8xf32>
    %619 = tpu.matmul %617, %618, %cst_197 {dimension_numbers = #tpu.dot_dimension_numbers<[1], [0], [0], [1], [0, 0, 1, 1], [], []>} : vector<3x6xf32>, vector<6x8xf32>, vector<3x8xf32> -> vector<3x8xf32>
    %620 = vector.extract_strided_slice %594 {offsets = [0, 1], sizes = [3, 1], strides = [1, 1]} : vector<3x4xf32> to vector<3x1xf32>
    %621 = vector.extract_strided_slice %589 {offsets = [1, 0], sizes = [1, 6], strides = [1, 1]} : vector<4x6xf32> to vector<1x6xf32>
    %622 = vector.broadcast %620 : vector<3x1xf32> to vector<3x6xf32>
    %623 = vector.broadcast %621 : vector<1x6xf32> to vector<3x6xf32>
    %624 = arith.addf %622, %623 : vector<3x6xf32>
    %cst_198 = arith.constant 0.000000e+00 : f32
    %625 = vector.broadcast %cst_198 : f32 to vector<3x6xf32>
    %626 = arith.cmpf ogt, %624, %625 : vector<3x6xf32>
    %cst_199 = arith.constant 2.000000e-01 : f32
    %627 = vector.broadcast %cst_199 : f32 to vector<3x6xf32>
    %628 = arith.mulf %627, %624 : vector<3x6xf32>
    %629 = arith.select %626, %624, %628 : vector<3x6xi1>, vector<3x6xf32>
    %cst_200 = arith.constant dense<0xFF800000> : vector<3xf32>
    %630 = vector.multi_reduction <maximumf>, %629, %cst_200 [1] : vector<3x6xf32> to vector<3xf32>
    %631 = vector.shape_cast %630 : vector<3xf32> to vector<3x1xf32>
    %632 = vector.broadcast %631 : vector<3x1xf32> to vector<3x6xf32>
    %633 = arith.subf %629, %632 : vector<3x6xf32>
    %634 = math.exp %633 : vector<3x6xf32>
    %635 = arith.mulf %634, %3 : vector<3x6xf32>
    %cst_201 = arith.constant dense<0.000000e+00> : vector<3xf32>
    %636 = vector.multi_reduction <add>, %635, %cst_201 [1] : vector<3x6xf32> to vector<3xf32>
    %637 = vector.shape_cast %636 : vector<3xf32> to vector<3x1xf32>
    %cst_202 = arith.constant 9.99999971E-10 : f32
    %638 = vector.broadcast %cst_202 : f32 to vector<3x1xf32>
    %639 = arith.maximumf %637, %638 : vector<3x1xf32>
    %640 = tpu.reciprocal %639 {approx = true} : vector<3x1xf32> -> vector<3x1xf32>
    %641 = vector.broadcast %640 : vector<3x1xf32> to vector<3x6xf32>
    %642 = arith.mulf %635, %641 : vector<3x6xf32>
    %643 = vector.extract_strided_slice %587 {offsets = [0, 8], sizes = [6, 8], strides = [1, 1]} : vector<6x32xf32> to vector<6x8xf32>
    %cst_203 = arith.constant dense<0.000000e+00> : vector<3x8xf32>
    %644 = tpu.matmul %642, %643, %cst_203 {dimension_numbers = #tpu.dot_dimension_numbers<[1], [0], [0], [1], [0, 0, 1, 1], [], []>} : vector<3x6xf32>, vector<6x8xf32>, vector<3x8xf32> -> vector<3x8xf32>
    %645 = vector.extract_strided_slice %594 {offsets = [0, 2], sizes = [3, 1], strides = [1, 1]} : vector<3x4xf32> to vector<3x1xf32>
    %646 = vector.extract_strided_slice %589 {offsets = [2, 0], sizes = [1, 6], strides = [1, 1]} : vector<4x6xf32> to vector<1x6xf32>
    %647 = vector.broadcast %645 : vector<3x1xf32> to vector<3x6xf32>
    %648 = vector.broadcast %646 : vector<1x6xf32> to vector<3x6xf32>
    %649 = arith.addf %647, %648 : vector<3x6xf32>
    %cst_204 = arith.constant 0.000000e+00 : f32
    %650 = vector.broadcast %cst_204 : f32 to vector<3x6xf32>
    %651 = arith.cmpf ogt, %649, %650 : vector<3x6xf32>
    %cst_205 = arith.constant 2.000000e-01 : f32
    %652 = vector.broadcast %cst_205 : f32 to vector<3x6xf32>
    %653 = arith.mulf %652, %649 : vector<3x6xf32>
    %654 = arith.select %651, %649, %653 : vector<3x6xi1>, vector<3x6xf32>
    %cst_206 = arith.constant dense<0xFF800000> : vector<3xf32>
    %655 = vector.multi_reduction <maximumf>, %654, %cst_206 [1] : vector<3x6xf32> to vector<3xf32>
    %656 = vector.shape_cast %655 : vector<3xf32> to vector<3x1xf32>
    %657 = vector.broadcast %656 : vector<3x1xf32> to vector<3x6xf32>
    %658 = arith.subf %654, %657 : vector<3x6xf32>
    %659 = math.exp %658 : vector<3x6xf32>
    %660 = arith.mulf %659, %3 : vector<3x6xf32>
    %cst_207 = arith.constant dense<0.000000e+00> : vector<3xf32>
    %661 = vector.multi_reduction <add>, %660, %cst_207 [1] : vector<3x6xf32> to vector<3xf32>
    %662 = vector.shape_cast %661 : vector<3xf32> to vector<3x1xf32>
    %cst_208 = arith.constant 9.99999971E-10 : f32
    %663 = vector.broadcast %cst_208 : f32 to vector<3x1xf32>
    %664 = arith.maximumf %662, %663 : vector<3x1xf32>
    %665 = tpu.reciprocal %664 {approx = true} : vector<3x1xf32> -> vector<3x1xf32>
    %666 = vector.broadcast %665 : vector<3x1xf32> to vector<3x6xf32>
    %667 = arith.mulf %660, %666 : vector<3x6xf32>
    %668 = vector.extract_strided_slice %587 {offsets = [0, 16], sizes = [6, 8], strides = [1, 1]} : vector<6x32xf32> to vector<6x8xf32>
    %cst_209 = arith.constant dense<0.000000e+00> : vector<3x8xf32>
    %669 = tpu.matmul %667, %668, %cst_209 {dimension_numbers = #tpu.dot_dimension_numbers<[1], [0], [0], [1], [0, 0, 1, 1], [], []>} : vector<3x6xf32>, vector<6x8xf32>, vector<3x8xf32> -> vector<3x8xf32>
    %670 = vector.extract_strided_slice %594 {offsets = [0, 3], sizes = [3, 1], strides = [1, 1]} : vector<3x4xf32> to vector<3x1xf32>
    %671 = vector.extract_strided_slice %589 {offsets = [3, 0], sizes = [1, 6], strides = [1, 1]} : vector<4x6xf32> to vector<1x6xf32>
    %672 = vector.broadcast %670 : vector<3x1xf32> to vector<3x6xf32>
    %673 = vector.broadcast %671 : vector<1x6xf32> to vector<3x6xf32>
    %674 = arith.addf %672, %673 : vector<3x6xf32>
    %cst_210 = arith.constant 0.000000e+00 : f32
    %675 = vector.broadcast %cst_210 : f32 to vector<3x6xf32>
    %676 = arith.cmpf ogt, %674, %675 : vector<3x6xf32>
    %cst_211 = arith.constant 2.000000e-01 : f32
    %677 = vector.broadcast %cst_211 : f32 to vector<3x6xf32>
    %678 = arith.mulf %677, %674 : vector<3x6xf32>
    %679 = arith.select %676, %674, %678 : vector<3x6xi1>, vector<3x6xf32>
    %cst_212 = arith.constant dense<0xFF800000> : vector<3xf32>
    %680 = vector.multi_reduction <maximumf>, %679, %cst_212 [1] : vector<3x6xf32> to vector<3xf32>
    %681 = vector.shape_cast %680 : vector<3xf32> to vector<3x1xf32>
    %682 = vector.broadcast %681 : vector<3x1xf32> to vector<3x6xf32>
    %683 = arith.subf %679, %682 : vector<3x6xf32>
    %684 = math.exp %683 : vector<3x6xf32>
    %685 = arith.mulf %684, %3 : vector<3x6xf32>
    %cst_213 = arith.constant dense<0.000000e+00> : vector<3xf32>
    %686 = vector.multi_reduction <add>, %685, %cst_213 [1] : vector<3x6xf32> to vector<3xf32>
    %687 = vector.shape_cast %686 : vector<3xf32> to vector<3x1xf32>
    %cst_214 = arith.constant 9.99999971E-10 : f32
    %688 = vector.broadcast %cst_214 : f32 to vector<3x1xf32>
    %689 = arith.maximumf %687, %688 : vector<3x1xf32>
    %690 = tpu.reciprocal %689 {approx = true} : vector<3x1xf32> -> vector<3x1xf32>
    %691 = vector.broadcast %690 : vector<3x1xf32> to vector<3x6xf32>
    %692 = arith.mulf %685, %691 : vector<3x6xf32>
    %693 = vector.extract_strided_slice %587 {offsets = [0, 24], sizes = [6, 8], strides = [1, 1]} : vector<6x32xf32> to vector<6x8xf32>
    %cst_215 = arith.constant dense<0.000000e+00> : vector<3x8xf32>
    %694 = tpu.matmul %692, %693, %cst_215 {dimension_numbers = #tpu.dot_dimension_numbers<[1], [0], [0], [1], [0, 0, 1, 1], [], []>} : vector<3x6xf32>, vector<6x8xf32>, vector<3x8xf32> -> vector<3x8xf32>
    %695 = tpu.concatenate %619, %644, %669, %694 in 1 : vector<3x8xf32>, vector<3x8xf32>, vector<3x8xf32>, vector<3x8xf32> -> vector<3x32xf32>
    %c0_216 = arith.constant 0 : index
    %c0_217 = arith.constant 0 : index
    %696 = vector.load %arg30[%c0_216, %c0_217] : memref<32x36xf32, #tpu.memory_space<vmem>>, vector<32x36xf32>
    %cst_218 = arith.constant dense<0.000000e+00> : vector<3x36xf32>
    %697 = tpu.matmul %467, %696, %cst_218 {dimension_numbers = #tpu.dot_dimension_numbers<[1], [0], [0], [1], [0, 0, 1, 1], [], []>} : vector<3x32xf32>, vector<32x36xf32>, vector<3x36xf32> -> vector<3x36xf32>
    %c0_219 = arith.constant 0 : index
    %c0_220 = arith.constant 0 : index
    %698 = vector.load %arg31[%c0_219, %c0_220] : memref<1x36xf32, #tpu.memory_space<vmem>>, vector<1x36xf32>
    %699 = vector.broadcast %698 : vector<1x36xf32> to vector<3x36xf32>
    %700 = arith.addf %697, %699 : vector<3x36xf32>
    %701 = vector.extract_strided_slice %700 {offsets = [0, 0], sizes = [3, 32], strides = [1, 1]} : vector<3x36xf32> to vector<3x32xf32>
    %702 = vector.extract_strided_slice %700 {offsets = [0, 32], sizes = [3, 4], strides = [1, 1]} : vector<3x36xf32> to vector<3x4xf32>
    %703 = tpu.transpose %702, [1, 0] : vector<3x4xf32> -> vector<4x3xf32>
    %c0_221 = arith.constant 0 : index
    %c0_222 = arith.constant 0 : index
    %704 = vector.load %arg32[%c0_221, %c0_222] : memref<32x4xf32, #tpu.memory_space<vmem>>, vector<32x4xf32>
    %cst_223 = arith.constant dense<0.000000e+00> : vector<6x4xf32>
    %705 = tpu.matmul %465, %704, %cst_223 {dimension_numbers = #tpu.dot_dimension_numbers<[1], [0], [0], [1], [0, 0, 1, 1], [], []>} : vector<6x32xf32>, vector<32x4xf32>, vector<6x4xf32> -> vector<6x4xf32>
    %c0_224 = arith.constant 0 : index
    %c0_225 = arith.constant 0 : index
    %706 = vector.load %arg33[%c0_224, %c0_225] : memref<1x4xf32, #tpu.memory_space<vmem>>, vector<1x4xf32>
    %707 = vector.broadcast %706 : vector<1x4xf32> to vector<6x4xf32>
    %708 = arith.addf %705, %707 : vector<6x4xf32>
    %709 = vector.extract_strided_slice %708 {offsets = [0, 0], sizes = [6, 1], strides = [1, 1]} : vector<6x4xf32> to vector<6x1xf32>
    %710 = vector.extract_strided_slice %703 {offsets = [0, 0], sizes = [1, 3], strides = [1, 1]} : vector<4x3xf32> to vector<1x3xf32>
    %711 = vector.broadcast %709 : vector<6x1xf32> to vector<6x3xf32>
    %712 = vector.broadcast %710 : vector<1x3xf32> to vector<6x3xf32>
    %713 = arith.addf %711, %712 : vector<6x3xf32>
    %cst_226 = arith.constant 0.000000e+00 : f32
    %714 = vector.broadcast %cst_226 : f32 to vector<6x3xf32>
    %715 = arith.cmpf ogt, %713, %714 : vector<6x3xf32>
    %cst_227 = arith.constant 2.000000e-01 : f32
    %716 = vector.broadcast %cst_227 : f32 to vector<6x3xf32>
    %717 = arith.mulf %716, %713 : vector<6x3xf32>
    %718 = arith.select %715, %713, %717 : vector<6x3xi1>, vector<6x3xf32>
    %cst_228 = arith.constant dense<0xFF800000> : vector<6xf32>
    %719 = vector.multi_reduction <maximumf>, %718, %cst_228 [1] : vector<6x3xf32> to vector<6xf32>
    %720 = vector.shape_cast %719 : vector<6xf32> to vector<6x1xf32>
    %721 = vector.broadcast %720 : vector<6x1xf32> to vector<6x3xf32>
    %722 = arith.subf %718, %721 : vector<6x3xf32>
    %723 = math.exp %722 : vector<6x3xf32>
    %724 = arith.mulf %723, %4 : vector<6x3xf32>
    %cst_229 = arith.constant dense<0.000000e+00> : vector<6xf32>
    %725 = vector.multi_reduction <add>, %724, %cst_229 [1] : vector<6x3xf32> to vector<6xf32>
    %726 = vector.shape_cast %725 : vector<6xf32> to vector<6x1xf32>
    %cst_230 = arith.constant 9.99999971E-10 : f32
    %727 = vector.broadcast %cst_230 : f32 to vector<6x1xf32>
    %728 = arith.maximumf %726, %727 : vector<6x1xf32>
    %729 = tpu.reciprocal %728 {approx = true} : vector<6x1xf32> -> vector<6x1xf32>
    %730 = vector.broadcast %729 : vector<6x1xf32> to vector<6x3xf32>
    %731 = arith.mulf %724, %730 : vector<6x3xf32>
    %732 = vector.extract_strided_slice %701 {offsets = [0, 0], sizes = [3, 8], strides = [1, 1]} : vector<3x32xf32> to vector<3x8xf32>
    %cst_231 = arith.constant dense<0.000000e+00> : vector<6x8xf32>
    %733 = tpu.matmul %731, %732, %cst_231 {dimension_numbers = #tpu.dot_dimension_numbers<[1], [0], [0], [1], [0, 0, 1, 1], [], []>} : vector<6x3xf32>, vector<3x8xf32>, vector<6x8xf32> -> vector<6x8xf32>
    %734 = vector.extract_strided_slice %708 {offsets = [0, 1], sizes = [6, 1], strides = [1, 1]} : vector<6x4xf32> to vector<6x1xf32>
    %735 = vector.extract_strided_slice %703 {offsets = [1, 0], sizes = [1, 3], strides = [1, 1]} : vector<4x3xf32> to vector<1x3xf32>
    %736 = vector.broadcast %734 : vector<6x1xf32> to vector<6x3xf32>
    %737 = vector.broadcast %735 : vector<1x3xf32> to vector<6x3xf32>
    %738 = arith.addf %736, %737 : vector<6x3xf32>
    %cst_232 = arith.constant 0.000000e+00 : f32
    %739 = vector.broadcast %cst_232 : f32 to vector<6x3xf32>
    %740 = arith.cmpf ogt, %738, %739 : vector<6x3xf32>
    %cst_233 = arith.constant 2.000000e-01 : f32
    %741 = vector.broadcast %cst_233 : f32 to vector<6x3xf32>
    %742 = arith.mulf %741, %738 : vector<6x3xf32>
    %743 = arith.select %740, %738, %742 : vector<6x3xi1>, vector<6x3xf32>
    %cst_234 = arith.constant dense<0xFF800000> : vector<6xf32>
    %744 = vector.multi_reduction <maximumf>, %743, %cst_234 [1] : vector<6x3xf32> to vector<6xf32>
    %745 = vector.shape_cast %744 : vector<6xf32> to vector<6x1xf32>
    %746 = vector.broadcast %745 : vector<6x1xf32> to vector<6x3xf32>
    %747 = arith.subf %743, %746 : vector<6x3xf32>
    %748 = math.exp %747 : vector<6x3xf32>
    %749 = arith.mulf %748, %4 : vector<6x3xf32>
    %cst_235 = arith.constant dense<0.000000e+00> : vector<6xf32>
    %750 = vector.multi_reduction <add>, %749, %cst_235 [1] : vector<6x3xf32> to vector<6xf32>
    %751 = vector.shape_cast %750 : vector<6xf32> to vector<6x1xf32>
    %cst_236 = arith.constant 9.99999971E-10 : f32
    %752 = vector.broadcast %cst_236 : f32 to vector<6x1xf32>
    %753 = arith.maximumf %751, %752 : vector<6x1xf32>
    %754 = tpu.reciprocal %753 {approx = true} : vector<6x1xf32> -> vector<6x1xf32>
    %755 = vector.broadcast %754 : vector<6x1xf32> to vector<6x3xf32>
    %756 = arith.mulf %749, %755 : vector<6x3xf32>
    %757 = vector.extract_strided_slice %701 {offsets = [0, 8], sizes = [3, 8], strides = [1, 1]} : vector<3x32xf32> to vector<3x8xf32>
    %cst_237 = arith.constant dense<0.000000e+00> : vector<6x8xf32>
    %758 = tpu.matmul %756, %757, %cst_237 {dimension_numbers = #tpu.dot_dimension_numbers<[1], [0], [0], [1], [0, 0, 1, 1], [], []>} : vector<6x3xf32>, vector<3x8xf32>, vector<6x8xf32> -> vector<6x8xf32>
    %759 = vector.extract_strided_slice %708 {offsets = [0, 2], sizes = [6, 1], strides = [1, 1]} : vector<6x4xf32> to vector<6x1xf32>
    %760 = vector.extract_strided_slice %703 {offsets = [2, 0], sizes = [1, 3], strides = [1, 1]} : vector<4x3xf32> to vector<1x3xf32>
    %761 = vector.broadcast %759 : vector<6x1xf32> to vector<6x3xf32>
    %762 = vector.broadcast %760 : vector<1x3xf32> to vector<6x3xf32>
    %763 = arith.addf %761, %762 : vector<6x3xf32>
    %cst_238 = arith.constant 0.000000e+00 : f32
    %764 = vector.broadcast %cst_238 : f32 to vector<6x3xf32>
    %765 = arith.cmpf ogt, %763, %764 : vector<6x3xf32>
    %cst_239 = arith.constant 2.000000e-01 : f32
    %766 = vector.broadcast %cst_239 : f32 to vector<6x3xf32>
    %767 = arith.mulf %766, %763 : vector<6x3xf32>
    %768 = arith.select %765, %763, %767 : vector<6x3xi1>, vector<6x3xf32>
    %cst_240 = arith.constant dense<0xFF800000> : vector<6xf32>
    %769 = vector.multi_reduction <maximumf>, %768, %cst_240 [1] : vector<6x3xf32> to vector<6xf32>
    %770 = vector.shape_cast %769 : vector<6xf32> to vector<6x1xf32>
    %771 = vector.broadcast %770 : vector<6x1xf32> to vector<6x3xf32>
    %772 = arith.subf %768, %771 : vector<6x3xf32>
    %773 = math.exp %772 : vector<6x3xf32>
    %774 = arith.mulf %773, %4 : vector<6x3xf32>
    %cst_241 = arith.constant dense<0.000000e+00> : vector<6xf32>
    %775 = vector.multi_reduction <add>, %774, %cst_241 [1] : vector<6x3xf32> to vector<6xf32>
    %776 = vector.shape_cast %775 : vector<6xf32> to vector<6x1xf32>
    %cst_242 = arith.constant 9.99999971E-10 : f32
    %777 = vector.broadcast %cst_242 : f32 to vector<6x1xf32>
    %778 = arith.maximumf %776, %777 : vector<6x1xf32>
    %779 = tpu.reciprocal %778 {approx = true} : vector<6x1xf32> -> vector<6x1xf32>
    %780 = vector.broadcast %779 : vector<6x1xf32> to vector<6x3xf32>
    %781 = arith.mulf %774, %780 : vector<6x3xf32>
    %782 = vector.extract_strided_slice %701 {offsets = [0, 16], sizes = [3, 8], strides = [1, 1]} : vector<3x32xf32> to vector<3x8xf32>
    %cst_243 = arith.constant dense<0.000000e+00> : vector<6x8xf32>
    %783 = tpu.matmul %781, %782, %cst_243 {dimension_numbers = #tpu.dot_dimension_numbers<[1], [0], [0], [1], [0, 0, 1, 1], [], []>} : vector<6x3xf32>, vector<3x8xf32>, vector<6x8xf32> -> vector<6x8xf32>
    %784 = vector.extract_strided_slice %708 {offsets = [0, 3], sizes = [6, 1], strides = [1, 1]} : vector<6x4xf32> to vector<6x1xf32>
    %785 = vector.extract_strided_slice %703 {offsets = [3, 0], sizes = [1, 3], strides = [1, 1]} : vector<4x3xf32> to vector<1x3xf32>
    %786 = vector.broadcast %784 : vector<6x1xf32> to vector<6x3xf32>
    %787 = vector.broadcast %785 : vector<1x3xf32> to vector<6x3xf32>
    %788 = arith.addf %786, %787 : vector<6x3xf32>
    %cst_244 = arith.constant 0.000000e+00 : f32
    %789 = vector.broadcast %cst_244 : f32 to vector<6x3xf32>
    %790 = arith.cmpf ogt, %788, %789 : vector<6x3xf32>
    %cst_245 = arith.constant 2.000000e-01 : f32
    %791 = vector.broadcast %cst_245 : f32 to vector<6x3xf32>
    %792 = arith.mulf %791, %788 : vector<6x3xf32>
    %793 = arith.select %790, %788, %792 : vector<6x3xi1>, vector<6x3xf32>
    %cst_246 = arith.constant dense<0xFF800000> : vector<6xf32>
    %794 = vector.multi_reduction <maximumf>, %793, %cst_246 [1] : vector<6x3xf32> to vector<6xf32>
    %795 = vector.shape_cast %794 : vector<6xf32> to vector<6x1xf32>
    %796 = vector.broadcast %795 : vector<6x1xf32> to vector<6x3xf32>
    %797 = arith.subf %793, %796 : vector<6x3xf32>
    %798 = math.exp %797 : vector<6x3xf32>
    %799 = arith.mulf %798, %4 : vector<6x3xf32>
    %cst_247 = arith.constant dense<0.000000e+00> : vector<6xf32>
    %800 = vector.multi_reduction <add>, %799, %cst_247 [1] : vector<6x3xf32> to vector<6xf32>
    %801 = vector.shape_cast %800 : vector<6xf32> to vector<6x1xf32>
    %cst_248 = arith.constant 9.99999971E-10 : f32
    %802 = vector.broadcast %cst_248 : f32 to vector<6x1xf32>
    %803 = arith.maximumf %801, %802 : vector<6x1xf32>
    %804 = tpu.reciprocal %803 {approx = true} : vector<6x1xf32> -> vector<6x1xf32>
    %805 = vector.broadcast %804 : vector<6x1xf32> to vector<6x3xf32>
    %806 = arith.mulf %799, %805 : vector<6x3xf32>
    %807 = vector.extract_strided_slice %701 {offsets = [0, 24], sizes = [3, 8], strides = [1, 1]} : vector<3x32xf32> to vector<3x8xf32>
    %cst_249 = arith.constant dense<0.000000e+00> : vector<6x8xf32>
    %808 = tpu.matmul %806, %807, %cst_249 {dimension_numbers = #tpu.dot_dimension_numbers<[1], [0], [0], [1], [0, 0, 1, 1], [], []>} : vector<6x3xf32>, vector<3x8xf32>, vector<6x8xf32> -> vector<6x8xf32>
    %809 = tpu.concatenate %733, %758, %783, %808 in 1 : vector<6x8xf32>, vector<6x8xf32>, vector<6x8xf32>, vector<6x8xf32> -> vector<6x32xf32>
    %810 = arith.addf %581, %809 : vector<6x32xf32>
    %c0_250 = arith.constant 0 : index
    %c0_251 = arith.constant 0 : index
    %811 = vector.load %arg34[%c0_250, %c0_251] : memref<32x36xf32, #tpu.memory_space<vmem>>, vector<32x36xf32>
    %cst_252 = arith.constant dense<0.000000e+00> : vector<3x36xf32>
    %812 = tpu.matmul %467, %811, %cst_252 {dimension_numbers = #tpu.dot_dimension_numbers<[1], [0], [0], [1], [0, 0, 1, 1], [], []>} : vector<3x32xf32>, vector<32x36xf32>, vector<3x36xf32> -> vector<3x36xf32>
    %c0_253 = arith.constant 0 : index
    %c0_254 = arith.constant 0 : index
    %813 = vector.load %arg35[%c0_253, %c0_254] : memref<1x36xf32, #tpu.memory_space<vmem>>, vector<1x36xf32>
    %814 = vector.broadcast %813 : vector<1x36xf32> to vector<3x36xf32>
    %815 = arith.addf %812, %814 : vector<3x36xf32>
    %816 = vector.extract_strided_slice %815 {offsets = [0, 0], sizes = [3, 32], strides = [1, 1]} : vector<3x36xf32> to vector<3x32xf32>
    %817 = vector.extract_strided_slice %815 {offsets = [0, 32], sizes = [3, 4], strides = [1, 1]} : vector<3x36xf32> to vector<3x4xf32>
    %818 = tpu.transpose %817, [1, 0] : vector<3x4xf32> -> vector<4x3xf32>
    %c0_255 = arith.constant 0 : index
    %c0_256 = arith.constant 0 : index
    %819 = vector.load %arg36[%c0_255, %c0_256] : memref<32x4xf32, #tpu.memory_space<vmem>>, vector<32x4xf32>
    %cst_257 = arith.constant dense<0.000000e+00> : vector<3x4xf32>
    %820 = tpu.matmul %467, %819, %cst_257 {dimension_numbers = #tpu.dot_dimension_numbers<[1], [0], [0], [1], [0, 0, 1, 1], [], []>} : vector<3x32xf32>, vector<32x4xf32>, vector<3x4xf32> -> vector<3x4xf32>
    %c0_258 = arith.constant 0 : index
    %c0_259 = arith.constant 0 : index
    %821 = vector.load %arg37[%c0_258, %c0_259] : memref<1x4xf32, #tpu.memory_space<vmem>>, vector<1x4xf32>
    %822 = vector.broadcast %821 : vector<1x4xf32> to vector<3x4xf32>
    %823 = arith.addf %820, %822 : vector<3x4xf32>
    %824 = vector.extract_strided_slice %823 {offsets = [0, 0], sizes = [3, 1], strides = [1, 1]} : vector<3x4xf32> to vector<3x1xf32>
    %825 = vector.extract_strided_slice %818 {offsets = [0, 0], sizes = [1, 3], strides = [1, 1]} : vector<4x3xf32> to vector<1x3xf32>
    %826 = vector.broadcast %824 : vector<3x1xf32> to vector<3x3xf32>
    %827 = vector.broadcast %825 : vector<1x3xf32> to vector<3x3xf32>
    %828 = arith.addf %826, %827 : vector<3x3xf32>
    %cst_260 = arith.constant 0.000000e+00 : f32
    %829 = vector.broadcast %cst_260 : f32 to vector<3x3xf32>
    %830 = arith.cmpf ogt, %828, %829 : vector<3x3xf32>
    %cst_261 = arith.constant 2.000000e-01 : f32
    %831 = vector.broadcast %cst_261 : f32 to vector<3x3xf32>
    %832 = arith.mulf %831, %828 : vector<3x3xf32>
    %833 = arith.select %830, %828, %832 : vector<3x3xi1>, vector<3x3xf32>
    %cst_262 = arith.constant dense<0xFF800000> : vector<3xf32>
    %834 = vector.multi_reduction <maximumf>, %833, %cst_262 [1] : vector<3x3xf32> to vector<3xf32>
    %835 = vector.shape_cast %834 : vector<3xf32> to vector<3x1xf32>
    %836 = vector.broadcast %835 : vector<3x1xf32> to vector<3x3xf32>
    %837 = arith.subf %833, %836 : vector<3x3xf32>
    %838 = math.exp %837 : vector<3x3xf32>
    %839 = arith.mulf %838, %5 : vector<3x3xf32>
    %cst_263 = arith.constant dense<0.000000e+00> : vector<3xf32>
    %840 = vector.multi_reduction <add>, %839, %cst_263 [1] : vector<3x3xf32> to vector<3xf32>
    %841 = vector.shape_cast %840 : vector<3xf32> to vector<3x1xf32>
    %cst_264 = arith.constant 9.99999971E-10 : f32
    %842 = vector.broadcast %cst_264 : f32 to vector<3x1xf32>
    %843 = arith.maximumf %841, %842 : vector<3x1xf32>
    %844 = tpu.reciprocal %843 {approx = true} : vector<3x1xf32> -> vector<3x1xf32>
    %845 = vector.broadcast %844 : vector<3x1xf32> to vector<3x3xf32>
    %846 = arith.mulf %839, %845 : vector<3x3xf32>
    %847 = vector.extract_strided_slice %816 {offsets = [0, 0], sizes = [3, 8], strides = [1, 1]} : vector<3x32xf32> to vector<3x8xf32>
    %cst_265 = arith.constant dense<0.000000e+00> : vector<3x8xf32>
    %848 = tpu.matmul %846, %847, %cst_265 {dimension_numbers = #tpu.dot_dimension_numbers<[1], [0], [0], [1], [0, 0, 1, 1], [], []>} : vector<3x3xf32>, vector<3x8xf32>, vector<3x8xf32> -> vector<3x8xf32>
    %849 = vector.extract_strided_slice %823 {offsets = [0, 1], sizes = [3, 1], strides = [1, 1]} : vector<3x4xf32> to vector<3x1xf32>
    %850 = vector.extract_strided_slice %818 {offsets = [1, 0], sizes = [1, 3], strides = [1, 1]} : vector<4x3xf32> to vector<1x3xf32>
    %851 = vector.broadcast %849 : vector<3x1xf32> to vector<3x3xf32>
    %852 = vector.broadcast %850 : vector<1x3xf32> to vector<3x3xf32>
    %853 = arith.addf %851, %852 : vector<3x3xf32>
    %cst_266 = arith.constant 0.000000e+00 : f32
    %854 = vector.broadcast %cst_266 : f32 to vector<3x3xf32>
    %855 = arith.cmpf ogt, %853, %854 : vector<3x3xf32>
    %cst_267 = arith.constant 2.000000e-01 : f32
    %856 = vector.broadcast %cst_267 : f32 to vector<3x3xf32>
    %857 = arith.mulf %856, %853 : vector<3x3xf32>
    %858 = arith.select %855, %853, %857 : vector<3x3xi1>, vector<3x3xf32>
    %cst_268 = arith.constant dense<0xFF800000> : vector<3xf32>
    %859 = vector.multi_reduction <maximumf>, %858, %cst_268 [1] : vector<3x3xf32> to vector<3xf32>
    %860 = vector.shape_cast %859 : vector<3xf32> to vector<3x1xf32>
    %861 = vector.broadcast %860 : vector<3x1xf32> to vector<3x3xf32>
    %862 = arith.subf %858, %861 : vector<3x3xf32>
    %863 = math.exp %862 : vector<3x3xf32>
    %864 = arith.mulf %863, %5 : vector<3x3xf32>
    %cst_269 = arith.constant dense<0.000000e+00> : vector<3xf32>
    %865 = vector.multi_reduction <add>, %864, %cst_269 [1] : vector<3x3xf32> to vector<3xf32>
    %866 = vector.shape_cast %865 : vector<3xf32> to vector<3x1xf32>
    %cst_270 = arith.constant 9.99999971E-10 : f32
    %867 = vector.broadcast %cst_270 : f32 to vector<3x1xf32>
    %868 = arith.maximumf %866, %867 : vector<3x1xf32>
    %869 = tpu.reciprocal %868 {approx = true} : vector<3x1xf32> -> vector<3x1xf32>
    %870 = vector.broadcast %869 : vector<3x1xf32> to vector<3x3xf32>
    %871 = arith.mulf %864, %870 : vector<3x3xf32>
    %872 = vector.extract_strided_slice %816 {offsets = [0, 8], sizes = [3, 8], strides = [1, 1]} : vector<3x32xf32> to vector<3x8xf32>
    %cst_271 = arith.constant dense<0.000000e+00> : vector<3x8xf32>
    %873 = tpu.matmul %871, %872, %cst_271 {dimension_numbers = #tpu.dot_dimension_numbers<[1], [0], [0], [1], [0, 0, 1, 1], [], []>} : vector<3x3xf32>, vector<3x8xf32>, vector<3x8xf32> -> vector<3x8xf32>
    %874 = vector.extract_strided_slice %823 {offsets = [0, 2], sizes = [3, 1], strides = [1, 1]} : vector<3x4xf32> to vector<3x1xf32>
    %875 = vector.extract_strided_slice %818 {offsets = [2, 0], sizes = [1, 3], strides = [1, 1]} : vector<4x3xf32> to vector<1x3xf32>
    %876 = vector.broadcast %874 : vector<3x1xf32> to vector<3x3xf32>
    %877 = vector.broadcast %875 : vector<1x3xf32> to vector<3x3xf32>
    %878 = arith.addf %876, %877 : vector<3x3xf32>
    %cst_272 = arith.constant 0.000000e+00 : f32
    %879 = vector.broadcast %cst_272 : f32 to vector<3x3xf32>
    %880 = arith.cmpf ogt, %878, %879 : vector<3x3xf32>
    %cst_273 = arith.constant 2.000000e-01 : f32
    %881 = vector.broadcast %cst_273 : f32 to vector<3x3xf32>
    %882 = arith.mulf %881, %878 : vector<3x3xf32>
    %883 = arith.select %880, %878, %882 : vector<3x3xi1>, vector<3x3xf32>
    %cst_274 = arith.constant dense<0xFF800000> : vector<3xf32>
    %884 = vector.multi_reduction <maximumf>, %883, %cst_274 [1] : vector<3x3xf32> to vector<3xf32>
    %885 = vector.shape_cast %884 : vector<3xf32> to vector<3x1xf32>
    %886 = vector.broadcast %885 : vector<3x1xf32> to vector<3x3xf32>
    %887 = arith.subf %883, %886 : vector<3x3xf32>
    %888 = math.exp %887 : vector<3x3xf32>
    %889 = arith.mulf %888, %5 : vector<3x3xf32>
    %cst_275 = arith.constant dense<0.000000e+00> : vector<3xf32>
    %890 = vector.multi_reduction <add>, %889, %cst_275 [1] : vector<3x3xf32> to vector<3xf32>
    %891 = vector.shape_cast %890 : vector<3xf32> to vector<3x1xf32>
    %cst_276 = arith.constant 9.99999971E-10 : f32
    %892 = vector.broadcast %cst_276 : f32 to vector<3x1xf32>
    %893 = arith.maximumf %891, %892 : vector<3x1xf32>
    %894 = tpu.reciprocal %893 {approx = true} : vector<3x1xf32> -> vector<3x1xf32>
    %895 = vector.broadcast %894 : vector<3x1xf32> to vector<3x3xf32>
    %896 = arith.mulf %889, %895 : vector<3x3xf32>
    %897 = vector.extract_strided_slice %816 {offsets = [0, 16], sizes = [3, 8], strides = [1, 1]} : vector<3x32xf32> to vector<3x8xf32>
    %cst_277 = arith.constant dense<0.000000e+00> : vector<3x8xf32>
    %898 = tpu.matmul %896, %897, %cst_277 {dimension_numbers = #tpu.dot_dimension_numbers<[1], [0], [0], [1], [0, 0, 1, 1], [], []>} : vector<3x3xf32>, vector<3x8xf32>, vector<3x8xf32> -> vector<3x8xf32>
    %899 = vector.extract_strided_slice %823 {offsets = [0, 3], sizes = [3, 1], strides = [1, 1]} : vector<3x4xf32> to vector<3x1xf32>
    %900 = vector.extract_strided_slice %818 {offsets = [3, 0], sizes = [1, 3], strides = [1, 1]} : vector<4x3xf32> to vector<1x3xf32>
    %901 = vector.broadcast %899 : vector<3x1xf32> to vector<3x3xf32>
    %902 = vector.broadcast %900 : vector<1x3xf32> to vector<3x3xf32>
    %903 = arith.addf %901, %902 : vector<3x3xf32>
    %cst_278 = arith.constant 0.000000e+00 : f32
    %904 = vector.broadcast %cst_278 : f32 to vector<3x3xf32>
    %905 = arith.cmpf ogt, %903, %904 : vector<3x3xf32>
    %cst_279 = arith.constant 2.000000e-01 : f32
    %906 = vector.broadcast %cst_279 : f32 to vector<3x3xf32>
    %907 = arith.mulf %906, %903 : vector<3x3xf32>
    %908 = arith.select %905, %903, %907 : vector<3x3xi1>, vector<3x3xf32>
    %cst_280 = arith.constant dense<0xFF800000> : vector<3xf32>
    %909 = vector.multi_reduction <maximumf>, %908, %cst_280 [1] : vector<3x3xf32> to vector<3xf32>
    %910 = vector.shape_cast %909 : vector<3xf32> to vector<3x1xf32>
    %911 = vector.broadcast %910 : vector<3x1xf32> to vector<3x3xf32>
    %912 = arith.subf %908, %911 : vector<3x3xf32>
    %913 = math.exp %912 : vector<3x3xf32>
    %914 = arith.mulf %913, %5 : vector<3x3xf32>
    %cst_281 = arith.constant dense<0.000000e+00> : vector<3xf32>
    %915 = vector.multi_reduction <add>, %914, %cst_281 [1] : vector<3x3xf32> to vector<3xf32>
    %916 = vector.shape_cast %915 : vector<3xf32> to vector<3x1xf32>
    %cst_282 = arith.constant 9.99999971E-10 : f32
    %917 = vector.broadcast %cst_282 : f32 to vector<3x1xf32>
    %918 = arith.maximumf %916, %917 : vector<3x1xf32>
    %919 = tpu.reciprocal %918 {approx = true} : vector<3x1xf32> -> vector<3x1xf32>
    %920 = vector.broadcast %919 : vector<3x1xf32> to vector<3x3xf32>
    %921 = arith.mulf %914, %920 : vector<3x3xf32>
    %922 = vector.extract_strided_slice %816 {offsets = [0, 24], sizes = [3, 8], strides = [1, 1]} : vector<3x32xf32> to vector<3x8xf32>
    %cst_283 = arith.constant dense<0.000000e+00> : vector<3x8xf32>
    %923 = tpu.matmul %921, %922, %cst_283 {dimension_numbers = #tpu.dot_dimension_numbers<[1], [0], [0], [1], [0, 0, 1, 1], [], []>} : vector<3x3xf32>, vector<3x8xf32>, vector<3x8xf32> -> vector<3x8xf32>
    %924 = tpu.concatenate %848, %873, %898, %923 in 1 : vector<3x8xf32>, vector<3x8xf32>, vector<3x8xf32>, vector<3x8xf32> -> vector<3x32xf32>
    %925 = arith.addf %695, %924 : vector<3x32xf32>
    %cst_284 = arith.constant 0.000000e+00 : f32
    %926 = vector.broadcast %cst_284 : f32 to vector<6x32xf32>
    %927 = arith.maximumf %810, %926 : vector<6x32xf32>
    %cst_285 = arith.constant 0.000000e+00 : f32
    %928 = vector.broadcast %cst_285 : f32 to vector<3x32xf32>
    %929 = arith.maximumf %925, %928 : vector<3x32xf32>
    %c0_286 = arith.constant 0 : index
    %c0_287 = arith.constant 0 : index
    %930 = vector.load %arg38[%c0_286, %c0_287] : memref<32x36xf32, #tpu.memory_space<vmem>>, vector<32x36xf32>
    %cst_288 = arith.constant dense<0.000000e+00> : vector<6x36xf32>
    %931 = tpu.matmul %927, %930, %cst_288 {dimension_numbers = #tpu.dot_dimension_numbers<[1], [0], [0], [1], [0, 0, 1, 1], [], []>} : vector<6x32xf32>, vector<32x36xf32>, vector<6x36xf32> -> vector<6x36xf32>
    %c0_289 = arith.constant 0 : index
    %c0_290 = arith.constant 0 : index
    %932 = vector.load %arg39[%c0_289, %c0_290] : memref<1x36xf32, #tpu.memory_space<vmem>>, vector<1x36xf32>
    %933 = vector.broadcast %932 : vector<1x36xf32> to vector<6x36xf32>
    %934 = arith.addf %931, %933 : vector<6x36xf32>
    %935 = vector.extract_strided_slice %934 {offsets = [0, 0], sizes = [6, 32], strides = [1, 1]} : vector<6x36xf32> to vector<6x32xf32>
    %936 = vector.extract_strided_slice %934 {offsets = [0, 32], sizes = [6, 4], strides = [1, 1]} : vector<6x36xf32> to vector<6x4xf32>
    %937 = tpu.transpose %936, [1, 0] : vector<6x4xf32> -> vector<4x6xf32>
    %c0_291 = arith.constant 0 : index
    %c0_292 = arith.constant 0 : index
    %938 = vector.load %arg40[%c0_291, %c0_292] : memref<32x4xf32, #tpu.memory_space<vmem>>, vector<32x4xf32>
    %cst_293 = arith.constant dense<0.000000e+00> : vector<6x4xf32>
    %939 = tpu.matmul %927, %938, %cst_293 {dimension_numbers = #tpu.dot_dimension_numbers<[1], [0], [0], [1], [0, 0, 1, 1], [], []>} : vector<6x32xf32>, vector<32x4xf32>, vector<6x4xf32> -> vector<6x4xf32>
    %c0_294 = arith.constant 0 : index
    %c0_295 = arith.constant 0 : index
    %940 = vector.load %arg41[%c0_294, %c0_295] : memref<1x4xf32, #tpu.memory_space<vmem>>, vector<1x4xf32>
    %941 = vector.broadcast %940 : vector<1x4xf32> to vector<6x4xf32>
    %942 = arith.addf %939, %941 : vector<6x4xf32>
    %943 = vector.extract_strided_slice %942 {offsets = [0, 0], sizes = [6, 1], strides = [1, 1]} : vector<6x4xf32> to vector<6x1xf32>
    %944 = vector.extract_strided_slice %937 {offsets = [0, 0], sizes = [1, 6], strides = [1, 1]} : vector<4x6xf32> to vector<1x6xf32>
    %945 = vector.broadcast %943 : vector<6x1xf32> to vector<6x6xf32>
    %946 = vector.broadcast %944 : vector<1x6xf32> to vector<6x6xf32>
    %947 = arith.addf %945, %946 : vector<6x6xf32>
    %cst_296 = arith.constant 0.000000e+00 : f32
    %948 = vector.broadcast %cst_296 : f32 to vector<6x6xf32>
    %949 = arith.cmpf ogt, %947, %948 : vector<6x6xf32>
    %cst_297 = arith.constant 2.000000e-01 : f32
    %950 = vector.broadcast %cst_297 : f32 to vector<6x6xf32>
    %951 = arith.mulf %950, %947 : vector<6x6xf32>
    %952 = arith.select %949, %947, %951 : vector<6x6xi1>, vector<6x6xf32>
    %cst_298 = arith.constant dense<0xFF800000> : vector<6xf32>
    %953 = vector.multi_reduction <maximumf>, %952, %cst_298 [1] : vector<6x6xf32> to vector<6xf32>
    %954 = vector.shape_cast %953 : vector<6xf32> to vector<6x1xf32>
    %955 = vector.broadcast %954 : vector<6x1xf32> to vector<6x6xf32>
    %956 = arith.subf %952, %955 : vector<6x6xf32>
    %957 = math.exp %956 : vector<6x6xf32>
    %958 = arith.mulf %957, %2 : vector<6x6xf32>
    %cst_299 = arith.constant dense<0.000000e+00> : vector<6xf32>
    %959 = vector.multi_reduction <add>, %958, %cst_299 [1] : vector<6x6xf32> to vector<6xf32>
    %960 = vector.shape_cast %959 : vector<6xf32> to vector<6x1xf32>
    %cst_300 = arith.constant 9.99999971E-10 : f32
    %961 = vector.broadcast %cst_300 : f32 to vector<6x1xf32>
    %962 = arith.maximumf %960, %961 : vector<6x1xf32>
    %963 = tpu.reciprocal %962 {approx = true} : vector<6x1xf32> -> vector<6x1xf32>
    %964 = vector.broadcast %963 : vector<6x1xf32> to vector<6x6xf32>
    %965 = arith.mulf %958, %964 : vector<6x6xf32>
    %966 = vector.extract_strided_slice %935 {offsets = [0, 0], sizes = [6, 8], strides = [1, 1]} : vector<6x32xf32> to vector<6x8xf32>
    %cst_301 = arith.constant dense<0.000000e+00> : vector<6x8xf32>
    %967 = tpu.matmul %965, %966, %cst_301 {dimension_numbers = #tpu.dot_dimension_numbers<[1], [0], [0], [1], [0, 0, 1, 1], [], []>} : vector<6x6xf32>, vector<6x8xf32>, vector<6x8xf32> -> vector<6x8xf32>
    %968 = vector.extract_strided_slice %942 {offsets = [0, 1], sizes = [6, 1], strides = [1, 1]} : vector<6x4xf32> to vector<6x1xf32>
    %969 = vector.extract_strided_slice %937 {offsets = [1, 0], sizes = [1, 6], strides = [1, 1]} : vector<4x6xf32> to vector<1x6xf32>
    %970 = vector.broadcast %968 : vector<6x1xf32> to vector<6x6xf32>
    %971 = vector.broadcast %969 : vector<1x6xf32> to vector<6x6xf32>
    %972 = arith.addf %970, %971 : vector<6x6xf32>
    %cst_302 = arith.constant 0.000000e+00 : f32
    %973 = vector.broadcast %cst_302 : f32 to vector<6x6xf32>
    %974 = arith.cmpf ogt, %972, %973 : vector<6x6xf32>
    %cst_303 = arith.constant 2.000000e-01 : f32
    %975 = vector.broadcast %cst_303 : f32 to vector<6x6xf32>
    %976 = arith.mulf %975, %972 : vector<6x6xf32>
    %977 = arith.select %974, %972, %976 : vector<6x6xi1>, vector<6x6xf32>
    %cst_304 = arith.constant dense<0xFF800000> : vector<6xf32>
    %978 = vector.multi_reduction <maximumf>, %977, %cst_304 [1] : vector<6x6xf32> to vector<6xf32>
    %979 = vector.shape_cast %978 : vector<6xf32> to vector<6x1xf32>
    %980 = vector.broadcast %979 : vector<6x1xf32> to vector<6x6xf32>
    %981 = arith.subf %977, %980 : vector<6x6xf32>
    %982 = math.exp %981 : vector<6x6xf32>
    %983 = arith.mulf %982, %2 : vector<6x6xf32>
    %cst_305 = arith.constant dense<0.000000e+00> : vector<6xf32>
    %984 = vector.multi_reduction <add>, %983, %cst_305 [1] : vector<6x6xf32> to vector<6xf32>
    %985 = vector.shape_cast %984 : vector<6xf32> to vector<6x1xf32>
    %cst_306 = arith.constant 9.99999971E-10 : f32
    %986 = vector.broadcast %cst_306 : f32 to vector<6x1xf32>
    %987 = arith.maximumf %985, %986 : vector<6x1xf32>
    %988 = tpu.reciprocal %987 {approx = true} : vector<6x1xf32> -> vector<6x1xf32>
    %989 = vector.broadcast %988 : vector<6x1xf32> to vector<6x6xf32>
    %990 = arith.mulf %983, %989 : vector<6x6xf32>
    %991 = vector.extract_strided_slice %935 {offsets = [0, 8], sizes = [6, 8], strides = [1, 1]} : vector<6x32xf32> to vector<6x8xf32>
    %cst_307 = arith.constant dense<0.000000e+00> : vector<6x8xf32>
    %992 = tpu.matmul %990, %991, %cst_307 {dimension_numbers = #tpu.dot_dimension_numbers<[1], [0], [0], [1], [0, 0, 1, 1], [], []>} : vector<6x6xf32>, vector<6x8xf32>, vector<6x8xf32> -> vector<6x8xf32>
    %993 = vector.extract_strided_slice %942 {offsets = [0, 2], sizes = [6, 1], strides = [1, 1]} : vector<6x4xf32> to vector<6x1xf32>
    %994 = vector.extract_strided_slice %937 {offsets = [2, 0], sizes = [1, 6], strides = [1, 1]} : vector<4x6xf32> to vector<1x6xf32>
    %995 = vector.broadcast %993 : vector<6x1xf32> to vector<6x6xf32>
    %996 = vector.broadcast %994 : vector<1x6xf32> to vector<6x6xf32>
    %997 = arith.addf %995, %996 : vector<6x6xf32>
    %cst_308 = arith.constant 0.000000e+00 : f32
    %998 = vector.broadcast %cst_308 : f32 to vector<6x6xf32>
    %999 = arith.cmpf ogt, %997, %998 : vector<6x6xf32>
    %cst_309 = arith.constant 2.000000e-01 : f32
    %1000 = vector.broadcast %cst_309 : f32 to vector<6x6xf32>
    %1001 = arith.mulf %1000, %997 : vector<6x6xf32>
    %1002 = arith.select %999, %997, %1001 : vector<6x6xi1>, vector<6x6xf32>
    %cst_310 = arith.constant dense<0xFF800000> : vector<6xf32>
    %1003 = vector.multi_reduction <maximumf>, %1002, %cst_310 [1] : vector<6x6xf32> to vector<6xf32>
    %1004 = vector.shape_cast %1003 : vector<6xf32> to vector<6x1xf32>
    %1005 = vector.broadcast %1004 : vector<6x1xf32> to vector<6x6xf32>
    %1006 = arith.subf %1002, %1005 : vector<6x6xf32>
    %1007 = math.exp %1006 : vector<6x6xf32>
    %1008 = arith.mulf %1007, %2 : vector<6x6xf32>
    %cst_311 = arith.constant dense<0.000000e+00> : vector<6xf32>
    %1009 = vector.multi_reduction <add>, %1008, %cst_311 [1] : vector<6x6xf32> to vector<6xf32>
    %1010 = vector.shape_cast %1009 : vector<6xf32> to vector<6x1xf32>
    %cst_312 = arith.constant 9.99999971E-10 : f32
    %1011 = vector.broadcast %cst_312 : f32 to vector<6x1xf32>
    %1012 = arith.maximumf %1010, %1011 : vector<6x1xf32>
    %1013 = tpu.reciprocal %1012 {approx = true} : vector<6x1xf32> -> vector<6x1xf32>
    %1014 = vector.broadcast %1013 : vector<6x1xf32> to vector<6x6xf32>
    %1015 = arith.mulf %1008, %1014 : vector<6x6xf32>
    %1016 = vector.extract_strided_slice %935 {offsets = [0, 16], sizes = [6, 8], strides = [1, 1]} : vector<6x32xf32> to vector<6x8xf32>
    %cst_313 = arith.constant dense<0.000000e+00> : vector<6x8xf32>
    %1017 = tpu.matmul %1015, %1016, %cst_313 {dimension_numbers = #tpu.dot_dimension_numbers<[1], [0], [0], [1], [0, 0, 1, 1], [], []>} : vector<6x6xf32>, vector<6x8xf32>, vector<6x8xf32> -> vector<6x8xf32>
    %1018 = vector.extract_strided_slice %942 {offsets = [0, 3], sizes = [6, 1], strides = [1, 1]} : vector<6x4xf32> to vector<6x1xf32>
    %1019 = vector.extract_strided_slice %937 {offsets = [3, 0], sizes = [1, 6], strides = [1, 1]} : vector<4x6xf32> to vector<1x6xf32>
    %1020 = vector.broadcast %1018 : vector<6x1xf32> to vector<6x6xf32>
    %1021 = vector.broadcast %1019 : vector<1x6xf32> to vector<6x6xf32>
    %1022 = arith.addf %1020, %1021 : vector<6x6xf32>
    %cst_314 = arith.constant 0.000000e+00 : f32
    %1023 = vector.broadcast %cst_314 : f32 to vector<6x6xf32>
    %1024 = arith.cmpf ogt, %1022, %1023 : vector<6x6xf32>
    %cst_315 = arith.constant 2.000000e-01 : f32
    %1025 = vector.broadcast %cst_315 : f32 to vector<6x6xf32>
    %1026 = arith.mulf %1025, %1022 : vector<6x6xf32>
    %1027 = arith.select %1024, %1022, %1026 : vector<6x6xi1>, vector<6x6xf32>
    %cst_316 = arith.constant dense<0xFF800000> : vector<6xf32>
    %1028 = vector.multi_reduction <maximumf>, %1027, %cst_316 [1] : vector<6x6xf32> to vector<6xf32>
    %1029 = vector.shape_cast %1028 : vector<6xf32> to vector<6x1xf32>
    %1030 = vector.broadcast %1029 : vector<6x1xf32> to vector<6x6xf32>
    %1031 = arith.subf %1027, %1030 : vector<6x6xf32>
    %1032 = math.exp %1031 : vector<6x6xf32>
    %1033 = arith.mulf %1032, %2 : vector<6x6xf32>
    %cst_317 = arith.constant dense<0.000000e+00> : vector<6xf32>
    %1034 = vector.multi_reduction <add>, %1033, %cst_317 [1] : vector<6x6xf32> to vector<6xf32>
    %1035 = vector.shape_cast %1034 : vector<6xf32> to vector<6x1xf32>
    %cst_318 = arith.constant 9.99999971E-10 : f32
    %1036 = vector.broadcast %cst_318 : f32 to vector<6x1xf32>
    %1037 = arith.maximumf %1035, %1036 : vector<6x1xf32>
    %1038 = tpu.reciprocal %1037 {approx = true} : vector<6x1xf32> -> vector<6x1xf32>
    %1039 = vector.broadcast %1038 : vector<6x1xf32> to vector<6x6xf32>
    %1040 = arith.mulf %1033, %1039 : vector<6x6xf32>
    %1041 = vector.extract_strided_slice %935 {offsets = [0, 24], sizes = [6, 8], strides = [1, 1]} : vector<6x32xf32> to vector<6x8xf32>
    %cst_319 = arith.constant dense<0.000000e+00> : vector<6x8xf32>
    %1042 = tpu.matmul %1040, %1041, %cst_319 {dimension_numbers = #tpu.dot_dimension_numbers<[1], [0], [0], [1], [0, 0, 1, 1], [], []>} : vector<6x6xf32>, vector<6x8xf32>, vector<6x8xf32> -> vector<6x8xf32>
    %1043 = tpu.concatenate %967, %992, %1017, %1042 in 1 : vector<6x8xf32>, vector<6x8xf32>, vector<6x8xf32>, vector<6x8xf32> -> vector<6x32xf32>
    %c0_320 = arith.constant 0 : index
    %c0_321 = arith.constant 0 : index
    %1044 = vector.load %arg42[%c0_320, %c0_321] : memref<32x20xf32, #tpu.memory_space<vmem>>, vector<32x20xf32>
    %cst_322 = arith.constant dense<0.000000e+00> : vector<6x20xf32>
    %1045 = tpu.matmul %927, %1044, %cst_322 {dimension_numbers = #tpu.dot_dimension_numbers<[1], [0], [0], [1], [0, 0, 1, 1], [], []>} : vector<6x32xf32>, vector<32x20xf32>, vector<6x20xf32> -> vector<6x20xf32>
    %c0_323 = arith.constant 0 : index
    %c0_324 = arith.constant 0 : index
    %1046 = vector.load %arg43[%c0_323, %c0_324] : memref<1x20xf32, #tpu.memory_space<vmem>>, vector<1x20xf32>
    %1047 = vector.broadcast %1046 : vector<1x20xf32> to vector<6x20xf32>
    %1048 = arith.addf %1045, %1047 : vector<6x20xf32>
    %1049 = vector.extract_strided_slice %1048 {offsets = [0, 0], sizes = [6, 16], strides = [1, 1]} : vector<6x20xf32> to vector<6x16xf32>
    %1050 = vector.extract_strided_slice %1048 {offsets = [0, 16], sizes = [6, 4], strides = [1, 1]} : vector<6x20xf32> to vector<6x4xf32>
    %1051 = tpu.transpose %1050, [1, 0] : vector<6x4xf32> -> vector<4x6xf32>
    %c0_325 = arith.constant 0 : index
    %c0_326 = arith.constant 0 : index
    %1052 = vector.load %arg44[%c0_325, %c0_326] : memref<32x4xf32, #tpu.memory_space<vmem>>, vector<32x4xf32>
    %cst_327 = arith.constant dense<0.000000e+00> : vector<3x4xf32>
    %1053 = tpu.matmul %929, %1052, %cst_327 {dimension_numbers = #tpu.dot_dimension_numbers<[1], [0], [0], [1], [0, 0, 1, 1], [], []>} : vector<3x32xf32>, vector<32x4xf32>, vector<3x4xf32> -> vector<3x4xf32>
    %c0_328 = arith.constant 0 : index
    %c0_329 = arith.constant 0 : index
    %1054 = vector.load %arg45[%c0_328, %c0_329] : memref<1x4xf32, #tpu.memory_space<vmem>>, vector<1x4xf32>
    %1055 = vector.broadcast %1054 : vector<1x4xf32> to vector<3x4xf32>
    %1056 = arith.addf %1053, %1055 : vector<3x4xf32>
    %1057 = vector.extract_strided_slice %1056 {offsets = [0, 0], sizes = [3, 1], strides = [1, 1]} : vector<3x4xf32> to vector<3x1xf32>
    %1058 = vector.extract_strided_slice %1051 {offsets = [0, 0], sizes = [1, 6], strides = [1, 1]} : vector<4x6xf32> to vector<1x6xf32>
    %1059 = vector.broadcast %1057 : vector<3x1xf32> to vector<3x6xf32>
    %1060 = vector.broadcast %1058 : vector<1x6xf32> to vector<3x6xf32>
    %1061 = arith.addf %1059, %1060 : vector<3x6xf32>
    %cst_330 = arith.constant 0.000000e+00 : f32
    %1062 = vector.broadcast %cst_330 : f32 to vector<3x6xf32>
    %1063 = arith.cmpf ogt, %1061, %1062 : vector<3x6xf32>
    %cst_331 = arith.constant 2.000000e-01 : f32
    %1064 = vector.broadcast %cst_331 : f32 to vector<3x6xf32>
    %1065 = arith.mulf %1064, %1061 : vector<3x6xf32>
    %1066 = arith.select %1063, %1061, %1065 : vector<3x6xi1>, vector<3x6xf32>
    %cst_332 = arith.constant dense<0xFF800000> : vector<3xf32>
    %1067 = vector.multi_reduction <maximumf>, %1066, %cst_332 [1] : vector<3x6xf32> to vector<3xf32>
    %1068 = vector.shape_cast %1067 : vector<3xf32> to vector<3x1xf32>
    %1069 = vector.broadcast %1068 : vector<3x1xf32> to vector<3x6xf32>
    %1070 = arith.subf %1066, %1069 : vector<3x6xf32>
    %1071 = math.exp %1070 : vector<3x6xf32>
    %1072 = arith.mulf %1071, %3 : vector<3x6xf32>
    %cst_333 = arith.constant dense<0.000000e+00> : vector<3xf32>
    %1073 = vector.multi_reduction <add>, %1072, %cst_333 [1] : vector<3x6xf32> to vector<3xf32>
    %1074 = vector.shape_cast %1073 : vector<3xf32> to vector<3x1xf32>
    %cst_334 = arith.constant 9.99999971E-10 : f32
    %1075 = vector.broadcast %cst_334 : f32 to vector<3x1xf32>
    %1076 = arith.maximumf %1074, %1075 : vector<3x1xf32>
    %1077 = tpu.reciprocal %1076 {approx = true} : vector<3x1xf32> -> vector<3x1xf32>
    %1078 = vector.broadcast %1077 : vector<3x1xf32> to vector<3x6xf32>
    %1079 = arith.mulf %1072, %1078 : vector<3x6xf32>
    %1080 = vector.extract_strided_slice %1049 {offsets = [0, 0], sizes = [6, 4], strides = [1, 1]} : vector<6x16xf32> to vector<6x4xf32>
    %cst_335 = arith.constant dense<0.000000e+00> : vector<3x4xf32>
    %1081 = tpu.matmul %1079, %1080, %cst_335 {dimension_numbers = #tpu.dot_dimension_numbers<[1], [0], [0], [1], [0, 0, 1, 1], [], []>} : vector<3x6xf32>, vector<6x4xf32>, vector<3x4xf32> -> vector<3x4xf32>
    %1082 = vector.extract_strided_slice %1056 {offsets = [0, 1], sizes = [3, 1], strides = [1, 1]} : vector<3x4xf32> to vector<3x1xf32>
    %1083 = vector.extract_strided_slice %1051 {offsets = [1, 0], sizes = [1, 6], strides = [1, 1]} : vector<4x6xf32> to vector<1x6xf32>
    %1084 = vector.broadcast %1082 : vector<3x1xf32> to vector<3x6xf32>
    %1085 = vector.broadcast %1083 : vector<1x6xf32> to vector<3x6xf32>
    %1086 = arith.addf %1084, %1085 : vector<3x6xf32>
    %cst_336 = arith.constant 0.000000e+00 : f32
    %1087 = vector.broadcast %cst_336 : f32 to vector<3x6xf32>
    %1088 = arith.cmpf ogt, %1086, %1087 : vector<3x6xf32>
    %cst_337 = arith.constant 2.000000e-01 : f32
    %1089 = vector.broadcast %cst_337 : f32 to vector<3x6xf32>
    %1090 = arith.mulf %1089, %1086 : vector<3x6xf32>
    %1091 = arith.select %1088, %1086, %1090 : vector<3x6xi1>, vector<3x6xf32>
    %cst_338 = arith.constant dense<0xFF800000> : vector<3xf32>
    %1092 = vector.multi_reduction <maximumf>, %1091, %cst_338 [1] : vector<3x6xf32> to vector<3xf32>
    %1093 = vector.shape_cast %1092 : vector<3xf32> to vector<3x1xf32>
    %1094 = vector.broadcast %1093 : vector<3x1xf32> to vector<3x6xf32>
    %1095 = arith.subf %1091, %1094 : vector<3x6xf32>
    %1096 = math.exp %1095 : vector<3x6xf32>
    %1097 = arith.mulf %1096, %3 : vector<3x6xf32>
    %cst_339 = arith.constant dense<0.000000e+00> : vector<3xf32>
    %1098 = vector.multi_reduction <add>, %1097, %cst_339 [1] : vector<3x6xf32> to vector<3xf32>
    %1099 = vector.shape_cast %1098 : vector<3xf32> to vector<3x1xf32>
    %cst_340 = arith.constant 9.99999971E-10 : f32
    %1100 = vector.broadcast %cst_340 : f32 to vector<3x1xf32>
    %1101 = arith.maximumf %1099, %1100 : vector<3x1xf32>
    %1102 = tpu.reciprocal %1101 {approx = true} : vector<3x1xf32> -> vector<3x1xf32>
    %1103 = vector.broadcast %1102 : vector<3x1xf32> to vector<3x6xf32>
    %1104 = arith.mulf %1097, %1103 : vector<3x6xf32>
    %1105 = vector.extract_strided_slice %1049 {offsets = [0, 4], sizes = [6, 4], strides = [1, 1]} : vector<6x16xf32> to vector<6x4xf32>
    %cst_341 = arith.constant dense<0.000000e+00> : vector<3x4xf32>
    %1106 = tpu.matmul %1104, %1105, %cst_341 {dimension_numbers = #tpu.dot_dimension_numbers<[1], [0], [0], [1], [0, 0, 1, 1], [], []>} : vector<3x6xf32>, vector<6x4xf32>, vector<3x4xf32> -> vector<3x4xf32>
    %1107 = vector.extract_strided_slice %1056 {offsets = [0, 2], sizes = [3, 1], strides = [1, 1]} : vector<3x4xf32> to vector<3x1xf32>
    %1108 = vector.extract_strided_slice %1051 {offsets = [2, 0], sizes = [1, 6], strides = [1, 1]} : vector<4x6xf32> to vector<1x6xf32>
    %1109 = vector.broadcast %1107 : vector<3x1xf32> to vector<3x6xf32>
    %1110 = vector.broadcast %1108 : vector<1x6xf32> to vector<3x6xf32>
    %1111 = arith.addf %1109, %1110 : vector<3x6xf32>
    %cst_342 = arith.constant 0.000000e+00 : f32
    %1112 = vector.broadcast %cst_342 : f32 to vector<3x6xf32>
    %1113 = arith.cmpf ogt, %1111, %1112 : vector<3x6xf32>
    %cst_343 = arith.constant 2.000000e-01 : f32
    %1114 = vector.broadcast %cst_343 : f32 to vector<3x6xf32>
    %1115 = arith.mulf %1114, %1111 : vector<3x6xf32>
    %1116 = arith.select %1113, %1111, %1115 : vector<3x6xi1>, vector<3x6xf32>
    %cst_344 = arith.constant dense<0xFF800000> : vector<3xf32>
    %1117 = vector.multi_reduction <maximumf>, %1116, %cst_344 [1] : vector<3x6xf32> to vector<3xf32>
    %1118 = vector.shape_cast %1117 : vector<3xf32> to vector<3x1xf32>
    %1119 = vector.broadcast %1118 : vector<3x1xf32> to vector<3x6xf32>
    %1120 = arith.subf %1116, %1119 : vector<3x6xf32>
    %1121 = math.exp %1120 : vector<3x6xf32>
    %1122 = arith.mulf %1121, %3 : vector<3x6xf32>
    %cst_345 = arith.constant dense<0.000000e+00> : vector<3xf32>
    %1123 = vector.multi_reduction <add>, %1122, %cst_345 [1] : vector<3x6xf32> to vector<3xf32>
    %1124 = vector.shape_cast %1123 : vector<3xf32> to vector<3x1xf32>
    %cst_346 = arith.constant 9.99999971E-10 : f32
    %1125 = vector.broadcast %cst_346 : f32 to vector<3x1xf32>
    %1126 = arith.maximumf %1124, %1125 : vector<3x1xf32>
    %1127 = tpu.reciprocal %1126 {approx = true} : vector<3x1xf32> -> vector<3x1xf32>
    %1128 = vector.broadcast %1127 : vector<3x1xf32> to vector<3x6xf32>
    %1129 = arith.mulf %1122, %1128 : vector<3x6xf32>
    %1130 = vector.extract_strided_slice %1049 {offsets = [0, 8], sizes = [6, 4], strides = [1, 1]} : vector<6x16xf32> to vector<6x4xf32>
    %cst_347 = arith.constant dense<0.000000e+00> : vector<3x4xf32>
    %1131 = tpu.matmul %1129, %1130, %cst_347 {dimension_numbers = #tpu.dot_dimension_numbers<[1], [0], [0], [1], [0, 0, 1, 1], [], []>} : vector<3x6xf32>, vector<6x4xf32>, vector<3x4xf32> -> vector<3x4xf32>
    %1132 = vector.extract_strided_slice %1056 {offsets = [0, 3], sizes = [3, 1], strides = [1, 1]} : vector<3x4xf32> to vector<3x1xf32>
    %1133 = vector.extract_strided_slice %1051 {offsets = [3, 0], sizes = [1, 6], strides = [1, 1]} : vector<4x6xf32> to vector<1x6xf32>
    %1134 = vector.broadcast %1132 : vector<3x1xf32> to vector<3x6xf32>
    %1135 = vector.broadcast %1133 : vector<1x6xf32> to vector<3x6xf32>
    %1136 = arith.addf %1134, %1135 : vector<3x6xf32>
    %cst_348 = arith.constant 0.000000e+00 : f32
    %1137 = vector.broadcast %cst_348 : f32 to vector<3x6xf32>
    %1138 = arith.cmpf ogt, %1136, %1137 : vector<3x6xf32>
    %cst_349 = arith.constant 2.000000e-01 : f32
    %1139 = vector.broadcast %cst_349 : f32 to vector<3x6xf32>
    %1140 = arith.mulf %1139, %1136 : vector<3x6xf32>
    %1141 = arith.select %1138, %1136, %1140 : vector<3x6xi1>, vector<3x6xf32>
    %cst_350 = arith.constant dense<0xFF800000> : vector<3xf32>
    %1142 = vector.multi_reduction <maximumf>, %1141, %cst_350 [1] : vector<3x6xf32> to vector<3xf32>
    %1143 = vector.shape_cast %1142 : vector<3xf32> to vector<3x1xf32>
    %1144 = vector.broadcast %1143 : vector<3x1xf32> to vector<3x6xf32>
    %1145 = arith.subf %1141, %1144 : vector<3x6xf32>
    %1146 = math.exp %1145 : vector<3x6xf32>
    %1147 = arith.mulf %1146, %3 : vector<3x6xf32>
    %cst_351 = arith.constant dense<0.000000e+00> : vector<3xf32>
    %1148 = vector.multi_reduction <add>, %1147, %cst_351 [1] : vector<3x6xf32> to vector<3xf32>
    %1149 = vector.shape_cast %1148 : vector<3xf32> to vector<3x1xf32>
    %cst_352 = arith.constant 9.99999971E-10 : f32
    %1150 = vector.broadcast %cst_352 : f32 to vector<3x1xf32>
    %1151 = arith.maximumf %1149, %1150 : vector<3x1xf32>
    %1152 = tpu.reciprocal %1151 {approx = true} : vector<3x1xf32> -> vector<3x1xf32>
    %1153 = vector.broadcast %1152 : vector<3x1xf32> to vector<3x6xf32>
    %1154 = arith.mulf %1147, %1153 : vector<3x6xf32>
    %1155 = vector.extract_strided_slice %1049 {offsets = [0, 12], sizes = [6, 4], strides = [1, 1]} : vector<6x16xf32> to vector<6x4xf32>
    %cst_353 = arith.constant dense<0.000000e+00> : vector<3x4xf32>
    %1156 = tpu.matmul %1154, %1155, %cst_353 {dimension_numbers = #tpu.dot_dimension_numbers<[1], [0], [0], [1], [0, 0, 1, 1], [], []>} : vector<3x6xf32>, vector<6x4xf32>, vector<3x4xf32> -> vector<3x4xf32>
    %1157 = tpu.concatenate %1081, %1106, %1131, %1156 in 1 : vector<3x4xf32>, vector<3x4xf32>, vector<3x4xf32>, vector<3x4xf32> -> vector<3x16xf32>
    %c0_354 = arith.constant 0 : index
    %c0_355 = arith.constant 0 : index
    %1158 = vector.load %arg46[%c0_354, %c0_355] : memref<32x36xf32, #tpu.memory_space<vmem>>, vector<32x36xf32>
    %cst_356 = arith.constant dense<0.000000e+00> : vector<3x36xf32>
    %1159 = tpu.matmul %929, %1158, %cst_356 {dimension_numbers = #tpu.dot_dimension_numbers<[1], [0], [0], [1], [0, 0, 1, 1], [], []>} : vector<3x32xf32>, vector<32x36xf32>, vector<3x36xf32> -> vector<3x36xf32>
    %c0_357 = arith.constant 0 : index
    %c0_358 = arith.constant 0 : index
    %1160 = vector.load %arg47[%c0_357, %c0_358] : memref<1x36xf32, #tpu.memory_space<vmem>>, vector<1x36xf32>
    %1161 = vector.broadcast %1160 : vector<1x36xf32> to vector<3x36xf32>
    %1162 = arith.addf %1159, %1161 : vector<3x36xf32>
    %1163 = vector.extract_strided_slice %1162 {offsets = [0, 0], sizes = [3, 32], strides = [1, 1]} : vector<3x36xf32> to vector<3x32xf32>
    %1164 = vector.extract_strided_slice %1162 {offsets = [0, 32], sizes = [3, 4], strides = [1, 1]} : vector<3x36xf32> to vector<3x4xf32>
    %1165 = tpu.transpose %1164, [1, 0] : vector<3x4xf32> -> vector<4x3xf32>
    %c0_359 = arith.constant 0 : index
    %c0_360 = arith.constant 0 : index
    %1166 = vector.load %arg48[%c0_359, %c0_360] : memref<32x4xf32, #tpu.memory_space<vmem>>, vector<32x4xf32>
    %cst_361 = arith.constant dense<0.000000e+00> : vector<6x4xf32>
    %1167 = tpu.matmul %927, %1166, %cst_361 {dimension_numbers = #tpu.dot_dimension_numbers<[1], [0], [0], [1], [0, 0, 1, 1], [], []>} : vector<6x32xf32>, vector<32x4xf32>, vector<6x4xf32> -> vector<6x4xf32>
    %c0_362 = arith.constant 0 : index
    %c0_363 = arith.constant 0 : index
    %1168 = vector.load %arg49[%c0_362, %c0_363] : memref<1x4xf32, #tpu.memory_space<vmem>>, vector<1x4xf32>
    %1169 = vector.broadcast %1168 : vector<1x4xf32> to vector<6x4xf32>
    %1170 = arith.addf %1167, %1169 : vector<6x4xf32>
    %1171 = vector.extract_strided_slice %1170 {offsets = [0, 0], sizes = [6, 1], strides = [1, 1]} : vector<6x4xf32> to vector<6x1xf32>
    %1172 = vector.extract_strided_slice %1165 {offsets = [0, 0], sizes = [1, 3], strides = [1, 1]} : vector<4x3xf32> to vector<1x3xf32>
    %1173 = vector.broadcast %1171 : vector<6x1xf32> to vector<6x3xf32>
    %1174 = vector.broadcast %1172 : vector<1x3xf32> to vector<6x3xf32>
    %1175 = arith.addf %1173, %1174 : vector<6x3xf32>
    %cst_364 = arith.constant 0.000000e+00 : f32
    %1176 = vector.broadcast %cst_364 : f32 to vector<6x3xf32>
    %1177 = arith.cmpf ogt, %1175, %1176 : vector<6x3xf32>
    %cst_365 = arith.constant 2.000000e-01 : f32
    %1178 = vector.broadcast %cst_365 : f32 to vector<6x3xf32>
    %1179 = arith.mulf %1178, %1175 : vector<6x3xf32>
    %1180 = arith.select %1177, %1175, %1179 : vector<6x3xi1>, vector<6x3xf32>
    %cst_366 = arith.constant dense<0xFF800000> : vector<6xf32>
    %1181 = vector.multi_reduction <maximumf>, %1180, %cst_366 [1] : vector<6x3xf32> to vector<6xf32>
    %1182 = vector.shape_cast %1181 : vector<6xf32> to vector<6x1xf32>
    %1183 = vector.broadcast %1182 : vector<6x1xf32> to vector<6x3xf32>
    %1184 = arith.subf %1180, %1183 : vector<6x3xf32>
    %1185 = math.exp %1184 : vector<6x3xf32>
    %1186 = arith.mulf %1185, %4 : vector<6x3xf32>
    %cst_367 = arith.constant dense<0.000000e+00> : vector<6xf32>
    %1187 = vector.multi_reduction <add>, %1186, %cst_367 [1] : vector<6x3xf32> to vector<6xf32>
    %1188 = vector.shape_cast %1187 : vector<6xf32> to vector<6x1xf32>
    %cst_368 = arith.constant 9.99999971E-10 : f32
    %1189 = vector.broadcast %cst_368 : f32 to vector<6x1xf32>
    %1190 = arith.maximumf %1188, %1189 : vector<6x1xf32>
    %1191 = tpu.reciprocal %1190 {approx = true} : vector<6x1xf32> -> vector<6x1xf32>
    %1192 = vector.broadcast %1191 : vector<6x1xf32> to vector<6x3xf32>
    %1193 = arith.mulf %1186, %1192 : vector<6x3xf32>
    %1194 = vector.extract_strided_slice %1163 {offsets = [0, 0], sizes = [3, 8], strides = [1, 1]} : vector<3x32xf32> to vector<3x8xf32>
    %cst_369 = arith.constant dense<0.000000e+00> : vector<6x8xf32>
    %1195 = tpu.matmul %1193, %1194, %cst_369 {dimension_numbers = #tpu.dot_dimension_numbers<[1], [0], [0], [1], [0, 0, 1, 1], [], []>} : vector<6x3xf32>, vector<3x8xf32>, vector<6x8xf32> -> vector<6x8xf32>
    %1196 = vector.extract_strided_slice %1170 {offsets = [0, 1], sizes = [6, 1], strides = [1, 1]} : vector<6x4xf32> to vector<6x1xf32>
    %1197 = vector.extract_strided_slice %1165 {offsets = [1, 0], sizes = [1, 3], strides = [1, 1]} : vector<4x3xf32> to vector<1x3xf32>
    %1198 = vector.broadcast %1196 : vector<6x1xf32> to vector<6x3xf32>
    %1199 = vector.broadcast %1197 : vector<1x3xf32> to vector<6x3xf32>
    %1200 = arith.addf %1198, %1199 : vector<6x3xf32>
    %cst_370 = arith.constant 0.000000e+00 : f32
    %1201 = vector.broadcast %cst_370 : f32 to vector<6x3xf32>
    %1202 = arith.cmpf ogt, %1200, %1201 : vector<6x3xf32>
    %cst_371 = arith.constant 2.000000e-01 : f32
    %1203 = vector.broadcast %cst_371 : f32 to vector<6x3xf32>
    %1204 = arith.mulf %1203, %1200 : vector<6x3xf32>
    %1205 = arith.select %1202, %1200, %1204 : vector<6x3xi1>, vector<6x3xf32>
    %cst_372 = arith.constant dense<0xFF800000> : vector<6xf32>
    %1206 = vector.multi_reduction <maximumf>, %1205, %cst_372 [1] : vector<6x3xf32> to vector<6xf32>
    %1207 = vector.shape_cast %1206 : vector<6xf32> to vector<6x1xf32>
    %1208 = vector.broadcast %1207 : vector<6x1xf32> to vector<6x3xf32>
    %1209 = arith.subf %1205, %1208 : vector<6x3xf32>
    %1210 = math.exp %1209 : vector<6x3xf32>
    %1211 = arith.mulf %1210, %4 : vector<6x3xf32>
    %cst_373 = arith.constant dense<0.000000e+00> : vector<6xf32>
    %1212 = vector.multi_reduction <add>, %1211, %cst_373 [1] : vector<6x3xf32> to vector<6xf32>
    %1213 = vector.shape_cast %1212 : vector<6xf32> to vector<6x1xf32>
    %cst_374 = arith.constant 9.99999971E-10 : f32
    %1214 = vector.broadcast %cst_374 : f32 to vector<6x1xf32>
    %1215 = arith.maximumf %1213, %1214 : vector<6x1xf32>
    %1216 = tpu.reciprocal %1215 {approx = true} : vector<6x1xf32> -> vector<6x1xf32>
    %1217 = vector.broadcast %1216 : vector<6x1xf32> to vector<6x3xf32>
    %1218 = arith.mulf %1211, %1217 : vector<6x3xf32>
    %1219 = vector.extract_strided_slice %1163 {offsets = [0, 8], sizes = [3, 8], strides = [1, 1]} : vector<3x32xf32> to vector<3x8xf32>
    %cst_375 = arith.constant dense<0.000000e+00> : vector<6x8xf32>
    %1220 = tpu.matmul %1218, %1219, %cst_375 {dimension_numbers = #tpu.dot_dimension_numbers<[1], [0], [0], [1], [0, 0, 1, 1], [], []>} : vector<6x3xf32>, vector<3x8xf32>, vector<6x8xf32> -> vector<6x8xf32>
    %1221 = vector.extract_strided_slice %1170 {offsets = [0, 2], sizes = [6, 1], strides = [1, 1]} : vector<6x4xf32> to vector<6x1xf32>
    %1222 = vector.extract_strided_slice %1165 {offsets = [2, 0], sizes = [1, 3], strides = [1, 1]} : vector<4x3xf32> to vector<1x3xf32>
    %1223 = vector.broadcast %1221 : vector<6x1xf32> to vector<6x3xf32>
    %1224 = vector.broadcast %1222 : vector<1x3xf32> to vector<6x3xf32>
    %1225 = arith.addf %1223, %1224 : vector<6x3xf32>
    %cst_376 = arith.constant 0.000000e+00 : f32
    %1226 = vector.broadcast %cst_376 : f32 to vector<6x3xf32>
    %1227 = arith.cmpf ogt, %1225, %1226 : vector<6x3xf32>
    %cst_377 = arith.constant 2.000000e-01 : f32
    %1228 = vector.broadcast %cst_377 : f32 to vector<6x3xf32>
    %1229 = arith.mulf %1228, %1225 : vector<6x3xf32>
    %1230 = arith.select %1227, %1225, %1229 : vector<6x3xi1>, vector<6x3xf32>
    %cst_378 = arith.constant dense<0xFF800000> : vector<6xf32>
    %1231 = vector.multi_reduction <maximumf>, %1230, %cst_378 [1] : vector<6x3xf32> to vector<6xf32>
    %1232 = vector.shape_cast %1231 : vector<6xf32> to vector<6x1xf32>
    %1233 = vector.broadcast %1232 : vector<6x1xf32> to vector<6x3xf32>
    %1234 = arith.subf %1230, %1233 : vector<6x3xf32>
    %1235 = math.exp %1234 : vector<6x3xf32>
    %1236 = arith.mulf %1235, %4 : vector<6x3xf32>
    %cst_379 = arith.constant dense<0.000000e+00> : vector<6xf32>
    %1237 = vector.multi_reduction <add>, %1236, %cst_379 [1] : vector<6x3xf32> to vector<6xf32>
    %1238 = vector.shape_cast %1237 : vector<6xf32> to vector<6x1xf32>
    %cst_380 = arith.constant 9.99999971E-10 : f32
    %1239 = vector.broadcast %cst_380 : f32 to vector<6x1xf32>
    %1240 = arith.maximumf %1238, %1239 : vector<6x1xf32>
    %1241 = tpu.reciprocal %1240 {approx = true} : vector<6x1xf32> -> vector<6x1xf32>
    %1242 = vector.broadcast %1241 : vector<6x1xf32> to vector<6x3xf32>
    %1243 = arith.mulf %1236, %1242 : vector<6x3xf32>
    %1244 = vector.extract_strided_slice %1163 {offsets = [0, 16], sizes = [3, 8], strides = [1, 1]} : vector<3x32xf32> to vector<3x8xf32>
    %cst_381 = arith.constant dense<0.000000e+00> : vector<6x8xf32>
    %1245 = tpu.matmul %1243, %1244, %cst_381 {dimension_numbers = #tpu.dot_dimension_numbers<[1], [0], [0], [1], [0, 0, 1, 1], [], []>} : vector<6x3xf32>, vector<3x8xf32>, vector<6x8xf32> -> vector<6x8xf32>
    %1246 = vector.extract_strided_slice %1170 {offsets = [0, 3], sizes = [6, 1], strides = [1, 1]} : vector<6x4xf32> to vector<6x1xf32>
    %1247 = vector.extract_strided_slice %1165 {offsets = [3, 0], sizes = [1, 3], strides = [1, 1]} : vector<4x3xf32> to vector<1x3xf32>
    %1248 = vector.broadcast %1246 : vector<6x1xf32> to vector<6x3xf32>
    %1249 = vector.broadcast %1247 : vector<1x3xf32> to vector<6x3xf32>
    %1250 = arith.addf %1248, %1249 : vector<6x3xf32>
    %cst_382 = arith.constant 0.000000e+00 : f32
    %1251 = vector.broadcast %cst_382 : f32 to vector<6x3xf32>
    %1252 = arith.cmpf ogt, %1250, %1251 : vector<6x3xf32>
    %cst_383 = arith.constant 2.000000e-01 : f32
    %1253 = vector.broadcast %cst_383 : f32 to vector<6x3xf32>
    %1254 = arith.mulf %1253, %1250 : vector<6x3xf32>
    %1255 = arith.select %1252, %1250, %1254 : vector<6x3xi1>, vector<6x3xf32>
    %cst_384 = arith.constant dense<0xFF800000> : vector<6xf32>
    %1256 = vector.multi_reduction <maximumf>, %1255, %cst_384 [1] : vector<6x3xf32> to vector<6xf32>
    %1257 = vector.shape_cast %1256 : vector<6xf32> to vector<6x1xf32>
    %1258 = vector.broadcast %1257 : vector<6x1xf32> to vector<6x3xf32>
    %1259 = arith.subf %1255, %1258 : vector<6x3xf32>
    %1260 = math.exp %1259 : vector<6x3xf32>
    %1261 = arith.mulf %1260, %4 : vector<6x3xf32>
    %cst_385 = arith.constant dense<0.000000e+00> : vector<6xf32>
    %1262 = vector.multi_reduction <add>, %1261, %cst_385 [1] : vector<6x3xf32> to vector<6xf32>
    %1263 = vector.shape_cast %1262 : vector<6xf32> to vector<6x1xf32>
    %cst_386 = arith.constant 9.99999971E-10 : f32
    %1264 = vector.broadcast %cst_386 : f32 to vector<6x1xf32>
    %1265 = arith.maximumf %1263, %1264 : vector<6x1xf32>
    %1266 = tpu.reciprocal %1265 {approx = true} : vector<6x1xf32> -> vector<6x1xf32>
    %1267 = vector.broadcast %1266 : vector<6x1xf32> to vector<6x3xf32>
    %1268 = arith.mulf %1261, %1267 : vector<6x3xf32>
    %1269 = vector.extract_strided_slice %1163 {offsets = [0, 24], sizes = [3, 8], strides = [1, 1]} : vector<3x32xf32> to vector<3x8xf32>
    %cst_387 = arith.constant dense<0.000000e+00> : vector<6x8xf32>
    %1270 = tpu.matmul %1268, %1269, %cst_387 {dimension_numbers = #tpu.dot_dimension_numbers<[1], [0], [0], [1], [0, 0, 1, 1], [], []>} : vector<6x3xf32>, vector<3x8xf32>, vector<6x8xf32> -> vector<6x8xf32>
    %1271 = tpu.concatenate %1195, %1220, %1245, %1270 in 1 : vector<6x8xf32>, vector<6x8xf32>, vector<6x8xf32>, vector<6x8xf32> -> vector<6x32xf32>
    %1272 = arith.addf %1043, %1271 : vector<6x32xf32>
    %c0_388 = arith.constant 0 : index
    %c0_389 = arith.constant 0 : index
    %1273 = vector.load %arg50[%c0_388, %c0_389] : memref<32x20xf32, #tpu.memory_space<vmem>>, vector<32x20xf32>
    %cst_390 = arith.constant dense<0.000000e+00> : vector<3x20xf32>
    %1274 = tpu.matmul %929, %1273, %cst_390 {dimension_numbers = #tpu.dot_dimension_numbers<[1], [0], [0], [1], [0, 0, 1, 1], [], []>} : vector<3x32xf32>, vector<32x20xf32>, vector<3x20xf32> -> vector<3x20xf32>
    %c0_391 = arith.constant 0 : index
    %c0_392 = arith.constant 0 : index
    %1275 = vector.load %arg51[%c0_391, %c0_392] : memref<1x20xf32, #tpu.memory_space<vmem>>, vector<1x20xf32>
    %1276 = vector.broadcast %1275 : vector<1x20xf32> to vector<3x20xf32>
    %1277 = arith.addf %1274, %1276 : vector<3x20xf32>
    %1278 = vector.extract_strided_slice %1277 {offsets = [0, 0], sizes = [3, 16], strides = [1, 1]} : vector<3x20xf32> to vector<3x16xf32>
    %1279 = vector.extract_strided_slice %1277 {offsets = [0, 16], sizes = [3, 4], strides = [1, 1]} : vector<3x20xf32> to vector<3x4xf32>
    %1280 = tpu.transpose %1279, [1, 0] : vector<3x4xf32> -> vector<4x3xf32>
    %c0_393 = arith.constant 0 : index
    %c0_394 = arith.constant 0 : index
    %1281 = vector.load %arg52[%c0_393, %c0_394] : memref<32x4xf32, #tpu.memory_space<vmem>>, vector<32x4xf32>
    %cst_395 = arith.constant dense<0.000000e+00> : vector<3x4xf32>
    %1282 = tpu.matmul %929, %1281, %cst_395 {dimension_numbers = #tpu.dot_dimension_numbers<[1], [0], [0], [1], [0, 0, 1, 1], [], []>} : vector<3x32xf32>, vector<32x4xf32>, vector<3x4xf32> -> vector<3x4xf32>
    %c0_396 = arith.constant 0 : index
    %c0_397 = arith.constant 0 : index
    %1283 = vector.load %arg53[%c0_396, %c0_397] : memref<1x4xf32, #tpu.memory_space<vmem>>, vector<1x4xf32>
    %1284 = vector.broadcast %1283 : vector<1x4xf32> to vector<3x4xf32>
    %1285 = arith.addf %1282, %1284 : vector<3x4xf32>
    %1286 = vector.extract_strided_slice %1285 {offsets = [0, 0], sizes = [3, 1], strides = [1, 1]} : vector<3x4xf32> to vector<3x1xf32>
    %1287 = vector.extract_strided_slice %1280 {offsets = [0, 0], sizes = [1, 3], strides = [1, 1]} : vector<4x3xf32> to vector<1x3xf32>
    %1288 = vector.broadcast %1286 : vector<3x1xf32> to vector<3x3xf32>
    %1289 = vector.broadcast %1287 : vector<1x3xf32> to vector<3x3xf32>
    %1290 = arith.addf %1288, %1289 : vector<3x3xf32>
    %cst_398 = arith.constant 0.000000e+00 : f32
    %1291 = vector.broadcast %cst_398 : f32 to vector<3x3xf32>
    %1292 = arith.cmpf ogt, %1290, %1291 : vector<3x3xf32>
    %cst_399 = arith.constant 2.000000e-01 : f32
    %1293 = vector.broadcast %cst_399 : f32 to vector<3x3xf32>
    %1294 = arith.mulf %1293, %1290 : vector<3x3xf32>
    %1295 = arith.select %1292, %1290, %1294 : vector<3x3xi1>, vector<3x3xf32>
    %cst_400 = arith.constant dense<0xFF800000> : vector<3xf32>
    %1296 = vector.multi_reduction <maximumf>, %1295, %cst_400 [1] : vector<3x3xf32> to vector<3xf32>
    %1297 = vector.shape_cast %1296 : vector<3xf32> to vector<3x1xf32>
    %1298 = vector.broadcast %1297 : vector<3x1xf32> to vector<3x3xf32>
    %1299 = arith.subf %1295, %1298 : vector<3x3xf32>
    %1300 = math.exp %1299 : vector<3x3xf32>
    %1301 = arith.mulf %1300, %5 : vector<3x3xf32>
    %cst_401 = arith.constant dense<0.000000e+00> : vector<3xf32>
    %1302 = vector.multi_reduction <add>, %1301, %cst_401 [1] : vector<3x3xf32> to vector<3xf32>
    %1303 = vector.shape_cast %1302 : vector<3xf32> to vector<3x1xf32>
    %cst_402 = arith.constant 9.99999971E-10 : f32
    %1304 = vector.broadcast %cst_402 : f32 to vector<3x1xf32>
    %1305 = arith.maximumf %1303, %1304 : vector<3x1xf32>
    %1306 = tpu.reciprocal %1305 {approx = true} : vector<3x1xf32> -> vector<3x1xf32>
    %1307 = vector.broadcast %1306 : vector<3x1xf32> to vector<3x3xf32>
    %1308 = arith.mulf %1301, %1307 : vector<3x3xf32>
    %1309 = vector.extract_strided_slice %1278 {offsets = [0, 0], sizes = [3, 4], strides = [1, 1]} : vector<3x16xf32> to vector<3x4xf32>
    %cst_403 = arith.constant dense<0.000000e+00> : vector<3x4xf32>
    %1310 = tpu.matmul %1308, %1309, %cst_403 {dimension_numbers = #tpu.dot_dimension_numbers<[1], [0], [0], [1], [0, 0, 1, 1], [], []>} : vector<3x3xf32>, vector<3x4xf32>, vector<3x4xf32> -> vector<3x4xf32>
    %1311 = vector.extract_strided_slice %1285 {offsets = [0, 1], sizes = [3, 1], strides = [1, 1]} : vector<3x4xf32> to vector<3x1xf32>
    %1312 = vector.extract_strided_slice %1280 {offsets = [1, 0], sizes = [1, 3], strides = [1, 1]} : vector<4x3xf32> to vector<1x3xf32>
    %1313 = vector.broadcast %1311 : vector<3x1xf32> to vector<3x3xf32>
    %1314 = vector.broadcast %1312 : vector<1x3xf32> to vector<3x3xf32>
    %1315 = arith.addf %1313, %1314 : vector<3x3xf32>
    %cst_404 = arith.constant 0.000000e+00 : f32
    %1316 = vector.broadcast %cst_404 : f32 to vector<3x3xf32>
    %1317 = arith.cmpf ogt, %1315, %1316 : vector<3x3xf32>
    %cst_405 = arith.constant 2.000000e-01 : f32
    %1318 = vector.broadcast %cst_405 : f32 to vector<3x3xf32>
    %1319 = arith.mulf %1318, %1315 : vector<3x3xf32>
    %1320 = arith.select %1317, %1315, %1319 : vector<3x3xi1>, vector<3x3xf32>
    %cst_406 = arith.constant dense<0xFF800000> : vector<3xf32>
    %1321 = vector.multi_reduction <maximumf>, %1320, %cst_406 [1] : vector<3x3xf32> to vector<3xf32>
    %1322 = vector.shape_cast %1321 : vector<3xf32> to vector<3x1xf32>
    %1323 = vector.broadcast %1322 : vector<3x1xf32> to vector<3x3xf32>
    %1324 = arith.subf %1320, %1323 : vector<3x3xf32>
    %1325 = math.exp %1324 : vector<3x3xf32>
    %1326 = arith.mulf %1325, %5 : vector<3x3xf32>
    %cst_407 = arith.constant dense<0.000000e+00> : vector<3xf32>
    %1327 = vector.multi_reduction <add>, %1326, %cst_407 [1] : vector<3x3xf32> to vector<3xf32>
    %1328 = vector.shape_cast %1327 : vector<3xf32> to vector<3x1xf32>
    %cst_408 = arith.constant 9.99999971E-10 : f32
    %1329 = vector.broadcast %cst_408 : f32 to vector<3x1xf32>
    %1330 = arith.maximumf %1328, %1329 : vector<3x1xf32>
    %1331 = tpu.reciprocal %1330 {approx = true} : vector<3x1xf32> -> vector<3x1xf32>
    %1332 = vector.broadcast %1331 : vector<3x1xf32> to vector<3x3xf32>
    %1333 = arith.mulf %1326, %1332 : vector<3x3xf32>
    %1334 = vector.extract_strided_slice %1278 {offsets = [0, 4], sizes = [3, 4], strides = [1, 1]} : vector<3x16xf32> to vector<3x4xf32>
    %cst_409 = arith.constant dense<0.000000e+00> : vector<3x4xf32>
    %1335 = tpu.matmul %1333, %1334, %cst_409 {dimension_numbers = #tpu.dot_dimension_numbers<[1], [0], [0], [1], [0, 0, 1, 1], [], []>} : vector<3x3xf32>, vector<3x4xf32>, vector<3x4xf32> -> vector<3x4xf32>
    %1336 = vector.extract_strided_slice %1285 {offsets = [0, 2], sizes = [3, 1], strides = [1, 1]} : vector<3x4xf32> to vector<3x1xf32>
    %1337 = vector.extract_strided_slice %1280 {offsets = [2, 0], sizes = [1, 3], strides = [1, 1]} : vector<4x3xf32> to vector<1x3xf32>
    %1338 = vector.broadcast %1336 : vector<3x1xf32> to vector<3x3xf32>
    %1339 = vector.broadcast %1337 : vector<1x3xf32> to vector<3x3xf32>
    %1340 = arith.addf %1338, %1339 : vector<3x3xf32>
    %cst_410 = arith.constant 0.000000e+00 : f32
    %1341 = vector.broadcast %cst_410 : f32 to vector<3x3xf32>
    %1342 = arith.cmpf ogt, %1340, %1341 : vector<3x3xf32>
    %cst_411 = arith.constant 2.000000e-01 : f32
    %1343 = vector.broadcast %cst_411 : f32 to vector<3x3xf32>
    %1344 = arith.mulf %1343, %1340 : vector<3x3xf32>
    %1345 = arith.select %1342, %1340, %1344 : vector<3x3xi1>, vector<3x3xf32>
    %cst_412 = arith.constant dense<0xFF800000> : vector<3xf32>
    %1346 = vector.multi_reduction <maximumf>, %1345, %cst_412 [1] : vector<3x3xf32> to vector<3xf32>
    %1347 = vector.shape_cast %1346 : vector<3xf32> to vector<3x1xf32>
    %1348 = vector.broadcast %1347 : vector<3x1xf32> to vector<3x3xf32>
    %1349 = arith.subf %1345, %1348 : vector<3x3xf32>
    %1350 = math.exp %1349 : vector<3x3xf32>
    %1351 = arith.mulf %1350, %5 : vector<3x3xf32>
    %cst_413 = arith.constant dense<0.000000e+00> : vector<3xf32>
    %1352 = vector.multi_reduction <add>, %1351, %cst_413 [1] : vector<3x3xf32> to vector<3xf32>
    %1353 = vector.shape_cast %1352 : vector<3xf32> to vector<3x1xf32>
    %cst_414 = arith.constant 9.99999971E-10 : f32
    %1354 = vector.broadcast %cst_414 : f32 to vector<3x1xf32>
    %1355 = arith.maximumf %1353, %1354 : vector<3x1xf32>
    %1356 = tpu.reciprocal %1355 {approx = true} : vector<3x1xf32> -> vector<3x1xf32>
    %1357 = vector.broadcast %1356 : vector<3x1xf32> to vector<3x3xf32>
    %1358 = arith.mulf %1351, %1357 : vector<3x3xf32>
    %1359 = vector.extract_strided_slice %1278 {offsets = [0, 8], sizes = [3, 4], strides = [1, 1]} : vector<3x16xf32> to vector<3x4xf32>
    %cst_415 = arith.constant dense<0.000000e+00> : vector<3x4xf32>
    %1360 = tpu.matmul %1358, %1359, %cst_415 {dimension_numbers = #tpu.dot_dimension_numbers<[1], [0], [0], [1], [0, 0, 1, 1], [], []>} : vector<3x3xf32>, vector<3x4xf32>, vector<3x4xf32> -> vector<3x4xf32>
    %1361 = vector.extract_strided_slice %1285 {offsets = [0, 3], sizes = [3, 1], strides = [1, 1]} : vector<3x4xf32> to vector<3x1xf32>
    %1362 = vector.extract_strided_slice %1280 {offsets = [3, 0], sizes = [1, 3], strides = [1, 1]} : vector<4x3xf32> to vector<1x3xf32>
    %1363 = vector.broadcast %1361 : vector<3x1xf32> to vector<3x3xf32>
    %1364 = vector.broadcast %1362 : vector<1x3xf32> to vector<3x3xf32>
    %1365 = arith.addf %1363, %1364 : vector<3x3xf32>
    %cst_416 = arith.constant 0.000000e+00 : f32
    %1366 = vector.broadcast %cst_416 : f32 to vector<3x3xf32>
    %1367 = arith.cmpf ogt, %1365, %1366 : vector<3x3xf32>
    %cst_417 = arith.constant 2.000000e-01 : f32
    %1368 = vector.broadcast %cst_417 : f32 to vector<3x3xf32>
    %1369 = arith.mulf %1368, %1365 : vector<3x3xf32>
    %1370 = arith.select %1367, %1365, %1369 : vector<3x3xi1>, vector<3x3xf32>
    %cst_418 = arith.constant dense<0xFF800000> : vector<3xf32>
    %1371 = vector.multi_reduction <maximumf>, %1370, %cst_418 [1] : vector<3x3xf32> to vector<3xf32>
    %1372 = vector.shape_cast %1371 : vector<3xf32> to vector<3x1xf32>
    %1373 = vector.broadcast %1372 : vector<3x1xf32> to vector<3x3xf32>
    %1374 = arith.subf %1370, %1373 : vector<3x3xf32>
    %1375 = math.exp %1374 : vector<3x3xf32>
    %1376 = arith.mulf %1375, %5 : vector<3x3xf32>
    %cst_419 = arith.constant dense<0.000000e+00> : vector<3xf32>
    %1377 = vector.multi_reduction <add>, %1376, %cst_419 [1] : vector<3x3xf32> to vector<3xf32>
    %1378 = vector.shape_cast %1377 : vector<3xf32> to vector<3x1xf32>
    %cst_420 = arith.constant 9.99999971E-10 : f32
    %1379 = vector.broadcast %cst_420 : f32 to vector<3x1xf32>
    %1380 = arith.maximumf %1378, %1379 : vector<3x1xf32>
    %1381 = tpu.reciprocal %1380 {approx = true} : vector<3x1xf32> -> vector<3x1xf32>
    %1382 = vector.broadcast %1381 : vector<3x1xf32> to vector<3x3xf32>
    %1383 = arith.mulf %1376, %1382 : vector<3x3xf32>
    %1384 = vector.extract_strided_slice %1278 {offsets = [0, 12], sizes = [3, 4], strides = [1, 1]} : vector<3x16xf32> to vector<3x4xf32>
    %cst_421 = arith.constant dense<0.000000e+00> : vector<3x4xf32>
    %1385 = tpu.matmul %1383, %1384, %cst_421 {dimension_numbers = #tpu.dot_dimension_numbers<[1], [0], [0], [1], [0, 0, 1, 1], [], []>} : vector<3x3xf32>, vector<3x4xf32>, vector<3x4xf32> -> vector<3x4xf32>
    %1386 = tpu.concatenate %1310, %1335, %1360, %1385 in 1 : vector<3x4xf32>, vector<3x4xf32>, vector<3x4xf32>, vector<3x4xf32> -> vector<3x16xf32>
    %1387 = arith.addf %1157, %1386 : vector<3x16xf32>
    %1388 = vector.extract_strided_slice %1272 {offsets = [0, 0], sizes = [6, 8], strides = [1, 1]} : vector<6x32xf32> to vector<6x8xf32>
    %1389 = vector.extract_strided_slice %1272 {offsets = [0, 8], sizes = [6, 8], strides = [1, 1]} : vector<6x32xf32> to vector<6x8xf32>
    %1390 = arith.addf %1388, %1389 : vector<6x8xf32>
    %1391 = vector.extract_strided_slice %1272 {offsets = [0, 16], sizes = [6, 8], strides = [1, 1]} : vector<6x32xf32> to vector<6x8xf32>
    %1392 = arith.addf %1390, %1391 : vector<6x8xf32>
    %1393 = vector.extract_strided_slice %1272 {offsets = [0, 24], sizes = [6, 8], strides = [1, 1]} : vector<6x32xf32> to vector<6x8xf32>
    %1394 = arith.addf %1392, %1393 : vector<6x8xf32>
    %cst_422 = arith.constant 2.500000e-01 : f32
    %1395 = vector.broadcast %cst_422 : f32 to vector<6x8xf32>
    %1396 = arith.mulf %1394, %1395 : vector<6x8xf32>
    %1397 = vector.extract_strided_slice %1387 {offsets = [0, 0], sizes = [3, 4], strides = [1, 1]} : vector<3x16xf32> to vector<3x4xf32>
    %1398 = vector.extract_strided_slice %1387 {offsets = [0, 4], sizes = [3, 4], strides = [1, 1]} : vector<3x16xf32> to vector<3x4xf32>
    %1399 = arith.addf %1397, %1398 : vector<3x4xf32>
    %1400 = vector.extract_strided_slice %1387 {offsets = [0, 8], sizes = [3, 4], strides = [1, 1]} : vector<3x16xf32> to vector<3x4xf32>
    %1401 = arith.addf %1399, %1400 : vector<3x4xf32>
    %1402 = vector.extract_strided_slice %1387 {offsets = [0, 12], sizes = [3, 4], strides = [1, 1]} : vector<3x16xf32> to vector<3x4xf32>
    %1403 = arith.addf %1401, %1402 : vector<3x4xf32>
    %cst_423 = arith.constant 2.500000e-01 : f32
    %1404 = vector.broadcast %cst_423 : f32 to vector<3x4xf32>
    %1405 = arith.mulf %1403, %1404 : vector<3x4xf32>
    %c0_424 = arith.constant 0 : index
    %c0_425 = arith.constant 0 : index
    %1406 = vector.load %arg54[%c0_424, %c0_425] : memref<6x8xf32, #tpu.memory_space<vmem>>, vector<6x8xf32>
    tpu.vector_store %arg54[%c0_424, %c0_425], %1396 {strides = array<i32>} : memref<6x8xf32, #tpu.memory_space<vmem>>, vector<6x8xf32>,
    %c0_426 = arith.constant 0 : index
    %c0_427 = arith.constant 0 : index
    %1407 = vector.load %arg55[%c0_426, %c0_427] : memref<3x4xf32, #tpu.memory_space<vmem>>, vector<3x4xf32>
    tpu.vector_store %arg55[%c0_426, %c0_427], %1405 {strides = array<i32>} : memref<3x4xf32, #tpu.memory_space<vmem>>, vector<3x4xf32>,
    return
  }
}

</mosaic_0001>

<bundles_post_ra>
// kernel: tpu_custom_call.1
= control target key start
LH: loop header
LB: loop body
LE: loop exit
PB: predicated region body
PF: predicated region fallthrough
CT: control target
= control target key end

     0   :  { %s4984_s6 = smov 1   ;;  %s4985_s10 = smov 2   ;;  %s6260_s0 = inlined_call_operand.smem [shape: u32[56], index: -1, kind: input, shape index: {}] }
   0x1   :  { %s5075_s5 = sld [smem:[%s6260_s0]]   ;;  %s4986_s14 = smov 3  }
   0x2   :  { %s5080_s9 = sld [smem:[%s6260_s0 + %s4984_s6]]   ;;  %s4987_s18 = smov 4  }
   0x3   :  { %s5085_s13 = sld [smem:[%s6260_s0 + %s4985_s10]]   ;;  %s4988_s22 = smov 5  }
   0x4   :  { %s5090_s17 = sld [smem:[%s6260_s0 + %s4986_s14]]   ;;  %s4989_s26 = smov 6  }
   0x5   :  { %s5095_s21 = sld [smem:[%s6260_s0 + %s4987_s18]]   ;;  %s4990_s30 = smov 7  }
   0x6   :  { %s5100_s25 = sld [smem:[%s6260_s0 + %s4988_s22]]   ;;  %s4991_s4 = smov 8  }
   0x7   :  { %s5105_s29 = sld [smem:[%s6260_s0 + %s4989_s26]]   ;;  %s4992_s10 = smov 9  }
   0x8   :  { %6280 = sst [smem:[#allocation31_spill]] %s5080_s9  ;;  %s4993_s15 = smov 10  }
   0x9   :  { %6281 = sst [smem:[#allocation32_spill]] %s5085_s13  ;;  %s4994_s20 = smov 11  }
   0xa   :  { %6282 = sst [smem:[#allocation33_spill]] %s5090_s17  ;;  %s4995_s26 = smov 12  }
   0xb   :  { %6283 = sst [smem:[#allocation34_spill]] %s5095_s21  ;;  %s4996_s1 = smov 13  }
   0xc   :  { %6284 = sst [smem:[#allocation35_spill]] %s5100_s25  ;;  %s4997_s7 = smov 14  }
   0xd   :  { %s5110_s3 = sld [smem:[%s6260_s0 + %s4990_s30]]   ;;  %s4999_s22 = smov 16  }
   0xe   :  { %s5115_s8 = sld [smem:[%s6260_s0 + %s4991_s4]]   ;;  %s5000_s28 = smov 17  }
   0xf   :  { %s5120_s14 = sld [smem:[%s6260_s0 + %s4992_s10]]  }
  0x10   :  { %s5125_s19 = sld [smem:[%s6260_s0 + %s4993_s15]]   ;;  %s4998_s15 = smov 15  }
  0x11   :  { %s5130_s24 = sld [smem:[%s6260_s0 + %s4994_s20]]  }
  0x12   :  { %s5135_s30 = sld [smem:[%s6260_s0 + %s4995_s26]]  }
  0x13   :  { %s5140_s6 = sld [smem:[%s6260_s0 + %s4996_s1]]  }
  0x14   :  { %s5145_s12 = sld [smem:[%s6260_s0 + %s4997_s7]]   ;;  %s5001_s7 = smov 18  }
  0x15   :  { %6285 = sst [smem:[#allocation36_spill]] %s5120_s14 }
  0x16   :  { %6286 = sst [smem:[#allocation37_spill]] %s5125_s19 }
  0x17   :  { %6287 = sst [smem:[#allocation38_spill]] %s5130_s24 }
  0x18   :  { %6288 = sst [smem:[#allocation39_spill]] %s5135_s30 }
  0x19   :  { %6289 = sst [smem:[#allocation40_spill]] %s5140_s6 }
  0x1a   :  { %6290 = sst [smem:[#allocation41_spill]] %s5145_s12 }
  0x1b   :  { %s5150_s20 = sld [smem:[%s6260_s0 + %s4998_s15]]   ;;  %s5002_s15 = smov 19  }
  0x1c   :  { %s5155_s27 = sld [smem:[%s6260_s0 + %s4999_s22]]   ;;  %s5003_s22 = smov 20  }
  0x1d   :  { %s5160_s4 = sld [smem:[%s6260_s0 + %s5000_s28]]   ;;  %s5004_s28 = smov 21  }
  0x1e   :  { %s5165_s25 = sld [smem:[%s6260_s0 + %s5001_s7]]   ;;  %s5005_s7 = smov 22  }
  0x1f   :  { %s5170_s21 = sld [smem:[%s6260_s0 + %s5002_s15]]   ;;  %s5006_s15 = smov 23  }
  0x21   :  { %6291 = sst [smem:[#allocation42_spill]] %s5150_s20 }
  0x22   :  { %6292 = sst [smem:[#allocation43_spill]] %s5155_s27 }
  0x23   :  { %6293 = sst [smem:[#allocation44_spill]] %s5160_s4 }
  0x24   :  { %6294 = sst [smem:[#allocation45_spill]] %s5165_s25 }
  0x25   :  { %6295 = sst [smem:[#allocation46_spill]] %s5170_s21 }
  0x26   :  { %s5175_s20 = sld [smem:[%s6260_s0 + %s5003_s22]]   ;;  %s5007_s22 = smov 24  }
  0x27   :  { %s5180_s4 = sld [smem:[%s6260_s0 + %s5004_s28]]   ;;  %s5008_s28 = smov 25  }
  0x28   :  { %s5185_s25 = sld [smem:[%s6260_s0 + %s5005_s7]]   ;;  %s5009_s7 = smov 26  }
  0x29   :  { %s5190_s21 = sld [smem:[%s6260_s0 + %s5006_s15]]   ;;  %s5010_s15 = smov 27  }
  0x2c   :  { %6296 = sst [smem:[#allocation47_spill]] %s5175_s20 }
  0x2d   :  { %6297 = sst [smem:[#allocation48_spill]] %s5180_s4 }
  0x2e   :  { %6298 = sst [smem:[#allocation49_spill]] %s5185_s25 }
  0x2f   :  { %6299 = sst [smem:[#allocation50_spill]] %s5190_s21 }
  0x30   :  { %s5195_s20 = sld [smem:[%s6260_s0 + %s5007_s22]]   ;;  %s5011_s22 = smov 28  }
  0x31   :  { %s5200_s4 = sld [smem:[%s6260_s0 + %s5008_s28]]   ;;  %s5012_s28 = smov 29  }
  0x32   :  { %s5205_s25 = sld [smem:[%s6260_s0 + %s5009_s7]]   ;;  %s5013_s7 = smov 30  }
  0x33   :  { %s5210_s21 = sld [smem:[%s6260_s0 + %s5010_s15]]   ;;  %s5014_s15 = smov 31  }
  0x36   :  { %6300 = sst [smem:[#allocation51_spill]] %s5195_s20 }
  0x37   :  { %6301 = sst [smem:[#allocation52_spill]] %s5200_s4 }
  0x38   :  { %6302 = sst [smem:[#allocation53_spill]] %s5205_s25 }
  0x39   :  { %6303 = sst [smem:[#allocation54_spill]] %s5210_s21 }
  0x3a   :  { %s5215_s20 = sld [smem:[%s6260_s0 + %s5011_s22]]   ;;  %s5015_s22 = smov 32  }
  0x3b   :  { %s5220_s4 = sld [smem:[%s6260_s0 + %s5012_s28]]   ;;  %s5016_s28 = smov 33  }
  0x3c   :  { %s5225_s25 = sld [smem:[%s6260_s0 + %s5013_s7]]   ;;  %s5017_s7 = smov 34  }
  0x3d   :  { %s5230_s21 = sld [smem:[%s6260_s0 + %s5014_s15]]   ;;  %s5018_s15 = smov 35  }
  0x40   :  { %6304 = sst [smem:[#allocation55_spill]] %s5215_s20 }
  0x41   :  { %6305 = sst [smem:[#allocation56_spill]] %s5220_s4 }
  0x42   :  { %6306 = sst [smem:[#allocation57_spill]] %s5225_s25 }
  0x43   :  { %6307 = sst [smem:[#allocation58_spill]] %s5230_s21 }
  0x44   :  { %s5235_s20 = sld [smem:[%s6260_s0 + %s5015_s22]]   ;;  %s5019_s22 = smov 36  }
  0x45   :  { %s5240_s4 = sld [smem:[%s6260_s0 + %s5016_s28]]   ;;  %s5020_s28 = smov 37  }
  0x46   :  { %s5245_s25 = sld [smem:[%s6260_s0 + %s5017_s7]]   ;;  %s5021_s7 = smov 38  }
  0x47   :  { %s5250_s21 = sld [smem:[%s6260_s0 + %s5018_s15]]   ;;  %s5022_s15 = smov 39  }
  0x48   :  { %s5260_s27 = sld [smem:[%s6260_s0 + %s5020_s28]]   ;;  %s5024_s28 = smov 41  }
  0x49   :  { %s5270_s12 = sld [smem:[%s6260_s0 + %s5022_s15]]   ;;  %s5026_s15 = smov 43  }
  0x4a   :  { %6308 = sst [smem:[#allocation59_spill]] %s5235_s20 }
  0x4b   :  { %s5255_s20 = sld [smem:[%s6260_s0 + %s5019_s22]]   ;;  %s5023_s22 = smov 40  }
  0x4c   :  { %6309 = sst [smem:[#allocation60_spill]] %s5245_s25 }
  0x4d   :  { %s5265_s25 = sld [smem:[%s6260_s0 + %s5021_s7]]   ;;  %s5025_s7 = smov 42  }
  0x4e   :  { %s5280_s17 = sld [smem:[%s6260_s0 + %s5024_s28]]   ;;  %s5028_s28 = smov 45  }
  0x4f   :  { %s5290_s6 = sld [smem:[%s6260_s0 + %s5026_s15]]   ;;  %s5030_s15 = smov 47  }
  0x50   :  { %s5300_s24 = sld [smem:[%s6260_s0 + %s5028_s28]]   ;;  %s5032_s28 = smov 49  }
  0x51   :  { %6310 = sst [smem:[#allocation61_spill]] %s5255_s20 }
  0x52   :  { %s5275_s20 = sld [smem:[%s6260_s0 + %s5023_s22]]   ;;  %s5027_s22 = smov 44  }
  0x53   :  { %6311 = sst [smem:[#allocation62_spill]] %s5265_s25 }
  0x54   :  { %s5285_s25 = sld [smem:[%s6260_s0 + %s5025_s7]]   ;;  %s5029_s7 = smov 46  }
  0x55   :  { %s5310_s9 = sld [smem:[%s6260_s0 + %s5030_s15]]   ;;  %s5034_s15 = smov 51  }
  0x56   :  { %s5320_s30 = sld [smem:[%s6260_s0 + %s5032_s28]]   ;;  %s5036_s28 = smov 53  }
  0x57   :  { %s5330_s19 = sld [smem:[%s6260_s0 + %s5034_s15]]   ;;  %s5038_s15 = smov 55  }
  0x58   :  { %6312 = sst [smem:[#allocation63_spill]] %s5275_s20 }
  0x59   :  { %s5295_s20 = sld [smem:[%s6260_s0 + %s5027_s22]]   ;;  %s5031_s22 = smov 48  }
  0x5a   :  { %6313 = sst [smem:[#allocation64_spill]] %s5285_s25 }
  0x5b   :  { %s5305_s25 = sld [smem:[%s6260_s0 + %s5029_s7]]   ;;  %s5033_s7 = smov 50  }
  0x5c   :  { %s5340_s13 = sld [smem:[%s6260_s0 + %s5036_s28]]  }
  0x5d   :  { %s5350_s14 = sld [smem:[%s6260_s0 + %s5038_s15]]  }
  0x5f   :  { %6314 = sst [smem:[#allocation65_spill]] %s5295_s20 }
  0x60   :  { %s5315_s20 = sld [smem:[%s6260_s0 + %s5031_s22]]   ;;  %s5035_s22 = smov 52  }
  0x61   :  { %6315 = sst [smem:[#allocation66_spill]] %s5305_s25 }
  0x62   :  { %s5325_s25 = sld [smem:[%s6260_s0 + %s5033_s7]]   ;;  %s5037_s7 = smov 54  }
  0x66   :  { %6316 = sst [smem:[#allocation67_spill]] %s5315_s20 }
  0x67   :  { %s5335_s20 = sld [smem:[%s6260_s0 + %s5035_s22]]  }
  0x68   :  { %6317 = sst [smem:[#allocation68_spill]] %s5325_s25 }
  0x69   :  { %s5345_s25 = sld [smem:[%s6260_s0 + %s5037_s7]]  }
  0x6a   :  { %117 = vsyncpa [#allocation3], 0 }
  0x6b   :  { %118 = vsyncpa [#allocation6], 0 }
  0x6c   :  { %119 = vsyncpa [#allocation9], 0 }
  0x6d   :  { %120 = vsyncpa [#allocation12], 0 }
  0x6e   :  { %121 = vsyncpa [#allocation15], 0 }
  0x6f   :  { %122 = vsyncpa [#allocation18], 0 }
  0x70   :  { %123 = vsyncpa [#allocation4], 0  ;;  %s209_s22 = sshll.u32 %s5250_s21, 4  ;;  %s210_s22 = int_to_ptr.hbm [resolvable:$true] %s209_s22 }
  0x71   :  { %124 = vsyncpa [#allocation22], 0  ;;  %s5039_s23 = smov [#allocation5]   ;;  %s235_s28 = sshll.u32 %s5270_s12, 4  ;;  %s236_s28 = int_to_ptr.hbm [resolvable:$true] %s235_s28 }
  0x72   :  { %s211_s26 = sshll.u32 %s5039_s23, 4  ;;  %s4656_s0 = sshra.s32 %s210_s22, 4  ;;  %s212_s26 = int_to_ptr.vmem [resolvable:$true] %s211_s26  ;;  %s4657_s0 = int_to_ptr.hbm [resolvable:$true] %s4656_s0 }
  0x73   :  { %s4658_s1 = scalar_lea.hbm %s4657_s0, 1  ;;  %s4660_s2 = scalar_lea.hbm %s5250_s21, 1 }
  0x74   :  { %p4659_p0 = scmp.ne.s32.totalorder %s4657_s0, %s4658_s1  ;;  %p4661_p1 = scmp.lt.s32.totalorder %s4657_s0, %s5250_s21 }
  0x75   :  { %p4662_p2 = scmp.lt.s32.totalorder %s4660_s2, %s4658_s1 }
  0x77   :  { %p4663_p3 = por %p4662_p2, %p4661_p1 }
  0x79   :  { %p4664_p4 = pnand %p4663_p3, %p4659_p0 }
  0x7b   :  { %4667 = shalt.err (!%p4664_p4)
}
  0x7c   :  { %214 = dma.hbm_to_vmem [thread:$0]  %s210_s22, 16, %s212_s26, [#allocation6]  }
  0x7d   :  { %s5040_s7 = smov [#allocation8]   ;;  %s261_s11 = sshll.u32 %s5290_s6, 4  ;;  %s262_s11 = int_to_ptr.hbm [resolvable:$true] %s261_s11 }
  0x7e   :  { %s237_s10 = sshll.u32 %s5040_s7, 4  ;;  %s4680_s15 = sshra.s32 %s236_s28, 4  ;;  %s238_s10 = int_to_ptr.vmem [resolvable:$true] %s237_s10  ;;  %s4681_s15 = int_to_ptr.hbm [resolvable:$true] %s4680_s15 }
  0x7f   :  { %s4682_s16 = scalar_lea.hbm %s4681_s15, 1  ;;  %s4684_s18 = scalar_lea.hbm %s5270_s12, 1 }
  0x80   :  { %p4683_p5 = scmp.ne.s32.totalorder %s4681_s15, %s4682_s16  ;;  %p4685_p6 = scmp.lt.s32.totalorder %s4681_s15, %s5270_s12 }
  0x81   :  { %p4686_p7 = scmp.lt.s32.totalorder %s4684_s18, %s4682_s16 }
  0x83   :  { %p4687_p8 = por %p4686_p7, %p4685_p6 }
  0x85   :  { %p4688_p9 = pnand %p4687_p8, %p4683_p5 }
  0x87   :  { %4691 = shalt.err (!%p4688_p9)
}
  0x88   :  { %240 = dma.hbm_to_vmem [thread:$0]  %s236_s28, 16, %s238_s10, [#allocation9]  }
  0x89   :  { %s287_s21 = sshll.u32 %s5310_s9, 4  ;;  %s5041_s22 = smov [#allocation11]   ;;  %s288_s21 = int_to_ptr.hbm [resolvable:$true] %s287_s21 }
  0x8a   :  { %s263_s23 = sshll.u32 %s5041_s22, 4  ;;  %s4704_s26 = sshra.s32 %s262_s11, 4  ;;  %s264_s23 = int_to_ptr.vmem [resolvable:$true] %s263_s23  ;;  %s4705_s26 = int_to_ptr.hbm [resolvable:$true] %s4704_s26 }
  0x8b   :  { %s4706_s0 = scalar_lea.hbm %s4705_s26, 1  ;;  %s4708_s1 = scalar_lea.hbm %s5290_s6, 1 }
  0x8c   :  { %p4707_p10 = scmp.ne.s32.totalorder %s4705_s26, %s4706_s0  ;;  %p4709_p11 = scmp.lt.s32.totalorder %s4705_s26, %s5290_s6 }
  0x8d   :  { %p4710_p12 = scmp.lt.s32.totalorder %s4708_s1, %s4706_s0 }
  0x8f   :  { %p4711_p13 = por %p4710_p12, %p4709_p11 }
  0x91   :  { %p4712_p0 = pnand %p4711_p13, %p4707_p10 }
  0x93   :  { %4715 = shalt.err (!%p4712_p0)
}
  0x94   :  { %266 = dma.hbm_to_vmem [thread:$0]  %s262_s11, 16, %s264_s23, [#allocation12]  }
  0x95   :  { %s5042_s12 = smov [#allocation14]   ;;  %s313_s2 = sshll.u32 %s5330_s19, 4  ;;  %s314_s2 = int_to_ptr.hbm [resolvable:$true] %s313_s2 }
  0x96   :  { %s289_s28 = sshll.u32 %s5042_s12, 4  ;;  %s4728_s7 = sshra.s32 %s288_s21, 4  ;;  %s290_s28 = int_to_ptr.vmem [resolvable:$true] %s289_s28  ;;  %s4729_s7 = int_to_ptr.hbm [resolvable:$true] %s4728_s7 }
  0x97   :  { %s4730_s10 = scalar_lea.hbm %s4729_s7, 1  ;;  %s4732_s15 = scalar_lea.hbm %s5310_s9, 1 }
  0x98   :  { %p4731_p1 = scmp.ne.s32.totalorder %s4729_s7, %s4730_s10  ;;  %p4733_p2 = scmp.lt.s32.totalorder %s4729_s7, %s5310_s9 }
  0x99   :  { %p4734_p3 = scmp.lt.s32.totalorder %s4732_s15, %s4730_s10 }
  0x9b   :  { %p4735_p4 = por %p4734_p3, %p4733_p2 }
  0x9d   :  { %p4736_p5 = pnand %p4735_p4, %p4731_p1 }
  0x9f   :  { %4739 = shalt.err (!%p4736_p5)
}
  0xa0   :  { %292 = dma.hbm_to_vmem [thread:$0]  %s288_s21, 16, %s290_s28, [#allocation15]  }
  0xa1   :  { %s196_s6 = sshll.u32 %s5240_s4, 4  ;;  %s5043_s11 = smov [#allocation17]   ;;  %s197_s6 = int_to_ptr.hbm [resolvable:$true] %s196_s6 }
  0xa2   :  { %s315_s16 = sshll.u32 %s5043_s11, 4  ;;  %s4752_s18 = sshra.s32 %s314_s2, 4  ;;  %s316_s16 = int_to_ptr.vmem [resolvable:$true] %s315_s16  ;;  %s4753_s18 = int_to_ptr.hbm [resolvable:$true] %s4752_s18 }
  0xa3   :  { %s4754_s22 = scalar_lea.hbm %s4753_s18, 1  ;;  %s4756_s23 = scalar_lea.hbm %s5330_s19, 1 }
  0xa4   :  { %p4755_p6 = scmp.ne.s32.totalorder %s4753_s18, %s4754_s22  ;;  %p4757_p7 = scmp.lt.s32.totalorder %s4753_s18, %s5330_s19 }
  0xa5   :  { %p4758_p8 = scmp.lt.s32.totalorder %s4756_s23, %s4754_s22 }
  0xa7   :  { %p4759_p9 = por %p4758_p8, %p4757_p7 }
  0xa9   :  { %p4760_p10 = pnand %p4759_p9, %p4755_p6 }
  0xab   :  { %4763 = shalt.err (!%p4760_p10)
}
  0xac   :  { %318 = dma.hbm_to_vmem [thread:$0]  %s314_s2, 16, %s316_s16, [#allocation18]  }
  0xad   :  { %s5044_s9 = smov [#allocation2]   ;;  %s222_s26 = sshll.u32 %s5260_s27, 4  ;;  %s223_s26 = int_to_ptr.hbm [resolvable:$true] %s222_s26 }
  0xae   :  { %s198_s21 = sshll.u32 %s5044_s9, 4  ;;  %s4776_s0 = sshra.s32 %s197_s6, 4  ;;  %s199_s21 = int_to_ptr.vmem [resolvable:$true] %s198_s21  ;;  %s4777_s0 = int_to_ptr.hbm [resolvable:$true] %s4776_s0 }
  0xaf   :  { %s4778_s1 = scalar_lea.hbm %s4777_s0, 1  ;;  %s4780_s12 = scalar_lea.hbm %s5240_s4, 1 }
  0xb0   :  { %p4779_p11 = scmp.ne.s32.totalorder %s4777_s0, %s4778_s1  ;;  %p4781_p12 = scmp.lt.s32.totalorder %s4777_s0, %s5240_s4 }
  0xb1   :  { %p4782_p13 = scmp.lt.s32.totalorder %s4780_s12, %s4778_s1 }
  0xb3   :  { %p4783_p0 = por %p4782_p13, %p4781_p12 }
  0xb5   :  { %p4784_p1 = pnand %p4783_p0, %p4779_p11 }
  0xb7   :  { %4787 = shalt.err (!%p4784_p1)
}
  0xb8   :  { %201 = dma.hbm_to_vmem [thread:$0]  %s197_s6, 16, %s199_s21, [#allocation3]  }
  0xb9   :  { %s248_s19 = sshll.u32 %s5280_s17, 4  ;;  %s5045_s28 = smov [#allocation7]   ;;  %s249_s19 = int_to_ptr.hbm [resolvable:$true] %s248_s19 }
  0xba   :  { %s224_s2 = sshll.u32 %s5045_s28, 4  ;;  %s4800_s7 = sshra.s32 %s223_s26, 4  ;;  %s225_s2 = int_to_ptr.vmem [resolvable:$true] %s224_s2  ;;  %s4801_s7 = int_to_ptr.hbm [resolvable:$true] %s4800_s7 }
  0xbb   :  { %s4802_s10 = scalar_lea.hbm %s4801_s7, 1  ;;  %s4804_s15 = scalar_lea.hbm %s5260_s27, 1 }
  0xbc   :  { %p4803_p2 = scmp.ne.s32.totalorder %s4801_s7, %s4802_s10  ;;  %p4805_p3 = scmp.lt.s32.totalorder %s4801_s7, %s5260_s27 }
  0xbd   :  { %p4806_p4 = scmp.lt.s32.totalorder %s4804_s15, %s4802_s10 }
  0xbf   :  { %p4807_p5 = por %p4806_p4, %p4805_p3 }
  0xc1   :  { %p4808_p6 = pnand %p4807_p5, %p4803_p2 }
  0xc3   :  { %4811 = shalt.err (!%p4808_p6)
}
  0xc4   :  { %227 = dma.hbm_to_vmem [thread:$0]  %s223_s26, 16, %s225_s2, [#allocation6]  }
  0xc5   :  { %s5046_s4 = smov [#allocation10]   ;;  %s274_s11 = sshll.u32 %s5300_s24, 4  ;;  %s275_s11 = int_to_ptr.hbm [resolvable:$true] %s274_s11 }
  0xc6   :  { %s250_s6 = sshll.u32 %s5046_s4, 4  ;;  %s4824_s16 = sshra.s32 %s249_s19, 4  ;;  %s251_s6 = int_to_ptr.vmem [resolvable:$true] %s250_s6  ;;  %s4825_s16 = int_to_ptr.hbm [resolvable:$true] %s4824_s16 }
  0xc7   :  { %s4826_s18 = scalar_lea.hbm %s4825_s16, 1  ;;  %s4828_s22 = scalar_lea.hbm %s5280_s17, 1 }
  0xc8   :  { %p4827_p7 = scmp.ne.s32.totalorder %s4825_s16, %s4826_s18  ;;  %p4829_p8 = scmp.lt.s32.totalorder %s4825_s16, %s5280_s17 }
  0xc9   :  { %p4830_p9 = scmp.lt.s32.totalorder %s4828_s22, %s4826_s18 }
  0xcb   :  { %p4831_p10 = por %p4830_p9, %p4829_p8 }
  0xcd   :  { %p4832_p11 = pnand %p4831_p10, %p4827_p7 }
  0xcf   :  { %4835 = shalt.err (!%p4832_p11)
}
  0xd0   :  { %253 = dma.hbm_to_vmem [thread:$0]  %s249_s19, 16, %s251_s6, [#allocation9]  }
  0xd1   :  { %s300_s27 = sshll.u32 %s5320_s30, 4  ;;  %s5047_s23 = smov [#allocation13]   ;;  %s301_s27 = int_to_ptr.hbm [resolvable:$true] %s300_s27 }
  0xd2   :  { %s276_s9 = sshll.u32 %s5047_s23, 4  ;;  %s4848_s21 = sshra.s32 %s275_s11, 4  ;;  %s277_s9 = int_to_ptr.vmem [resolvable:$true] %s276_s9  ;;  %s4849_s21 = int_to_ptr.hbm [resolvable:$true] %s4848_s21 }
  0xd3   :  { %s4850_s26 = scalar_lea.hbm %s4849_s21, 1  ;;  %s4852_s0 = scalar_lea.hbm %s5300_s24, 1 }
  0xd4   :  { %p4851_p12 = scmp.ne.s32.totalorder %s4849_s21, %s4850_s26  ;;  %p4853_p13 = scmp.lt.s32.totalorder %s4849_s21, %s5300_s24 }
  0xd5   :  { %p4854_p0 = scmp.lt.s32.totalorder %s4852_s0, %s4850_s26 }
  0xd7   :  { %p4855_p1 = por %p4854_p0, %p4853_p13 }
  0xd9   :  { %p4856_p2 = pnand %p4855_p1, %p4851_p12 }
  0xdb   :  { %4859 = shalt.err (!%p4856_p2)
}
  0xdc   :  { %279 = dma.hbm_to_vmem [thread:$0]  %s275_s11, 16, %s277_s9, [#allocation12]  }
  0xdd   :  { %s5048_s17 = smov [#allocation16]   ;;  %s326_s12 = sshll.u32 %s5340_s13, 4  ;;  %s327_s12 = int_to_ptr.hbm [resolvable:$true] %s326_s12 }
  0xde   :  { %s302_s1 = sshll.u32 %s5048_s17, 4  ;;  %s4872_s19 = sshra.s32 %s301_s27, 4  ;;  %s303_s1 = int_to_ptr.vmem [resolvable:$true] %s302_s1  ;;  %s4873_s19 = int_to_ptr.hbm [resolvable:$true] %s4872_s19 }
  0xdf   :  { %s4874_s28 = scalar_lea.hbm %s4873_s19, 1  ;;  %s4876_s2 = scalar_lea.hbm %s5320_s30, 1 }
  0xe0   :  { %p4875_p3 = scmp.ne.s32.totalorder %s4873_s19, %s4874_s28  ;;  %p4877_p4 = scmp.lt.s32.totalorder %s4873_s19, %s5320_s30 }
  0xe1   :  { %p4878_p5 = scmp.lt.s32.totalorder %s4876_s2, %s4874_s28 }
  0xe3   :  { %p4879_p6 = por %p4878_p5, %p4877_p4 }
  0xe5   :  { %p4880_p7 = pnand %p4879_p6, %p4875_p3 }
  0xe7   :  { %4883 = shalt.err (!%p4880_p7)
}
  0xe8   :  { %305 = dma.hbm_to_vmem [thread:$0]  %s301_s27, 16, %s303_s1, [#allocation15]  }
  0xe9   :  { %s5049_s24 = smov [#allocation19]   ;;  %s4896_s10 = sshra.s32 %s327_s12, 4  ;;  %s4897_s10 = int_to_ptr.hbm [resolvable:$true] %s4896_s10 }
  0xea   :  { %s328_s7 = sshll.u32 %s5049_s24, 4  ;;  %s4898_s15 = scalar_lea.hbm %s4897_s10, 1  ;;  %s329_s7 = int_to_ptr.vmem [resolvable:$true] %s328_s7 }
  0xeb   :  { %p4899_p8 = scmp.ne.s32.totalorder %s4897_s10, %s4898_s15  ;;  %s4900_s4 = scalar_lea.hbm %s5340_s13, 1 }
  0xec   :  { %p4901_p9 = scmp.lt.s32.totalorder %s4897_s10, %s5340_s13  ;;  %p4902_p10 = scmp.lt.s32.totalorder %s4900_s4, %s4898_s15 }
  0xee   :  { %p4903_p11 = por %p4902_p10, %p4901_p9 }
  0xf0   :  { %p4904_p12 = pnand %p4903_p11, %p4899_p8 }
  0xf2   :  { %4907 = shalt.err (!%p4904_p12)
}
  0xf3   :  { %331 = dma.hbm_to_vmem [thread:$0]  %s327_s12, 16, %s329_s7, [#allocation18]  }
  0xf4   :  { %4968 = dma.done.wait [#allocation3], 16  }
  0xf5   :  { %4969 = vsyncadd [#allocation3], 4294967280 }
  0xf6   :  { %4970 = dma.done.wait [#allocation6], 32  }
  0xf7   :  { %4971 = vsyncadd [#allocation6], 4294967264 }
  0xf8   :  { %4972 = dma.done.wait [#allocation9], 32  }
  0xf9   :  { %4973 = vsyncadd [#allocation9], 4294967264 }
  0xfa   :  { %4974 = dma.done.wait [#allocation12], 32  }
  0xfb   :  { %4975 = vsyncadd [#allocation12], 4294967264 }
  0xfc   :  { %4976 = dma.done.wait [#allocation15], 32  }
  0xfd   :  { %4977 = vsyncadd [#allocation15], 4294967264 }
  0xfe   :  { %4978 = dma.done.wait [#allocation18], 32  }
  0xff   :  { %4979 = vsyncadd [#allocation18], 4294967264  ;;  %s6318_s13 = sld [smem:[#allocation36_spill]]  ;;  %vm391_vm0 = vcmask 1045504   ;;  %vm387_vm1 = vcmask 48128   ;;  %v5050_v3 = vmov 1  }
 0x100   :  { %v382_v0 = vld [vmem:[%s5105_s29] sm:$0x3f]  ;;  %4387 = vset.pattern.permute.xlu1 %v5050_v3  ;;  %v5051_v4 = vmov 0   ;;  %vm489_vm3 = vcmask 46080   ;;  %s6319_s29 = sld [smem:[#allocation32_spill]]  ;;  %v5053_v29 = vmov 2  }
 0x101   :  { %v5387_v1 = vld [vmem:[%s5075_s5] sm:$0x3f]  ;;  %4174 = vmatpush.msk.msra.mxu0 %vm391_vm0, %v382_v0  ;;  %4386 = vset.pattern.permute.xlu0 %v5051_v4  ;;  %s5052_s5 = smov 96   ;;  %s5054_s30 = smov 120   ;;  %vm766_vm5 = vcmask 1043456   ;;  %vm762_vm7 = vcmask 31744  }
 0x102   :  { %v451_v2 = vld [vmem:[%s5115_s8] sm:$0x3f]  ;;  %4175 = vmatmul.msk.f32.vlgmr.msra.gmra.mxu0 %vm387_vm1, %v5387_v1  ;;  %4388 = vset.pattern.permute.xlu2 %v5053_v29  ;;  %s6321_s8 = sld [smem:[#allocation39_spill]]  ;;  %v5055_v57 = vmov 3   ;;  %vm800_vm9 = vcmask 43008   ;;  %s5056_s22 = smov 112  }
 0x103   :  { %4176 = vmatpush.msk.msra.mxu1 %vm391_vm0, %v451_v2  ;;  %v4432_v5 = vld [vmem:[%s5110_s3] ss:$0 sm:$0xff]  ;;  %s6320_s3 = sld [smem:[#allocation37_spill]]  ;;  %s5057_s27 = smov 104   ;;  %vm1103_vm14 = vcmask 21504  }
 0x104   :  { %4177 = vmatmul.msk.f32.vlgmr.msra.gmra.mxu1 %vm387_vm1, %v5387_v1  ;;  %s6322_s6 = sld [smem:[#allocation31_spill]]  ;;  %s5058_s28 = smov 8  }
 0x105   :  { %v4433_v6 = vld [vmem:[%s6318_s13] ss:$0 sm:$0xff]  ;;  %s6323_s11 = sld [smem:[#allocation38_spill]]  ;;  %s5059_s2 = smov 16  }
 0x106   :  { %v5420_v31 = vld [vmem:[%s6319_s29] sm:$0x3f]  ;;  %s6324_s16 = sld [smem:[#allocation40_spill]]  ;;  %s5060_s24 = smov 24  }
 0x107   :  { %s6325_s18 = sld [smem:[#allocation33_spill]] }
 0x108   :  { %v757_v42 = vld [vmem:[%s6321_s8] sm:$0xf]  ;;  %s6326_s23 = sld [smem:[#allocation41_spill]] }
 0x109   :  { %v693_v39 = vld [vmem:[%s6320_s3] sm:$0x3f]  ;;  %s6327_s9 = sld [smem:[#allocation43_spill]] }
 0x10a   :  { %v5441_v56 = vld [vmem:[%s6322_s6] sm:$0x7]  ;;  %s6328_s21 = sld [smem:[#allocation42_spill]] }
 0x10b   :  { %v4434_v59 = vld [vmem:[%s6323_s11] ss:$0 sm:$0xff]  ;;  %s6329_s26 = sld [smem:[#allocation44_spill]] }
 0x10c   :  { %v4435_v63 = vld [vmem:[%s6324_s16] ss:$0 sm:$0xff]  ;;  %s6330_s0 = sld [smem:[#allocation34_spill]] }
 0x10d   :  { %s6331_s17 = sld [smem:[#allocation45_spill]] }
 0x10e   :  { %s6332_s1 = sld [smem:[#allocation47_spill]] }
 0x10f   :  { %s6333_s12 = sld [smem:[#allocation46_spill]] }
 0x110   :  { %s6334_s19 = sld [smem:[#allocation48_spill]] }
 0x111   :  { %s6335_s7 = sld [smem:[#allocation35_spill]] }
 0x112   :  { %s6336_s10 = sld [smem:[#allocation49_spill]] }
 0x113   :  { %s6337_s15 = sld [smem:[#allocation51_spill]] }
 0x114   :  { %s6338_s4 = sld [smem:[#allocation50_spill]] }
 0x115   :  { %s6339_s13 = sld [smem:[#allocation52_spill]] }
 0x116   :  { %s6340_s3 = sld [smem:[#allocation53_spill]] }
 0x117   :  { %s6341_s8 = sld [smem:[#allocation55_spill]] }
 0x118   :  { %s6342_s6 = sld [smem:[#allocation54_spill]] }
 0x119   :  { %s6343_s11 = sld [smem:[#allocation56_spill]] }
 0x11a   :  { %s6344_s16 = sld [smem:[#allocation57_spill]] }
 0x17f   :  { %v412_v7 = vpop.f32.mrf.mxu0 }
 0x180   :  { %v5400_v9 = vadd.f32 %v4432_v5, %v412_v7 }
 0x181   :  { %v476_v8 = vpop.f32.mrf.mxu1 }
 0x182   :  { %v5402_v10 = vadd.f32 %v4433_v6, %v476_v8  ;;  %416 = vrot.lane.b32.xlu0 %v5400_v9, %s5052_s5  ;;  %4178 = vmatpush.msk.msra.mxu2 %vm391_vm0, %v5400_v9 }
 0x184   :  { %529 = vperm.xlu1 %4387, %v5402_v10   ;;  %4186 = vmatpush.msk.msrb.mxu2 %vm391_vm0, %v693_v39 }
 0x18a   :  { %481 = vperm.xlu0 %4386, %v5402_v10  }
 0x192   :  { %4391 = vset.pattern.permute.xlu0 %v5050_v3 }
 0x1f4   :  { %v417_v11 = vpop.permute.xlu0 %416 }
 0x1f5   :  { %419 = vxpose.xlu1.b32.start.end [1/1] (short) (narrow) %v417_v11, 8 }
 0x1f6   :  { %v530_v12 = vpop.permute.xlu1 %529 }
 0x1fc   :  { %v482_v16 = vpop.permute.xlu0 %481 }
 0x248   :  { %4389 = vset.pattern.permute.xlu1 %v5051_v4 }
 0x299   :  { %v5412_v13 = vpop.trf.xlu1 }
 0x29a   :  { %v484_v14 = vperm.slane %v5412_v13, 0  ;;  %v532_v15 = vperm.slane %v5412_v13, 1  ;;  %v581_v48 = vperm.slane %v5412_v13, 2  ;;  %v630_v11 = vperm.slane %v5412_v13, 3 }
 0x29c   :  { %v485_v17 = vadd.f32 %v484_v14, %v482_v16  ;;  %v533_v19 = vadd.f32 %v532_v15, %v530_v12 }
 0x29e   :  { %vm486_vm2 = vcmp.gt.f32.partialorder %v485_v17, 0.0  ;;  %v487_v18 = vmul.f32 0.2, %v485_v17  ;;  %v535_v22 = vmul.f32 0.2, %v533_v19  ;;  %vm534_vm4 = vcmp.gt.f32.partialorder %v533_v19, 0.0 }
 0x2a0   :  { %v488_v20 = vsel %vm486_vm2, %v485_v17, %v487_v18  ;;  %v536_v23 = vsel %vm534_vm4, %v533_v19, %v535_v22  ;;  %vm1121_vm4 = vcmask 1042432  }
 0x2a1   :  { %v490_v21 = vsel %vm489_vm3, %v488_v20, -inf  ;;  %v537_v24 = vsel %vm489_vm3, %v536_v23, -inf }
 0x2a2   :  { %491 = vmax.xlane.f32.xlu2 %v490_v21 }
 0x2aa   :  { %538 = vmax.xlane.f32.xlu2 %v537_v24 }
 0x315   :  { %v492_v25 = vpop.xlane.xlu2 %491 }
 0x316   :  { %v493_v26 = vsub.f32 %v488_v20, %v492_v25 }
 0x318   :  { %v494_v27 = vmul.f32 1.442695, %v493_v26 }
 0x31a   :  { %4456 = vpow2.f32 %v494_v27 }
 0x31d   :  { %v539_v28 = vpop.xlane.xlu2 %538 }
 0x31e   :  { %v540_v30 = vsub.f32 %v536_v23, %v539_v28 }
 0x320   :  { %v4457_v32 = vpop.eup %4456  ;;  %v541_v33 = vmul.f32 1.442695, %v540_v30 }
 0x321   :  { %v496_v34 = vmul.f32 %v4457_v32, %v5420_v31 }
 0x322   :  { %4458 = vpow2.f32 %v541_v33 }
 0x323   :  { %v497_v35 = vsel %vm489_vm3, %v496_v34, 0.0 }
 0x324   :  { %498 = vadd.xlane.f32.xlu2 %v497_v35 }
 0x328   :  { %v4459_v36 = vpop.eup %4458 }
 0x329   :  { %v543_v37 = vmul.f32 %v4459_v36, %v5420_v31 }
 0x32b   :  { %v544_v38 = vsel %vm489_vm3, %v543_v37, 0.0 }
 0x32c   :  { %545 = vadd.xlane.f32.xlu0 %v544_v38 }
 0x33c   :  { %550 = vrot.lane.b32.xlu2 %v5400_v9, %s5054_s30 }
 0x344   :  { %578 = vperm.xlu2 %4388, %v5402_v10  }
 0x34c   :  { %4390 = vset.pattern.permute.xlu2 %v5055_v57 }
 0x397   :  { %v499_v40 = vpop.xlane.xlu2 %498 }
 0x398   :  { %v500_v41 = vmax.f32 %v499_v40, 1e-09  ;;  %v5480_v40 = vld [vmem:[%s6325_s18] sm:$0x7] }
 0x39a   :  { %4460 = vrcp.f32 %v500_v41 }
 0x39f   :  { %v546_v43 = vpop.xlane.xlu0 %545  ;;  %v551_v44 = vpop.permute.xlu2 %550 }
 0x3a0   :  { %v4461_v45 = vpop.eup %4460  ;;  %v547_v46 = vmax.f32 %v546_v43, 1e-09  ;;  %4180 = vmatpush.msk.msra.mxu3 %vm391_vm0, %v551_v44 }
 0x3a1   :  { %v502_v47 = vmul.f32 %v4461_v45, %v496_v34 }
 0x3a2   :  { %4188 = vmatpush.msk.msrb.mxu3 %vm766_vm5, %v757_v42  ;;  %4462 = vrcp.f32 %v547_v46 }
 0x3a3   :  { %4179 = vmatmul.msk.f32.vlgmr.msra.gmra.mxu2 %vm387_vm1, %v502_v47 }
 0x3a7   :  { %v579_v49 = vpop.permute.xlu2 %578 }
 0x3a8   :  { %v4463_v50 = vpop.eup %4462  ;;  %v582_v51 = vadd.f32 %v581_v48, %v579_v49 }
 0x3a9   :  { %v549_v52 = vmul.f32 %v4463_v50, %v543_v37 }
 0x3aa   :  { %vm583_vm6 = vcmp.gt.f32.partialorder %v582_v51, 0.0  ;;  %v584_v53 = vmul.f32 0.2, %v582_v51 }
 0x3ab   :  { %4181 = vmatmul.msk.f32.vlgmr.msra.gmra.mxu3 %vm387_vm1, %v549_v52  ;;  %4187 = vmatmul.msk.f32.vlgmr.msrb.gmra.mxu2 %vm387_vm1, %v5387_v1 }
 0x3ac   :  { %v585_v54 = vsel %vm583_vm6, %v582_v51, %v584_v53 }
 0x3ad   :  { %v586_v55 = vsel %vm489_vm3, %v585_v54, -inf }
 0x3ae   :  { %587 = vmax.xlane.f32.xlu0 %v586_v55 }
 0x3b3   :  { %4189 = vmatmul.msk.f32.vlgmr.msrb.gmra.mxu3 %vm762_vm7, %v5441_v56 }
 0x421   :  { %v588_v5 = vpop.xlane.xlu0 %587 }
 0x422   :  { %v589_v7 = vsub.f32 %v585_v54, %v588_v5  ;;  %v1001_v5 = vld [vmem:[%s6326_s23] sm:$0xf]  ;;  %s6345_s23 = sld [smem:[#allocation59_spill]] }
 0x424   :  { %v590_v8 = vmul.f32 1.442695, %v589_v7 }
 0x426   :  { %v5446_v58 = vpop.f32.mrf.mxu2  ;;  %4464 = vpow2.f32 %v590_v8 }
 0x42c   :  { %v4465_v17 = vpop.eup %4464 }
 0x42d   :  { %v5466_v18 = vmul.f32 %v4465_v17, %v5420_v31 }
 0x42e   :  { %v5449_v60 = vpop.f32.mrf.mxu3  ;;  %v718_v61 = vpop.f32.mrf.mxu2 }
 0x42f   :  { %v5451_v62 = vadd.f32 %v4434_v59, %v718_v61  ;;  %v593_v19 = vsel %vm489_vm3, %v5466_v18, 0.0 }
 0x431   :  { %722 = vrot.lane.b32.xlu2 %v5451_v62, %s5052_s5 }
 0x436   :  { %v787_v0 = vpop.f32.mrf.mxu3 }
 0x437   :  { %v5456_v2 = vadd.f32 %v4435_v63, %v787_v0 }
 0x439   :  { %627 = vperm.xlu2 %4390, %v5402_v10   ;;  %840 = vperm.xlu0 %4391, %v5456_v2  }
 0x43a   :  { %792 = vperm.xlu1 %4389, %v5456_v2  }
 0x441   :  { %4392 = vset.pattern.permute.xlu0 %v5053_v29 }
 0x442   :  { %4393 = vset.pattern.permute.xlu1 %v5055_v57 }
 0x48b   :  { %v723_v6 = vpop.permute.xlu2 %722 }
 0x48c   :  { %725 = vxpose.xlu2.b32.start.end [1/1] (short) (narrow) %v723_v6, 8 }
 0x493   :  { %v628_v12 = vpop.permute.xlu2 %627 }
 0x494   :  { %v631_v14 = vadd.f32 %v630_v11, %v628_v12 }
 0x496   :  { %vm632_vm8 = vcmp.gt.f32.partialorder %v631_v14, 0.0  ;;  %v633_v10 = vmul.f32 0.2, %v631_v14 }
 0x498   :  { %v634_v15 = vsel %vm632_vm8, %v631_v14, %v633_v10 }
 0x499   :  { %v635_v16 = vsel %vm489_vm3, %v634_v15, -inf }
 0x49a   :  { %636 = vmax.xlane.f32.xlu0 %v635_v16 }
 0x4a2   :  { %594 = vadd.xlane.f32.xlu0 %v593_v19 }
 0x4ab   :  { %v841_v23 = vpop.permute.xlu0 %840 }
 0x4ac   :  { %v793_v20 = vpop.permute.xlu1 %792 }
 0x4ee   :  { %4395 = vset.pattern.permute.xlu2 %v5050_v3 }
 0x50d   :  { %v637_v47 = vpop.xlane.xlu0 %636 }
 0x50e   :  { %v638_v48 = vsub.f32 %v634_v15, %v637_v47  ;;  %v1065_v15 = vld [vmem:[%s6327_s9] sm:$0x3f]  ;;  %s6346_s9 = sld [smem:[#allocation58_spill]] }
 0x510   :  { %v639_v49 = vmul.f32 1.442695, %v638_v48 }
 0x515   :  { %v595_v53 = vpop.xlane.xlu0 %594 }
 0x516   :  { %v596_v54 = vmax.f32 %v595_v53, 1e-09 }
 0x525   :  { %v5471_v13 = vpop.trf.xlu2 }
 0x526   :  { %v795_v21 = vperm.slane %v5471_v13, 0  ;;  %v843_v22 = vperm.slane %v5471_v13, 1 }
 0x528   :  { %v796_v24 = vadd.f32 %v795_v21, %v793_v20  ;;  %v844_v25 = vadd.f32 %v843_v22, %v841_v23  ;;  %v4436_v20 = vld [vmem:[%s6328_s21] ss:$0 sm:$0xff]  ;;  %s6347_s21 = sld [smem:[#allocation60_spill]] }
 0x52a   :  { %vm845_vm10 = vcmp.gt.f32.partialorder %v844_v25, 0.0  ;;  %v846_v26 = vmul.f32 0.2, %v844_v25  ;;  %vm797_vm11 = vcmp.gt.f32.partialorder %v796_v24, 0.0  ;;  %v798_v27 = vmul.f32 0.2, %v796_v24 }
 0x52c   :  { %v847_v28 = vsel %vm845_vm10, %v844_v25, %v846_v26  ;;  %v799_v30 = vsel %vm797_vm11, %v796_v24, %v798_v27  ;;  %v4437_v25 = vld [vmem:[%s6329_s26] ss:$0 sm:$0xff]  ;;  %vm1117_vm10 = vcmask 23552   ;;  %s6348_s26 = sld [smem:[#allocation61_spill]] }
 0x52d   :  { %v848_v32 = vsel %vm800_vm9, %v847_v28, -inf  ;;  %v801_v33 = vsel %vm800_vm9, %v799_v30, -inf }
 0x52e   :  { %849 = vmax.xlane.f32.xlu1 %v848_v32  ;;  %802 = vmax.xlane.f32.xlu2 %v801_v33 }
 0x546   :  { %861 = vrot.lane.b32.xlu2 %v5451_v62, %s5054_s30 }
 0x5a1   :  { %v850_v34 = vpop.xlane.xlu1 %849  ;;  %v803_v35 = vpop.xlane.xlu2 %802 }
 0x5a2   :  { %v851_v36 = vsub.f32 %v847_v28, %v850_v34  ;;  %v804_v37 = vsub.f32 %v799_v30, %v803_v35  ;;  %v892_v28 = vperm.slane %v5471_v13, 2  ;;  %v941_v34 = vperm.slane %v5471_v13, 3 }
 0x5a4   :  { %v852_v38 = vmul.f32 1.442695, %v851_v36  ;;  %v805_v39 = vmul.f32 1.442695, %v804_v37 }
 0x5a6   :  { %4466 = vpow2.f32 %v852_v38 }
 0x5a7   :  { %4468 = vpow2.f32 %v805_v39 }
 0x5a8   :  { %4470 = vpow2.f32 %v639_v49 }
 0x5a9   :  { %4472 = vrcp.f32 %v596_v54  ;;  %v862_v6 = vpop.permute.xlu2 %861 }
 0x5ac   :  { %v4467_v41 = vpop.eup %4466 }
 0x5ad   :  { %v4469_v42 = vpop.eup %4468  ;;  %v854_v43 = vmul.f32 %v4467_v41, %v5480_v40 }
 0x5ae   :  { %v807_v44 = vmul.f32 %v4469_v42, %v5480_v40  ;;  %v4471_v50 = vpop.eup %4470 }
 0x5af   :  { %v855_v45 = vsel %vm800_vm9, %v854_v43, 0.0  ;;  %v641_v51 = vmul.f32 %v4471_v50, %v5420_v31  ;;  %v4473_v61 = vpop.eup %4472 }
 0x5b0   :  { %856 = vadd.xlane.f32.xlu1 %v855_v45  ;;  %v808_v46 = vsel %vm800_vm9, %v807_v44, 0.0  ;;  %v598_v0 = vmul.f32 %v4473_v61, %v5466_v18 }
 0x5b1   :  { %809 = vadd.xlane.f32.xlu0 %v808_v46  ;;  %v642_v52 = vsel %vm489_vm3, %v641_v51, 0.0 }
 0x5c5   :  { %599 = vrot.lane.b32.xlu0 %v5400_v9, %s5056_s22 }
 0x5c9   :  { %648 = vrot.lane.b32.xlu1 %v5400_v9, %s5057_s27 }
 0x5d1   :  { %938 = vperm.xlu1 %4393, %v5456_v2  }
 0x5d9   :  { %4394 = vset.pattern.permute.xlu1 %v5051_v4 }
 0x5ef   :  { %643 = vadd.xlane.f32.xlu0 %v642_v52 }
 0x603   :  { %889 = vperm.xlu0 %4392, %v5456_v2  }
 0x623   :  { %v857_v59 = vpop.xlane.xlu1 %856 }
 0x624   :  { %v810_v9 = vpop.xlane.xlu0 %809  ;;  %v858_v12 = vmax.f32 %v857_v59, 1e-09 }
 0x625   :  { %v811_v55 = vmax.f32 %v810_v9, 1e-09 }
 0x627   :  { %4474 = vrcp.f32 %v811_v55 }
 0x62d   :  { %v4475_v2 = vpop.eup %4474 }
 0x62e   :  { %v813_v7 = vmul.f32 %v4475_v2, %v807_v44 }
 0x637   :  { %v600_v63 = vpop.permute.xlu0 %599 }
 0x638   :  { %4182 = vmatpush.msk.msrb.mxu0 %vm391_vm0, %v600_v63 }
 0x639   :  { %4183 = vmatmul.msk.f32.vlgmr.msrb.gmra.mxu0 %vm387_vm1, %v598_v0 }
 0x63a   :  { %4190 = vmatpush.msk.msra.mxu0 %vm391_vm0, %v5451_v62 }
 0x63b   :  { %v649_v31 = vpop.permute.xlu1 %648 }
 0x63c   :  { %4198 = vmatpush.msk.msrb.mxu0 %vm766_vm5, %v1001_v5  ;;  %4184 = vmatpush.msk.msrb.mxu1 %vm391_vm0, %v649_v31 }
 0x63e   :  { %4192 = vmatpush.msk.msra.mxu1 %vm391_vm0, %v862_v6 }
 0x641   :  { %4191 = vmatmul.msk.f32.vlgmr.msra.gmra.mxu0 %vm387_vm1, %v813_v7 }
 0x643   :  { %v939_v33 = vpop.permute.xlu1 %938 }
 0x644   :  { %v942_v35 = vadd.f32 %v941_v34, %v939_v33 }
 0x646   :  { %v944_v38 = vmul.f32 0.2, %v942_v35  ;;  %vm943_vm13 = vcmp.gt.f32.partialorder %v942_v35, 0.0 }
 0x648   :  { %v945_v39 = vsel %vm943_vm13, %v942_v35, %v944_v38 }
 0x649   :  { %4199 = vmatmul.msk.f32.vlgmr.msrb.gmra.mxu0 %vm762_vm7, %v5441_v56  ;;  %v946_v41 = vsel %vm800_vm9, %v945_v39, -inf }
 0x662   :  { %v644_v8 = vpop.xlane.xlu0 %643 }
 0x663   :  { %v645_v11 = vmax.f32 %v644_v8, 1e-09 }
 0x665   :  { %4476 = vrcp.f32 %v645_v11 }
 0x666   :  { %4478 = vrcp.f32 %v858_v12 }
 0x66b   :  { %v4477_v14 = vpop.eup %4476 }
 0x66c   :  { %v647_v10 = vmul.f32 %v4477_v14, %v641_v51  ;;  %v4479_v16 = vpop.eup %4478 }
 0x66d   :  { %v860_v17 = vmul.f32 %v4479_v16, %v854_v43 }
 0x66e   :  { %4185 = vmatmul.msk.f32.vlgmr.msrb.gmra.mxu1 %vm387_vm1, %v647_v10 }
 0x66f   :  { %4200 = vmatpush.msk.msrb.mxu1 %vm391_vm0, %v1065_v15 }
 0x676   :  { %4193 = vmatmul.msk.f32.vlgmr.msra.gmra.mxu1 %vm387_vm1, %v860_v17 }
 0x67e   :  { %4201 = vmatmul.msk.f32.vlgmr.msrb.gmra.mxu1 %vm387_vm1, %v5387_v1  ;;  %v890_v1 = vpop.permute.xlu0 %889 }
 0x67f   :  { %v893_v30 = vadd.f32 %v892_v28, %v890_v1 }
 0x681   :  { %v895_v32 = vmul.f32 0.2, %v893_v30  ;;  %vm894_vm12 = vcmp.gt.f32.partialorder %v893_v30, 0.0 }
 0x683   :  { %v896_v36 = vsel %vm894_vm12, %v893_v30, %v895_v32 }
 0x684   :  { %v897_v37 = vsel %vm800_vm9, %v896_v36, -inf }
 0x6b6   :  { %v5513_v18 = vpop.f32.mrf.mxu0 }
 0x6be   :  { %v5515_v19 = vpop.f32.mrf.mxu0 }
 0x6c6   :  { %v1026_v21 = vpop.f32.mrf.mxu0 }
 0x6c7   :  { %v5518_v22 = vadd.f32 %v4436_v20, %v1026_v21  ;;  %v5549_v20 = vld [vmem:[%s6330_s0] sm:$0x3f] }
 0x6c9   :  { %1030 = vrot.lane.b32.xlu1 %v5518_v22, %s5052_s5 }
 0x6eb   :  { %v5522_v23 = vpop.f32.mrf.mxu1 }
 0x6f3   :  { %v5524_v24 = vpop.f32.mrf.mxu1 }
 0x6fb   :  { %v1090_v26 = vpop.f32.mrf.mxu1 }
 0x6fc   :  { %v1091_v27 = vadd.f32 %v4437_v25, %v1090_v26 }
 0x6fe   :  { %1145 = vperm.xlu2 %4395, %v1091_v27   ;;  %1095 = vperm.xlu1 %4394, %v1091_v27  }
 0x727   :  { %898 = vmax.xlane.f32.xlu2 %v897_v37 }
 0x72f   :  { %947 = vmax.xlane.f32.xlu2 %v946_v41 }
 0x73b   :  { %v1031_v42 = vpop.permute.xlu1 %1030 }
 0x73c   :  { %1033 = vxpose.xlu1.b32.start.end [1/1] (short) (narrow) %v1031_v42, 8 }
 0x758   :  { %v1146_v43 = vpop.permute.xlu2 %1145 }
 0x770   :  { %v1096_v9 = vpop.permute.xlu1 %1095 }
 0x78f   :  { %4398 = vset.pattern.permute.xlu1 %v5050_v3 }
 0x79a   :  { %v899_v44 = vpop.xlane.xlu2 %898 }
 0x79b   :  { %v900_v45 = vsub.f32 %v896_v36, %v899_v44 }
 0x79d   :  { %v901_v46 = vmul.f32 1.442695, %v900_v45 }
 0x79f   :  { %4480 = vpow2.f32 %v901_v46 }
 0x7a2   :  { %v948_v13 = vpop.xlane.xlu2 %947 }
 0x7a3   :  { %v949_v47 = vsub.f32 %v945_v39, %v948_v13 }
 0x7a5   :  { %v4481_v48 = vpop.eup %4480  ;;  %v950_v49 = vmul.f32 1.442695, %v949_v47 }
 0x7a6   :  { %v903_v50 = vmul.f32 %v4481_v48, %v5480_v40 }
 0x7a7   :  { %4482 = vpow2.f32 %v950_v49 }
 0x7a8   :  { %v904_v51 = vsel %vm800_vm9, %v903_v50, 0.0 }
 0x7a9   :  { %905 = vadd.xlane.f32.xlu2 %v904_v51 }
 0x7ad   :  { %v4483_v52 = vpop.eup %4482 }
 0x7ae   :  { %v952_v53 = vmul.f32 %v4483_v52, %v5480_v40 }
 0x7b0   :  { %v953_v54 = vsel %vm800_vm9, %v952_v53, 0.0 }
 0x7b1   :  { %954 = vadd.xlane.f32.xlu2 %v953_v54 }
 0x7e0   :  { %v5536_v55 = vpop.trf.xlu1 }
 0x7e1   :  { %v1148_v59 = vperm.slane %v5536_v55, 1  ;;  %v1098_v61 = vperm.slane %v5536_v55, 0  ;;  %v1246_v39 = vperm.slane %v5536_v55, 3  ;;  %v1197_v46 = vperm.slane %v5536_v55, 2 }
 0x7e3   :  { %v1149_v63 = vadd.f32 %v1148_v59, %v1146_v43  ;;  %v1099_v0 = vadd.f32 %v1098_v61, %v1096_v9 }
 0x7e5   :  { %vm1150_vm15 = vcmp.gt.f32.partialorder %v1149_v63, 0.0  ;;  %v1151_v5 = vmul.f32 0.2, %v1149_v63  ;;  %vm1100_vm2 = vcmp.gt.f32.partialorder %v1099_v0, 0.0  ;;  %v1101_v31 = vmul.f32 0.2, %v1099_v0 }
 0x7e7   :  { %v1152_v2 = vsel %vm1150_vm15, %v1149_v63, %v1151_v5  ;;  %v1102_v6 = vsel %vm1100_vm2, %v1099_v0, %v1101_v31  ;;  %vm687_vm2 = vcmask 64512  }
 0x7e8   :  { %v1153_v40 = vsel %vm1103_vm14, %v1152_v2, -inf  ;;  %v1104_v7 = vsel %vm1103_vm14, %v1102_v6, -inf }
 0x7e9   :  { %1154 = vmax.xlane.f32.xlu1 %v1153_v40  ;;  %1105 = vmax.xlane.f32.xlu0 %v1104_v7 }
 0x7fd   :  { %910 = vrot.lane.b32.xlu0 %v5451_v62, %s5056_s22 }
 0x805   :  { %959 = vrot.lane.b32.xlu0 %v5451_v62, %s5057_s27 }
 0x80d   :  { %1194 = vperm.xlu0 %4392, %v1091_v27  }
 0x815   :  { %4396 = vset.pattern.permute.xlu0 %v5055_v57 }
 0x816   :  { %1243 = vperm.xlu0 %4396, %v1091_v27  }
 0x81c   :  { %v906_v12 = vpop.xlane.xlu2 %905 }
 0x81d   :  { %v907_v16 = vmax.f32 %v906_v12, 1e-09 }
 0x81e   :  { %4397 = vset.pattern.permute.xlu0 %v5051_v4 }
 0x824   :  { %v955_v62 = vpop.xlane.xlu2 %954 }
 0x825   :  { %v956_v26 = vmax.f32 %v955_v62, 1e-09  ;;  %v4438_v62 = vld [vmem:[%s6333_s12] ss:$0 sm:$0xff]  ;;  %s6352_s12 = sld [smem:[#allocation65_spill]] }
 0x85c   :  { %v1155_v8 = vpop.xlane.xlu1 %1154  ;;  %v1106_v11 = vpop.xlane.xlu0 %1105 }
 0x85d   :  { %v1107_v14 = vsub.f32 %v1102_v6, %v1106_v11  ;;  %v1156_v10 = vsub.f32 %v1152_v2, %v1155_v8 }
 0x85f   :  { %v1108_v15 = vmul.f32 1.442695, %v1107_v14  ;;  %v1157_v17 = vmul.f32 1.442695, %v1156_v10 }
 0x861   :  { %4484 = vpow2.f32 %v1108_v15 }
 0x862   :  { %4486 = vrcp.f32 %v907_v16  ;;  %v1371_v16 = vld [vmem:[%s6332_s1] sm:$0xf]  ;;  %s6350_s1 = sld [smem:[#allocation63_spill]] }
 0x863   :  { %4488 = vpow2.f32 %v1157_v17 }
 0x864   :  { %4490 = vrcp.f32 %v956_v26 }
 0x867   :  { %v4485_v21 = vpop.eup %4484 }
 0x868   :  { %v1110_v25 = vmul.f32 %v4485_v21, %v5549_v20  ;;  %v4487_v27 = vpop.eup %4486 }
 0x869   :  { %v4489_v28 = vpop.eup %4488  ;;  %v909_v30 = vmul.f32 %v4487_v27, %v903_v50  ;;  %v1307_v50 = vld [vmem:[%s6331_s17] sm:$0xf]  ;;  %s6349_s17 = sld [smem:[#allocation62_spill]] }
 0x86a   :  { %v1111_v1 = vsel %vm1103_vm14, %v1110_v25, 0.0  ;;  %v1159_v33 = vmul.f32 %v4489_v28, %v5549_v20  ;;  %v4491_v35 = vpop.eup %4490 }
 0x86b   :  { %1112 = vadd.xlane.f32.xlu2 %v1111_v1  ;;  %v958_v36 = vmul.f32 %v4491_v35, %v952_v53 }
 0x86c   :  { %v1160_v34 = vsel %vm1103_vm14, %v1159_v33, 0.0 }
 0x86f   :  { %v911_v32 = vpop.permute.xlu0 %910 }
 0x870   :  { %4194 = vmatpush.msk.msra.mxu2 %vm391_vm0, %v911_v32 }
 0x871   :  { %4195 = vmatmul.msk.f32.vlgmr.msra.gmra.mxu2 %vm387_vm1, %v909_v30 }
 0x872   :  { %4202 = vmatpush.msk.msrb.mxu2 %vm1121_vm4, %v5518_v22 }
 0x873   :  { %1161 = vadd.xlane.f32.xlu2 %v1160_v34 }
 0x874   :  { %4210 = vmatpush.msk.msra.mxu2 %vm766_vm5, %v1307_v50 }
 0x877   :  { %v960_v37 = vpop.permute.xlu0 %959 }
 0x878   :  { %4196 = vmatpush.msk.msra.mxu3 %vm391_vm0, %v960_v37  ;;  %v4439_v37 = vld [vmem:[%s6334_s19] ss:$0 sm:$0xff]  ;;  %s5061_s19 = smov 124  }
 0x879   :  { %4197 = vmatmul.msk.f32.vlgmr.msra.gmra.mxu3 %vm387_vm1, %v958_v36 }
 0x87f   :  { %v1195_v38 = vpop.permute.xlu0 %1194 }
 0x880   :  { %v1198_v13 = vadd.f32 %v1197_v46, %v1195_v38 }
 0x882   :  { %v1200_v47 = vmul.f32 0.2, %v1198_v13  ;;  %vm1199_vm8 = vcmp.gt.f32.partialorder %v1198_v13, 0.0 }
 0x884   :  { %v1201_v48 = vsel %vm1199_vm8, %v1198_v13, %v1200_v47  ;;  %vm691_vm8 = vcmask 195584  }
 0x885   :  { %v1202_v49 = vsel %vm1103_vm14, %v1201_v48, -inf }
 0x888   :  { %v1244_v41 = vpop.permute.xlu0 %1243 }
 0x889   :  { %v1247_v42 = vadd.f32 %v1246_v39, %v1244_v41 }
 0x88b   :  { %vm1248_vm6 = vcmp.gt.f32.partialorder %v1247_v42, 0.0  ;;  %v1249_v43 = vmul.f32 0.2, %v1247_v42  ;;  %1166 = vrot.lane.b32.xlu2 %v5518_v22, %s5054_s30 }
 0x88d   :  { %v1250_v44 = vsel %vm1248_vm6, %v1247_v42, %v1249_v43  ;;  %vm689_vm6 = vcmask 130048  }
 0x88e   :  { %v1251_v45 = vsel %vm1103_vm14, %v1250_v44, -inf }
 0x88f   :  { %1252 = vmax.xlane.f32.xlu0 %v1251_v45 }
 0x8b4   :  { %1203 = vmax.xlane.f32.xlu2 %v1202_v49 }
 0x8de   :  { %v1113_v51 = vpop.xlane.xlu2 %1112 }
 0x8df   :  { %v1114_v52 = vmax.f32 %v1113_v51, 1e-09 }
 0x8e1   :  { %4492 = vrcp.f32 %v1114_v52 }
 0x8e6   :  { %v1162_v53 = vpop.xlane.xlu2 %1161 }
 0x8e7   :  { %v4493_v54 = vpop.eup %4492  ;;  %v1163_v9 = vmax.f32 %v1162_v53, 1e-09 }
 0x8e8   :  { %v1116_v59 = vmul.f32 %v4493_v54, %v1110_v25 }
 0x8e9   :  { %4494 = vrcp.f32 %v1163_v9 }
 0x8ea   :  { %4203 = vmatmul.msk.f32.vlgmr.msrb.gmra.mxu2 %vm1117_vm10, %v1116_v59 }
 0x8ee   :  { %v1167_v55 = vpop.permute.xlu2 %1166 }
 0x8ef   :  { %v4495_v61 = vpop.eup %4494  ;;  %4204 = vmatpush.msk.msrb.mxu3 %vm1121_vm4, %v1167_v55 }
 0x8f0   :  { %v1165_v63 = vmul.f32 %v4495_v61, %v1159_v33 }
 0x8f1   :  { %4212 = vmatpush.msk.msra.mxu3 %vm766_vm5, %v1371_v16  ;;  %vm1409_vm5 = vcmask 18432  }
 0x8f2   :  { %4205 = vmatmul.msk.f32.vlgmr.msrb.gmra.mxu3 %vm1117_vm10, %v1165_v63  ;;  %4211 = vmatmul.msk.f32.vlgmr.msra.gmra.mxu2 %vm762_vm7, %v5441_v56  ;;  %v5626_v63 = vld [vmem:[%s6335_s7] sm:$0x7] }
 0x8f4   :  { %v5582_v15 = vpop.f32.mrf.mxu2 }
 0x8fa   :  { %4213 = vmatmul.msk.f32.vlgmr.msra.gmra.mxu3 %vm762_vm7, %v5441_v56 }
 0x8fc   :  { %v5601_v34 = vpop.f32.mrf.mxu3 }
 0x902   :  { %v1253_v0 = vpop.xlane.xlu0 %1252 }
 0x903   :  { %v1254_v5 = vsub.f32 %v1250_v44, %v1253_v0 }
 0x905   :  { %v1255_v31 = vmul.f32 1.442695, %v1254_v5 }
 0x907   :  { %4496 = vpow2.f32 %v1255_v31 }
 0x90d   :  { %v4497_v2 = vpop.eup %4496 }
 0x90e   :  { %v1257_v6 = vmul.f32 %v4497_v2, %v5549_v20 }
 0x910   :  { %v1258_v40 = vsel %vm1103_vm14, %v1257_v6, 0.0 }
 0x911   :  { %1259 = vadd.xlane.f32.xlu2 %v1258_v40 }
 0x927   :  { %v1204_v7 = vpop.xlane.xlu2 %1203 }
 0x928   :  { %v1205_v8 = vsub.f32 %v1201_v48, %v1204_v7 }
 0x929   :  { %1264 = vrot.lane.b32.xlu2 %v5518_v22, %s5057_s27 }
 0x92a   :  { %v1206_v11 = vmul.f32 1.442695, %v1205_v8 }
 0x92c   :  { %4498 = vpow2.f32 %v1206_v11 }
 0x932   :  { %v4499_v12 = vpop.eup %4498 }
 0x933   :  { %v1208_v14 = vmul.f32 %v4499_v12, %v5549_v20 }
 0x935   :  { %v1209_v10 = vsel %vm1103_vm14, %v1208_v14, 0.0 }
 0x936   :  { %1210 = vadd.xlane.f32.xlu1 %v1209_v10 }
 0x94f   :  { %1215 = vrot.lane.b32.xlu1 %v5518_v22, %s5056_s22 }
 0x96d   :  { %v5585_v17 = vpop.f32.mrf.mxu2 }
 0x975   :  { %v1332_v21 = vpop.f32.mrf.mxu2  ;;  %v1190_v35 = vpop.f32.mrf.mxu3 }
 0x976   :  { %v5591_v25 = vadd.f32 %v4438_v62, %v1332_v21 }
 0x978   :  { %1336 = vrot.lane.b32.xlu0 %v5591_v25, %s5052_s5 }
 0x97d   :  { %v1396_v38 = vpop.f32.mrf.mxu3 }
 0x97e   :  { %v1397_v39 = vadd.f32 %v4439_v37, %v1396_v38  ;;  %v1614_v37 = vld [vmem:[%s6336_s10 + $0x8] sm:$0xff] }
 0x97f   :  { %v1682_v38 = vld [vmem:[%s6337_s15 + $0x8] sm:$0xff] }
 0x980   :  { %1449 = vperm.xlu1 %4398, %v1397_v39   ;;  %1401 = vperm.xlu0 %4397, %v1397_v39  }
 0x984   :  { %v1260_v20 = vpop.xlane.xlu2 %1259 }
 0x985   :  { %v1261_v26 = vmax.f32 %v1260_v20, 1e-09 }
 0x987   :  { %4500 = vrcp.f32 %v1261_v26 }
 0x988   :  { %4399 = vset.pattern.permute.xlu0 %v5053_v29 }
 0x98c   :  { %v1265_v22 = vpop.permute.xlu2 %1264 }
 0x98d   :  { %v4501_v27 = vpop.eup %4500  ;;  %4208 = vmatpush.msk.msra.mxu1 %vm1121_vm4, %v1265_v22 }
 0x98e   :  { %v1263_v1 = vmul.f32 %v4501_v27, %v1257_v6 }
 0x990   :  { %4209 = vmatmul.msk.f32.vlgmr.msra.gmra.mxu1 %vm1117_vm10, %v1263_v1 }
 0x9a9   :  { %v1211_v28 = vpop.xlane.xlu1 %1210 }
 0x9aa   :  { %v1212_v56 = vmax.f32 %v1211_v28, 1e-09 }
 0x9ac   :  { %4502 = vrcp.f32 %v1212_v56 }
 0x9b2   :  { %v4503_v30 = vpop.eup %4502 }
 0x9b3   :  { %v1214_v32 = vmul.f32 %v4503_v30, %v1208_v14  ;;  %v1616_v30 = vld [vmem:[%s6336_s10 + $0x18] sm:$0xff] }
 0x9c1   :  { %v1216_v33 = vpop.permute.xlu1 %1215 }
 0x9c2   :  { %4206 = vmatpush.msk.msra.mxu0 %vm1121_vm4, %v1216_v33  ;;  %v1615_v33 = vld [vmem:[%s6336_s10 + $0x10] sm:$0xff] }
 0x9c3   :  { %4207 = vmatmul.msk.f32.vlgmr.msra.gmra.mxu0 %vm1117_vm10, %v1214_v32  ;;  %v1684_v32 = vld [vmem:[%s6337_s15 + $0x18] sm:$0xff] }
 0x9c4   :  { %4214 = vmatpush.msk.msrb.mxu0 %vm1121_vm4, %v5591_v25 }
 0x9c6   :  { %1637 = vmatpush.msra.mxu0 %v1616_v30 }
 0x9c8   :  { %1638 = vmatpush.msra.mxu0 %v1615_v33 }
 0x9ca   :  { %1639 = vmatpush.msra.mxu0 %v1614_v37 }
 0x9ea   :  { %v1337_v36 = vpop.permute.xlu0 %1336 }
 0x9eb   :  { %1339 = vxpose.xlu2.b32.start.end [1/1] (short) (narrow) %v1337_v36, 8 }
 0x9f2   :  { %v1450_v41 = vpop.permute.xlu1 %1449  ;;  %v1402_v43 = vpop.permute.xlu0 %1401 }
 0xa0d   :  { %v1288_v54 = vpop.f32.mrf.mxu1 }
 0xa40   :  { %v1239_v53 = vpop.f32.mrf.mxu0 }
 0xa4d   :  { %4401 = vset.pattern.permute.xlu2 %v5051_v4 }
 0xa84   :  { %v5606_v42 = vpop.trf.xlu2 }
 0xa85   :  { %v1452_v44 = vperm.slane %v5606_v42, 1  ;;  %v1404_v45 = vperm.slane %v5606_v42, 0  ;;  %v1501_v12 = vperm.slane %v5606_v42, 2  ;;  %v1550_v20 = vperm.slane %v5606_v42, 3 }
 0xa87   :  { %v1453_v46 = vadd.f32 %v1452_v44, %v1450_v41  ;;  %v1405_v13 = vadd.f32 %v1404_v45, %v1402_v43  ;;  %v1681_v41 = vld [vmem:[%s6337_s15] sm:$0xff] }
 0xa89   :  { %vm1454_vm11 = vcmp.gt.f32.partialorder %v1453_v46, 0.0  ;;  %v1455_v47 = vmul.f32 0.2, %v1453_v46  ;;  %vm1406_vm12 = vcmp.gt.f32.partialorder %v1405_v13, 0.0  ;;  %v1407_v48 = vmul.f32 0.2, %v1405_v13 }
 0xa8b   :  { %v1456_v49 = vsel %vm1454_vm11, %v1453_v46, %v1455_v47  ;;  %v1408_v50 = vsel %vm1406_vm12, %v1405_v13, %v1407_v48  ;;  %vm1621_vm11 = vcmask 261120  }
 0xa8c   :  { %v1457_v51 = vsel %vm1409_vm5, %v1456_v49, -inf  ;;  %v1410_v52 = vsel %vm1409_vm5, %v1408_v50, -inf }
 0xa8d   :  { %1458 = vmax.xlane.f32.xlu0 %v1457_v51  ;;  %1411 = vmax.xlane.f32.xlu1 %v1410_v52 }
 0xaa1   :  { %1292 = vrot.lane.b32.xlu0 %v1190_v35, %s5058_s28  ;;  %v1683_v35 = vld [vmem:[%s6337_s15 + $0x10] sm:$0xff]  ;;  %s5062_s15 = smov 116  }
 0xaa6   :  { %676 = vrot.lane.b32.xlu1 %v5449_v60, %s5058_s28 }
 0xaa9   :  { %1296 = vrot.lane.b32.xlu0 %v1239_v53, %s5059_s2 }
 0xaae   :  { %680 = vrot.lane.b32.xlu1 %v5513_v18, %s5059_s2 }
 0xab1   :  { %1300 = vrot.lane.b32.xlu0 %v1288_v54, %s5060_s24 }
 0xab6   :  { %684 = vrot.lane.b32.xlu1 %v5522_v23, %s5060_s24 }
 0xab9   :  { %1470 = vrot.lane.b32.xlu0 %v5591_v25, %s5054_s30 }
 0xac1   :  { %1498 = vperm.xlu0 %4399, %v1397_v39  }
 0xac9   :  { %4400 = vset.pattern.permute.xlu0 %v5055_v57 }
 0xaca   :  { %1547 = vperm.xlu0 %4400, %v1397_v39   ;;  %v1613_v39 = vld [vmem:[%s6336_s10] sm:$0xff]  ;;  %s6353_s10 = sld [smem:[#allocation66_spill]] }
 0xacb   :  { %1640 = vmatpush.msra.mxu0 %v1613_v39 }
 0xad2   :  { %4404 = vset.pattern.permute.xlu0 %v5051_v4 }
 0xb00   :  { %v1412_v60 = vpop.xlane.xlu1 %1411  ;;  %v1459_v9 = vpop.xlane.xlu0 %1458 }
 0xb01   :  { %v1413_v18 = vsub.f32 %v1408_v50, %v1412_v60  ;;  %v1460_v59 = vsub.f32 %v1456_v49, %v1459_v9 }
 0xb03   :  { %v1414_v55 = vmul.f32 1.442695, %v1413_v18  ;;  %v1461_v61 = vmul.f32 1.442695, %v1460_v59 }
 0xb05   :  { %4504 = vpow2.f32 %v1414_v55 }
 0xb06   :  { %4506 = vpow2.f32 %v1461_v61 }
 0xb0b   :  { %v4505_v23 = vpop.eup %4504 }
 0xb0c   :  { %v4507_v0 = vpop.eup %4506  ;;  %v5629_v5 = vmul.f32 %v4505_v23, %v5626_v63 }
 0xb0d   :  { %v5632_v31 = vmul.f32 %v4507_v0, %v5626_v63 }
 0xb0e   :  { %v1417_v2 = vsel %vm1409_vm5, %v5629_v5, 0.0 }
 0xb0f   :  { %1418 = vadd.xlane.f32.xlu2 %v1417_v2  ;;  %v1464_v6 = vsel %vm1409_vm5, %v5632_v31, 0.0 }
 0xb10   :  { %1465 = vadd.xlane.f32.xlu1 %v1464_v6 }
 0xb13   :  { %v1293_v40 = vpop.permute.xlu0 %1292 }
 0xb14   :  { %v1303_v51 = vsel %vm687_vm2, %v5585_v17, %v1293_v40 }
 0xb18   :  { %v677_v56 = vpop.permute.xlu1 %676 }
 0xb19   :  { %v688_v47 = vsel %vm687_vm2, %v5446_v58, %v677_v56 }
 0xb1b   :  { %v1297_v7 = vpop.permute.xlu0 %1296 }
 0xb1c   :  { %v1304_v54 = vsel %vm689_vm6, %v1303_v51, %v1297_v7 }
 0xb20   :  { %v681_v36 = vpop.permute.xlu1 %680 }
 0xb21   :  { %v690_v49 = vsel %vm689_vm6, %v688_v47, %v681_v36 }
 0xb23   :  { %v1301_v8 = vpop.permute.xlu0 %1300 }
 0xb24   :  { %v1305_v58 = vsel %vm691_vm8, %v1304_v54, %v1301_v8 }
 0xb27   :  { %1519 = vrot.lane.b32.xlu2 %v5591_v25, %s5056_s22 }
 0xb28   :  { %v685_v42 = vpop.permute.xlu1 %684 }
 0xb29   :  { %v692_v52 = vsel %vm691_vm8, %v690_v49, %v685_v42 }
 0xb2a   :  { %v1306_v60 = vadd.f32 %v1305_v58, %v692_v52 }
 0xb2b   :  { %v1471_v11 = vpop.permute.xlu0 %1470 }
 0xb2c   :  { %4216 = vmatpush.msk.msrb.mxu1 %vm1121_vm4, %v1471_v11  ;;  %v5668_v9 = vmax.f32 %v1306_v60, 0.0 }
 0xb2e   :  { %1701 = vmatpush.msra.mxu1 %v1684_v32 }
 0xb30   :  { %1702 = vmatpush.msra.mxu1 %v1683_v35 }
 0xb32   :  { %1703 = vmatpush.msra.mxu1 %v1682_v38 }
 0xb33   :  { %v1499_v14 = vpop.permute.xlu0 %1498 }
 0xb34   :  { %v1502_v10 = vadd.f32 %v1501_v12, %v1499_v14  ;;  %1704 = vmatpush.msra.mxu1 %v1681_v41  ;;  %v4440_v12 = vld [vmem:[%s6338_s4] ss:$0 sm:$0xff]  ;;  %s5063_s4 = smov 4  }
 0xb35   :  { %v4441_v14 = vld [vmem:[%s6339_s13] ss:$0 sm:$0xff]  ;;  %s5064_s13 = smov 12  }
 0xb36   :  { %vm1503_vm13 = vcmp.gt.f32.partialorder %v1502_v10, 0.0  ;;  %v1504_v16 = vmul.f32 0.2, %v1502_v10 }
 0xb38   :  { %v1505_v62 = vsel %vm1503_vm13, %v1502_v10, %v1504_v16 }
 0xb39   :  { %v1506_v21 = vsel %vm1409_vm5, %v1505_v62, -inf }
 0xb3a   :  { %1507 = vmax.xlane.f32.xlu0 %v1506_v21 }
 0xb3c   :  { %v1548_v26 = vpop.permute.xlu0 %1547 }
 0xb3d   :  { %v1551_v22 = vadd.f32 %v1550_v20, %v1548_v26 }
 0xb3f   :  { %vm1552_vm15 = vcmp.gt.f32.partialorder %v1551_v22, 0.0  ;;  %v1553_v27 = vmul.f32 0.2, %v1551_v22 }
 0xb41   :  { %v1554_v1 = vsel %vm1552_vm15, %v1551_v22, %v1553_v27 }
 0xb42   :  { %v1555_v28 = vsel %vm1409_vm5, %v1554_v1, -inf }
 0xb43   :  { %1556 = vmax.xlane.f32.xlu1 %v1555_v28 }
 0xb5c   :  { %1568 = vrot.lane.b32.xlu1 %v5591_v25, %s5057_s27 }
 0xb82   :  { %v1419_v25 = vpop.xlane.xlu2 %1418 }
 0xb83   :  { %v1420_v43 = vmax.f32 %v1419_v25, 1e-09  ;;  %v1466_v44 = vpop.xlane.xlu1 %1465 }
 0xb84   :  { %v1467_v45 = vmax.f32 %v1466_v44, 1e-09 }
 0xb85   :  { %4508 = vrcp.f32 %v1420_v43 }
 0xb86   :  { %4510 = vrcp.f32 %v1467_v45 }
 0xb8a   :  { %v1520_v46 = vpop.permute.xlu2 %1519 }
 0xb8b   :  { %v4509_v13 = vpop.eup %4508  ;;  %4218 = vmatpush.msk.msrb.mxu2 %vm1121_vm4, %v1520_v46 }
 0xb8c   :  { %v4511_v48 = vpop.eup %4510  ;;  %v1422_v50 = vmul.f32 %v4509_v13, %v5629_v5 }
 0xb8d   :  { %v1469_v53 = vmul.f32 %v4511_v48, %v5632_v31 }
 0xb8e   :  { %4215 = vmatmul.msk.f32.vlgmr.msrb.gmra.mxu0 %vm1117_vm10, %v1422_v50 }
 0xb8f   :  { %4217 = vmatmul.msk.f32.vlgmr.msrb.gmra.mxu1 %vm1117_vm10, %v1469_v53  ;;  %v5713_v53 = vld [vmem:[%s6319_s29] sm:$0x3f] }
 0xb96   :  { %4222 = vmatmul.msk.f32.vlgmr.msra.gmra.mxu0 %vm1621_vm11, %v5668_v9 }
 0xb97   :  { %4223 = vmatmul.msk.f32.vlgmr.msra.gmra.mxu1 %vm1621_vm11, %v5668_v9 }
 0xbad   :  { %v1508_v17 = vpop.xlane.xlu0 %1507 }
 0xbae   :  { %v1509_v18 = vsub.f32 %v1505_v62, %v1508_v17 }
 0xbb0   :  { %v1510_v59 = vmul.f32 1.442695, %v1509_v18  ;;  %v1922_v18 = vld [vmem:[%s6340_s3 + $0x18] sm:$0xff] }
 0xbb2   :  { %4512 = vpow2.f32 %v1510_v59  ;;  %v1921_v59 = vld [vmem:[%s6340_s3 + $0x10] sm:$0xff] }
 0xbb6   :  { %v1557_v55 = vpop.xlane.xlu1 %1556 }
 0xbb7   :  { %v1558_v61 = vsub.f32 %v1554_v1, %v1557_v55 }
 0xbb8   :  { %v4513_v23 = vpop.eup %4512 }
 0xbb9   :  { %v1559_v0 = vmul.f32 1.442695, %v1558_v61  ;;  %v1512_v5 = vmul.f32 %v4513_v23, %v5626_v63  ;;  %v1920_v61 = vld [vmem:[%s6340_s3 + $0x8] sm:$0xff]  ;;  %v1919_v23 = vld [vmem:[%s6340_s3] sm:$0xff] }
 0xbbb   :  { %4514 = vpow2.f32 %v1559_v0  ;;  %v1513_v31 = vsel %vm1409_vm5, %v1512_v5, 0.0  ;;  %v1986_v0 = vld [vmem:[%s6341_s8 + $0x18] sm:$0xff] }
 0xbbc   :  { %1514 = vadd.xlane.f32.xlu1 %v1513_v31  ;;  %v1985_v31 = vld [vmem:[%s6341_s8 + $0x10] sm:$0xff] }
 0xbc1   :  { %v4515_v2 = vpop.eup %4514 }
 0xbc2   :  { %v1561_v6 = vmul.f32 %v4515_v2, %v5626_v63  ;;  %v1984_v2 = vld [vmem:[%s6341_s8 + $0x8] sm:$0xff] }
 0xbc4   :  { %v1562_v40 = vsel %vm1409_vm5, %v1561_v6, 0.0 }
 0xbc5   :  { %1563 = vadd.xlane.f32.xlu1 %v1562_v40 }
 0xbce   :  { %v1569_v7 = vpop.permute.xlu1 %1568 }
 0xbcf   :  { %4220 = vmatpush.msk.msrb.mxu3 %vm1121_vm4, %v1569_v7 }
 0xc0b   :  { %v5679_v8 = vpop.f32.mrf.mxu0 }
 0xc0c   :  { %v1494_v11 = vpop.f32.mrf.mxu1 }
 0xc13   :  { %v1642_v10 = vpop.f32.mrf.mxu0 }
 0xc14   :  { %v5683_v16 = vadd.f32 %v4440_v12, %v1642_v10  ;;  %v1706_v62 = vpop.f32.mrf.mxu1 }
 0xc15   :  { %v5685_v21 = vadd.f32 %v4441_v14, %v1706_v62 }
 0xc16   :  { %4224 = vmatpush.msk.msra.mxu2 %vm391_vm0, %v5683_v16  ;;  %1646 = vrot.lane.b32.xlu0 %v5683_v16, %s5052_s5 }
 0xc17   :  { %1711 = vperm.xlu2 %4401, %v5685_v21   ;;  %1758 = vperm.xlu1 %4398, %v5685_v21  }
 0xc1f   :  { %4402 = vset.pattern.permute.xlu1 %v5053_v29 }
 0xc2f   :  { %v1515_v63 = vpop.xlane.xlu1 %1514 }
 0xc30   :  { %v1516_v20 = vmax.f32 %v1515_v63, 1e-09 }
 0xc32   :  { %4516 = vrcp.f32 %v1516_v20 }
 0xc38   :  { %v4517_v26 = vpop.eup %4516  ;;  %v1564_v22 = vpop.xlane.xlu1 %1563 }
 0xc39   :  { %v1518_v27 = vmul.f32 %v4517_v26, %v1512_v5  ;;  %v1565_v1 = vmax.f32 %v1564_v22, 1e-09 }
 0xc3b   :  { %4518 = vrcp.f32 %v1565_v1  ;;  %4219 = vmatmul.msk.f32.vlgmr.msrb.gmra.mxu2 %vm1117_vm10, %v1518_v27 }
 0xc3c   :  { %1939 = vmatpush.msrb.mxu2 %v1922_v18 }
 0xc3e   :  { %1940 = vmatpush.msrb.mxu2 %v1921_v59 }
 0xc40   :  { %1941 = vmatpush.msrb.mxu2 %v1920_v61 }
 0xc41   :  { %v4519_v28 = vpop.eup %4518 }
 0xc42   :  { %v1567_v56 = vmul.f32 %v4519_v28, %v1561_v6  ;;  %1942 = vmatpush.msrb.mxu2 %v1919_v23  ;;  %v1983_v6 = vld [vmem:[%s6341_s8] sm:$0xff] }
 0xc44   :  { %4221 = vmatmul.msk.f32.vlgmr.msrb.gmra.mxu3 %vm1117_vm10, %v1567_v56 }
 0xc71   :  { %v1712_v32 = vpop.permute.xlu2 %1711 }
 0xc88   :  { %v1647_v30 = vpop.permute.xlu0 %1646 }
 0xc89   :  { %1649 = vxpose.xlu2.b32.start.end [1/1] (short) (narrow) %v1647_v30, 8  ;;  %v1759_v37 = vpop.permute.xlu1 %1758 }
 0xcbe   :  { %v1543_v46 = vpop.f32.mrf.mxu2 }
 0xcc7   :  { %v1592_v17 = vpop.f32.mrf.mxu3 }
 0xd22   :  { %v5696_v33 = vpop.trf.xlu2 }
 0xd23   :  { %v1761_v35 = vperm.slane %v5696_v33, 1  ;;  %v1714_v36 = vperm.slane %v5696_v33, 0 }
 0xd25   :  { %v1762_v38 = vadd.f32 %v1761_v35, %v1759_v37  ;;  %v1715_v39 = vadd.f32 %v1714_v36, %v1712_v32  ;;  %v4442_v37 = vld [vmem:[%s6342_s6] ss:$0 sm:$0xff] }
 0xd27   :  { %vm1763_vm12 = vcmp.gt.f32.partialorder %v1762_v38, 0.0  ;;  %v1764_v41 = vmul.f32 0.2, %v1762_v38  ;;  %vm1716_vm13 = vcmp.gt.f32.partialorder %v1715_v39, 0.0  ;;  %v1717_v42 = vmul.f32 0.2, %v1715_v39 }
 0xd29   :  { %v1765_v25 = vsel %vm1763_vm12, %v1762_v38, %v1764_v41  ;;  %v1718_v43 = vsel %vm1716_vm13, %v1715_v39, %v1717_v42  ;;  %v4443_v41 = vld [vmem:[%s6343_s11] ss:$0 sm:$0xff] }
 0xd2a   :  { %v1766_v44 = vsel %vm489_vm3, %v1765_v25, -inf  ;;  %v1719_v45 = vsel %vm489_vm3, %v1718_v43, -inf }
 0xd2b   :  { %1767 = vmax.xlane.f32.xlu0 %v1766_v44  ;;  %1720 = vmax.xlane.f32.xlu1 %v1719_v45  ;;  %v1810_v44 = vperm.slane %v5696_v33, 2 }
 0xd3f   :  { %1779 = vrot.lane.b32.xlu0 %v5683_v16, %s5054_s30 }
 0xd44   :  { %987 = vrot.lane.b32.xlu1 %v5524_v24, %s5058_s28 }
 0xd47   :  { %1596 = vrot.lane.b32.xlu0 %v1494_v11, %s5058_s28 }
 0xd4c   :  { %1600 = vrot.lane.b32.xlu1 %v1543_v46, %s5059_s2 }
 0xd4f   :  { %991 = vrot.lane.b32.xlu0 %v5582_v15, %s5059_s2 }
 0xd57   :  { %995 = vrot.lane.b32.xlu0 %v5601_v34, %s5060_s24 }
 0xd9e   :  { %v1768_v13 = vpop.xlane.xlu0 %1767  ;;  %v1721_v47 = vpop.xlane.xlu1 %1720 }
 0xd9f   :  { %v1769_v48 = vsub.f32 %v1765_v25, %v1768_v13  ;;  %v1722_v49 = vsub.f32 %v1718_v43, %v1721_v47 }
 0xda1   :  { %v1770_v50 = vmul.f32 1.442695, %v1769_v48  ;;  %v1723_v51 = vmul.f32 1.442695, %v1722_v49 }
 0xda3   :  { %4520 = vpow2.f32 %v1770_v50 }
 0xda4   :  { %4522 = vpow2.f32 %v1723_v51 }
 0xda9   :  { %v4521_v24 = vpop.eup %4520 }
 0xdaa   :  { %v4523_v52 = vpop.eup %4522  ;;  %v1772_v54 = vmul.f32 %v5713_v53, %v4521_v24 }
 0xdab   :  { %v1725_v15 = vmul.f32 %v5713_v53, %v4523_v52 }
 0xdac   :  { %v1773_v34 = vsel %vm489_vm3, %v1772_v54, 0.0 }
 0xdad   :  { %1774 = vadd.xlane.f32.xlu1 %v1773_v34  ;;  %v1726_v58 = vsel %vm489_vm3, %v1725_v15, 0.0 }
 0xdae   :  { %1727 = vadd.xlane.f32.xlu2 %v1726_v58  ;;  %v1859_v58 = vperm.slane %v5696_v33, 3 }
 0xdb1   :  { %v1780_v60 = vpop.permute.xlu0 %1779 }
 0xdb2   :  { %4226 = vmatpush.msk.msra.mxu3 %vm391_vm0, %v1780_v60 }
 0xdb4   :  { %2006 = vmatpush.msrb.mxu3 %v1986_v0 }
 0xdb6   :  { %v988_v55 = vpop.permute.xlu1 %987  ;;  %2007 = vmatpush.msrb.mxu3 %v1985_v31 }
 0xdb7   :  { %v998_v22 = vsel %vm687_vm2, %v5515_v19, %v988_v55 }
 0xdb8   :  { %2008 = vmatpush.msrb.mxu3 %v1984_v2 }
 0xdb9   :  { %v1597_v12 = vpop.permute.xlu0 %1596 }
 0xdba   :  { %2009 = vmatpush.msrb.mxu3 %v1983_v6  ;;  %v1607_v27 = vsel %vm687_vm2, %v5679_v8, %v1597_v12 }
 0xdbe   :  { %v1601_v5 = vpop.permute.xlu1 %1600 }
 0xdbf   :  { %v1608_v1 = vsel %vm689_vm6, %v1607_v27, %v1601_v5 }
 0xdc1   :  { %v992_v20 = vpop.permute.xlu0 %991 }
 0xdc2   :  { %v999_v28 = vsel %vm689_vm6, %v998_v22, %v992_v20 }
 0xdc6   :  { %1604 = vrot.lane.b32.xlu1 %v1592_v17, %s5060_s24 }
 0xdc9   :  { %v996_v26 = vpop.permute.xlu0 %995 }
 0xdca   :  { %v1000_v30 = vsel %vm691_vm8, %v999_v28, %v996_v26 }
 0xdce   :  { %1807 = vperm.xlu1 %4402, %v5685_v21  }
 0xdd6   :  { %4403 = vset.pattern.permute.xlu1 %v5055_v57 }
 0xdd7   :  { %1856 = vperm.xlu1 %4403, %v5685_v21  }
 0xddf   :  { %4405 = vset.pattern.permute.xlu1 %v5050_v3 }
 0xe20   :  { %v1775_v40 = vpop.xlane.xlu1 %1774 }
 0xe21   :  { %v1728_v7 = vpop.xlane.xlu2 %1727  ;;  %v1776_v11 = vmax.f32 %v1775_v40, 1e-09 }
 0xe22   :  { %v1729_v14 = vmax.f32 %v1728_v7, 1e-09 }
 0xe23   :  { %4524 = vrcp.f32 %v1776_v11 }
 0xe24   :  { %4526 = vrcp.f32 %v1729_v14 }
 0xe29   :  { %v4525_v10 = vpop.eup %4524 }
 0xe2a   :  { %v4527_v62 = vpop.eup %4526  ;;  %v1778_v21 = vmul.f32 %v4525_v10, %v1772_v54 }
 0xe2b   :  { %v1731_v63 = vmul.f32 %v4527_v62, %v1725_v15 }
 0xe2c   :  { %4227 = vmatmul.msk.f32.vlgmr.msra.gmra.mxu3 %vm387_vm1, %v1778_v21 }
 0xe2d   :  { %4225 = vmatmul.msk.f32.vlgmr.msra.gmra.mxu2 %vm387_vm1, %v1731_v63 }
 0xe35   :  { %4232 = vmatmul.msk.f32.vlgmr.msrb.gmra.mxu2 %vm1621_vm11, %v5668_v9 }
 0xe38   :  { %v1605_v56 = vpop.permute.xlu1 %1604 }
 0xe39   :  { %v1609_v32 = vsel %vm691_vm8, %v1608_v1, %v1605_v56 }
 0xe3a   :  { %v1610_v35 = vadd.f32 %v1609_v32, %v1000_v30 }
 0xe3c   :  { %v5745_v36 = vmax.f32 %v1610_v35, 0.0  ;;  %v5790_v35 = vld [vmem:[%s6325_s18] sm:$0x7] }
 0xe3e   :  { %4233 = vmatmul.msk.f32.vlgmr.msrb.gmra.mxu3 %vm1621_vm11, %v5745_v36 }
 0xe40   :  { %v1808_v43 = vpop.permute.xlu1 %1807 }
 0xe41   :  { %v1811_v45 = vadd.f32 %v1810_v44, %v1808_v43 }
 0xe43   :  { %v1813_v46 = vmul.f32 0.2, %v1811_v45  ;;  %vm1812_vm15 = vcmp.gt.f32.partialorder %v1811_v45, 0.0 }
 0xe45   :  { %v1814_v13 = vsel %vm1812_vm15, %v1811_v45, %v1813_v46 }
 0xe46   :  { %v1815_v47 = vsel %vm489_vm3, %v1814_v13, -inf }
 0xe49   :  { %v1857_v49 = vpop.permute.xlu1 %1856 }
 0xe4a   :  { %v1860_v60 = vadd.f32 %v1859_v58, %v1857_v49  ;;  %v2224_v49 = vld [vmem:[%s6344_s16] sm:$0xff] }
 0xe4c   :  { %v1862_v17 = vmul.f32 0.2, %v1860_v60  ;;  %vm1861_vm12 = vcmp.gt.f32.partialorder %v1860_v60, 0.0 }
 0xe4e   :  { %v1863_v18 = vsel %vm1861_vm12, %v1860_v60, %v1862_v17  ;;  %v2291_v17 = vld [vmem:[%s6345_s23 + $0x18] sm:$0xff] }
 0xe4f   :  { %v1864_v59 = vsel %vm489_vm3, %v1863_v18, -inf }
 0xeaf   :  { %v5752_v8 = vpop.f32.mrf.mxu3 }
 0xeb0   :  { %v5749_v19 = vpop.f32.mrf.mxu2 }
 0xeb8   :  { %v1944_v38 = vpop.f32.mrf.mxu2 }
 0xeb9   :  { %v5754_v39 = vadd.f32 %v4442_v37, %v1944_v38 }
 0xebb   :  { %1948 = vrot.lane.b32.xlu0 %v5754_v39, %s5052_s5 }
 0xec1   :  { %v2011_v42 = vpop.f32.mrf.mxu3 }
 0xec2   :  { %v5759_v25 = vadd.f32 %v4443_v41, %v2011_v42 }
 0xec4   :  { %2063 = vperm.xlu1 %4405, %v5759_v25   ;;  %2016 = vperm.xlu0 %4404, %v5759_v25  }
 0xecc   :  { %4406 = vset.pattern.permute.xlu1 %v5053_v29 }
 0xeee   :  { %1816 = vmax.xlane.f32.xlu1 %v1815_v47  ;;  %v2226_v47 = vld [vmem:[%s6344_s16 + $0x10] sm:$0xff] }
 0xf2d   :  { %v1949_v48 = vpop.permute.xlu0 %1948 }
 0xf2e   :  { %1951 = vxpose.xlu0.b32.start.end [1/1] (short) (narrow) %v1949_v48, 8  ;;  %v2225_v48 = vld [vmem:[%s6344_s16 + $0x8] sm:$0xff] }
 0xf36   :  { %v2064_v50 = vpop.permute.xlu1 %2063  ;;  %v2017_v55 = vpop.permute.xlu0 %2016 }
 0xf61   :  { %v1817_v51 = vpop.xlane.xlu1 %1816 }
 0xf62   :  { %v1818_v24 = vsub.f32 %v1814_v13, %v1817_v51  ;;  %v2227_v13 = vld [vmem:[%s6344_s16 + $0x18] sm:$0xff] }
 0xf64   :  { %v1819_v52 = vmul.f32 1.442695, %v1818_v24 }
 0xf66   :  { %4528 = vpow2.f32 %v1819_v52 }
 0xf6c   :  { %v4529_v54 = vpop.eup %4528 }
 0xf6d   :  { %v1821_v15 = vmul.f32 %v5713_v53, %v4529_v54 }
 0xf6f   :  { %v1822_v34 = vsel %vm489_vm3, %v1821_v15, 0.0 }
 0xf70   :  { %1823 = vadd.xlane.f32.xlu1 %v1822_v34 }
 0xf89   :  { %1828 = vrot.lane.b32.xlu1 %v5683_v16, %s5056_s22 }
 0xf91   :  { %2084 = vrot.lane.b32.xlu1 %v5754_v39, %s5054_s30 }
 0xf95   :  { %4409 = vset.pattern.permute.xlu0 %v5053_v29 }
 0xf99   :  { %2112 = vperm.xlu1 %4406, %v5759_v25  }
 0xf9f   :  { %1865 = vmax.xlane.f32.xlu0 %v1864_v59  ;;  %v2290_v59 = vld [vmem:[%s6345_s23 + $0x10] sm:$0xff] }
 0xfa1   :  { %4407 = vset.pattern.permute.xlu1 %v5055_v57 }
 0xfd2   :  { %v5777_v61 = vpop.trf.xlu0 }
 0xfd3   :  { %v2019_v33 = vperm.slane %v5777_v61, 0  ;;  %v2066_v62 = vperm.slane %v5777_v61, 1 }
 0xfd5   :  { %v2020_v23 = vadd.f32 %v2019_v33, %v2017_v55  ;;  %v2067_v63 = vadd.f32 %v2066_v62, %v2064_v50  ;;  %v2289_v33 = vld [vmem:[%s6345_s23 + $0x8] sm:$0xff] }
 0xfd7   :  { %vm2021_vm13 = vcmp.gt.f32.partialorder %v2020_v23, 0.0  ;;  %v2022_v0 = vmul.f32 0.2, %v2020_v23  ;;  %v2069_v22 = vmul.f32 0.2, %v2067_v63  ;;  %vm2068_vm15 = vcmp.gt.f32.partialorder %v2067_v63, 0.0 }
 0xfd9   :  { %v2023_v5 = vsel %vm2021_vm13, %v2020_v23, %v2022_v0  ;;  %v2070_v27 = vsel %vm2068_vm15, %v2067_v63, %v2069_v22  ;;  %v2288_v0 = vld [vmem:[%s6345_s23] sm:$0xff] }
 0xfda   :  { %v2024_v31 = vsel %vm800_vm9, %v2023_v5, -inf  ;;  %v2071_v1 = vsel %vm800_vm9, %v2070_v27, -inf }
 0xfdb   :  { %2025 = vmax.xlane.f32.xlu2 %v2024_v31 }
 0xfe3   :  { %v1824_v2 = vpop.xlane.xlu1 %1823 }
 0xfe4   :  { %v1825_v6 = vmax.f32 %v1824_v2, 1e-09  ;;  %v4444_v2 = vld [vmem:[%s6346_s9] ss:$0 sm:$0xff] }
 0xfe6   :  { %4530 = vrcp.f32 %v1825_v6 }
 0xfec   :  { %v4531_v40 = vpop.eup %4530 }
 0xfed   :  { %v1827_v7 = vmul.f32 %v4531_v40, %v1821_v15 }
 0xffb   :  { %v1829_v11 = vpop.permute.xlu1 %1828 }
 0xffc   :  { %4228 = vmatpush.msk.msrb.mxu0 %vm391_vm0, %v1829_v11 }
 0xffd   :  { %4229 = vmatmul.msk.f32.vlgmr.msrb.gmra.mxu0 %vm387_vm1, %v1827_v7 }
 0xffe   :  { %4234 = vmatpush.msk.msra.mxu0 %vm391_vm0, %v5754_v39 }
0x1000   :  { %2244 = vmatpush.msrb.mxu0 %v2227_v13 }
0x1002   :  { %2245 = vmatpush.msrb.mxu0 %v2226_v47 }
0x1004   :  { %2246 = vmatpush.msrb.mxu0 %v2225_v48 }
0x1006   :  { %2247 = vmatpush.msrb.mxu0 %v2224_v49 }
0x1012   :  { %v1866_v12 = vpop.xlane.xlu0 %1865 }
0x1013   :  { %v1867_v14 = vsub.f32 %v1863_v18, %v1866_v12  ;;  %v2085_v18 = vpop.permute.xlu1 %2084  ;;  %v4445_v12 = vld [vmem:[#allocation2] ss:$0 sm:$0xff] }
0x1015   :  { %v1868_v10 = vmul.f32 1.442695, %v1867_v14 }
0x1017   :  { %4532 = vpow2.f32 %v1868_v10 }
0x101b   :  { %v2113_v10 = vpop.permute.xlu1 %2112 }
0x101d   :  { %v4533_v21 = vpop.eup %4532 }
0x101e   :  { %v1870_v20 = vmul.f32 %v5713_v53, %v4533_v21  ;;  %v2115_v21 = vperm.slane %v5777_v61, 2 }
0x1020   :  { %v1871_v26 = vsel %vm489_vm3, %v1870_v20, 0.0  ;;  %v2116_v63 = vadd.f32 %v2115_v21, %v2113_v10 }
0x1021   :  { %1872 = vadd.xlane.f32.xlu2 %v1871_v26  ;;  %v2164_v26 = vperm.slane %v5777_v61, 3 }
0x1022   :  { %vm2117_vm12 = vcmp.gt.f32.partialorder %v2116_v63, 0.0 }
0x1029   :  { %2072 = vmax.xlane.f32.xlu2 %v2071_v1 }
0x104e   :  { %v2026_v28 = vpop.xlane.xlu2 %2025 }
0x104f   :  { %v2027_v56 = vsub.f32 %v2023_v5, %v2026_v28 }
0x1051   :  { %v2028_v30 = vmul.f32 1.442695, %v2027_v56 }
0x1053   :  { %4534 = vpow2.f32 %v2028_v30 }
0x1059   :  { %v4535_v32 = vpop.eup %4534 }
0x105a   :  { %v2030_v53 = vmul.f32 %v5790_v35, %v4535_v32 }
0x105c   :  { %v2031_v37 = vsel %vm800_vm9, %v2030_v53, 0.0 }
0x105d   :  { %2032 = vadd.xlane.f32.xlu2 %v2031_v37 }
0x107a   :  { %v5815_v5 = vpop.f32.mrf.mxu0 }
0x1094   :  { %v1873_v38 = vpop.xlane.xlu2 %1872 }
0x1095   :  { %v1874_v54 = vmax.f32 %v1873_v38, 1e-09 }
0x109c   :  { %v2073_v41 = vpop.xlane.xlu2 %2072 }
0x109d   :  { %v2074_v42 = vsub.f32 %v2070_v27, %v2073_v41 }
0x109f   :  { %v2075_v43 = vmul.f32 1.442695, %v2074_v42 }
0x10a1   :  { %4536 = vpow2.f32 %v2075_v43 }
0x10a7   :  { %v4537_v44 = vpop.eup %4536 }
0x10a8   :  { %v2077_v45 = vmul.f32 %v5790_v35, %v4537_v44 }
0x10aa   :  { %v2078_v46 = vsel %vm800_vm9, %v2077_v45, 0.0 }
0x10ab   :  { %2079 = vadd.xlane.f32.xlu2 %v2078_v46 }
0x10c3   :  { %1877 = vrot.lane.b32.xlu2 %v5683_v16, %s5057_s27 }
0x10d0   :  { %v2033_v50 = vpop.xlane.xlu2 %2032 }
0x10d1   :  { %v2034_v51 = vmax.f32 %v2033_v50, 1e-09 }
0x10d3   :  { %4538 = vrcp.f32 %v2034_v51 }
0x10d4   :  { %4540 = vrcp.f32 %v1874_v54 }
0x10d9   :  { %v4539_v24 = vpop.eup %4538 }
0x10da   :  { %v2036_v52 = vmul.f32 %v4539_v24, %v2030_v53  ;;  %v4541_v58 = vpop.eup %4540 }
0x10db   :  { %v1876_v16 = vmul.f32 %v4541_v58, %v1870_v20 }
0x10dc   :  { %4235 = vmatmul.msk.f32.vlgmr.msra.gmra.mxu0 %vm387_vm1, %v2036_v52 }
0x10e4   :  { %4242 = vmatmul.msk.f32.vlgmr.msrb.gmra.mxu0 %vm1621_vm11, %v5745_v36 }
0x111e   :  { %v2080_v15 = vpop.xlane.xlu2 %2079 }
0x111f   :  { %v2081_v34 = vmax.f32 %v2080_v15, 1e-09 }
0x1121   :  { %4542 = vrcp.f32 %v2081_v34 }
0x1126   :  { %v1878_v60 = vpop.permute.xlu2 %1877 }
0x1127   :  { %4230 = vmatpush.msk.msrb.mxu1 %vm391_vm0, %v1878_v60  ;;  %v4543_v55 = vpop.eup %4542 }
0x1128   :  { %4231 = vmatmul.msk.f32.vlgmr.msrb.gmra.mxu1 %vm387_vm1, %v1876_v16  ;;  %v2083_v23 = vmul.f32 %v4543_v55, %v2077_v45 }
0x1129   :  { %4236 = vmatpush.msk.msra.mxu1 %vm391_vm0, %v2085_v18 }
0x112b   :  { %2308 = vmatpush.msrb.mxu1 %v2291_v17 }
0x112d   :  { %2309 = vmatpush.msrb.mxu1 %v2290_v59 }
0x112f   :  { %2310 = vmatpush.msrb.mxu1 %v2289_v33 }
0x1130   :  { %4237 = vmatmul.msk.f32.vlgmr.msra.gmra.mxu1 %vm387_vm1, %v2083_v23 }
0x1131   :  { %2311 = vmatpush.msrb.mxu1 %v2288_v0 }
0x1138   :  { %4243 = vmatmul.msk.f32.vlgmr.msrb.gmra.mxu1 %vm1621_vm11, %v5668_v9 }
0x1159   :  { %v5817_v31 = vpop.f32.mrf.mxu0 }
0x1161   :  { %v2249_v6 = vpop.f32.mrf.mxu0 }
0x1162   :  { %v5820_v40 = vadd.f32 %v4444_v2, %v2249_v6  ;;  %v5853_v2 = vld [vmem:[%s6330_s0] sm:$0x3f] }
0x1164   :  { %2253 = vrot.lane.b32.xlu1 %v5820_v40, %s5052_s5 }
0x116c   :  { %2161 = vperm.xlu1 %4407, %v5759_v25   ;;  %v2118_v25 = vmul.f32 0.2, %v2116_v63 }
0x116e   :  { %v2119_v27 = vsel %vm2117_vm12, %v2116_v63, %v2118_v25 }
0x116f   :  { %v2120_v1 = vsel %vm800_vm9, %v2119_v27, -inf }
0x11a5   :  { %v5825_v7 = vpop.f32.mrf.mxu1 }
0x11ad   :  { %v5827_v11 = vpop.f32.mrf.mxu1 }
0x11b5   :  { %v2313_v14 = vpop.f32.mrf.mxu1 }
0x11b6   :  { %v2314_v9 = vadd.f32 %v4445_v12, %v2313_v14 }
0x11b8   :  { %2318 = vperm.xlu2 %4401, %v2314_v9  }
0x11c0   :  { %4408 = vset.pattern.permute.xlu2 %v5050_v3 }
0x11c1   :  { %2365 = vperm.xlu2 %4408, %v2314_v9  }
0x11c9   :  { %4411 = vset.pattern.permute.xlu2 %v5051_v4 }
0x11d6   :  { %v2254_v62 = vpop.permute.xlu1 %2253 }
0x11d7   :  { %2256 = vxpose.xlu1.b32.start.end [1/1] (short) (narrow) %v2254_v62, 8 }
0x11de   :  { %v2162_v20 = vpop.permute.xlu1 %2161 }
0x11df   :  { %v2165_v22 = vadd.f32 %v2164_v26, %v2162_v20 }
0x11e1   :  { %v2167_v28 = vmul.f32 0.2, %v2165_v22  ;;  %vm2166_vm13 = vcmp.gt.f32.partialorder %v2165_v22, 0.0 }
0x11e3   :  { %v2168_v56 = vsel %vm2166_vm13, %v2165_v22, %v2167_v28 }
0x11e4   :  { %v2169_v30 = vsel %vm800_vm9, %v2168_v56, -inf }
0x11ea   :  { %2121 = vmax.xlane.f32.xlu2 %v2120_v1 }
0x11f2   :  { %2170 = vmax.xlane.f32.xlu2 %v2169_v30 }
0x1212   :  { %v2319_v32 = vpop.permute.xlu2 %2318 }
0x121b   :  { %v2366_v53 = vpop.permute.xlu2 %2365 }
0x122a   :  { %4415 = vset.pattern.permute.xlu1 %v5051_v4 }
0x125d   :  { %v2122_v37 = vpop.xlane.xlu2 %2121 }
0x125e   :  { %v2123_v38 = vsub.f32 %v2119_v27, %v2122_v37 }
0x1260   :  { %v2124_v41 = vmul.f32 1.442695, %v2123_v38 }
0x1262   :  { %4544 = vpow2.f32 %v2124_v41 }
0x1265   :  { %v2171_v61 = vpop.xlane.xlu2 %2170 }
0x1266   :  { %v2172_v42 = vsub.f32 %v2168_v56, %v2171_v61 }
0x1268   :  { %v4545_v43 = vpop.eup %4544  ;;  %v2173_v44 = vmul.f32 1.442695, %v2172_v42 }
0x1269   :  { %v2126_v45 = vmul.f32 %v5790_v35, %v4545_v43 }
0x126a   :  { %4546 = vpow2.f32 %v2173_v44  ;;  %v2530_v44 = vld [vmem:[%s6347_s21 + $0x18] sm:$0xff] }
0x126b   :  { %v2127_v46 = vsel %vm800_vm9, %v2126_v45, 0.0 }
0x126c   :  { %2128 = vadd.xlane.f32.xlu2 %v2127_v46  ;;  %v2528_v46 = vld [vmem:[%s6347_s21 + $0x8] sm:$0xff] }
0x1270   :  { %v4547_v13 = vpop.eup %4546 }
0x1271   :  { %v2175_v47 = vmul.f32 %v5790_v35, %v4547_v13  ;;  %v2527_v13 = vld [vmem:[%s6347_s21] sm:$0xff] }
0x1273   :  { %v2176_v48 = vsel %vm800_vm9, %v2175_v47, 0.0 }
0x1274   :  { %2177 = vadd.xlane.f32.xlu2 %v2176_v48 }
0x127b   :  { %v5840_v49 = vpop.trf.xlu1 }
0x127c   :  { %v2321_v50 = vperm.slane %v5840_v49, 0  ;;  %v2368_v51 = vperm.slane %v5840_v49, 1  ;;  %v2466_v28 = vperm.slane %v5840_v49, 3  ;;  %v2417_v38 = vperm.slane %v5840_v49, 2 }
0x127e   :  { %v2322_v24 = vadd.f32 %v2321_v50, %v2319_v32  ;;  %v2369_v54 = vadd.f32 %v2368_v51, %v2366_v53 }
0x1280   :  { %vm2323_vm15 = vcmp.gt.f32.partialorder %v2322_v24, 0.0  ;;  %v2324_v52 = vmul.f32 0.2, %v2322_v24  ;;  %v2371_v58 = vmul.f32 0.2, %v2369_v54  ;;  %vm2370_vm12 = vcmp.gt.f32.partialorder %v2369_v54, 0.0 }
0x1282   :  { %v2325_v15 = vsel %vm2323_vm15, %v2322_v24, %v2324_v52  ;;  %v2372_v35 = vsel %vm2370_vm12, %v2369_v54, %v2371_v58  ;;  %v2594_v52 = vld [vmem:[%s6348_s26 + $0x18] sm:$0xff]  ;;  %v2593_v58 = vld [vmem:[%s6348_s26 + $0x10] sm:$0xff] }
0x1283   :  { %v2326_v34 = vsel %vm1103_vm14, %v2325_v15, -inf  ;;  %v2373_v16 = vsel %vm1103_vm14, %v2372_v35, -inf }
0x1284   :  { %2327 = vmax.xlane.f32.xlu0 %v2326_v34 }
0x128c   :  { %2374 = vmax.xlane.f32.xlu0 %v2373_v16  ;;  %v2591_v16 = vld [vmem:[%s6348_s26] sm:$0xff] }
0x12a0   :  { %2133 = vrot.lane.b32.xlu0 %v5754_v39, %s5056_s22 }
0x12a8   :  { %2182 = vrot.lane.b32.xlu0 %v5754_v39, %s5057_s27 }
0x12b0   :  { %2414 = vperm.xlu0 %4409, %v2314_v9  }
0x12b8   :  { %4410 = vset.pattern.permute.xlu0 %v5055_v57 }
0x12b9   :  { %2463 = vperm.xlu0 %4410, %v2314_v9  }
0x12c1   :  { %4412 = vset.pattern.permute.xlu0 %v5050_v3 }
0x12df   :  { %v2129_v55 = vpop.xlane.xlu2 %2128 }
0x12e0   :  { %v2130_v39 = vmax.f32 %v2129_v55, 1e-09 }
0x12e7   :  { %v2178_v9 = vpop.xlane.xlu2 %2177 }
0x12e8   :  { %v2179_v62 = vmax.f32 %v2178_v9, 1e-09 }
0x12f7   :  { %v2328_v60 = vpop.xlane.xlu0 %2327 }
0x12f8   :  { %v2329_v17 = vsub.f32 %v2325_v15, %v2328_v60 }
0x12fa   :  { %v2330_v18 = vmul.f32 1.442695, %v2329_v17 }
0x12fc   :  { %4548 = vpow2.f32 %v2330_v18 }
0x12ff   :  { %v2375_v59 = vpop.xlane.xlu0 %2374 }
0x1300   :  { %v2376_v33 = vsub.f32 %v2372_v35, %v2375_v59  ;;  %v2592_v35 = vld [vmem:[%s6348_s26 + $0x8] sm:$0xff] }
0x1302   :  { %v4549_v23 = vpop.eup %4548  ;;  %v2377_v0 = vmul.f32 1.442695, %v2376_v33 }
0x1303   :  { %v2332_v6 = vmul.f32 %v5853_v2, %v4549_v23 }
0x1304   :  { %4550 = vpow2.f32 %v2377_v0 }
0x1305   :  { %v2333_v12 = vsel %vm1103_vm14, %v2332_v6, 0.0  ;;  %4552 = vrcp.f32 %v2130_v39 }
0x1306   :  { %2334 = vadd.xlane.f32.xlu1 %v2333_v12  ;;  %4554 = vrcp.f32 %v2179_v62 }
0x130a   :  { %v4551_v14 = vpop.eup %4550 }
0x130b   :  { %v2379_v10 = vmul.f32 %v5853_v2, %v4551_v14  ;;  %v4553_v63 = vpop.eup %4552 }
0x130c   :  { %v2132_v25 = vmul.f32 %v4553_v63, %v2126_v45  ;;  %v4555_v26 = vpop.eup %4554  ;;  %v2529_v45 = vld [vmem:[%s6347_s21 + $0x10] sm:$0xff] }
0x130d   :  { %v2380_v21 = vsel %vm1103_vm14, %v2379_v10, 0.0  ;;  %v2181_v22 = vmul.f32 %v4555_v26, %v2175_v47 }
0x130e   :  { %2381 = vadd.xlane.f32.xlu2 %v2380_v21  ;;  %v4446_v21 = vld [vmem:[#allocation5] ss:$0 sm:$0xff] }
0x1312   :  { %v2134_v20 = vpop.permute.xlu0 %2133 }
0x1313   :  { %4238 = vmatpush.msk.msra.mxu2 %vm391_vm0, %v2134_v20 }
0x1314   :  { %4239 = vmatmul.msk.f32.vlgmr.msra.gmra.mxu2 %vm387_vm1, %v2132_v25 }
0x1315   :  { %4244 = vmatpush.msk.msrb.mxu2 %vm1121_vm4, %v5820_v40 }
0x1317   :  { %2547 = vmatpush.msra.mxu2 %v2530_v44 }
0x1319   :  { %2548 = vmatpush.msra.mxu2 %v2529_v45 }
0x131a   :  { %v2183_v27 = vpop.permute.xlu0 %2182 }
0x131b   :  { %4240 = vmatpush.msk.msra.mxu3 %vm391_vm0, %v2183_v27  ;;  %2549 = vmatpush.msra.mxu2 %v2528_v46 }
0x131c   :  { %4241 = vmatmul.msk.f32.vlgmr.msra.gmra.mxu3 %vm387_vm1, %v2181_v22 }
0x131d   :  { %2550 = vmatpush.msra.mxu2 %v2527_v13 }
0x1322   :  { %v2415_v1 = vpop.permute.xlu0 %2414 }
0x1323   :  { %v2418_v41 = vadd.f32 %v2417_v38, %v2415_v1 }
0x1325   :  { %v2420_v61 = vmul.f32 0.2, %v2418_v41  ;;  %vm2419_vm15 = vcmp.gt.f32.partialorder %v2418_v41, 0.0 }
0x1326   :  { %2386 = vrot.lane.b32.xlu2 %v5820_v40, %s5054_s30 }
0x1327   :  { %v2421_v42 = vsel %vm2419_vm15, %v2418_v41, %v2420_v61 }
0x1328   :  { %v2422_v43 = vsel %vm1103_vm14, %v2421_v42, -inf }
0x132b   :  { %v2464_v56 = vpop.permute.xlu0 %2463 }
0x132c   :  { %v2467_v30 = vadd.f32 %v2466_v28, %v2464_v56 }
0x132e   :  { %v2469_v32 = vmul.f32 0.2, %v2467_v30  ;;  %vm2468_vm13 = vcmp.gt.f32.partialorder %v2467_v30, 0.0 }
0x1330   :  { %v2470_v53 = vsel %vm2468_vm13, %v2467_v30, %v2469_v32 }
0x1331   :  { %v2471_v37 = vsel %vm1103_vm14, %v2470_v53, -inf }
0x1332   :  { %2472 = vmax.xlane.f32.xlu0 %v2471_v37 }
0x1346   :  { %2484 = vrot.lane.b32.xlu0 %v5820_v40, %s5057_s27 }
0x134f   :  { %2423 = vmax.xlane.f32.xlu2 %v2422_v43 }
0x1379   :  { %v2335_v47 = vpop.xlane.xlu1 %2334 }
0x137a   :  { %v2336_v48 = vmax.f32 %v2335_v47, 1e-09 }
0x137c   :  { %4556 = vrcp.f32 %v2336_v48 }
0x1381   :  { %v2382_v49 = vpop.xlane.xlu2 %2381 }
0x1382   :  { %v4557_v50 = vpop.eup %4556  ;;  %v2383_v51 = vmax.f32 %v2382_v49, 1e-09 }
0x1383   :  { %v2338_v24 = vmul.f32 %v4557_v50, %v2332_v6 }
0x1384   :  { %4558 = vrcp.f32 %v2383_v51 }
0x1385   :  { %4245 = vmatmul.msk.f32.vlgmr.msrb.gmra.mxu2 %vm1117_vm10, %v2338_v24 }
0x1389   :  { %v2387_v54 = vpop.permute.xlu2 %2386 }
0x138a   :  { %v4559_v15 = vpop.eup %4558  ;;  %4246 = vmatpush.msk.msrb.mxu3 %vm1121_vm4, %v2387_v54 }
0x138b   :  { %v2385_v34 = vmul.f32 %v4559_v15, %v2379_v10 }
0x138c   :  { %2611 = vmatpush.msra.mxu3 %v2594_v52 }
0x138d   :  { %4247 = vmatmul.msk.f32.vlgmr.msrb.gmra.mxu3 %vm1117_vm10, %v2385_v34  ;;  %4252 = vmatmul.msk.f32.vlgmr.msra.gmra.mxu2 %vm1621_vm11, %v5745_v36 }
0x138e   :  { %2612 = vmatpush.msra.mxu3 %v2593_v58 }
0x1390   :  { %2613 = vmatpush.msra.mxu3 %v2592_v35 }
0x1392   :  { %2614 = vmatpush.msra.mxu3 %v2591_v16  ;;  %v5932_v16 = vld [vmem:[%s6335_s7] sm:$0x7] }
0x1395   :  { %4253 = vmatmul.msk.f32.vlgmr.msra.gmra.mxu3 %vm1621_vm11, %v5745_v36 }
0x1397   :  { %v5895_v9 = vpop.f32.mrf.mxu2 }
0x139f   :  { %v5897_v10 = vpop.f32.mrf.mxu3 }
0x13a5   :  { %v2473_v60 = vpop.xlane.xlu0 %2472 }
0x13a6   :  { %v2474_v17 = vsub.f32 %v2470_v53, %v2473_v60 }
0x13a8   :  { %v2475_v18 = vmul.f32 1.442695, %v2474_v17 }
0x13aa   :  { %4560 = vpow2.f32 %v2475_v18 }
0x13b0   :  { %v4561_v59 = vpop.eup %4560 }
0x13b1   :  { %v2477_v55 = vmul.f32 %v5853_v2, %v4561_v59 }
0x13b3   :  { %v2478_v33 = vsel %vm1103_vm14, %v2477_v55, 0.0 }
0x13b4   :  { %2479 = vadd.xlane.f32.xlu1 %v2478_v33 }
0x13b8   :  { %v2485_v23 = vpop.permute.xlu0 %2484 }
0x13b9   :  { %4250 = vmatpush.msk.msra.mxu1 %vm1121_vm4, %v2485_v23 }
0x13c2   :  { %v2424_v0 = vpop.xlane.xlu2 %2423 }
0x13c3   :  { %v2425_v6 = vsub.f32 %v2421_v42, %v2424_v0 }
0x13c5   :  { %v2426_v39 = vmul.f32 1.442695, %v2425_v6 }
0x13c7   :  { %4562 = vpow2.f32 %v2426_v39 }
0x13cd   :  { %v4563_v12 = vpop.eup %4562 }
0x13ce   :  { %v2428_v36 = vmul.f32 %v5853_v2, %v4563_v12  ;;  %v4447_v2 = vld [vmem:[#allocation7] ss:$0 sm:$0xff] }
0x13d0   :  { %v2429_v14 = vsel %vm1103_vm14, %v2428_v36, 0.0 }
0x13d1   :  { %2430 = vadd.xlane.f32.xlu2 %v2429_v14 }
0x13e9   :  { %2435 = vrot.lane.b32.xlu2 %v5820_v40, %s5056_s22 }
0x1408   :  { %v5899_v62 = vpop.f32.mrf.mxu2 }
0x1410   :  { %v2410_v63 = vpop.f32.mrf.mxu3  ;;  %v2552_v25 = vpop.f32.mrf.mxu2 }
0x1411   :  { %v5901_v20 = vadd.f32 %v4446_v21, %v2552_v25 }
0x1413   :  { %2556 = vrot.lane.b32.xlu1 %v5901_v20, %s5052_s5 }
0x1418   :  { %v2616_v26 = vpop.f32.mrf.mxu3 }
0x1419   :  { %v2617_v22 = vadd.f32 %v4447_v2, %v2616_v26 }
0x141b   :  { %2621 = vperm.xlu2 %4411, %v2617_v22   ;;  %2668 = vperm.xlu0 %4412, %v2617_v22  }
0x1423   :  { %4413 = vset.pattern.permute.xlu0 %v5053_v29 }
0x1427   :  { %v2480_v40 = vpop.xlane.xlu1 %2479 }
0x1428   :  { %v2481_v27 = vmax.f32 %v2480_v40, 1e-09 }
0x142a   :  { %4564 = vrcp.f32 %v2481_v27 }
0x1430   :  { %v4565_v1 = vpop.eup %4564 }
0x1431   :  { %v2483_v28 = vmul.f32 %v4565_v1, %v2477_v55 }
0x1433   :  { %4251 = vmatmul.msk.f32.vlgmr.msra.gmra.mxu1 %vm1117_vm10, %v2483_v28 }
0x1444   :  { %v2431_v56 = vpop.xlane.xlu2 %2430 }
0x1445   :  { %v2432_v30 = vmax.f32 %v2431_v56, 1e-09  ;;  %v2835_v56 = vld [vmem:[%s6349_s17 + $0x18] sm:$0xff] }
0x1447   :  { %4566 = vrcp.f32 %v2432_v30  ;;  %v2902_v30 = vld [vmem:[%s6350_s1 + $0x18] sm:$0xff] }
0x144c   :  { %v2436_v32 = vpop.permute.xlu2 %2435 }
0x144d   :  { %v4567_v53 = vpop.eup %4566  ;;  %4248 = vmatpush.msk.msra.mxu0 %vm1121_vm4, %v2436_v32  ;;  %v2834_v32 = vld [vmem:[%s6349_s17 + $0x10] sm:$0xff] }
0x144e   :  { %v2434_v37 = vmul.f32 %v4567_v53, %v2428_v36  ;;  %v2901_v53 = vld [vmem:[%s6350_s1 + $0x10] sm:$0xff] }
0x144f   :  { %4254 = vmatpush.msk.msrb.mxu0 %vm1121_vm4, %v5901_v20 }
0x1450   :  { %4249 = vmatmul.msk.f32.vlgmr.msra.gmra.mxu0 %vm1117_vm10, %v2434_v37 }
0x1451   :  { %2855 = vmatpush.msra.mxu0 %v2835_v56 }
0x1453   :  { %2856 = vmatpush.msra.mxu0 %v2834_v32 }
0x1475   :  { %v2622_v41 = vpop.permute.xlu2 %2621 }
0x1485   :  { %v2557_v38 = vpop.permute.xlu1 %2556 }
0x1486   :  { %2559 = vxpose.xlu2.b32.start.end [1/1] (short) (narrow) %v2557_v38, 8  ;;  %v2833_v38 = vld [vmem:[%s6349_s17 + $0x8] sm:$0xff] }
0x1487   :  { %2857 = vmatpush.msra.mxu0 %v2833_v38 }
0x148d   :  { %v2669_v44 = vpop.permute.xlu0 %2668 }
0x14b0   :  { %v2508_v52 = vpop.f32.mrf.mxu1 }
0x14cd   :  { %v2459_v24 = vpop.f32.mrf.mxu0 }
0x14e8   :  { %4416 = vset.pattern.permute.xlu2 %v5050_v3 }
0x151f   :  { %v5912_v61 = vpop.trf.xlu2 }
0x1520   :  { %v2624_v42 = vperm.slane %v5912_v61, 0  ;;  %v2671_v43 = vperm.slane %v5912_v61, 1  ;;  %v2720_v36 = vperm.slane %v5912_v61, 2  ;;  %v2769_v2 = vperm.slane %v5912_v61, 3  ;;  %v2832_v61 = vld [vmem:[%s6349_s17] sm:$0xff] }
0x1521   :  { %2858 = vmatpush.msra.mxu0 %v2832_v61 }
0x1522   :  { %v2625_v45 = vadd.f32 %v2624_v42, %v2622_v41  ;;  %v2672_v46 = vadd.f32 %v2671_v43, %v2669_v44  ;;  %v2900_v41 = vld [vmem:[%s6350_s1 + $0x8] sm:$0xff]  ;;  %v2899_v42 = vld [vmem:[%s6350_s1] sm:$0xff] }
0x1524   :  { %vm2626_vm12 = vcmp.gt.f32.partialorder %v2625_v45, 0.0  ;;  %v2627_v13 = vmul.f32 0.2, %v2625_v45  ;;  %vm2673_vm13 = vcmp.gt.f32.partialorder %v2672_v46, 0.0  ;;  %v2674_v47 = vmul.f32 0.2, %v2672_v46 }
0x1526   :  { %v2628_v48 = vsel %vm2626_vm12, %v2625_v45, %v2627_v13  ;;  %v2675_v49 = vsel %vm2673_vm13, %v2672_v46, %v2674_v47 }
0x1527   :  { %v2629_v50 = vsel %vm1409_vm5, %v2628_v48, -inf  ;;  %v2676_v51 = vsel %vm1409_vm5, %v2675_v49, -inf }
0x1528   :  { %2630 = vmax.xlane.f32.xlu1 %v2629_v50  ;;  %2677 = vmax.xlane.f32.xlu0 %v2676_v51 }
0x153c   :  { %2512 = vrot.lane.b32.xlu0 %v2410_v63, %s5058_s28 }
0x1541   :  { %1905 = vrot.lane.b32.xlu1 %v5752_v8, %s5058_s28 }
0x1544   :  { %2516 = vrot.lane.b32.xlu0 %v2459_v24, %s5059_s2 }
0x1549   :  { %1909 = vrot.lane.b32.xlu1 %v5815_v5, %s5059_s2 }
0x154c   :  { %2520 = vrot.lane.b32.xlu0 %v2508_v52, %s5060_s24 }
0x1551   :  { %1913 = vrot.lane.b32.xlu1 %v5825_v7, %s5060_s24 }
0x1554   :  { %2689 = vrot.lane.b32.xlu0 %v5901_v20, %s5054_s30 }
0x155c   :  { %2717 = vperm.xlu0 %4413, %v2617_v22  }
0x1564   :  { %4414 = vset.pattern.permute.xlu0 %v5055_v57 }
0x1565   :  { %2766 = vperm.xlu0 %4414, %v2617_v22  }
0x156d   :  { %4417 = vset.pattern.permute.xlu0 %v5053_v29 }
0x159b   :  { %v2631_v8 = vpop.xlane.xlu1 %2630  ;;  %v2678_v54 = vpop.xlane.xlu0 %2677 }
0x159c   :  { %v2632_v15 = vsub.f32 %v2628_v48, %v2631_v8  ;;  %v2679_v5 = vsub.f32 %v2675_v49, %v2678_v54 }
0x159e   :  { %v2633_v34 = vmul.f32 1.442695, %v2632_v15  ;;  %v2680_v58 = vmul.f32 1.442695, %v2679_v5 }
0x15a0   :  { %4568 = vpow2.f32 %v2633_v34 }
0x15a1   :  { %4570 = vpow2.f32 %v2680_v58 }
0x15a6   :  { %v4569_v35 = vpop.eup %4568 }
0x15a7   :  { %v4571_v7 = vpop.eup %4570  ;;  %v5935_v60 = vmul.f32 %v5932_v16, %v4569_v35 }
0x15a8   :  { %v5938_v17 = vmul.f32 %v5932_v16, %v4571_v7 }
0x15a9   :  { %v2636_v18 = vsel %vm1409_vm5, %v5935_v60, 0.0 }
0x15aa   :  { %2637 = vadd.xlane.f32.xlu2 %v2636_v18  ;;  %v2683_v59 = vsel %vm1409_vm5, %v5938_v17, 0.0 }
0x15ab   :  { %2684 = vadd.xlane.f32.xlu1 %v2683_v59 }
0x15ae   :  { %v2513_v55 = vpop.permute.xlu0 %2512 }
0x15af   :  { %v2523_v33 = vsel %vm687_vm2, %v5899_v62, %v2513_v55 }
0x15b3   :  { %v1906_v28 = vpop.permute.xlu1 %1905 }
0x15b4   :  { %v1916_v48 = vsel %vm687_vm2, %v5749_v19, %v1906_v28 }
0x15b6   :  { %v2517_v23 = vpop.permute.xlu0 %2516 }
0x15b7   :  { %v2524_v0 = vsel %vm689_vm6, %v2523_v33, %v2517_v23 }
0x15bb   :  { %v1910_v37 = vpop.permute.xlu1 %1909 }
0x15bc   :  { %v1917_v50 = vsel %vm689_vm6, %v1916_v48, %v1910_v37 }
0x15be   :  { %v2521_v6 = vpop.permute.xlu0 %2520 }
0x15bf   :  { %v2525_v39 = vsel %vm691_vm8, %v2524_v0, %v2521_v6  ;;  %v4448_v6 = vld [vmem:[#allocation8] ss:$0 sm:$0xff] }
0x15c2   :  { %2787 = vrot.lane.b32.xlu2 %v5901_v20, %s5057_s27 }
0x15c3   :  { %v1914_v43 = vpop.permute.xlu1 %1913 }
0x15c4   :  { %v1918_v24 = vsel %vm691_vm8, %v1917_v50, %v1914_v43  ;;  %v6019_v50 = vld [vmem:[%s6319_s29] sm:$0x3f]  ;;  %s6351_s29 = sld [smem:[#allocation64_spill]] }
0x15c5   :  { %v2526_v8 = vadd.f32 %v2525_v39, %v1918_v24  ;;  %v4449_v39 = vld [vmem:[#allocation10] ss:$0 sm:$0xff] }
0x15c6   :  { %v2690_v12 = vpop.permute.xlu0 %2689 }
0x15c7   :  { %4256 = vmatpush.msk.msrb.mxu1 %vm1121_vm4, %v2690_v12  ;;  %v5974_v54 = vmax.f32 %v2526_v8, 0.0 }
0x15c9   :  { %2919 = vmatpush.msra.mxu1 %v2902_v30 }
0x15cb   :  { %2920 = vmatpush.msra.mxu1 %v2901_v53 }
0x15cd   :  { %2921 = vmatpush.msra.mxu1 %v2900_v41 }
0x15ce   :  { %v2718_v14 = vpop.permute.xlu0 %2717 }
0x15cf   :  { %v2721_v21 = vadd.f32 %v2720_v36, %v2718_v14  ;;  %2922 = vmatpush.msra.mxu1 %v2899_v42 }
0x15d1   :  { %v2723_v63 = vmul.f32 0.2, %v2721_v21  ;;  %vm2722_vm15 = vcmp.gt.f32.partialorder %v2721_v21, 0.0 }
0x15d3   :  { %v2724_v62 = vsel %vm2722_vm15, %v2721_v21, %v2723_v63 }
0x15d4   :  { %v2725_v25 = vsel %vm1409_vm5, %v2724_v62, -inf }
0x15d5   :  { %2726 = vmax.xlane.f32.xlu1 %v2725_v25 }
0x15d7   :  { %v2767_v26 = vpop.permute.xlu0 %2766 }
0x15d8   :  { %v2770_v22 = vadd.f32 %v2769_v2, %v2767_v26 }
0x15da   :  { %v2772_v40 = vmul.f32 0.2, %v2770_v22  ;;  %vm2771_vm12 = vcmp.gt.f32.partialorder %v2770_v22, 0.0 }
0x15dc   :  { %v2773_v27 = vsel %vm2771_vm12, %v2770_v22, %v2772_v40 }
0x15dd   :  { %v2774_v1 = vsel %vm1409_vm5, %v2773_v27, -inf }
0x15de   :  { %2775 = vmax.xlane.f32.xlu0 %v2774_v1 }
0x15ee   :  { %2738 = vrot.lane.b32.xlu1 %v5901_v20, %s5056_s22 }
0x161d   :  { %v2638_v20 = vpop.xlane.xlu2 %2637 }
0x161e   :  { %v2639_v44 = vmax.f32 %v2638_v20, 1e-09  ;;  %v2685_v45 = vpop.xlane.xlu1 %2684 }
0x161f   :  { %v2686_v46 = vmax.f32 %v2685_v45, 1e-09 }
0x1620   :  { %4572 = vrcp.f32 %v2639_v44 }
0x1621   :  { %4574 = vrcp.f32 %v2686_v46 }
0x1625   :  { %v2788_v13 = vpop.permute.xlu2 %2787 }
0x1626   :  { %v4573_v47 = vpop.eup %4572  ;;  %4260 = vmatpush.msk.msrb.mxu3 %vm1121_vm4, %v2788_v13 }
0x1627   :  { %v4575_v49 = vpop.eup %4574  ;;  %v2641_v51 = vmul.f32 %v4573_v47, %v5935_v60 }
0x1628   :  { %v2688_v52 = vmul.f32 %v4575_v49, %v5938_v17 }
0x1629   :  { %4255 = vmatmul.msk.f32.vlgmr.msrb.gmra.mxu0 %vm1117_vm10, %v2641_v51 }
0x162a   :  { %4257 = vmatmul.msk.f32.vlgmr.msrb.gmra.mxu1 %vm1117_vm10, %v2688_v52 }
0x1631   :  { %4262 = vmatmul.msk.f32.vlgmr.msra.gmra.mxu0 %vm1621_vm11, %v5974_v54 }
0x1632   :  { %4263 = vmatmul.msk.f32.vlgmr.msra.gmra.mxu1 %vm1621_vm11, %v5974_v54 }
0x1648   :  { %v2727_v19 = vpop.xlane.xlu1 %2726 }
0x1649   :  { %v2728_v15 = vsub.f32 %v2724_v62, %v2727_v19 }
0x164b   :  { %v2729_v5 = vmul.f32 1.442695, %v2728_v15 }
0x164d   :  { %4576 = vpow2.f32 %v2729_v5 }
0x1651   :  { %v2776_v34 = vpop.xlane.xlu0 %2775 }
0x1652   :  { %v2777_v58 = vsub.f32 %v2773_v27, %v2776_v34 }
0x1653   :  { %v4577_v35 = vpop.eup %4576 }
0x1654   :  { %v2778_v7 = vmul.f32 1.442695, %v2777_v58  ;;  %v2731_v60 = vmul.f32 %v5932_v16, %v4577_v35 }
0x1656   :  { %4578 = vpow2.f32 %v2778_v7  ;;  %v2732_v17 = vsel %vm1409_vm5, %v2731_v60, 0.0 }
0x1657   :  { %2733 = vadd.xlane.f32.xlu1 %v2732_v17 }
0x165c   :  { %v4579_v18 = vpop.eup %4578 }
0x165d   :  { %v2780_v59 = vmul.f32 %v5932_v16, %v4579_v18 }
0x165f   :  { %v2781_v55 = vsel %vm1409_vm5, %v2780_v59, 0.0 }
0x1660   :  { %v2739_v33 = vpop.permute.xlu1 %2738  ;;  %2782 = vadd.xlane.f32.xlu1 %v2781_v55 }
0x1661   :  { %4258 = vmatpush.msk.msrb.mxu2 %vm1121_vm4, %v2739_v33 }
0x16a6   :  { %v5985_v23 = vpop.f32.mrf.mxu0 }
0x16a7   :  { %v2713_v0 = vpop.f32.mrf.mxu1 }
0x16ae   :  { %v2860_v12 = vpop.f32.mrf.mxu0 }
0x16af   :  { %v5987_v36 = vadd.f32 %v4448_v6, %v2860_v12  ;;  %v2924_v14 = vpop.f32.mrf.mxu1  ;;  %v3139_v6 = vld [vmem:[%s6351_s29 + $0x10] sm:$0xff]  ;;  %v3137_v12 = vld [vmem:[%s6351_s29] sm:$0xff] }
0x16b0   :  { %v5989_v21 = vadd.f32 %v4449_v39, %v2924_v14  ;;  %v3138_v39 = vld [vmem:[%s6351_s29 + $0x8] sm:$0xff]  ;;  %v3204_v14 = vld [vmem:[%s6352_s12 + $0x18] sm:$0xff] }
0x16b1   :  { %4264 = vmatpush.msk.msra.mxu2 %vm391_vm0, %v5987_v36  ;;  %2864 = vrot.lane.b32.xlu0 %v5987_v36, %s5052_s5 }
0x16b2   :  { %2976 = vperm.xlu2 %4416, %v5989_v21   ;;  %2929 = vperm.xlu1 %4415, %v5989_v21  }
0x16ba   :  { %4418 = vset.pattern.permute.xlu2 %v5055_v57 }
0x16ca   :  { %v2734_v16 = vpop.xlane.xlu1 %2733 }
0x16cb   :  { %v2735_v63 = vmax.f32 %v2734_v16, 1e-09  ;;  %v3203_v16 = vld [vmem:[%s6352_s12 + $0x10] sm:$0xff] }
0x16cd   :  { %4580 = vrcp.f32 %v2735_v63  ;;  %v3201_v63 = vld [vmem:[%s6352_s12] sm:$0xff] }
0x16d3   :  { %v4581_v62 = vpop.eup %4580  ;;  %v2783_v25 = vpop.xlane.xlu1 %2782 }
0x16d4   :  { %v2737_v2 = vmul.f32 %v4581_v62, %v2731_v60  ;;  %v2784_v26 = vmax.f32 %v2783_v25, 1e-09 }
0x16d6   :  { %4582 = vrcp.f32 %v2784_v26  ;;  %4259 = vmatmul.msk.f32.vlgmr.msrb.gmra.mxu2 %vm1117_vm10, %v2737_v2 }
0x16dc   :  { %v4583_v22 = vpop.eup %4582 }
0x16dd   :  { %v2786_v40 = vmul.f32 %v4583_v22, %v2780_v59 }
0x16df   :  { %4261 = vmatmul.msk.f32.vlgmr.msrb.gmra.mxu3 %vm1117_vm10, %v2786_v40 }
0x170c   :  { %v2977_v32 = vpop.permute.xlu2 %2976 }
0x1723   :  { %v2865_v27 = vpop.permute.xlu0 %2864 }
0x1724   :  { %2867 = vxpose.xlu1.b32.start.end [1/1] (short) (narrow) %v2865_v27, 8  ;;  %v2930_v1 = vpop.permute.xlu1 %2929 }
0x1759   :  { %v2762_v20 = vpop.f32.mrf.mxu2 }
0x1762   :  { %v2811_v44 = vpop.f32.mrf.mxu3 }
0x1777   :  { %4421 = vset.pattern.permute.xlu1 %v5053_v29 }
0x177e   :  { %2210 = vrot.lane.b32.xlu1 %v5827_v11, %s5058_s28 }
0x17c8   :  { %v6003_v28 = vpop.trf.xlu1 }
0x17c9   :  { %v2932_v56 = vperm.slane %v6003_v28, 0  ;;  %v2979_v30 = vperm.slane %v6003_v28, 1  ;;  %v3028_v18 = vperm.slane %v6003_v28, 2 }
0x17cb   :  { %v2980_v53 = vadd.f32 %v2979_v30, %v2977_v32  ;;  %v2933_v37 = vadd.f32 %v2932_v56, %v2930_v1 }
0x17cd   :  { %vm2981_vm13 = vcmp.gt.f32.partialorder %v2980_v53, 0.0  ;;  %v2982_v38 = vmul.f32 0.2, %v2980_v53  ;;  %vm2934_vm15 = vcmp.gt.f32.partialorder %v2933_v37, 0.0  ;;  %v2935_v41 = vmul.f32 0.2, %v2933_v37 }
0x17cf   :  { %v2983_v61 = vsel %vm2981_vm13, %v2980_v53, %v2982_v38  ;;  %v2936_v42 = vsel %vm2934_vm15, %v2933_v37, %v2935_v41 }
0x17d0   :  { %v2984_v43 = vsel %vm489_vm3, %v2983_v61, -inf  ;;  %v2937_v11 = vsel %vm489_vm3, %v2936_v42, -inf }
0x17d1   :  { %2985 = vmax.xlane.f32.xlu0 %v2984_v43  ;;  %2938 = vmax.xlane.f32.xlu2 %v2937_v11 }
0x17e5   :  { %2997 = vrot.lane.b32.xlu0 %v5987_v36, %s5054_s30 }
0x17e9   :  { %2815 = vrot.lane.b32.xlu2 %v2713_v0, %s5058_s28 }
0x17ed   :  { %2214 = vrot.lane.b32.xlu0 %v5895_v9, %s5059_s2 }
0x17f0   :  { %v2211_v27 = vpop.permute.xlu1 %2210 }
0x17f1   :  { %v2221_v1 = vsel %vm687_vm2, %v5817_v31, %v2211_v27  ;;  %v4450_v31 = vld [vmem:[#allocation11] ss:$0 sm:$0xff] }
0x17f5   :  { %2819 = vrot.lane.b32.xlu0 %v2762_v20, %s5059_s2  ;;  %v4451_v20 = vld [vmem:[#allocation13] ss:$0 sm:$0xff] }
0x17fd   :  { %2823 = vrot.lane.b32.xlu0 %v2811_v44, %s5060_s24 }
0x1805   :  { %3025 = vperm.xlu0 %4417, %v5989_v21  }
0x180d   :  { %4420 = vset.pattern.permute.xlu0 %v5050_v3 }
0x1844   :  { %v2986_v45 = vpop.xlane.xlu0 %2985  ;;  %v2939_v46 = vpop.xlane.xlu2 %2938 }
0x1845   :  { %v2940_v13 = vsub.f32 %v2936_v42, %v2939_v46  ;;  %v2987_v47 = vsub.f32 %v2983_v61, %v2986_v45 }
0x1847   :  { %v2941_v48 = vmul.f32 1.442695, %v2940_v13  ;;  %v2988_v49 = vmul.f32 1.442695, %v2987_v47 }
0x1849   :  { %4584 = vpow2.f32 %v2941_v48 }
0x184a   :  { %4586 = vpow2.f32 %v2988_v49 }
0x184c   :  { %v2816_v58 = vpop.permute.xlu2 %2815 }
0x184d   :  { %v2826_v35 = vsel %vm687_vm2, %v5985_v23, %v2816_v58 }
0x184f   :  { %v4585_v9 = vpop.eup %4584 }
0x1850   :  { %v2943_v51 = vmul.f32 %v6019_v50, %v4585_v9  ;;  %v4587_v52 = vpop.eup %4586 }
0x1851   :  { %v2990_v19 = vmul.f32 %v6019_v50, %v4587_v52  ;;  %v3077_v52 = vperm.slane %v6003_v28, 3 }
0x1852   :  { %v2944_v24 = vsel %vm489_vm3, %v2943_v51, 0.0 }
0x1853   :  { %2945 = vadd.xlane.f32.xlu2 %v2944_v24  ;;  %v2991_v15 = vsel %vm489_vm3, %v2990_v19, 0.0 }
0x1857   :  { %v2998_v8 = vpop.permute.xlu0 %2997 }
0x1858   :  { %4266 = vmatpush.msk.msra.mxu3 %vm391_vm0, %v2998_v8 }
0x185a   :  { %3224 = vmatpush.msrb.mxu3 %v3204_v14 }
0x185b   :  { %2992 = vadd.xlane.f32.xlu2 %v2991_v15 }
0x185c   :  { %3225 = vmatpush.msrb.mxu3 %v3203_v16 }
0x185f   :  { %v2215_v5 = vpop.permute.xlu0 %2214 }
0x1860   :  { %v2222_v56 = vsel %vm689_vm6, %v2221_v1, %v2215_v5 }
0x1867   :  { %v2820_v34 = vpop.permute.xlu0 %2819 }
0x1868   :  { %v2827_v7 = vsel %vm689_vm6, %v2826_v35, %v2820_v34 }
0x186f   :  { %v2824_v60 = vpop.permute.xlu0 %2823 }
0x1870   :  { %v2828_v17 = vsel %vm691_vm8, %v2827_v7, %v2824_v60 }
0x1873   :  { %2218 = vrot.lane.b32.xlu2 %v5897_v10, %s5060_s24  ;;  %v3140_v10 = vld [vmem:[%s6351_s29 + $0x18] sm:$0xff] }
0x1874   :  { %3157 = vmatpush.msrb.mxu2 %v3140_v10 }
0x1876   :  { %3158 = vmatpush.msrb.mxu2 %v3139_v6 }
0x1877   :  { %v3026_v59 = vpop.permute.xlu0 %3025 }
0x1878   :  { %v3029_v55 = vadd.f32 %v3028_v18, %v3026_v59  ;;  %3159 = vmatpush.msrb.mxu2 %v3138_v39 }
0x187a   :  { %v3031_v33 = vmul.f32 0.2, %v3029_v55  ;;  %vm3030_vm12 = vcmp.gt.f32.partialorder %v3029_v55, 0.0  ;;  %3160 = vmatpush.msrb.mxu2 %v3137_v12 }
0x187b   :  { %3074 = vperm.xlu2 %4418, %v5989_v21   ;;  %v3202_v21 = vld [vmem:[%s6352_s12 + $0x8] sm:$0xff] }
0x187c   :  { %v3032_v23 = vsel %vm3030_vm12, %v3029_v55, %v3031_v33  ;;  %3226 = vmatpush.msrb.mxu3 %v3202_v21 }
0x187d   :  { %v3033_v0 = vsel %vm489_vm3, %v3032_v23, -inf }
0x187e   :  { %3034 = vmax.xlane.f32.xlu0 %v3033_v0  ;;  %3227 = vmatpush.msrb.mxu3 %v3201_v63 }
0x1883   :  { %4419 = vset.pattern.permute.xlu2 %v5051_v4 }
0x18c6   :  { %v2946_v62 = vpop.xlane.xlu2 %2945 }
0x18c7   :  { %v2947_v25 = vmax.f32 %v2946_v62, 1e-09 }
0x18c9   :  { %4588 = vrcp.f32 %v2947_v25 }
0x18ce   :  { %v2993_v2 = vpop.xlane.xlu2 %2992 }
0x18cf   :  { %v4589_v26 = vpop.eup %4588  ;;  %v2994_v22 = vmax.f32 %v2993_v2, 1e-09 }
0x18d0   :  { %v2949_v40 = vmul.f32 %v4589_v26, %v2943_v51 }
0x18d1   :  { %4590 = vrcp.f32 %v2994_v22 }
0x18d2   :  { %4265 = vmatmul.msk.f32.vlgmr.msra.gmra.mxu2 %vm387_vm1, %v2949_v40  ;;  %v6088_v40 = vld [vmem:[%s6325_s18] sm:$0x7]  ;;  %s6354_s18 = sld [smem:[#allocation67_spill]] }
0x18d6   :  { %v2219_v30 = vpop.permute.xlu2 %2218 }
0x18d7   :  { %v4591_v32 = vpop.eup %4590  ;;  %v2223_v53 = vsel %vm691_vm8, %v2222_v56, %v2219_v30 }
0x18d8   :  { %v2996_v37 = vmul.f32 %v4591_v32, %v2990_v19  ;;  %v2829_v38 = vadd.f32 %v2828_v17, %v2223_v53 }
0x18da   :  { %4267 = vmatmul.msk.f32.vlgmr.msra.gmra.mxu3 %vm387_vm1, %v2996_v37  ;;  %4272 = vmatmul.msk.f32.vlgmr.msrb.gmra.mxu2 %vm1621_vm11, %v5974_v54  ;;  %v6052_v41 = vmax.f32 %v2829_v38, 0.0 }
0x18de   :  { %v3075_v51 = vpop.permute.xlu2 %3074 }
0x18df   :  { %v3078_v8 = vadd.f32 %v3077_v52, %v3075_v51 }
0x18e1   :  { %v3080_v19 = vmul.f32 0.2, %v3078_v8  ;;  %vm3079_vm13 = vcmp.gt.f32.partialorder %v3078_v8, 0.0 }
0x18e2   :  { %4273 = vmatmul.msk.f32.vlgmr.msrb.gmra.mxu3 %vm1621_vm11, %v6052_v41 }
0x18e3   :  { %v3081_v15 = vsel %vm3079_vm13, %v3078_v8, %v3080_v19 }
0x18e4   :  { %v3082_v5 = vsel %vm489_vm3, %v3081_v15, -inf }
0x18f1   :  { %v3035_v46 = vpop.xlane.xlu0 %3034 }
0x18f2   :  { %v3036_v13 = vsub.f32 %v3032_v23, %v3035_v46  ;;  %v3444_v46 = vld [vmem:[%s6353_s10 + $0x8] sm:$0xff] }
0x18f4   :  { %v3037_v47 = vmul.f32 1.442695, %v3036_v13  ;;  %v3443_v13 = vld [vmem:[%s6353_s10] sm:$0xff] }
0x18f6   :  { %4592 = vpow2.f32 %v3037_v47 }
0x18fc   :  { %v4593_v48 = vpop.eup %4592 }
0x18fd   :  { %v3039_v49 = vmul.f32 %v6019_v50, %v4593_v48 }
0x18ff   :  { %v3040_v9 = vsel %vm489_vm3, %v3039_v49, 0.0 }
0x1955   :  { %v6056_v61 = vpop.f32.mrf.mxu2 }
0x195d   :  { %v3021_v42 = vpop.f32.mrf.mxu3  ;;  %v3162_v43 = vpop.f32.mrf.mxu2 }
0x195e   :  { %v6058_v11 = vadd.f32 %v4450_v31, %v3162_v43 }
0x1960   :  { %3166 = vrot.lane.b32.xlu2 %v6058_v11, %s5056_s22 }
0x1965   :  { %v3229_v44 = vpop.f32.mrf.mxu3 }
0x1966   :  { %v6062_v45 = vadd.f32 %v4451_v20, %v3229_v44  ;;  %v3446_v20 = vld [vmem:[%s6353_s10 + $0x18] sm:$0xff]  ;;  %v3445_v44 = vld [vmem:[%s6353_s10 + $0x10] sm:$0xff] }
0x1968   :  { %3281 = vperm.xlu0 %4420, %v6062_v45   ;;  %3234 = vperm.xlu2 %4419, %v6062_v45  }
0x1970   :  { %4422 = vset.pattern.permute.xlu0 %v5055_v57 }
0x1992   :  { %3041 = vadd.xlane.f32.xlu0 %v3040_v9 }
0x19ba   :  { %v3167_v24 = vpop.permute.xlu2 %3166 }
0x19bb   :  { %3169 = vxpose.xlu2.b32.start.end [1/1] (short) (narrow) %v3167_v24, 8 }
0x19c2   :  { %v3235_v34 = vpop.permute.xlu2 %3234 }
0x19da   :  { %v3282_v0 = vpop.permute.xlu0 %3281 }
0x1a05   :  { %v3042_v2 = vpop.xlane.xlu0 %3041 }
0x1a06   :  { %v3043_v22 = vmax.f32 %v3042_v2, 1e-09 }
0x1a2c   :  { %3083 = vmax.xlane.f32.xlu2 %v3082_v5  ;;  %v3510_v5 = vld [vmem:[%s6354_s18 + $0x18] sm:$0xff] }
0x1a44   :  { %3351 = vrot.lane.b32.xlu2 %v6058_v11, %s5054_s30 }
0x1a54   :  { %v6073_v58 = vpop.trf.xlu2 }
0x1a55   :  { %v3237_v35 = vperm.slane %v6073_v58, 0  ;;  %v3284_v33 = vperm.slane %v6073_v58, 1 }
0x1a57   :  { %v3238_v7 = vadd.f32 %v3237_v35, %v3235_v34  ;;  %v3285_v6 = vadd.f32 %v3284_v33, %v3282_v0  ;;  %v3509_v35 = vld [vmem:[%s6354_s18 + $0x10] sm:$0xff] }
0x1a59   :  { %vm3239_vm15 = vcmp.gt.f32.partialorder %v3238_v7, 0.0  ;;  %v3240_v60 = vmul.f32 0.2, %v3238_v7  ;;  %v3287_v14 = vmul.f32 0.2, %v3285_v6  ;;  %vm3286_vm12 = vcmp.gt.f32.partialorder %v3285_v6, 0.0 }
0x1a5b   :  { %v3241_v17 = vsel %vm3239_vm15, %v3238_v7, %v3240_v60  ;;  %v3288_v16 = vsel %vm3286_vm12, %v3285_v6, %v3287_v14  ;;  %v3508_v60 = vld [vmem:[%s6354_s18 + $0x8] sm:$0xff] }
0x1a5c   :  { %v3242_v28 = vsel %vm800_vm9, %v3241_v17, -inf  ;;  %v3289_v21 = vsel %vm800_vm9, %v3288_v16, -inf }
0x1a5d   :  { %3243 = vmax.xlane.f32.xlu1 %v3242_v28  ;;  %v3507_v28 = vld [vmem:[%s6354_s18] sm:$0xff] }
0x1a76   :  { %3046 = vrot.lane.b32.xlu1 %v5987_v36, %s5056_s22 }
0x1a7e   :  { %3302 = vrot.lane.b32.xlu1 %v6058_v11, %s5061_s19 }
0x1a86   :  { %3123 = vrot.lane.b32.xlu1 %v3021_v42, %s5058_s28 }
0x1a9f   :  { %v3084_v18 = vpop.xlane.xlu2 %3083 }
0x1aa0   :  { %v3085_v59 = vsub.f32 %v3081_v15, %v3084_v18 }
0x1aa2   :  { %v3086_v55 = vmul.f32 1.442695, %v3085_v59  ;;  %v4452_v59 = vld [vmem:[#allocation14] ss:$0 sm:$0xff] }
0x1aa4   :  { %4594 = vpow2.f32 %v3086_v55 }
0x1aa7   :  { %v3352_v23 = vpop.permute.xlu2 %3351 }
0x1aa8   :  { %4278 = vmatpush.msk.msra.mxu2 %vm391_vm0, %v3352_v23 }
0x1aaa   :  { %v4595_v10 = vpop.eup %4594 }
0x1aab   :  { %v3088_v39 = vmul.f32 %v6019_v50, %v4595_v10 }
0x1aad   :  { %v3089_v12 = vsel %vm489_vm3, %v3088_v39, 0.0 }
0x1aae   :  { %3090 = vadd.xlane.f32.xlu0 %v3089_v12 }
0x1ab6   :  { %3290 = vmax.xlane.f32.xlu0 %v3289_v21 }
0x1ad0   :  { %v3244_v63 = vpop.xlane.xlu1 %3243 }
0x1ad1   :  { %v3245_v62 = vsub.f32 %v3241_v17, %v3244_v63 }
0x1ad3   :  { %v3246_v25 = vmul.f32 1.442695, %v3245_v62 }
0x1ad5   :  { %4596 = vpow2.f32 %v3246_v25 }
0x1ad6   :  { %4598 = vrcp.f32 %v3043_v22 }
0x1adb   :  { %v4597_v26 = vpop.eup %4596 }
0x1adc   :  { %v3248_v50 = vmul.f32 %v6088_v40, %v4597_v26  ;;  %v4599_v1 = vpop.eup %4598  ;;  %v3382_v26 = vperm.slane %v6073_v58, 3 }
0x1add   :  { %v3045_v56 = vmul.f32 %v4599_v1, %v3039_v49 }
0x1ade   :  { %v3249_v27 = vsel %vm800_vm9, %v3248_v50, 0.0 }
0x1adf   :  { %3250 = vadd.xlane.f32.xlu0 %v3249_v27 }
0x1ae8   :  { %v3047_v30 = vpop.permute.xlu1 %3046 }
0x1ae9   :  { %4268 = vmatpush.msk.msrb.mxu0 %vm391_vm0, %v3047_v30 }
0x1aea   :  { %4269 = vmatmul.msk.f32.vlgmr.msrb.gmra.mxu0 %vm387_vm1, %v3045_v56 }
0x1aeb   :  { %4274 = vmatpush.msk.msra.mxu0 %vm391_vm0, %v6058_v11 }
0x1aed   :  { %3463 = vmatpush.msrb.mxu0 %v3446_v20 }
0x1aef   :  { %3464 = vmatpush.msrb.mxu0 %v3445_v44 }
0x1af0   :  { %v3303_v34 = vpop.permute.xlu1 %3302 }
0x1af1   :  { %3465 = vmatpush.msrb.mxu0 %v3444_v46 }
0x1af3   :  { %3466 = vmatpush.msrb.mxu0 %v3443_v13 }
0x1af8   :  { %v3124_v0 = vpop.permute.xlu1 %3123 }
0x1af9   :  { %v3134_v21 = vsel %vm687_vm2, %v6056_v61, %v3124_v0 }
0x1b21   :  { %v3091_v32 = vpop.xlane.xlu0 %3090 }
0x1b29   :  { %v3291_v53 = vpop.xlane.xlu0 %3290 }
0x1b2a   :  { %v3292_v37 = vsub.f32 %v3288_v16, %v3291_v53 }
0x1b2c   :  { %v3293_v38 = vmul.f32 1.442695, %v3292_v37 }
0x1b2e   :  { %4600 = vpow2.f32 %v3293_v38 }
0x1b34   :  { %v4601_v31 = vpop.eup %4600 }
0x1b35   :  { %v3295_v42 = vmul.f32 %v6088_v40, %v4601_v31 }
0x1b37   :  { %v3296_v43 = vsel %vm800_vm9, %v3295_v42, 0.0 }
0x1b38   :  { %3297 = vadd.xlane.f32.xlu0 %v3296_v43 }
0x1b4c   :  { %3095 = vrot.lane.b32.xlu0 %v5987_v36, %s5057_s27  ;;  %v3092_v36 = vmax.f32 %v3091_v32, 1e-09 }
0x1b52   :  { %v3251_v47 = vpop.xlane.xlu0 %3250 }
0x1b53   :  { %v3252_v48 = vmax.f32 %v3251_v47, 1e-09 }
0x1b55   :  { %4602 = vrcp.f32 %v3252_v48 }
0x1b56   :  { %4604 = vrcp.f32 %v3092_v36 }
0x1b5b   :  { %v4603_v49 = vpop.eup %4602 }
0x1b5c   :  { %v3254_v9 = vmul.f32 %v4603_v49, %v3248_v50  ;;  %v4605_v8 = vpop.eup %4604 }
0x1b5d   :  { %v3094_v19 = vmul.f32 %v4605_v8, %v3088_v39  ;;  %v3333_v39 = vperm.slane %v6073_v58, 2 }
0x1b5e   :  { %4275 = vmatmul.msk.f32.vlgmr.msra.gmra.mxu0 %vm387_vm1, %v3254_v9 }
0x1b66   :  { %4282 = vmatmul.msk.f32.vlgmr.msrb.gmra.mxu0 %vm1621_vm11, %v6052_v41 }
0x1b67   :  { %v3070_v51 = vpop.f32.mrf.mxu0 }
0x1b68   :  { %3127 = vrot.lane.b32.xlu1 %v3070_v51, %s5059_s2 }
0x1b70   :  { %3330 = vperm.xlu1 %4421, %v6062_v45  }
0x1b78   :  { %4423 = vset.pattern.permute.xlu1 %v5051_v4 }
0x1bab   :  { %v3298_v24 = vpop.xlane.xlu0 %3297 }
0x1bac   :  { %v3299_v52 = vmax.f32 %v3298_v24, 1e-09  ;;  %v4453_v24 = vld [vmem:[#allocation16] ss:$0 sm:$0xff] }
0x1bae   :  { %4606 = vrcp.f32 %v3299_v52 }
0x1bb4   :  { %v4607_v7 = vpop.eup %4606 }
0x1bb5   :  { %v3301_v17 = vmul.f32 %v4607_v7, %v3295_v42 }
0x1bbe   :  { %v3096_v15 = vpop.permute.xlu0 %3095 }
0x1bbf   :  { %4270 = vmatpush.msk.msrb.mxu1 %vm391_vm0, %v3096_v15 }
0x1bc0   :  { %4271 = vmatmul.msk.f32.vlgmr.msrb.gmra.mxu1 %vm387_vm1, %v3094_v19 }
0x1bc1   :  { %4276 = vmatpush.msk.msra.mxu1 %vm391_vm0, %v3303_v34 }
0x1bc3   :  { %3527 = vmatpush.msrb.mxu1 %v3510_v5 }
0x1bc5   :  { %3528 = vmatpush.msrb.mxu1 %v3509_v35 }
0x1bc7   :  { %3529 = vmatpush.msrb.mxu1 %v3508_v60 }
0x1bc8   :  { %4277 = vmatmul.msk.f32.vlgmr.msra.gmra.mxu1 %vm387_vm1, %v3301_v17 }
0x1bc9   :  { %3530 = vmatpush.msrb.mxu1 %v3507_v28 }
0x1bd0   :  { %4283 = vmatmul.msk.f32.vlgmr.msrb.gmra.mxu1 %vm1621_vm11, %v5974_v54 }
0x1bda   :  { %v3128_v10 = vpop.permute.xlu1 %3127 }
0x1bdb   :  { %v6120_v18 = vpop.f32.mrf.mxu0  ;;  %v3135_v63 = vsel %vm689_vm6, %v3134_v21, %v3128_v10 }
0x1be2   :  { %v3331_v6 = vpop.permute.xlu1 %3330 }
0x1be3   :  { %v3468_v55 = vpop.f32.mrf.mxu0  ;;  %v3334_v12 = vadd.f32 %v3333_v39, %v3331_v6 }
0x1be4   :  { %v6122_v33 = vadd.f32 %v4452_v59, %v3468_v55 }
0x1be5   :  { %v3336_v14 = vmul.f32 0.2, %v3334_v12  ;;  %vm3335_vm3 = vcmp.gt.f32.partialorder %v3334_v12, 0.0 }
0x1be6   :  { %4284 = vmatpush.msk.msrb.mxu2 %vm1121_vm4, %v6122_v33 }
0x1be7   :  { %v3337_v54 = vsel %vm3335_vm3, %v3334_v12, %v3336_v14 }
0x1be8   :  { %v3338_v16 = vsel %vm800_vm9, %v3337_v54, -inf }
0x1c3d   :  { %v3119_v23 = vpop.f32.mrf.mxu1 }
0x1c3e   :  { %3131 = vrot.lane.b32.xlu0 %v3119_v23, %s5060_s24 }
0x1c45   :  { %v3326_v53 = vpop.f32.mrf.mxu1 }
0x1c4d   :  { %v3532_v52 = vpop.f32.mrf.mxu1 }
0x1c4e   :  { %v3533_v8 = vadd.f32 %v4453_v24, %v3532_v52 }
0x1c68   :  { %3339 = vmax.xlane.f32.xlu0 %v3338_v16 }
0x1c7c   :  { %3379 = vperm.xlu0 %4422, %v6062_v45  }
0x1c84   :  { %4429 = vset.pattern.permute.xlu0 %v5053_v29 }
0x1cb0   :  { %v3132_v62 = vpop.permute.xlu0 %3131 }
0x1cb1   :  { %v6135_v25 = vsel %vm691_vm8, %v3135_v63, %v3132_v62 }
0x1cdb   :  { %v3340_v2 = vpop.xlane.xlu0 %3339 }
0x1cdc   :  { %v3341_v61 = vsub.f32 %v3337_v54, %v3340_v2 }
0x1cde   :  { %v3342_v56 = vmul.f32 1.442695, %v3341_v61 }
0x1ce0   :  { %4608 = vpow2.f32 %v3342_v56 }
0x1ce6   :  { %v4609_v30 = vpop.eup %4608 }
0x1ce7   :  { %v3344_v32 = vmul.f32 %v6088_v40, %v4609_v30  ;;  %v4654_v30 = vld [vmem:[%s6330_s0] sm:$0x3f] }
0x1ce9   :  { %v3345_v58 = vsel %vm800_vm9, %v3344_v32, 0.0 }
0x1cee   :  { %v3380_v22 = vpop.permute.xlu0 %3379 }
0x1cef   :  { %v3383_v50 = vadd.f32 %v3382_v26, %v3380_v22 }
0x1cf1   :  { %v3385_v27 = vmul.f32 0.2, %v3383_v50  ;;  %vm3384_vm13 = vcmp.gt.f32.partialorder %v3383_v50, 0.0 }
0x1cf3   :  { %v3386_v1 = vsel %vm3384_vm13, %v3383_v50, %v3385_v27 }
0x1cf4   :  { %v3387_v45 = vsel %vm800_vm9, %v3386_v1, -inf }
0x1cf5   :  { %3388 = vmax.xlane.f32.xlu1 %v3387_v45 }
0x1d0e   :  { %3400 = vrot.lane.b32.xlu1 %v6058_v11, %s5062_s15 }
0x1d38   :  { %3346 = vadd.xlane.f32.xlu1 %v3345_v58 }
0x1d51   :  { %3428 = vrot.lane.b32.xlu1 %v3326_v53, %s5063_s4 }
0x1d68   :  { %v3389_v37 = vpop.xlane.xlu1 %3388 }
0x1d69   :  { %v3390_v38 = vsub.f32 %v3386_v1, %v3389_v37 }
0x1d6b   :  { %v3391_v31 = vmul.f32 1.442695, %v3390_v38 }
0x1d6d   :  { %4610 = vpow2.f32 %v3391_v31 }
0x1d73   :  { %v4611_v42 = vpop.eup %4610 }
0x1d74   :  { %v3393_v11 = vmul.f32 %v6088_v40, %v4611_v42 }
0x1d76   :  { %v3394_v43 = vsel %vm800_vm9, %v3393_v11, 0.0 }
0x1d77   :  { %3395 = vadd.xlane.f32.xlu2 %v3394_v43 }
0x1d80   :  { %v3401_v20 = vpop.permute.xlu1 %3400 }
0x1d81   :  { %4280 = vmatpush.msk.msra.mxu3 %vm391_vm0, %v3401_v20  ;;  %vm3441_vm0 = vcmask 97280  }
0x1dab   :  { %v3347_v44 = vpop.xlane.xlu1 %3346 }
0x1dac   :  { %v3348_v46 = vmax.f32 %v3347_v44, 1e-09 }
0x1dae   :  { %4612 = vrcp.f32 %v3348_v46 }
0x1db4   :  { %v4613_v13 = vpop.eup %4612 }
0x1db5   :  { %v3350_v47 = vmul.f32 %v4613_v13, %v3344_v32 }
0x1db7   :  { %4279 = vmatmul.msk.f32.vlgmr.msra.gmra.mxu2 %vm387_vm1, %v3350_v47 }
0x1dc3   :  { %v3429_v5 = vpop.permute.xlu1 %3428 }
0x1dc4   :  { %v3439_v34 = vsel %vm762_vm7, %v6120_v18, %v3429_v5 }
0x1dea   :  { %v3396_v48 = vpop.xlane.xlu2 %3395 }
0x1deb   :  { %v3397_v49 = vmax.f32 %v3396_v48, 1e-09 }
0x1ded   :  { %4614 = vrcp.f32 %v3397_v49 }
0x1df3   :  { %v4615_v9 = vpop.eup %4614 }
0x1df4   :  { %v3399_v51 = vmul.f32 %v4615_v9, %v3393_v11 }
0x1df6   :  { %4281 = vmatmul.msk.f32.vlgmr.msra.gmra.mxu3 %vm387_vm1, %v3399_v51 }
0x1e3a   :  { %v3375_v40 = vpop.f32.mrf.mxu2 }
0x1e3b   :  { %3432 = vrot.lane.b32.xlu0 %v3375_v40, %s5058_s28 }
0x1e43   :  { %3472 = vrot.lane.b32.xlu0 %v6122_v33, %s5052_s5  ;;  %s6355_s5 = sld [smem:[#allocation68_spill]] }
0x1e49   :  { %v3749_v46 = vld [vmem:[%s6355_s5 + $0x18] sm:$0xff]  ;;  %v3748_v13 = vld [vmem:[%s6355_s5 + $0x10] sm:$0xff]  ;;  %v3747_v48 = vld [vmem:[%s6355_s5 + $0x8] sm:$0xff] }
0x1e4a   :  { %3766 = vmatpush.msra.mxu2 %v3749_v46  ;;  %v3746_v9 = vld [vmem:[%s6355_s5] sm:$0xff] }
0x1e4c   :  { %3767 = vmatpush.msra.mxu2 %v3748_v13 }
0x1e4e   :  { %3768 = vmatpush.msra.mxu2 %v3747_v48 }
0x1e50   :  { %3769 = vmatpush.msra.mxu2 %v3746_v9 }
0x1e79   :  { %v3424_v36 = vpop.f32.mrf.mxu3 }
0x1e7a   :  { %3436 = vrot.lane.b32.xlu1 %v3424_v36, %s5064_s13 }
0x1e82   :  { %3537 = vperm.xlu1 %4423, %v3533_v8  }
0x1e8a   :  { %4425 = vset.pattern.permute.xlu1 %v5053_v29 }
0x1e8b   :  { %3633 = vperm.xlu1 %4425, %v3533_v8  }
0x1e93   :  { %4426 = vset.pattern.permute.xlu1 %v5055_v57 }
0x1e94   :  { %3682 = vperm.xlu1 %4426, %v3533_v8  }
0x1e9c   :  { %3703 = vrot.lane.b32.xlu1 %v6122_v33, %s5057_s27 }
0x1e9d   :  { %4428 = vset.pattern.permute.xlu1 %v5050_v3 }
0x1ead   :  { %v3433_v19 = vpop.permute.xlu0 %3432 }
0x1eae   :  { %v3440_v35 = vsel %vm687_vm2, %v3439_v34, %v3433_v19 }
0x1eb5   :  { %v3473_v15 = vpop.permute.xlu0 %3472 }
0x1eb6   :  { %3475 = vxpose.xlu2.b32.start.end [1/1] (short) (narrow) %v3473_v15, 8 }
0x1eec   :  { %v3437_v29 = vpop.permute.xlu1 %3436 }
0x1eed   :  { %v6162_v7 = vsel %vm3441_vm0, %v3440_v35, %v3437_v29 }
0x1ef4   :  { %v3538_v60 = vpop.permute.xlu1 %3537 }
0x1efd   :  { %v3634_v17 = vpop.permute.xlu1 %3633 }
0x1f06   :  { %v3683_v28 = vpop.permute.xlu1 %3682 }
0x1f0e   :  { %v3704_v59 = vpop.permute.xlu1 %3703 }
0x1f0f   :  { %4290 = vmatpush.msk.msra.mxu1 %vm1121_vm4, %v3704_v59  ;;  %v3811_v59 = vld [vmem:[%s5335_s20 + $0x8] sm:$0xff] }
0x1f18   :  { %4424 = vset.pattern.permute.xlu2 %v5050_v3 }
0x1f1f   :  { %3584 = vperm.xlu2 %4424, %v3533_v8  }
0x1f27   :  { %4427 = vset.pattern.permute.xlu2 %v5051_v4 }
0x1f4f   :  { %v3491_v55 = vpop.trf.xlu2 }
0x1f50   :  { %v3540_v23 = vperm.slane %v3491_v55, 0  ;;  %v3587_v39 = vperm.slane %v3491_v55, 1  ;;  %v3636_v4 = vperm.slane %v3491_v55, 2  ;;  %v3685_v63 = vperm.slane %v3491_v55, 3  ;;  %v3810_v55 = vld [vmem:[%s5335_s20] sm:$0xff] }
0x1f52   :  { %v3541_v18 = vadd.f32 %v3540_v23, %v3538_v60  ;;  %v3637_v21 = vadd.f32 %v3636_v4, %v3634_v17  ;;  %v3686_v26 = vadd.f32 %v3685_v63, %v3683_v28  ;;  %v3813_v17 = vld [vmem:[%s5335_s20 + $0x18] sm:$0xff]  ;;  %v3812_v28 = vld [vmem:[%s5335_s20 + $0x10] sm:$0xff]  ;;  %s5065_s20 = smov [#allocation20]  }
0x1f53   :  { %v4454_v63 = vld [vmem:[#allocation17] ss:$0 sm:$0xff] }
0x1f54   :  { %vm3542_vm1 = vcmp.gt.f32.partialorder %v3541_v18, 0.0  ;;  %v3543_v0 = vmul.f32 0.2, %v3541_v18  ;;  %v3639_v62 = vmul.f32 0.2, %v3637_v21  ;;  %vm3638_vm15 = vcmp.gt.f32.partialorder %v3637_v21, 0.0 }
0x1f55   :  { %v3688_v50 = vmul.f32 0.2, %v3686_v26  ;;  %vm3687_vm12 = vcmp.gt.f32.partialorder %v3686_v26, 0.0 }
0x1f56   :  { %v3544_v10 = vsel %vm3542_vm1, %v3541_v18, %v3543_v0  ;;  %v3640_v2 = vsel %vm3638_vm15, %v3637_v21, %v3639_v62 }
0x1f57   :  { %v3545_v6 = vsel %vm1103_vm14, %v3544_v10, -inf  ;;  %v3641_v22 = vsel %vm1103_vm14, %v3640_v2, -inf  ;;  %v3689_v27 = vsel %vm3687_vm12, %v3686_v26, %v3688_v50  ;;  %v4455_v26 = vld [vmem:[#allocation19] ss:$0 sm:$0xff] }
0x1f58   :  { %3546 = vmax.xlane.f32.xlu0 %v3545_v6  ;;  %v3690_v61 = vsel %vm1103_vm14, %v3689_v27, -inf }
0x1f79   :  { %v3585_v12 = vpop.permute.xlu2 %3584 }
0x1f7a   :  { %v3588_v14 = vadd.f32 %v3587_v39, %v3585_v12 }
0x1f7c   :  { %v3590_v54 = vmul.f32 0.2, %v3588_v14  ;;  %vm3589_vm9 = vcmp.gt.f32.partialorder %v3588_v14, 0.0 }
0x1f7e   :  { %v3591_v16 = vsel %vm3589_vm9, %v3588_v14, %v3590_v54 }
0x1f7f   :  { %v3592_v3 = vsel %vm1103_vm14, %v3591_v16, -inf }
0x1f80   :  { %3593 = vmax.xlane.f32.xlu0 %v3592_v3 }
0x1f94   :  { %3605 = vrot.lane.b32.xlu0 %v6122_v33, %s5054_s30 }
0x1f9c   :  { %3654 = vrot.lane.b32.xlu0 %v6122_v33, %s5056_s22 }
0x1fc6   :  { %3642 = vmax.xlane.f32.xlu0 %v3641_v22 }
0x1fcb   :  { %v3547_v1 = vpop.xlane.xlu0 %3546 }
0x1fcc   :  { %v3548_v45 = vsub.f32 %v3544_v10, %v3547_v1 }
0x1fce   :  { %v3549_v56 = vmul.f32 1.442695, %v3548_v45  ;;  %3691 = vmax.xlane.f32.xlu0 %v3690_v61 }
0x1fd0   :  { %4616 = vpow2.f32 %v3549_v56 }
0x1fd6   :  { %v4617_v33 = vpop.eup %4616 }
0x1fd7   :  { %v3551_v32 = vmul.f32 %v4654_v30, %v4617_v33 }
0x1fd9   :  { %v3552_v58 = vsel %vm1103_vm14, %v3551_v32, 0.0 }
0x1fda   :  { %3553 = vadd.xlane.f32.xlu1 %v3552_v58 }
0x1ff3   :  { %v3594_v53 = vpop.xlane.xlu0 %3593 }
0x1ff4   :  { %v3595_v37 = vsub.f32 %v3591_v16, %v3594_v53 }
0x1ff6   :  { %v3596_v38 = vmul.f32 1.442695, %v3595_v37 }
0x1ff8   :  { %4618 = vpow2.f32 %v3596_v38 }
0x1ffe   :  { %v4619_v31 = vpop.eup %4618 }
0x1fff   :  { %v3598_v42 = vmul.f32 %v4654_v30, %v4619_v31 }
0x2001   :  { %v3599_v11 = vsel %vm1103_vm14, %v3598_v42, 0.0 }
0x2002   :  { %3600 = vadd.xlane.f32.xlu1 %v3599_v11 }
0x2006   :  { %v3606_v43 = vpop.permute.xlu0 %3605 }
0x2007   :  { %4286 = vmatpush.msk.msrb.mxu3 %vm1121_vm4, %v3606_v43 }
0x2009   :  { %3830 = vmatpush.msra.mxu3 %v3813_v17 }
0x200b   :  { %3831 = vmatpush.msra.mxu3 %v3812_v28 }
0x200d   :  { %3832 = vmatpush.msra.mxu3 %v3811_v59 }
0x200e   :  { %v3655_v20 = vpop.permute.xlu0 %3654 }
0x200f   :  { %4288 = vmatpush.msk.msra.mxu0 %vm1121_vm4, %v3655_v20  ;;  %3833 = vmatpush.msra.mxu3 %v3810_v55 }
0x2039   :  { %v3643_v44 = vpop.xlane.xlu0 %3642 }
0x203a   :  { %v3644_v47 = vsub.f32 %v3640_v2, %v3643_v44 }
0x203c   :  { %v3645_v49 = vmul.f32 1.442695, %v3644_v47 }
0x203e   :  { %4620 = vpow2.f32 %v3645_v49 }
0x2041   :  { %v3692_v51 = vpop.xlane.xlu0 %3691 }
0x2042   :  { %v3693_v40 = vsub.f32 %v3689_v27, %v3692_v51 }
0x2044   :  { %v4621_v36 = vpop.eup %4620  ;;  %v3694_v24 = vmul.f32 1.442695, %v3693_v40 }
0x2045   :  { %v3647_v52 = vmul.f32 %v4654_v30, %v4621_v36 }
0x2046   :  { %4622 = vpow2.f32 %v3694_v24 }
0x2047   :  { %v3648_v8 = vsel %vm1103_vm14, %v3647_v52, 0.0 }
0x2048   :  { %3649 = vadd.xlane.f32.xlu1 %v3648_v8 }
0x204c   :  { %v4623_v19 = vpop.eup %4622 }
0x204d   :  { %v3554_v15 = vpop.xlane.xlu1 %3553  ;;  %v3696_v5 = vmul.f32 %v4654_v30, %v4623_v19 }
0x204e   :  { %v3555_v34 = vmax.f32 %v3554_v15, 1e-09 }
0x204f   :  { %v3697_v35 = vsel %vm1103_vm14, %v3696_v5, 0.0 }
0x2050   :  { %4624 = vrcp.f32 %v3555_v34  ;;  %3698 = vadd.xlane.f32.xlu2 %v3697_v35  ;;  %v4655_v35 = vld [vmem:[%s6335_s7] sm:$0x7] }
0x2056   :  { %v4625_v29 = vpop.eup %4624 }
0x2057   :  { %v3557_v60 = vmul.f32 %v4625_v29, %v3551_v32 }
0x2059   :  { %4285 = vmatmul.msk.f32.vlgmr.msrb.gmra.mxu2 %vm1117_vm10, %v3557_v60 }
0x2061   :  { %4292 = vmatmul.msk.f32.vlgmr.msra.gmra.mxu2 %vm1621_vm11, %v6052_v41 }
0x2075   :  { %v3601_v23 = vpop.xlane.xlu1 %3600 }
0x2076   :  { %v3602_v18 = vmax.f32 %v3601_v23, 1e-09 }
0x2078   :  { %4626 = vrcp.f32 %v3602_v18 }
0x207e   :  { %v4627_v0 = vpop.eup %4626 }
0x207f   :  { %v3604_v10 = vmul.f32 %v4627_v0, %v3598_v42 }
0x2081   :  { %4287 = vmatmul.msk.f32.vlgmr.msrb.gmra.mxu3 %vm1117_vm10, %v3604_v10 }
0x2089   :  { %4293 = vmatmul.msk.f32.vlgmr.msra.gmra.mxu3 %vm1621_vm11, %v6052_v41 }
0x20bb   :  { %v3650_v6 = vpop.xlane.xlu1 %3649 }
0x20bc   :  { %v3651_v39 = vmax.f32 %v3650_v6, 1e-09 }
0x20be   :  { %4628 = vrcp.f32 %v3651_v39 }
0x20c3   :  { %v3699_v12 = vpop.xlane.xlu2 %3698 }
0x20c4   :  { %v4629_v14 = vpop.eup %4628  ;;  %v3700_v54 = vmax.f32 %v3699_v12, 1e-09 }
0x20c5   :  { %v3653_v16 = vmul.f32 %v4629_v14, %v3647_v52 }
0x20c6   :  { %4630 = vrcp.f32 %v3700_v54 }
0x20c7   :  { %4289 = vmatmul.msk.f32.vlgmr.msra.gmra.mxu0 %vm1117_vm10, %v3653_v16 }
0x20cc   :  { %v4631_v3 = vpop.eup %4630 }
0x20cd   :  { %v3702_v4 = vmul.f32 %v4631_v3, %v3696_v5 }
0x20cf   :  { %4291 = vmatmul.msk.f32.vlgmr.msra.gmra.mxu1 %vm1117_vm10, %v3702_v4 }
0x20dc   :  { %v3580_v21 = vpop.f32.mrf.mxu2 }
0x20e4   :  { %v3771_v62 = vpop.f32.mrf.mxu2 }
0x20e5   :  { %v6198_v2 = vadd.f32 %v4454_v63, %v3771_v62 }
0x20e7   :  { %3775 = vrot.lane.b32.xlu0 %v6198_v2, %s5056_s22  ;;  %4294 = vmatpush.msk.msrb.mxu0 %vm1121_vm4, %v6198_v2 }
0x2104   :  { %v3629_v41 = vpop.f32.mrf.mxu3 }
0x210c   :  { %v3835_v22 = vpop.f32.mrf.mxu3 }
0x210d   :  { %v3836_v50 = vadd.f32 %v4455_v26, %v3835_v22 }
0x210f   :  { %3840 = vperm.xlu2 %4427, %v3836_v50  }
0x2117   :  { %3908 = vrot.lane.b32.xlu2 %v6198_v2, %s5061_s19 }
0x2144   :  { %v3678_v27 = vpop.f32.mrf.mxu0 }
0x2145   :  { %3735 = vrot.lane.b32.xlu1 %v3678_v27, %s5059_s2 }
0x214c   :  { %v3727_v1 = vpop.f32.mrf.mxu1 }
0x214d   :  { %3739 = vrot.lane.b32.xlu1 %v3727_v1, %s5060_s24 }
0x2155   :  { %3731 = vrot.lane.b32.xlu1 %v3629_v41, %s5058_s28 }
0x2159   :  { %v3776_v56 = vpop.permute.xlu0 %3775 }
0x215d   :  { %3887 = vperm.xlu1 %4428, %v3836_v50  }
0x2169   :  { %v3841_v45 = vpop.permute.xlu2 %3840 }
0x2171   :  { %v3909_v61 = vpop.permute.xlu2 %3908 }
0x2172   :  { %4296 = vmatpush.msk.msrb.mxu1 %vm1121_vm4, %v3909_v61 }
0x2192   :  { %3778 = vxpose.xlu1.b32.start.end [1/1] (short) (narrow) %v3776_v56, 8 }
0x21b7   :  { %v3736_v33 = vpop.permute.xlu1 %3735 }
0x21bf   :  { %v3740_v30 = vpop.permute.xlu1 %3739 }
0x21c7   :  { %v3732_v32 = vpop.permute.xlu1 %3731 }
0x21c8   :  { %v3742_v58 = vsel %vm687_vm2, %v3580_v21, %v3732_v32 }
0x21c9   :  { %v3743_v53 = vsel %vm689_vm6, %v3742_v58, %v3736_v33 }
0x21ca   :  { %v3744_v37 = vsel %vm691_vm8, %v3743_v53, %v3740_v30 }
0x21cb   :  { %v6214_v38 = vadd.f32 %v3744_v37, %v6135_v25 }
0x21cf   :  { %v3888_v31 = vpop.permute.xlu1 %3887 }
0x21e5   :  { %4430 = vset.pattern.permute.xlu1 %v5055_v57 }
0x21ec   :  { %3985 = vperm.xlu1 %4430, %v3836_v50  }
0x2236   :  { %v3794_v42 = vpop.trf.xlu1 }
0x2237   :  { %v3843_v11 = vperm.slane %v3794_v42, 0  ;;  %v3890_v43 = vperm.slane %v3794_v42, 1  ;;  %v3988_v9 = vperm.slane %v3794_v42, 3  ;;  %v3939_v17 = vperm.slane %v3794_v42, 2 }
0x2239   :  { %v3844_v20 = vadd.f32 %v3843_v11, %v3841_v45  ;;  %v3891_v46 = vadd.f32 %v3890_v43, %v3888_v31 }
0x223b   :  { %vm3845_vm14 = vcmp.gt.f32.partialorder %v3844_v20, 0.0  ;;  %v3846_v44 = vmul.f32 0.2, %v3844_v20  ;;  %v3893_v48 = vmul.f32 0.2, %v3891_v46  ;;  %vm3892_vm6 = vcmp.gt.f32.partialorder %v3891_v46, 0.0 }
0x223d   :  { %v3847_v13 = vsel %vm3845_vm14, %v3844_v20, %v3846_v44  ;;  %v3894_v49 = vsel %vm3892_vm6, %v3891_v46, %v3893_v48 }
0x223e   :  { %v3848_v47 = vsel %vm1409_vm5, %v3847_v13, -inf  ;;  %v3895_v25 = vsel %vm1409_vm5, %v3894_v49, -inf }
0x223f   :  { %3849 = vmax.xlane.f32.xlu0 %v3848_v47 }
0x2247   :  { %3896 = vmax.xlane.f32.xlu0 %v3895_v25 }
0x225b   :  { %3936 = vperm.xlu0 %4429, %v3836_v50  }
0x225e   :  { %v3986_v51 = vpop.permute.xlu1 %3985 }
0x225f   :  { %v3989_v40 = vadd.f32 %v3988_v9, %v3986_v51 }
0x2261   :  { %v3991_v36 = vmul.f32 0.2, %v3989_v40  ;;  %vm3990_vm8 = vcmp.gt.f32.partialorder %v3989_v40, 0.0 }
0x2263   :  { %v3992_v24 = vsel %vm3990_vm8, %v3989_v40, %v3991_v36  ;;  %4431 = vset.pattern.permute.xlu0 %v5055_v57 }
0x2264   :  { %v3993_v52 = vsel %vm1409_vm5, %v3992_v24, -inf }
0x2265   :  { %3994 = vmax.xlane.f32.xlu1 %v3993_v52 }
0x22b2   :  { %v3850_v8 = vpop.xlane.xlu0 %3849 }
0x22b3   :  { %v3851_v18 = vsub.f32 %v3847_v13, %v3850_v8 }
0x22b5   :  { %v3852_v0 = vmul.f32 1.442695, %v3851_v18 }
0x22ba   :  { %v3897_v19 = vpop.xlane.xlu0 %3896 }
0x22bb   :  { %v3898_v15 = vsub.f32 %v3894_v49, %v3897_v19 }
0x22bd   :  { %v3899_v5 = vmul.f32 1.442695, %v3898_v15 }
0x22bf   :  { %4632 = vpow2.f32 %v3899_v5 }
0x22c0   :  { %4634 = vpow2.f32 %v3852_v0 }
0x22c5   :  { %v4633_v34 = vpop.eup %4632 }
0x22c6   :  { %v3901_v29 = vmul.f32 %v4655_v35, %v4633_v34  ;;  %v4635_v10 = vpop.eup %4634 }
0x22c7   :  { %v3854_v6 = vmul.f32 %v4655_v35, %v4635_v10 }
0x22c8   :  { %v3902_v60 = vsel %vm1409_vm5, %v3901_v29, 0.0 }
0x22c9   :  { %3903 = vadd.xlane.f32.xlu0 %v3902_v60  ;;  %v3855_v39 = vsel %vm1409_vm5, %v3854_v6, 0.0 }
0x22cd   :  { %v3937_v28 = vpop.permute.xlu0 %3936 }
0x22ce   :  { %v3940_v59 = vadd.f32 %v3939_v17, %v3937_v28 }
0x22d0   :  { %v3942_v55 = vmul.f32 0.2, %v3940_v59  ;;  %vm3941_vm11 = vcmp.gt.f32.partialorder %v3940_v59, 0.0 }
0x22d2   :  { %v3943_v57 = vsel %vm3941_vm11, %v3940_v59, %v3942_v55 }
0x22d3   :  { %v3944_v23 = vsel %vm1409_vm5, %v3943_v57, -inf }
0x22d4   :  { %3945 = vmax.xlane.f32.xlu2 %v3944_v23 }
0x22d8   :  { %v3995_v16 = vpop.xlane.xlu1 %3994 }
0x22d9   :  { %v3996_v21 = vsub.f32 %v3992_v24, %v3995_v16 }
0x22db   :  { %v3997_v41 = vmul.f32 1.442695, %v3996_v21 }
0x22ec   :  { %3957 = vrot.lane.b32.xlu2 %v6198_v2, %s5054_s30 }
0x2315   :  { %3856 = vadd.xlane.f32.xlu2 %v3855_v39 }
0x232d   :  { %4006 = vrot.lane.b32.xlu2 %v6198_v2, %s5062_s15 }
0x233c   :  { %v3904_v12 = vpop.xlane.xlu0 %3903 }
0x233d   :  { %v3905_v14 = vmax.f32 %v3904_v12, 1e-09 }
0x233f   :  { %4636 = vrcp.f32 %v3905_v14 }
0x2345   :  { %v4637_v54 = vpop.eup %4636 }
0x2346   :  { %v3907_v3 = vmul.f32 %v4637_v54, %v3901_v29 }
0x2347   :  { %v3946_v4 = vpop.xlane.xlu2 %3945 }
0x2348   :  { %v3947_v63 = vsub.f32 %v3943_v57, %v3946_v4  ;;  %4297 = vmatmul.msk.f32.vlgmr.msrb.gmra.mxu1 %vm1117_vm10, %v3907_v3 }
0x234a   :  { %v3948_v62 = vmul.f32 1.442695, %v3947_v63 }
0x234c   :  { %4638 = vpow2.f32 %v3948_v62 }
0x234d   :  { %4640 = vpow2.f32 %v3997_v41 }
0x234f   :  { %v3958_v26 = vpop.permute.xlu2 %3957 }
0x2350   :  { %4298 = vmatpush.msk.msrb.mxu2 %vm1121_vm4, %v3958_v26 }
0x2352   :  { %v4639_v22 = vpop.eup %4638 }
0x2353   :  { %v3950_v2 = vmul.f32 %v4655_v35, %v4639_v22  ;;  %v4641_v27 = vpop.eup %4640 }
0x2354   :  { %v3999_v1 = vmul.f32 %v4655_v35, %v4641_v27 }
0x2355   :  { %v3951_v50 = vsel %vm1409_vm5, %v3950_v2, 0.0 }
0x2356   :  { %3952 = vadd.xlane.f32.xlu0 %v3951_v50  ;;  %v4000_v45 = vsel %vm1409_vm5, %v3999_v1, 0.0 }
0x235e   :  { %4001 = vadd.xlane.f32.xlu0 %v4000_v45 }
0x2388   :  { %v3857_v61 = vpop.xlane.xlu2 %3856 }
0x2389   :  { %v3858_v56 = vmax.f32 %v3857_v61, 1e-09 }
0x238b   :  { %4642 = vrcp.f32 %v3858_v56 }
0x2390   :  { %v4007_v33 = vpop.permute.xlu2 %4006 }
0x2391   :  { %v4643_v30 = vpop.eup %4642  ;;  %4300 = vmatpush.msk.msrb.mxu3 %vm1121_vm4, %v4007_v33 }
0x2392   :  { %v3860_v32 = vmul.f32 %v4643_v30, %v3854_v6 }
0x2394   :  { %4295 = vmatmul.msk.f32.vlgmr.msrb.gmra.mxu0 %vm1117_vm10, %v3860_v32 }
0x23c5   :  { %v3932_v58 = vpop.f32.mrf.mxu1 }
0x23c6   :  { %4034 = vrot.lane.b32.xlu0 %v3932_v58, %s5063_s4 }
0x23c9   :  { %v3953_v53 = vpop.xlane.xlu0 %3952 }
0x23ca   :  { %v3954_v37 = vmax.f32 %v3953_v53, 1e-09 }
0x23cc   :  { %4644 = vrcp.f32 %v3954_v37 }
0x23ce   :  { %4054 = vrot.lane.b32.xlu0 %v6214_v38, %s5056_s22  ;;  %s4086_s22 = sshll.u32 %s5065_s20, 4  ;;  %s4087_s22 = int_to_ptr.vmem [resolvable:$true] %s4086_s22 }
0x23d1   :  { %v4002_v31 = vpop.xlane.xlu0 %4001 }
0x23d2   :  { %v4645_v42 = vpop.eup %4644  ;;  %v4003_v11 = vmax.f32 %v4002_v31, 1e-09 }
0x23d3   :  { %v3956_v43 = vmul.f32 %v4645_v42, %v3950_v2 }
0x23d4   :  { %4646 = vrcp.f32 %v4003_v11 }
0x23d5   :  { %4299 = vmatmul.msk.f32.vlgmr.msrb.gmra.mxu2 %vm1117_vm10, %v3956_v43 }
0x23da   :  { %v4647_v20 = vpop.eup %4646 }
0x23db   :  { %v4005_v44 = vmul.f32 %v4647_v20, %v3999_v1 }
0x23dd   :  { %4301 = vmatmul.msk.f32.vlgmr.msrb.gmra.mxu3 %vm1117_vm10, %v4005_v44 }
0x2411   :  { %v3883_v49 = vpop.f32.mrf.mxu0 }
0x2438   :  { %v4035_v48 = vpop.permute.xlu0 %4034 }
0x2439   :  { %v4045_v25 = vsel %vm762_vm7, %v3883_v49, %v4035_v48  ;;  %vm4077_vm7 = vcmask 62464  }
0x2440   :  { %v4055_v8 = vpop.permute.xlu0 %4054 }
0x2458   :  { %v3981_v46 = vpop.f32.mrf.mxu2 }
0x2459   :  { %4038 = vrot.lane.b32.xlu2 %v3981_v46, %s5058_s28  ;;  %s4936_s28 = scalar_lea.hbm %s5345_s25, 8 }
0x2460   :  { %v4030_v13 = vpop.f32.mrf.mxu3 }
0x2461   :  { %4042 = vrot.lane.b32.xlu2 %v4030_v13, %s5064_s13 }
0x2469   :  { %4050 = vrot.lane.b32.xlu2 %v6214_v38, %s5054_s30 }
0x2471   :  { %4058 = vrot.lane.b32.xlu2 %v6214_v38, %s5057_s27  ;;  %s4088_s27 = sshll.u32 %s5345_s25, 4  ;;  %s4089_s27 = int_to_ptr.hbm [resolvable:$true] %s4088_s27 }
0x24b3   :  { %v4039_v47 = vpop.permute.xlu2 %4038 }
0x24b4   :  { %v4046_v9 = vsel %vm687_vm2, %v4045_v25, %v4039_v47 }
0x24bb   :  { %v4043_v51 = vpop.permute.xlu2 %4042 }
0x24bc   :  { %v4047_v40 = vsel %vm3441_vm0, %v4046_v9, %v4043_v51 }
0x24bd   :  { %v4048_v36 = vadd.f32 %v4047_v40, %v6162_v7 }
0x24bf   :  { %4072 = vrot.lane.b32.xlu2 %v4048_v36, %s5062_s15  ;;  %4068 = vrot.lane.b32.xlu1 %v4048_v36, %s5054_s30  ;;  %s4932_s30 = sshra.s32 %s4089_s27, 4  ;;  %s4933_s30 = int_to_ptr.hbm [resolvable:$true] %s4932_s30 }
0x24c0   :  { %4064 = vrot.lane.b32.xlu0 %v4048_v36, %s5061_s19  ;;  %s4934_s0 = scalar_lea.hbm %s4933_s30, 8  ;;  %p4937_p0 = scmp.lt.s32.totalorder %s4933_s30, %s5345_s25 }
0x24c1   :  { %p4935_p13 = scmp.ne.s32.totalorder %s4933_s30, %s4934_s0  ;;  %p4938_p1 = scmp.lt.s32.totalorder %s4936_s28, %s4934_s0 }
0x24c3   :  { %v4051_v24 = vpop.permute.xlu2 %4050  ;;  %p4939_p2 = por %p4938_p1, %p4937_p0 }
0x24c4   :  { %v4053_v52 = vadd.f32 %v4051_v24, %v6214_v38 }
0x24c5   :  { %p4940_p3 = pnand %p4939_p2, %p4935_p13 }
0x24c6   :  { %v4057_v19 = vadd.f32 %v4055_v8, %v4053_v52 }
0x24cb   :  { %v4059_v15 = vpop.permute.xlu2 %4058 }
0x24cc   :  { %v4061_v5 = vadd.f32 %v4059_v15, %v4057_v19 }
0x24ce   :  { %v4062_v7 = vmul.f32 0.25, %v4061_v5 }
0x24d0   :  { %4078 = vst.msk [vmem:[#allocation20] sm:$0x3f] %vm4077_vm7, %v4062_v7 }
0x24d1   :  { %4943 = shalt.err (!%p4940_p3)
}
0x24d2   :  { %4091 = dma.vmem_to_hbm [thread:$0]  %s4087_s22, 128, %s4089_s27, [#allocation4]   ;;  %vm4079_vm4 = vcmask 26624  }
0x24d3   :  { %s5066_s2 = smov [#allocation21]   ;;  %s4099_s7 = sshll.u32 %s5350_s14, 4  ;;  %s4100_s7 = int_to_ptr.hbm [resolvable:$true] %s4099_s7 }
0x24d4   :  { %s4097_s24 = sshll.u32 %s5066_s2, 4  ;;  %s4956_s25 = sshra.s32 %s4100_s7, 4  ;;  %s4098_s24 = int_to_ptr.vmem [resolvable:$true] %s4097_s24  ;;  %s4957_s25 = int_to_ptr.hbm [resolvable:$true] %s4956_s25 }
0x24d5   :  { %s4958_s3 = scalar_lea.hbm %s4957_s25, 4  ;;  %s4960_s8 = scalar_lea.hbm %s5350_s14, 4 }
0x24d6   :  { %p4959_p4 = scmp.ne.s32.totalorder %s4957_s25, %s4958_s3  ;;  %p4961_p5 = scmp.lt.s32.totalorder %s4957_s25, %s5350_s14 }
0x24d7   :  { %p4962_p6 = scmp.lt.s32.totalorder %s4960_s8, %s4958_s3 }
0x24d9   :  { %p4963_p7 = por %p4962_p6, %p4961_p5 }
0x24db   :  { %p4964_p8 = pnand %p4963_p7, %p4959_p4 }
0x2519   :  { %v4073_v60 = vpop.permute.xlu2 %4072 }
0x2531   :  { %v4069_v35 = vpop.permute.xlu1 %4068 }
0x2532   :  { %v4065_v38 = vpop.permute.xlu0 %4064 }
0x2533   :  { %v4067_v34 = vadd.f32 %v4065_v38, %v4048_v36 }
0x2535   :  { %v4071_v29 = vadd.f32 %v4069_v35, %v4067_v34 }
0x2537   :  { %v4075_v17 = vadd.f32 %v4073_v60, %v4071_v29 }
0x2539   :  { %v4076_v28 = vmul.f32 0.25, %v4075_v17 }
0x253b   :  { %4080 = vst.msk [vmem:[#allocation21] sm:$0x7] %vm4079_vm4, %v4076_v28 }
0x253c   :  { %4967 = shalt.err (!%p4964_p8)
}
0x253d   :  { %4102 = dma.vmem_to_hbm [thread:$0]  %s4098_s24, 64, %s4100_s7, [#allocation22]  }
0x253e   :  { %4980 = dma.done.wait [#allocation4], 128  }
0x253f   :  { %4981 = vsyncadd [#allocation4], 4294967168 }
0x2540   :  { %4982 = dma.done.wait [#allocation22], 64  }
0x2541   :  { %4983 = vsyncadd [#allocation22], 4294967232 }
0x2542   :  { %4111 = vsyncpa [#allocation3], 1 }
0x2543   :  { %4112 = vsyncpa [#allocation6], 1 }
0x2544   :  { %4113 = vsyncpa [#allocation9], 1 }
0x2545   :  { %4114 = vsyncpa [#allocation12], 1 }
0x2546   :  { %4115 = vsyncpa [#allocation15], 1 }
0x2547   :  { %4116 = vsyncpa [#allocation18], 1 }
0x2548   :  { %4117 = vsyncpa [#allocation4], 1 }
0x2549   :  { %4118 = vsyncpa [#allocation22], 1 }

</bundles_post_ra>
